<compile_context>
chip_gen: v7x
topology: tpu7x:2x2x1
jax: 0.10.0
libtpu: 0.0.40
codegen_flags: <defaults>
</compile_context>

<pallas_src>
import functools
import math

import numpy as np
import jax
import jax.numpy as jnp
from jax.experimental import pallas as pl
from jax.experimental.pallas import tpu as pltpu


# ----------------------------- static helpers ------------------------------
def _block_dims(h, w):
    """Flat padded layout sizes for one (H, W) conv block (per image)."""
    hp, wp = h + 2, w + 2
    t = hp * wp                      # zero-padded flat length
    lc = t - 2 * (wp + 1)            # conv-GEMM rows (all 9 taps stay in bounds)
    lp = lc - (wp + 1)               # 4-way pool-max rows
    return hp, wp, t, lc, lp


def _pad_place_matrix(h, w):
    """(T, Lc) 0/1 matrix: scatter conv-GEMM rows back into the zero-padded flat
    layout of the next conv, zeroing the junk rows that land on padding."""
    hp, wp, t, lc, _ = _block_dims(h, w)
    m = np.zeros((t, lc), np.float32)
    for r in range(1, h + 1):
        for c in range(1, w + 1):
            p = r * wp + c
            m[p, p - wp - 1] = 1.0
    return m


def _pool_place_matrix(h, w, final=False):
    """Select the stride-2 2x2 window maxima and scatter them into the next
    block's zero-padded flat layout ((T_next, Lp)), or into a dense row-major
    (H/2*W/2, Lp) output if `final`."""
    hp, wp, t, lc, lp = _block_dims(h, w)
    h2, w2 = h // 2, w // 2
    if final:
        m = np.zeros((h2 * w2, lp), np.float32)
    else:
        hp2, wp2, t2, _, _ = _block_dims(h2, w2)
        m = np.zeros((t2, lp), np.float32)
    for i in range(h2):
        for j in range(w2):
            q = 2 * i * wp + 2 * j                 # pool-max row of window (i, j)
            if final:
                m[i * w2 + j, q] = 1.0
            else:
                m[(i + 1) * wp2 + (j + 1), q] = 1.0
    return m


# --------------------------------- kernel ----------------------------------
def _fused_kernel(x_ref,
                  w1, b1, w2, b2, w3, b3, w4, b4, w5, b5, w6, b6,
                  p1, g1, p2, g2, p3, g3,
                  o_ref,
                  a1, a2, y2, a3, a4, y4, a5, a6, y6,
                  *, dims):
    (wp1, lc1, lp1), (wp2, lc2, lp2), (wp3, lc3, lp3) = dims

    def conv_relu(a_ref, w_ref, b_ref, wp, lc):
        # im2col: 9 shifted flat slices concatenated along the contraction axis
        # -> a single (Lc, 9*Cin) @ (9*Cin, Cout) MXU GEMM, fused bias + ReLU.
        taps = [a_ref[pl.ds(dy * wp + dx, lc), :]
                for dy in range(3) for dx in range(3)]
        patches = jnp.concatenate(taps, axis=-1)
        y = jnp.dot(patches, w_ref[...], preferred_element_type=jnp.float32)
        return jnp.maximum(y + b_ref[...], 0.0)

    def pool4(y_ref, wp, lp):
        # elementwise max over the 4 flat offsets of each 2x2 window; the
        # stride-2 selection happens in the following placement matmul.
        return jnp.maximum(
            jnp.maximum(y_ref[pl.ds(0, lp), :], y_ref[pl.ds(1, lp), :]),
            jnp.maximum(y_ref[pl.ds(wp, lp), :], y_ref[pl.ds(wp + 1, lp), :]))

    def place(m_ref, v):
        return jnp.dot(m_ref[...], v, preferred_element_type=jnp.float32)

    a1[...] = x_ref[0]                                    # padded flat image (T1, 3)

    # block 1  (H x W)
    a2[...] = place(p1, conv_relu(a1, w1, b1, wp1, lc1))
    y2[...] = conv_relu(a2, w2, b2, wp1, lc1)
    a3[...] = place(g1, pool4(y2, wp1, lp1))
    # block 2  (H/2 x W/2)
    a4[...] = place(p2, conv_relu(a3, w3, b3, wp2, lc2))
    y4[...] = conv_relu(a4, w4, b4, wp2, lc2)
    a5[...] = place(g2, pool4(y4, wp2, lp2))
    # block 3  (H/4 x W/4).  nn.Dropout2d(p=0.05) is identity at inference.
    a6[...] = place(p3, conv_relu(a5, w5, b5, wp3, lc3))
    y6[...] = conv_relu(a6, w6, b6, wp3, lc3)
    o_ref[0] = place(g3, pool4(y6, wp3, lp3))             # (H/8 * W/8, Cout)


# -------------------------------- wrapper -----------------------------------
def moderate_cnn_conv_blocks(x_nchw, params):
    x = jnp.transpose(x_nchw, (0, 2, 3, 1)).astype(jnp.float32)   # NCHW -> NHWC
    n, h, wdt, cin = x.shape
    assert h % 8 == 0 and wdt % 8 == 0, "spatial dims must survive three 2x2 pools"

    hs = [(h, wdt), (h // 2, wdt // 2), (h // 4, wdt // 4)]
    dims = tuple((wd + 2, _block_dims(hh, wd)[3], _block_dims(hh, wd)[4])
                 for hh, wd in hs)
    (_, lc1, _), (_, lc2, _), (_, lc3, _) = dims
    t1 = (h + 2) * (wdt + 2)
    t2 = (h // 2 + 2) * (wdt // 2 + 2)
    t3 = (h // 4 + 2) * (wdt // 4 + 2)
    hf, wf = h // 8, wdt // 8

    # zero-padded, flattened-spatial input layout: (N, (H+2)*(W+2), 3)
    xp = jnp.pad(x, ((0, 0), (1, 1), (1, 1), (0, 0)))
    xf = xp.reshape(n, t1, cin)

    # weights as (9*Cin, Cout) GEMM operands, biases as (1, Cout)
    wmats, bvecs = [], []
    for wk, bk in params:
        kh, kw_, ci, co = wk.shape
        wmats.append(wk.reshape(kh * kw_ * ci, co).astype(jnp.float32))
        bvecs.append(bk.reshape(1, co).astype(jnp.float32))
    c0, c1, c2, c3, c4, c5 = [wm.shape[1] for wm in wmats]

    # constant placement / pool-selection matrices (host-built, VMEM-resident)
    p1 = jnp.asarray(_pad_place_matrix(*hs[0]))
    g1 = jnp.asarray(_pool_place_matrix(*hs[0]))
    p2 = jnp.asarray(_pad_place_matrix(*hs[1]))
    g2 = jnp.asarray(_pool_place_matrix(*hs[1]))
    p3 = jnp.asarray(_pad_place_matrix(*hs[2]))
    g3 = jnp.asarray(_pool_place_matrix(*hs[2], final=True))

    operands = ([xf]
                + [v for wb in zip(wmats, bvecs) for v in wb]
                + [p1, g1, p2, g2, p3, g3])

    def full2d(a):
        return pl.BlockSpec(a.shape, lambda b: (0, 0))

    in_specs = ([pl.BlockSpec((1, t1, cin), lambda b: (b, 0, 0))]
                + [full2d(a) for a in operands[1:]])

    out = pl.pallas_call(
        functools.partial(_fused_kernel, dims=dims),
        out_shape=jax.ShapeDtypeStruct((n, hf * wf, c5), jnp.float32),
        grid=(n,),
        in_specs=in_specs,
        out_specs=pl.BlockSpec((1, hf * wf, c5), lambda b: (b, 0, 0)),
        scratch_shapes=[
            pltpu.VMEM((t1, cin), jnp.float32),   # a1: padded input
            pltpu.VMEM((t1, c0), jnp.float32),    # a2: padded conv1 output
            pltpu.VMEM((lc1, c1), jnp.float32),   # y2: conv2 output (pre-pool)
            pltpu.VMEM((t2, c1), jnp.float32),    # a3: padded pool1 output
            pltpu.VMEM((t2, c2), jnp.float32),    # a4: padded conv3 output
            pltpu.VMEM((lc2, c3), jnp.float32),   # y4: conv4 output (pre-pool)
            pltpu.VMEM((t3, c3), jnp.float32),    # a5: padded pool2 output
            pltpu.VMEM((t3, c4), jnp.float32),    # a6: padded conv5 output
            pltpu.VMEM((lc3, c5), jnp.float32),   # y6: conv6 output (pre-pool)
        ],
        compiler_params=pltpu.CompilerParams(
            dimension_semantics=("parallel",),        # batch across v7x TensorCores
            vmem_limit_bytes=32 * 1024 * 1024),
    )(*operands)

    out = out.reshape(n, hf, wf, c5)
    return jnp.transpose(out, (0, 3, 1, 2))               # NHWC -> NCHW


# ------------------------------ params / main -------------------------------
def init_params(key, num_filters):
    """Deterministic init matching the PyTorch Conv2d layer shapes (HWIO)."""
    cins = [3] + list(num_filters[:-1])
    params = []
    for cin, cout in zip(cins, num_filters):
        key, kw, kb = jax.random.split(key, 3)
        bound = 1.0 / math.sqrt(cin * 9)
        w = jax.random.uniform(kw, (3, 3, cin, cout), jnp.float32, -bound, bound)
        b = jax.random.uniform(kb, (cout,), jnp.float32, -bound, bound)
        params.append((w, b))
    return params


# ------------------------- pure-JAX reference check -------------------------
def _ref_conv(x, w, b):
    y = jax.lax.conv_general_dilated(x, w, (1, 1), "SAME",
                                     dimension_numbers=("NHWC", "HWIO", "NHWC"))
    return jnp.maximum(y + b, 0.0)


def _ref_pool(x):
    return jax.lax.reduce_window(x, -jnp.inf, jax.lax.max,
                                 (1, 2, 2, 1), (1, 2, 2, 1), "VALID")


def _ref_forward(x_nchw, params):
    x = jnp.transpose(x_nchw, (0, 2, 3, 1))
    for idx, (w, b) in enumerate(params):
        x = _ref_conv(x, w, b)
        if idx in (1, 3, 5):
            x = _ref_pool(x)
    return jnp.transpose(x, (0, 3, 1, 2))


if __name__ == "__main__":
    key = jax.random.PRNGKey(0)
    key, kx = jax.random.split(key)
    num_filters = [8, 16, 16, 32, 32, 64]
    params = init_params(key, num_filters)
    x = jax.random.normal(kx, (2, 3, 16, 16), dtype=jnp.float32)  # NCHW like PyTorch

    fwd = jax.jit(moderate_cnn_conv_blocks)
    out = jax.block_until_ready(fwd(x, params))
    ref = jax.block_until_ready(_ref_forward(x, params))

    assert out.shape == (2, num_filters[-1], 2, 2), out.shape
    assert jnp.allclose(out, ref, atol=1e-4, rtol=1e-4), float(jnp.max(jnp.abs(out - ref)))
    print("KERNEL_OK")
</pallas_src>

<mosaic_0001>
module attributes {stable_mosaic.version = 11 : i64} {
  func.func @_fused_kernel(%arg0: i32, %arg1: memref<1x324x3xf32, #tpu.memory_space<vmem>>, %arg2: memref<27x8xf32, #tpu.memory_space<vmem>>, %arg3: memref<1x8xf32, #tpu.memory_space<vmem>>, %arg4: memref<72x16xf32, #tpu.memory_space<vmem>>, %arg5: memref<1x16xf32, #tpu.memory_space<vmem>>, %arg6: memref<144x16xf32, #tpu.memory_space<vmem>>, %arg7: memref<1x16xf32, #tpu.memory_space<vmem>>, %arg8: memref<144x32xf32, #tpu.memory_space<vmem>>, %arg9: memref<1x32xf32, #tpu.memory_space<vmem>>, %arg10: memref<288x32xf32, #tpu.memory_space<vmem>>, %arg11: memref<1x32xf32, #tpu.memory_space<vmem>>, %arg12: memref<288x64xf32, #tpu.memory_space<vmem>>, %arg13: memref<1x64xf32, #tpu.memory_space<vmem>>, %arg14: memref<324x286xf32, #tpu.memory_space<vmem>>, %arg15: memref<100x267xf32, #tpu.memory_space<vmem>>, %arg16: memref<100x78xf32, #tpu.memory_space<vmem>>, %arg17: memref<36x67xf32, #tpu.memory_space<vmem>>, %arg18: memref<36x22xf32, #tpu.memory_space<vmem>>, %arg19: memref<4x15xf32, #tpu.memory_space<vmem>>, %arg20: memref<1x4x64xf32, #tpu.memory_space<vmem>>, %arg21: memref<324x3xf32, #tpu.memory_space<vmem>>, %arg22: memref<324x8xf32, #tpu.memory_space<vmem>>, %arg23: memref<286x16xf32, #tpu.memory_space<vmem>>, %arg24: memref<100x16xf32, #tpu.memory_space<vmem>>, %arg25: memref<100x16xf32, #tpu.memory_space<vmem>>, %arg26: memref<78x32xf32, #tpu.memory_space<vmem>>, %arg27: memref<36x32xf32, #tpu.memory_space<vmem>>, %arg28: memref<36x32xf32, #tpu.memory_space<vmem>>, %arg29: memref<22x64xf32, #tpu.memory_space<vmem>>) attributes {dimension_semantics = [#tpu.dimension_semantics<parallel>], iteration_bounds = array<i64: 2>, scalar_prefetch = 0 : i64, scratch_operands = 9 : i64, tpu.core_type = #tpu.core_type<tc>, window_params = [{transform_indices = @transform_0, window_bounds = array<i64: 1, 324, 3>}, {pipeline_mode = #tpu.pipeline_mode<synchronous>, transform_indices = @transform_1, window_bounds = array<i64: 27, 8>}, {pipeline_mode = #tpu.pipeline_mode<synchronous>, transform_indices = @transform_2, window_bounds = array<i64: 1, 8>}, {pipeline_mode = #tpu.pipeline_mode<synchronous>, transform_indices = @transform_3, window_bounds = array<i64: 72, 16>}, {pipeline_mode = #tpu.pipeline_mode<synchronous>, transform_indices = @transform_4, window_bounds = array<i64: 1, 16>}, {pipeline_mode = #tpu.pipeline_mode<synchronous>, transform_indices = @transform_5, window_bounds = array<i64: 144, 16>}, {pipeline_mode = #tpu.pipeline_mode<synchronous>, transform_indices = @transform_6, window_bounds = array<i64: 1, 16>}, {pipeline_mode = #tpu.pipeline_mode<synchronous>, transform_indices = @transform_7, window_bounds = array<i64: 144, 32>}, {pipeline_mode = #tpu.pipeline_mode<synchronous>, transform_indices = @transform_8, window_bounds = array<i64: 1, 32>}, {pipeline_mode = #tpu.pipeline_mode<synchronous>, transform_indices = @transform_9, window_bounds = array<i64: 288, 32>}, {pipeline_mode = #tpu.pipeline_mode<synchronous>, transform_indices = @transform_10, window_bounds = array<i64: 1, 32>}, {pipeline_mode = #tpu.pipeline_mode<synchronous>, transform_indices = @transform_11, window_bounds = array<i64: 288, 64>}, {pipeline_mode = #tpu.pipeline_mode<synchronous>, transform_indices = @transform_12, window_bounds = array<i64: 1, 64>}, {pipeline_mode = #tpu.pipeline_mode<synchronous>, transform_indices = @transform_13, window_bounds = array<i64: 324, 286>}, {pipeline_mode = #tpu.pipeline_mode<synchronous>, transform_indices = @transform_14, window_bounds = array<i64: 100, 267>}, {pipeline_mode = #tpu.pipeline_mode<synchronous>, transform_indices = @transform_15, window_bounds = array<i64: 100, 78>}, {pipeline_mode = #tpu.pipeline_mode<synchronous>, transform_indices = @transform_16, window_bounds = array<i64: 36, 67>}, {pipeline_mode = #tpu.pipeline_mode<synchronous>, transform_indices = @transform_17, window_bounds = array<i64: 36, 22>}, {pipeline_mode = #tpu.pipeline_mode<synchronous>, transform_indices = @transform_18, window_bounds = array<i64: 4, 15>}, {transform_indices = @transform_19, window_bounds = array<i64: 1, 4, 64>}]} {
    %c0 = arith.constant 0 : index
    %c0_0 = arith.constant 0 : index
    %c0_1 = arith.constant 0 : index
    %0 = vector.load %arg1[%c0, %c0_0, %c0_1] : memref<1x324x3xf32, #tpu.memory_space<vmem>>, vector<1x324x3xf32>
    %1 = vector.shape_cast %0 : vector<1x324x3xf32> to vector<324x3xf32>
    %c0_2 = arith.constant 0 : index
    %c0_3 = arith.constant 0 : index
    %2 = vector.load %arg21[%c0_2, %c0_3] : memref<324x3xf32, #tpu.memory_space<vmem>>, vector<324x3xf32>
    tpu.vector_store %arg21[%c0_2, %c0_3], %1 {strides = array<i32>} : memref<324x3xf32, #tpu.memory_space<vmem>>, vector<324x3xf32>,
    %c0_4 = arith.constant 0 : index
    %c0_5 = arith.constant 0 : index
    %3 = vector.load %arg21[%c0_4, %c0_5] : memref<324x3xf32, #tpu.memory_space<vmem>>, vector<286x3xf32>
    %c1 = arith.constant 1 : index
    %c0_6 = arith.constant 0 : index
    %4 = vector.load %arg21[%c1, %c0_6] : memref<324x3xf32, #tpu.memory_space<vmem>>, vector<286x3xf32>
    %c2 = arith.constant 2 : index
    %c0_7 = arith.constant 0 : index
    %5 = vector.load %arg21[%c2, %c0_7] : memref<324x3xf32, #tpu.memory_space<vmem>>, vector<286x3xf32>
    %c18 = arith.constant 18 : index
    %c0_8 = arith.constant 0 : index
    %6 = vector.load %arg21[%c18, %c0_8] : memref<324x3xf32, #tpu.memory_space<vmem>>, vector<286x3xf32>
    %c19 = arith.constant 19 : index
    %c0_9 = arith.constant 0 : index
    %7 = vector.load %arg21[%c19, %c0_9] : memref<324x3xf32, #tpu.memory_space<vmem>>, vector<286x3xf32>
    %c20 = arith.constant 20 : index
    %c0_10 = arith.constant 0 : index
    %8 = vector.load %arg21[%c20, %c0_10] : memref<324x3xf32, #tpu.memory_space<vmem>>, vector<286x3xf32>
    %c36 = arith.constant 36 : index
    %c0_11 = arith.constant 0 : index
    %9 = vector.load %arg21[%c36, %c0_11] : memref<324x3xf32, #tpu.memory_space<vmem>>, vector<286x3xf32>
    %c37 = arith.constant 37 : index
    %c0_12 = arith.constant 0 : index
    %10 = vector.load %arg21[%c37, %c0_12] : memref<324x3xf32, #tpu.memory_space<vmem>>, vector<286x3xf32>
    %c38 = arith.constant 38 : index
    %c0_13 = arith.constant 0 : index
    %11 = vector.load %arg21[%c38, %c0_13] : memref<324x3xf32, #tpu.memory_space<vmem>>, vector<286x3xf32>
    %12 = tpu.concatenate %3, %4, %5, %6, %7, %8, %9, %10, %11 in 1 : vector<286x3xf32>, vector<286x3xf32>, vector<286x3xf32>, vector<286x3xf32>, vector<286x3xf32>, vector<286x3xf32>, vector<286x3xf32>, vector<286x3xf32>, vector<286x3xf32> -> vector<286x27xf32>
    %c0_14 = arith.constant 0 : index
    %c0_15 = arith.constant 0 : index
    %13 = vector.load %arg2[%c0_14, %c0_15] : memref<27x8xf32, #tpu.memory_space<vmem>>, vector<27x8xf32>
    %cst = arith.constant dense<0.000000e+00> : vector<286x8xf32>
    %14 = tpu.matmul %12, %13, %cst {dimension_numbers = #tpu.dot_dimension_numbers<[1], [0], [0], [1], [0, 0, 1, 1], [], []>} : vector<286x27xf32>, vector<27x8xf32>, vector<286x8xf32> -> vector<286x8xf32>
    %c0_16 = arith.constant 0 : index
    %c0_17 = arith.constant 0 : index
    %15 = vector.load %arg3[%c0_16, %c0_17] : memref<1x8xf32, #tpu.memory_space<vmem>>, vector<1x8xf32>
    %16 = vector.broadcast %15 : vector<1x8xf32> to vector<286x8xf32>
    %17 = arith.addf %14, %16 : vector<286x8xf32>
    %cst_18 = arith.constant 0.000000e+00 : f32
    %18 = vector.broadcast %cst_18 : f32 to vector<286x8xf32>
    %19 = arith.maximumf %17, %18 : vector<286x8xf32>
    %c0_19 = arith.constant 0 : index
    %c0_20 = arith.constant 0 : index
    %20 = vector.load %arg14[%c0_19, %c0_20] : memref<324x286xf32, #tpu.memory_space<vmem>>, vector<324x286xf32>
    %cst_21 = arith.constant dense<0.000000e+00> : vector<324x8xf32>
    %21 = tpu.matmul %20, %19, %cst_21 {dimension_numbers = #tpu.dot_dimension_numbers<[1], [0], [0], [1], [0, 0, 1, 1], [], []>} : vector<324x286xf32>, vector<286x8xf32>, vector<324x8xf32> -> vector<324x8xf32>
    %c0_22 = arith.constant 0 : index
    %c0_23 = arith.constant 0 : index
    %22 = vector.load %arg22[%c0_22, %c0_23] : memref<324x8xf32, #tpu.memory_space<vmem>>, vector<324x8xf32>
    tpu.vector_store %arg22[%c0_22, %c0_23], %21 {strides = array<i32>} : memref<324x8xf32, #tpu.memory_space<vmem>>, vector<324x8xf32>,
    %c0_24 = arith.constant 0 : index
    %c0_25 = arith.constant 0 : index
    %23 = vector.load %arg22[%c0_24, %c0_25] : memref<324x8xf32, #tpu.memory_space<vmem>>, vector<286x8xf32>
    %c1_26 = arith.constant 1 : index
    %c0_27 = arith.constant 0 : index
    %24 = vector.load %arg22[%c1_26, %c0_27] : memref<324x8xf32, #tpu.memory_space<vmem>>, vector<286x8xf32>
    %c2_28 = arith.constant 2 : index
    %c0_29 = arith.constant 0 : index
    %25 = vector.load %arg22[%c2_28, %c0_29] : memref<324x8xf32, #tpu.memory_space<vmem>>, vector<286x8xf32>
    %c18_30 = arith.constant 18 : index
    %c0_31 = arith.constant 0 : index
    %26 = vector.load %arg22[%c18_30, %c0_31] : memref<324x8xf32, #tpu.memory_space<vmem>>, vector<286x8xf32>
    %c19_32 = arith.constant 19 : index
    %c0_33 = arith.constant 0 : index
    %27 = vector.load %arg22[%c19_32, %c0_33] : memref<324x8xf32, #tpu.memory_space<vmem>>, vector<286x8xf32>
    %c20_34 = arith.constant 20 : index
    %c0_35 = arith.constant 0 : index
    %28 = vector.load %arg22[%c20_34, %c0_35] : memref<324x8xf32, #tpu.memory_space<vmem>>, vector<286x8xf32>
    %c36_36 = arith.constant 36 : index
    %c0_37 = arith.constant 0 : index
    %29 = vector.load %arg22[%c36_36, %c0_37] : memref<324x8xf32, #tpu.memory_space<vmem>>, vector<286x8xf32>
    %c37_38 = arith.constant 37 : index
    %c0_39 = arith.constant 0 : index
    %30 = vector.load %arg22[%c37_38, %c0_39] : memref<324x8xf32, #tpu.memory_space<vmem>>, vector<286x8xf32>
    %c38_40 = arith.constant 38 : index
    %c0_41 = arith.constant 0 : index
    %31 = vector.load %arg22[%c38_40, %c0_41] : memref<324x8xf32, #tpu.memory_space<vmem>>, vector<286x8xf32>
    %32 = tpu.concatenate %23, %24, %25, %26, %27, %28, %29, %30, %31 in 1 : vector<286x8xf32>, vector<286x8xf32>, vector<286x8xf32>, vector<286x8xf32>, vector<286x8xf32>, vector<286x8xf32>, vector<286x8xf32>, vector<286x8xf32>, vector<286x8xf32> -> vector<286x72xf32>
    %c0_42 = arith.constant 0 : index
    %c0_43 = arith.constant 0 : index
    %33 = vector.load %arg4[%c0_42, %c0_43] : memref<72x16xf32, #tpu.memory_space<vmem>>, vector<72x16xf32>
    %cst_44 = arith.constant dense<0.000000e+00> : vector<286x16xf32>
    %34 = tpu.matmul %32, %33, %cst_44 {dimension_numbers = #tpu.dot_dimension_numbers<[1], [0], [0], [1], [0, 0, 1, 1], [], []>} : vector<286x72xf32>, vector<72x16xf32>, vector<286x16xf32> -> vector<286x16xf32>
    %c0_45 = arith.constant 0 : index
    %c0_46 = arith.constant 0 : index
    %35 = vector.load %arg5[%c0_45, %c0_46] : memref<1x16xf32, #tpu.memory_space<vmem>>, vector<1x16xf32>
    %36 = vector.broadcast %35 : vector<1x16xf32> to vector<286x16xf32>
    %37 = arith.addf %34, %36 : vector<286x16xf32>
    %cst_47 = arith.constant 0.000000e+00 : f32
    %38 = vector.broadcast %cst_47 : f32 to vector<286x16xf32>
    %39 = arith.maximumf %37, %38 : vector<286x16xf32>
    %c0_48 = arith.constant 0 : index
    %c0_49 = arith.constant 0 : index
    %40 = vector.load %arg23[%c0_48, %c0_49] : memref<286x16xf32, #tpu.memory_space<vmem>>, vector<286x16xf32>
    tpu.vector_store %arg23[%c0_48, %c0_49], %39 {strides = array<i32>} : memref<286x16xf32, #tpu.memory_space<vmem>>, vector<286x16xf32>,
    %c0_50 = arith.constant 0 : index
    %c0_51 = arith.constant 0 : index
    %41 = vector.load %arg23[%c0_50, %c0_51] : memref<286x16xf32, #tpu.memory_space<vmem>>, vector<267x16xf32>
    %c1_52 = arith.constant 1 : index
    %c0_53 = arith.constant 0 : index
    %42 = vector.load %arg23[%c1_52, %c0_53] : memref<286x16xf32, #tpu.memory_space<vmem>>, vector<267x16xf32>
    %43 = arith.maximumf %41, %42 : vector<267x16xf32>
    %c18_54 = arith.constant 18 : index
    %c0_55 = arith.constant 0 : index
    %44 = vector.load %arg23[%c18_54, %c0_55] : memref<286x16xf32, #tpu.memory_space<vmem>>, vector<267x16xf32>
    %c19_56 = arith.constant 19 : index
    %c0_57 = arith.constant 0 : index
    %45 = vector.load %arg23[%c19_56, %c0_57] : memref<286x16xf32, #tpu.memory_space<vmem>>, vector<267x16xf32>
    %46 = arith.maximumf %44, %45 : vector<267x16xf32>
    %47 = arith.maximumf %43, %46 : vector<267x16xf32>
    %c0_58 = arith.constant 0 : index
    %c0_59 = arith.constant 0 : index
    %48 = vector.load %arg15[%c0_58, %c0_59] : memref<100x267xf32, #tpu.memory_space<vmem>>, vector<100x267xf32>
    %cst_60 = arith.constant dense<0.000000e+00> : vector<100x16xf32>
    %49 = tpu.matmul %48, %47, %cst_60 {dimension_numbers = #tpu.dot_dimension_numbers<[1], [0], [0], [1], [0, 0, 1, 1], [], []>} : vector<100x267xf32>, vector<267x16xf32>, vector<100x16xf32> -> vector<100x16xf32>
    %c0_61 = arith.constant 0 : index
    %c0_62 = arith.constant 0 : index
    %50 = vector.load %arg24[%c0_61, %c0_62] : memref<100x16xf32, #tpu.memory_space<vmem>>, vector<100x16xf32>
    tpu.vector_store %arg24[%c0_61, %c0_62], %49 {strides = array<i32>} : memref<100x16xf32, #tpu.memory_space<vmem>>, vector<100x16xf32>,
    %c0_63 = arith.constant 0 : index
    %c0_64 = arith.constant 0 : index
    %51 = vector.load %arg24[%c0_63, %c0_64] : memref<100x16xf32, #tpu.memory_space<vmem>>, vector<78x16xf32>
    %c1_65 = arith.constant 1 : index
    %c0_66 = arith.constant 0 : index
    %52 = vector.load %arg24[%c1_65, %c0_66] : memref<100x16xf32, #tpu.memory_space<vmem>>, vector<78x16xf32>
    %c2_67 = arith.constant 2 : index
    %c0_68 = arith.constant 0 : index
    %53 = vector.load %arg24[%c2_67, %c0_68] : memref<100x16xf32, #tpu.memory_space<vmem>>, vector<78x16xf32>
    %c10 = arith.constant 10 : index
    %c0_69 = arith.constant 0 : index
    %54 = vector.load %arg24[%c10, %c0_69] : memref<100x16xf32, #tpu.memory_space<vmem>>, vector<78x16xf32>
    %c11 = arith.constant 11 : index
    %c0_70 = arith.constant 0 : index
    %55 = vector.load %arg24[%c11, %c0_70] : memref<100x16xf32, #tpu.memory_space<vmem>>, vector<78x16xf32>
    %c12 = arith.constant 12 : index
    %c0_71 = arith.constant 0 : index
    %56 = vector.load %arg24[%c12, %c0_71] : memref<100x16xf32, #tpu.memory_space<vmem>>, vector<78x16xf32>
    %c20_72 = arith.constant 20 : index
    %c0_73 = arith.constant 0 : index
    %57 = vector.load %arg24[%c20_72, %c0_73] : memref<100x16xf32, #tpu.memory_space<vmem>>, vector<78x16xf32>
    %c21 = arith.constant 21 : index
    %c0_74 = arith.constant 0 : index
    %58 = vector.load %arg24[%c21, %c0_74] : memref<100x16xf32, #tpu.memory_space<vmem>>, vector<78x16xf32>
    %c22 = arith.constant 22 : index
    %c0_75 = arith.constant 0 : index
    %59 = vector.load %arg24[%c22, %c0_75] : memref<100x16xf32, #tpu.memory_space<vmem>>, vector<78x16xf32>
    %60 = tpu.concatenate %51, %52, %53, %54, %55, %56, %57, %58, %59 in 1 : vector<78x16xf32>, vector<78x16xf32>, vector<78x16xf32>, vector<78x16xf32>, vector<78x16xf32>, vector<78x16xf32>, vector<78x16xf32>, vector<78x16xf32>, vector<78x16xf32> -> vector<78x144xf32>
    %c0_76 = arith.constant 0 : index
    %c0_77 = arith.constant 0 : index
    %61 = vector.load %arg6[%c0_76, %c0_77] : memref<144x16xf32, #tpu.memory_space<vmem>>, vector<144x16xf32>
    %cst_78 = arith.constant dense<0.000000e+00> : vector<78x16xf32>
    %62 = tpu.matmul %60, %61, %cst_78 {dimension_numbers = #tpu.dot_dimension_numbers<[1], [0], [0], [1], [0, 0, 1, 1], [], []>} : vector<78x144xf32>, vector<144x16xf32>, vector<78x16xf32> -> vector<78x16xf32>
    %c0_79 = arith.constant 0 : index
    %c0_80 = arith.constant 0 : index
    %63 = vector.load %arg7[%c0_79, %c0_80] : memref<1x16xf32, #tpu.memory_space<vmem>>, vector<1x16xf32>
    %64 = vector.broadcast %63 : vector<1x16xf32> to vector<78x16xf32>
    %65 = arith.addf %62, %64 : vector<78x16xf32>
    %cst_81 = arith.constant 0.000000e+00 : f32
    %66 = vector.broadcast %cst_81 : f32 to vector<78x16xf32>
    %67 = arith.maximumf %65, %66 : vector<78x16xf32>
    %c0_82 = arith.constant 0 : index
    %c0_83 = arith.constant 0 : index
    %68 = vector.load %arg16[%c0_82, %c0_83] : memref<100x78xf32, #tpu.memory_space<vmem>>, vector<100x78xf32>
    %cst_84 = arith.constant dense<0.000000e+00> : vector<100x16xf32>
    %69 = tpu.matmul %68, %67, %cst_84 {dimension_numbers = #tpu.dot_dimension_numbers<[1], [0], [0], [1], [0, 0, 1, 1], [], []>} : vector<100x78xf32>, vector<78x16xf32>, vector<100x16xf32> -> vector<100x16xf32>
    %c0_85 = arith.constant 0 : index
    %c0_86 = arith.constant 0 : index
    %70 = vector.load %arg25[%c0_85, %c0_86] : memref<100x16xf32, #tpu.memory_space<vmem>>, vector<100x16xf32>
    tpu.vector_store %arg25[%c0_85, %c0_86], %69 {strides = array<i32>} : memref<100x16xf32, #tpu.memory_space<vmem>>, vector<100x16xf32>,
    %c0_87 = arith.constant 0 : index
    %c0_88 = arith.constant 0 : index
    %71 = vector.load %arg25[%c0_87, %c0_88] : memref<100x16xf32, #tpu.memory_space<vmem>>, vector<78x16xf32>
    %c1_89 = arith.constant 1 : index
    %c0_90 = arith.constant 0 : index
    %72 = vector.load %arg25[%c1_89, %c0_90] : memref<100x16xf32, #tpu.memory_space<vmem>>, vector<78x16xf32>
    %c2_91 = arith.constant 2 : index
    %c0_92 = arith.constant 0 : index
    %73 = vector.load %arg25[%c2_91, %c0_92] : memref<100x16xf32, #tpu.memory_space<vmem>>, vector<78x16xf32>
    %c10_93 = arith.constant 10 : index
    %c0_94 = arith.constant 0 : index
    %74 = vector.load %arg25[%c10_93, %c0_94] : memref<100x16xf32, #tpu.memory_space<vmem>>, vector<78x16xf32>
    %c11_95 = arith.constant 11 : index
    %c0_96 = arith.constant 0 : index
    %75 = vector.load %arg25[%c11_95, %c0_96] : memref<100x16xf32, #tpu.memory_space<vmem>>, vector<78x16xf32>
    %c12_97 = arith.constant 12 : index
    %c0_98 = arith.constant 0 : index
    %76 = vector.load %arg25[%c12_97, %c0_98] : memref<100x16xf32, #tpu.memory_space<vmem>>, vector<78x16xf32>
    %c20_99 = arith.constant 20 : index
    %c0_100 = arith.constant 0 : index
    %77 = vector.load %arg25[%c20_99, %c0_100] : memref<100x16xf32, #tpu.memory_space<vmem>>, vector<78x16xf32>
    %c21_101 = arith.constant 21 : index
    %c0_102 = arith.constant 0 : index
    %78 = vector.load %arg25[%c21_101, %c0_102] : memref<100x16xf32, #tpu.memory_space<vmem>>, vector<78x16xf32>
    %c22_103 = arith.constant 22 : index
    %c0_104 = arith.constant 0 : index
    %79 = vector.load %arg25[%c22_103, %c0_104] : memref<100x16xf32, #tpu.memory_space<vmem>>, vector<78x16xf32>
    %80 = tpu.concatenate %71, %72, %73, %74, %75, %76, %77, %78, %79 in 1 : vector<78x16xf32>, vector<78x16xf32>, vector<78x16xf32>, vector<78x16xf32>, vector<78x16xf32>, vector<78x16xf32>, vector<78x16xf32>, vector<78x16xf32>, vector<78x16xf32> -> vector<78x144xf32>
    %c0_105 = arith.constant 0 : index
    %c0_106 = arith.constant 0 : index
    %81 = vector.load %arg8[%c0_105, %c0_106] : memref<144x32xf32, #tpu.memory_space<vmem>>, vector<144x32xf32>
    %cst_107 = arith.constant dense<0.000000e+00> : vector<78x32xf32>
    %82 = tpu.matmul %80, %81, %cst_107 {dimension_numbers = #tpu.dot_dimension_numbers<[1], [0], [0], [1], [0, 0, 1, 1], [], []>} : vector<78x144xf32>, vector<144x32xf32>, vector<78x32xf32> -> vector<78x32xf32>
    %c0_108 = arith.constant 0 : index
    %c0_109 = arith.constant 0 : index
    %83 = vector.load %arg9[%c0_108, %c0_109] : memref<1x32xf32, #tpu.memory_space<vmem>>, vector<1x32xf32>
    %84 = vector.broadcast %83 : vector<1x32xf32> to vector<78x32xf32>
    %85 = arith.addf %82, %84 : vector<78x32xf32>
    %cst_110 = arith.constant 0.000000e+00 : f32
    %86 = vector.broadcast %cst_110 : f32 to vector<78x32xf32>
    %87 = arith.maximumf %85, %86 : vector<78x32xf32>
    %c0_111 = arith.constant 0 : index
    %c0_112 = arith.constant 0 : index
    %88 = vector.load %arg26[%c0_111, %c0_112] : memref<78x32xf32, #tpu.memory_space<vmem>>, vector<78x32xf32>
    tpu.vector_store %arg26[%c0_111, %c0_112], %87 {strides = array<i32>} : memref<78x32xf32, #tpu.memory_space<vmem>>, vector<78x32xf32>,
    %c0_113 = arith.constant 0 : index
    %c0_114 = arith.constant 0 : index
    %89 = vector.load %arg26[%c0_113, %c0_114] : memref<78x32xf32, #tpu.memory_space<vmem>>, vector<67x32xf32>
    %c1_115 = arith.constant 1 : index
    %c0_116 = arith.constant 0 : index
    %90 = vector.load %arg26[%c1_115, %c0_116] : memref<78x32xf32, #tpu.memory_space<vmem>>, vector<67x32xf32>
    %91 = arith.maximumf %89, %90 : vector<67x32xf32>
    %c10_117 = arith.constant 10 : index
    %c0_118 = arith.constant 0 : index
    %92 = vector.load %arg26[%c10_117, %c0_118] : memref<78x32xf32, #tpu.memory_space<vmem>>, vector<67x32xf32>
    %c11_119 = arith.constant 11 : index
    %c0_120 = arith.constant 0 : index
    %93 = vector.load %arg26[%c11_119, %c0_120] : memref<78x32xf32, #tpu.memory_space<vmem>>, vector<67x32xf32>
    %94 = arith.maximumf %92, %93 : vector<67x32xf32>
    %95 = arith.maximumf %91, %94 : vector<67x32xf32>
    %c0_121 = arith.constant 0 : index
    %c0_122 = arith.constant 0 : index
    %96 = vector.load %arg17[%c0_121, %c0_122] : memref<36x67xf32, #tpu.memory_space<vmem>>, vector<36x67xf32>
    %cst_123 = arith.constant dense<0.000000e+00> : vector<36x32xf32>
    %97 = tpu.matmul %96, %95, %cst_123 {dimension_numbers = #tpu.dot_dimension_numbers<[1], [0], [0], [1], [0, 0, 1, 1], [], []>} : vector<36x67xf32>, vector<67x32xf32>, vector<36x32xf32> -> vector<36x32xf32>
    %c0_124 = arith.constant 0 : index
    %c0_125 = arith.constant 0 : index
    %98 = vector.load %arg27[%c0_124, %c0_125] : memref<36x32xf32, #tpu.memory_space<vmem>>, vector<36x32xf32>
    tpu.vector_store %arg27[%c0_124, %c0_125], %97 {strides = array<i32>} : memref<36x32xf32, #tpu.memory_space<vmem>>, vector<36x32xf32>,
    %c0_126 = arith.constant 0 : index
    %c0_127 = arith.constant 0 : index
    %99 = vector.load %arg27[%c0_126, %c0_127] : memref<36x32xf32, #tpu.memory_space<vmem>>, vector<22x32xf32>
    %c1_128 = arith.constant 1 : index
    %c0_129 = arith.constant 0 : index
    %100 = vector.load %arg27[%c1_128, %c0_129] : memref<36x32xf32, #tpu.memory_space<vmem>>, vector<22x32xf32>
    %c2_130 = arith.constant 2 : index
    %c0_131 = arith.constant 0 : index
    %101 = vector.load %arg27[%c2_130, %c0_131] : memref<36x32xf32, #tpu.memory_space<vmem>>, vector<22x32xf32>
    %c6 = arith.constant 6 : index
    %c0_132 = arith.constant 0 : index
    %102 = vector.load %arg27[%c6, %c0_132] : memref<36x32xf32, #tpu.memory_space<vmem>>, vector<22x32xf32>
    %c7 = arith.constant 7 : index
    %c0_133 = arith.constant 0 : index
    %103 = vector.load %arg27[%c7, %c0_133] : memref<36x32xf32, #tpu.memory_space<vmem>>, vector<22x32xf32>
    %c8 = arith.constant 8 : index
    %c0_134 = arith.constant 0 : index
    %104 = vector.load %arg27[%c8, %c0_134] : memref<36x32xf32, #tpu.memory_space<vmem>>, vector<22x32xf32>
    %c12_135 = arith.constant 12 : index
    %c0_136 = arith.constant 0 : index
    %105 = vector.load %arg27[%c12_135, %c0_136] : memref<36x32xf32, #tpu.memory_space<vmem>>, vector<22x32xf32>
    %c13 = arith.constant 13 : index
    %c0_137 = arith.constant 0 : index
    %106 = vector.load %arg27[%c13, %c0_137] : memref<36x32xf32, #tpu.memory_space<vmem>>, vector<22x32xf32>
    %c14 = arith.constant 14 : index
    %c0_138 = arith.constant 0 : index
    %107 = vector.load %arg27[%c14, %c0_138] : memref<36x32xf32, #tpu.memory_space<vmem>>, vector<22x32xf32>
    %108 = tpu.concatenate %99, %100, %101, %102, %103, %104, %105, %106, %107 in 1 : vector<22x32xf32>, vector<22x32xf32>, vector<22x32xf32>, vector<22x32xf32>, vector<22x32xf32>, vector<22x32xf32>, vector<22x32xf32>, vector<22x32xf32>, vector<22x32xf32> -> vector<22x288xf32>
    %c0_139 = arith.constant 0 : index
    %c0_140 = arith.constant 0 : index
    %109 = vector.load %arg10[%c0_139, %c0_140] : memref<288x32xf32, #tpu.memory_space<vmem>>, vector<288x32xf32>
    %cst_141 = arith.constant dense<0.000000e+00> : vector<22x32xf32>
    %110 = tpu.matmul %108, %109, %cst_141 {dimension_numbers = #tpu.dot_dimension_numbers<[1], [0], [0], [1], [0, 0, 1, 1], [], []>} : vector<22x288xf32>, vector<288x32xf32>, vector<22x32xf32> -> vector<22x32xf32>
    %c0_142 = arith.constant 0 : index
    %c0_143 = arith.constant 0 : index
    %111 = vector.load %arg11[%c0_142, %c0_143] : memref<1x32xf32, #tpu.memory_space<vmem>>, vector<1x32xf32>
    %112 = vector.broadcast %111 : vector<1x32xf32> to vector<22x32xf32>
    %113 = arith.addf %110, %112 : vector<22x32xf32>
    %cst_144 = arith.constant 0.000000e+00 : f32
    %114 = vector.broadcast %cst_144 : f32 to vector<22x32xf32>
    %115 = arith.maximumf %113, %114 : vector<22x32xf32>
    %c0_145 = arith.constant 0 : index
    %c0_146 = arith.constant 0 : index
    %116 = vector.load %arg18[%c0_145, %c0_146] : memref<36x22xf32, #tpu.memory_space<vmem>>, vector<36x22xf32>
    %cst_147 = arith.constant dense<0.000000e+00> : vector<36x32xf32>
    %117 = tpu.matmul %116, %115, %cst_147 {dimension_numbers = #tpu.dot_dimension_numbers<[1], [0], [0], [1], [0, 0, 1, 1], [], []>} : vector<36x22xf32>, vector<22x32xf32>, vector<36x32xf32> -> vector<36x32xf32>
    %c0_148 = arith.constant 0 : index
    %c0_149 = arith.constant 0 : index
    %118 = vector.load %arg28[%c0_148, %c0_149] : memref<36x32xf32, #tpu.memory_space<vmem>>, vector<36x32xf32>
    tpu.vector_store %arg28[%c0_148, %c0_149], %117 {strides = array<i32>} : memref<36x32xf32, #tpu.memory_space<vmem>>, vector<36x32xf32>,
    %c0_150 = arith.constant 0 : index
    %c0_151 = arith.constant 0 : index
    %119 = vector.load %arg28[%c0_150, %c0_151] : memref<36x32xf32, #tpu.memory_space<vmem>>, vector<22x32xf32>
    %c1_152 = arith.constant 1 : index
    %c0_153 = arith.constant 0 : index
    %120 = vector.load %arg28[%c1_152, %c0_153] : memref<36x32xf32, #tpu.memory_space<vmem>>, vector<22x32xf32>
    %c2_154 = arith.constant 2 : index
    %c0_155 = arith.constant 0 : index
    %121 = vector.load %arg28[%c2_154, %c0_155] : memref<36x32xf32, #tpu.memory_space<vmem>>, vector<22x32xf32>
    %c6_156 = arith.constant 6 : index
    %c0_157 = arith.constant 0 : index
    %122 = vector.load %arg28[%c6_156, %c0_157] : memref<36x32xf32, #tpu.memory_space<vmem>>, vector<22x32xf32>
    %c7_158 = arith.constant 7 : index
    %c0_159 = arith.constant 0 : index
    %123 = vector.load %arg28[%c7_158, %c0_159] : memref<36x32xf32, #tpu.memory_space<vmem>>, vector<22x32xf32>
    %c8_160 = arith.constant 8 : index
    %c0_161 = arith.constant 0 : index
    %124 = vector.load %arg28[%c8_160, %c0_161] : memref<36x32xf32, #tpu.memory_space<vmem>>, vector<22x32xf32>
    %c12_162 = arith.constant 12 : index
    %c0_163 = arith.constant 0 : index
    %125 = vector.load %arg28[%c12_162, %c0_163] : memref<36x32xf32, #tpu.memory_space<vmem>>, vector<22x32xf32>
    %c13_164 = arith.constant 13 : index
    %c0_165 = arith.constant 0 : index
    %126 = vector.load %arg28[%c13_164, %c0_165] : memref<36x32xf32, #tpu.memory_space<vmem>>, vector<22x32xf32>
    %c14_166 = arith.constant 14 : index
    %c0_167 = arith.constant 0 : index
    %127 = vector.load %arg28[%c14_166, %c0_167] : memref<36x32xf32, #tpu.memory_space<vmem>>, vector<22x32xf32>
    %128 = tpu.concatenate %119, %120, %121, %122, %123, %124, %125, %126, %127 in 1 : vector<22x32xf32>, vector<22x32xf32>, vector<22x32xf32>, vector<22x32xf32>, vector<22x32xf32>, vector<22x32xf32>, vector<22x32xf32>, vector<22x32xf32>, vector<22x32xf32> -> vector<22x288xf32>
    %c0_168 = arith.constant 0 : index
    %c0_169 = arith.constant 0 : index
    %129 = vector.load %arg12[%c0_168, %c0_169] : memref<288x64xf32, #tpu.memory_space<vmem>>, vector<288x64xf32>
    %cst_170 = arith.constant dense<0.000000e+00> : vector<22x64xf32>
    %130 = tpu.matmul %128, %129, %cst_170 {dimension_numbers = #tpu.dot_dimension_numbers<[1], [0], [0], [1], [0, 0, 1, 1], [], []>} : vector<22x288xf32>, vector<288x64xf32>, vector<22x64xf32> -> vector<22x64xf32>
    %c0_171 = arith.constant 0 : index
    %c0_172 = arith.constant 0 : index
    %131 = vector.load %arg13[%c0_171, %c0_172] : memref<1x64xf32, #tpu.memory_space<vmem>>, vector<1x64xf32>
    %132 = vector.broadcast %131 : vector<1x64xf32> to vector<22x64xf32>
    %133 = arith.addf %130, %132 : vector<22x64xf32>
    %cst_173 = arith.constant 0.000000e+00 : f32
    %134 = vector.broadcast %cst_173 : f32 to vector<22x64xf32>
    %135 = arith.maximumf %133, %134 : vector<22x64xf32>
    %c0_174 = arith.constant 0 : index
    %c0_175 = arith.constant 0 : index
    %136 = vector.load %arg29[%c0_174, %c0_175] : memref<22x64xf32, #tpu.memory_space<vmem>>, vector<22x64xf32>
    tpu.vector_store %arg29[%c0_174, %c0_175], %135 {strides = array<i32>} : memref<22x64xf32, #tpu.memory_space<vmem>>, vector<22x64xf32>,
    %c0_176 = arith.constant 0 : index
    %c0_177 = arith.constant 0 : index
    %137 = vector.load %arg29[%c0_176, %c0_177] : memref<22x64xf32, #tpu.memory_space<vmem>>, vector<15x64xf32>
    %c1_178 = arith.constant 1 : index
    %c0_179 = arith.constant 0 : index
    %138 = vector.load %arg29[%c1_178, %c0_179] : memref<22x64xf32, #tpu.memory_space<vmem>>, vector<15x64xf32>
    %139 = arith.maximumf %137, %138 : vector<15x64xf32>
    %c6_180 = arith.constant 6 : index
    %c0_181 = arith.constant 0 : index
    %140 = vector.load %arg29[%c6_180, %c0_181] : memref<22x64xf32, #tpu.memory_space<vmem>>, vector<15x64xf32>
    %c7_182 = arith.constant 7 : index
    %c0_183 = arith.constant 0 : index
    %141 = vector.load %arg29[%c7_182, %c0_183] : memref<22x64xf32, #tpu.memory_space<vmem>>, vector<15x64xf32>
    %142 = arith.maximumf %140, %141 : vector<15x64xf32>
    %143 = arith.maximumf %139, %142 : vector<15x64xf32>
    %c0_184 = arith.constant 0 : index
    %c0_185 = arith.constant 0 : index
    %144 = vector.load %arg19[%c0_184, %c0_185] : memref<4x15xf32, #tpu.memory_space<vmem>>, vector<4x15xf32>
    %cst_186 = arith.constant dense<0.000000e+00> : vector<4x64xf32>
    %145 = tpu.matmul %144, %143, %cst_186 {dimension_numbers = #tpu.dot_dimension_numbers<[1], [0], [0], [1], [0, 0, 1, 1], [], []>} : vector<4x15xf32>, vector<15x64xf32>, vector<4x64xf32> -> vector<4x64xf32>
    %c0_187 = arith.constant 0 : index
    %c0_188 = arith.constant 0 : index
    %c0_189 = arith.constant 0 : index
    %146 = vector.load %arg20[%c0_187, %c0_188, %c0_189] : memref<1x4x64xf32, #tpu.memory_space<vmem>>, vector<1x4x64xf32>
    %147 = vector.shape_cast %146 : vector<1x4x64xf32> to vector<4x64xf32>
    %148 = vector.shape_cast %145 : vector<4x64xf32> to vector<1x4x64xf32>
    tpu.vector_store %arg20[%c0_187, %c0_188, %c0_189], %148 {strides = array<i32>} : memref<1x4x64xf32, #tpu.memory_space<vmem>>, vector<1x4x64xf32>,
    return
  }
  func.func @transform_0(%arg0: i32) -> (i32, i32, i32) {
    %c0_i32 = arith.constant 0 : i32
    %c0_i32_0 = arith.constant 0 : i32
    %c0_i32_1 = arith.constant 0 : i32
    return %arg0, %c0_i32, %c0_i32_0 : i32, i32, i32
  }
  func.func @transform_1(%arg0: i32) -> (i32, i32) {
    %c0_i32 = arith.constant 0 : i32
    %c0_i32_0 = arith.constant 0 : i32
    %c0_i32_1 = arith.constant 0 : i32
    return %c0_i32, %c0_i32_0 : i32, i32
  }
  func.func @transform_2(%arg0: i32) -> (i32, i32) {
    %c0_i32 = arith.constant 0 : i32
    %c0_i32_0 = arith.constant 0 : i32
    %c0_i32_1 = arith.constant 0 : i32
    return %c0_i32, %c0_i32_0 : i32, i32
  }
  func.func @transform_3(%arg0: i32) -> (i32, i32) {
    %c0_i32 = arith.constant 0 : i32
    %c0_i32_0 = arith.constant 0 : i32
    %c0_i32_1 = arith.constant 0 : i32
    return %c0_i32, %c0_i32_0 : i32, i32
  }
  func.func @transform_4(%arg0: i32) -> (i32, i32) {
    %c0_i32 = arith.constant 0 : i32
    %c0_i32_0 = arith.constant 0 : i32
    %c0_i32_1 = arith.constant 0 : i32
    return %c0_i32, %c0_i32_0 : i32, i32
  }
  func.func @transform_5(%arg0: i32) -> (i32, i32) {
    %c0_i32 = arith.constant 0 : i32
    %c0_i32_0 = arith.constant 0 : i32
    %c0_i32_1 = arith.constant 0 : i32
    return %c0_i32, %c0_i32_0 : i32, i32
  }
  func.func @transform_6(%arg0: i32) -> (i32, i32) {
    %c0_i32 = arith.constant 0 : i32
    %c0_i32_0 = arith.constant 0 : i32
    %c0_i32_1 = arith.constant 0 : i32
    return %c0_i32, %c0_i32_0 : i32, i32
  }
  func.func @transform_7(%arg0: i32) -> (i32, i32) {
    %c0_i32 = arith.constant 0 : i32
    %c0_i32_0 = arith.constant 0 : i32
    %c0_i32_1 = arith.constant 0 : i32
    return %c0_i32, %c0_i32_0 : i32, i32
  }
  func.func @transform_8(%arg0: i32) -> (i32, i32) {
    %c0_i32 = arith.constant 0 : i32
    %c0_i32_0 = arith.constant 0 : i32
    %c0_i32_1 = arith.constant 0 : i32
    return %c0_i32, %c0_i32_0 : i32, i32
  }
  func.func @transform_9(%arg0: i32) -> (i32, i32) {
    %c0_i32 = arith.constant 0 : i32
    %c0_i32_0 = arith.constant 0 : i32
    %c0_i32_1 = arith.constant 0 : i32
    return %c0_i32, %c0_i32_0 : i32, i32
  }
  func.func @transform_10(%arg0: i32) -> (i32, i32) {
    %c0_i32 = arith.constant 0 : i32
    %c0_i32_0 = arith.constant 0 : i32
    %c0_i32_1 = arith.constant 0 : i32
    return %c0_i32, %c0_i32_0 : i32, i32
  }
  func.func @transform_11(%arg0: i32) -> (i32, i32) {
    %c0_i32 = arith.constant 0 : i32
    %c0_i32_0 = arith.constant 0 : i32
    %c0_i32_1 = arith.constant 0 : i32
    return %c0_i32, %c0_i32_0 : i32, i32
  }
  func.func @transform_12(%arg0: i32) -> (i32, i32) {
    %c0_i32 = arith.constant 0 : i32
    %c0_i32_0 = arith.constant 0 : i32
    %c0_i32_1 = arith.constant 0 : i32
    return %c0_i32, %c0_i32_0 : i32, i32
  }
  func.func @transform_13(%arg0: i32) -> (i32, i32) {
    %c0_i32 = arith.constant 0 : i32
    %c0_i32_0 = arith.constant 0 : i32
    %c0_i32_1 = arith.constant 0 : i32
    return %c0_i32, %c0_i32_0 : i32, i32
  }
  func.func @transform_14(%arg0: i32) -> (i32, i32) {
    %c0_i32 = arith.constant 0 : i32
    %c0_i32_0 = arith.constant 0 : i32
    %c0_i32_1 = arith.constant 0 : i32
    return %c0_i32, %c0_i32_0 : i32, i32
  }
  func.func @transform_15(%arg0: i32) -> (i32, i32) {
    %c0_i32 = arith.constant 0 : i32
    %c0_i32_0 = arith.constant 0 : i32
    %c0_i32_1 = arith.constant 0 : i32
    return %c0_i32, %c0_i32_0 : i32, i32
  }
  func.func @transform_16(%arg0: i32) -> (i32, i32) {
    %c0_i32 = arith.constant 0 : i32
    %c0_i32_0 = arith.constant 0 : i32
    %c0_i32_1 = arith.constant 0 : i32
    return %c0_i32, %c0_i32_0 : i32, i32
  }
  func.func @transform_17(%arg0: i32) -> (i32, i32) {
    %c0_i32 = arith.constant 0 : i32
    %c0_i32_0 = arith.constant 0 : i32
    %c0_i32_1 = arith.constant 0 : i32
    return %c0_i32, %c0_i32_0 : i32, i32
  }
  func.func @transform_18(%arg0: i32) -> (i32, i32) {
    %c0_i32 = arith.constant 0 : i32
    %c0_i32_0 = arith.constant 0 : i32
    %c0_i32_1 = arith.constant 0 : i32
    return %c0_i32, %c0_i32_0 : i32, i32
  }
  func.func @transform_19(%arg0: i32) -> (i32, i32, i32) {
    %c0_i32 = arith.constant 0 : i32
    %c0_i32_0 = arith.constant 0 : i32
    %c0_i32_1 = arith.constant 0 : i32
    return %arg0, %c0_i32, %c0_i32_0 : i32, i32, i32
  }
}

</mosaic_0001>

<bundles_post_ra>
// kernel: moderate_cnn_conv_blocks.1
= control target key start
LH: loop header
LB: loop body
LE: loop exit
PB: predicated region body
PF: predicated region fallthrough
CT: control target
= control target key end

     0   :  { %s15059_s0 = inlined_call_operand.vmem [shape: f32[2,324,3], index: 0, kind: input, shape index: {}]   ;;  %s15060_s1 = inlined_call_operand.vmem [shape: f32[27,8], index: 1, kind: input, shape index: {}]   ;;  %s15061_s2 = inlined_call_operand.vmem [shape: f32[1,8], index: 2, kind: input, shape index: {}]   ;;  %s15062_s3 = inlined_call_operand.hbm [shape: f32[72,16], index: 3, kind: input, shape index: {}]   ;;  %s15063_s4 = inlined_call_operand.vmem [shape: f32[1,16], index: 4, kind: input, shape index: {}]   ;;  %s15064_s5 = inlined_call_operand.vmem [shape: f32[144,16], index: 5, kind: input, shape index: {}]   ;;  %s15065_s6 = inlined_call_operand.vmem [shape: f32[1,16], index: 6, kind: input, shape index: {}]   ;;  %s15066_s7 = inlined_call_operand.hbm [shape: f32[144,32], index: 7, kind: input, shape index: {}]   ;;  %s15067_s8 = inlined_call_operand.vmem [shape: f32[1,32], index: 8, kind: input, shape index: {}]   ;;  %s15068_s9 = inlined_call_operand.hbm [shape: f32[288,32], index: 9, kind: input, shape index: {}]   ;;  %s15069_s10 = inlined_call_operand.vmem [shape: f32[1,32], index: 10, kind: input, shape index: {}]   ;;  %s15070_s11 = inlined_call_operand.hbm [shape: f32[288,64], index: 11, kind: input, shape index: {}]   ;;  %s15071_s12 = inlined_call_operand.vmem [shape: f32[1,64], index: 12, kind: input, shape index: {}]   ;;  %s15072_s13 = inlined_call_operand.vmem [shape: f32[324,286], index: 13, kind: input, shape index: {}]   ;;  %s15073_s14 = inlined_call_operand.hbm [shape: f32[100,267], index: 14, kind: input, shape index: {}]   ;;  %s15074_s15 = inlined_call_operand.vmem [shape: f32[100,78], index: 15, kind: input, shape index: {}]   ;;  %s15075_s16 = inlined_call_operand.hbm [shape: f32[36,67], index: 16, kind: input, shape index: {}]   ;;  %s15076_s17 = inlined_call_operand.hbm [shape: f32[36,22], index: 17, kind: input, shape index: {}]   ;;  %s15077_s18 = inlined_call_operand.vmem [shape: f32[4,15], index: 18, kind: input, shape index: {}]   ;;  %s15078_s19 = inlined_call_operand.hbm [shape: f32[2,4,64], index: 19, kind: output, shape index: {}]  }
   0x1   :  { %15096 = sst [smem:[#allocation37_spill]] %s15059_s0 }
   0x2   :  { %15097 = sst [smem:[#allocation38_spill]] %s15060_s1 }
   0x3   :  { %15098 = sst [smem:[#allocation39_spill]] %s15061_s2 }
   0x4   :  { %15099 = sst [smem:[#allocation40_spill]] %s15062_s3 }
   0x5   :  { %15100 = sst [smem:[#allocation41_spill]] %s15066_s7 }
   0x6   :  { %15101 = sst [smem:[#allocation42_spill]] %s15070_s11 }
   0x7   :  { %15102 = sst [smem:[#allocation43_spill]] %s15071_s12 }
   0x8   :  { %15103 = sst [smem:[#allocation44_spill]] %s15077_s18 }
   0x9   :  { %15104 = sst [smem:[#allocation45_spill]] %s15078_s19 }
   0xa   :  { %24 = vsyncpa [#allocation12], 0 }
   0xb   :  { %25 = vsyncpa [#allocation15], 0 }
   0xc   :  { %26 = vsyncpa [#allocation18], 0 }
   0xd   :  { %27 = vsyncpa [#allocation21], 0 }
   0xe   :  { %28 = vsyncpa [#allocation13], 0 }
   0xf   :  { %30 = vsyncpa [#allocation13 + $0x1], 0  ;;  %s11287_s0 = smov 0   ;;  %s11289_s30 = smov 0  }
  0x10   :  { %s11291_s20 = smov 0   ;;  %s11293_s21 = smov 0  }
  0x11 LB: > { %15105 = sst [smem:[#allocation29_spill]] %s11139_s0  ;;  %s11308_s1 = sadd.s32 4294967295, %s11151_s21   ;;  %s11151_s21 = sphi %s11293_s21, %s15148_s21   ;;  %s11147_s20 = sphi %s11291_s20, %s15151_s20   ;;  %s11143_s30 = sphi %s11289_s30, %s15150_s30   ;;  %s11139_s0 = sphi %s11287_s0, %s15149_s0  }
  0x12   : > { %15106 = sst [smem:[#allocation30_spill]] %s11143_s30  ;;  %s8929_s22 = sadd.s32 4294967294, %s11151_s21  }
  0x13   : > { %15107 = sst [smem:[#allocation31_spill]] %s11147_s20  ;;  %s11312_s2 = sadd.s32 1, %s11151_s21  }
  0x14   : > { %15108 = sst [smem:[#allocation32_spill]] %s11151_s21  ;;  %s447_s23 = sadd.s32 1, %s11147_s20 }
  0x15   : > { %15109 = sst [smem:[#allocation33_spill]] %s11312_s2  ;;  %s444_s24 = ssub.s32 %s11151_s21, %s11312_s2 }
  0x16   : > { %p457_p0 = scmp.ne.s32.totalorder %s11147_s20, %s11143_s30  ;;  %p445_p1 = scmp.eq.s32.totalorder %s444_s24, 0 }
  0x17   : > { %p458_p2 = scmp.eq.s32.totalorder %s11308_s1, 1  ;;  %p463_p3 = scmp.ne.s32.totalorder %s11143_s30, %s11139_s0 }
  0x18   : > { %p464_p4 = scmp.eq.s32.totalorder %s8929_s22, 1  ;;  %p8930_p7 = scmp.ge.s32.totalorder %s11151_s21, 1 }
  0x19   : > { %s11323_s25 = scalar_select %p445_p1, %s11147_s20, %s447_s23  }
  0x1a   : > { %p11325_p5 = por %p458_p2, %p457_p0  ;;  %p11329_p6 = por %p464_p4, %p463_p3 }
  0x1b   : > { %15110 = sst [smem:[#allocation34_spill]] %s11323_s25  ;;  %p471_p8 = scmp.lt.s32.totalorder %s11151_s21, 3 }
  0x1c   : > { %s15111_s3 = scalar_select %p11325_p5, 1, 0 }
  0x1d   : > { %s15113_s26 = scalar_select %p11329_p6, 1, 0 }
  0x1e   : > { %15112 = sst [smem:[#allocation35_spill]] %s15111_s3  ;;  %p15089_p9 = scmp.eq.s32.totalorder %s11308_s1, 0 }
  0x1f   : > { %15114 = sst [smem:[#allocation36_spill]] %s15113_s26  ;;  %p11336_p10 = pnand %p8930_p7, %p471_p8 }
  0x20   : > { %s11153_s28 = smov [#allocation14]   ;;  %s11154_s23 = smov [#allocation17]  }
  0x21   : > { %s15115_s27 = scalar_select %p11336_p10, 1, 0 }
  0x22   : > { %p10359_p11 = pneg %p11336_p10  ;;  %s511_s29 = sshll.u32 %s11153_s28, 4  ;;  %s11342_s29 = int_to_ptr.vmem [resolvable:$true] %s511_s29 }
  0x23   : > { %s543_s24 = sshll.u32 %s11154_s23, 4  ;;  %s11155_s25 = smov [#allocation20]   ;;  %s11350_s24 = int_to_ptr.vmem [resolvable:$true] %s543_s24 }
  0x24   : > { %p11346_p12 = pnand %p15089_p9, %p10359_p11  ;;  %s11352_s20 = sshll.u32 %s11155_s25, 4  ;;  %s579_s20 = int_to_ptr.vmem [resolvable:$true] %s11352_s20 }
  0x25   : > { %s15117_s7 = sld [smem:[#allocation41_spill]] }
  0x26   : > { %p11362_p0 = pneg %p11346_p12 }
  0x2b   : > { %s10877_s0 = scalar_lea.hbm %s15117_s7, 2304 }
  0x2c   : > { %p10878_p13 = scmp.ne.s32.totalorder %s15117_s7, %s10877_s0  ;;  %p10884_p3 = scmp.lt.u32.totalorder %s10877_s0, %s15117_s7 }
  0x2e   : > { %p10880_p1 = pnand %p11362_p0, %p10878_p13 }
  0x30   : > { %p10881_p2 = pneg %p10880_p1 }
  0x32   : > { %p10886_p4 = pnand %p10884_p3, %p10881_p2 }
  0x34   : > { %10889 = shalt.err (!%p10886_p4)
}
  0x35   : > { %s10890_s21 = scalar_lea.vmem %s11342_s29, 2304  ;;  %p10898_p9 = scmp.lt.s32.totalorder %s11342_s29, %s11342_s29 }
  0x36   : > { %p10891_p7 = scmp.ne.s32.totalorder %s11342_s29, %s10890_s21  ;;  %p10899_p6 = scmp.lt.s32.totalorder %s10890_s21, %s10890_s21 }
  0x38   : > { %p10893_p8 = pnand %p10891_p7, %p11362_p0  ;;  %p10900_p13 = por %p10899_p6, %p10898_p9 }
  0x3a   : > { %p10894_p11 = pneg %p10893_p8 }
  0x3c   : > { %p10901_p1 = pnand %p10900_p13, %p10894_p11 }
  0x3e   : > { %10904 = shalt.err (!%p10901_p1)
}
  0x3f   : > { %s15095_s2 = smov 128   ;;  %s11157_s0 = smov 8  }
  0x40   : > { %10365 = dma.hbm_to_vmem [thread:$0]  (!%p11346_p12), %s15117_s7, 2304, %s11342_s29, [#allocation15], %s15095_s2, %s15095_s2, %s11157_s0  }
  0x41   : > { %s15119_s11 = sld [smem:[#allocation42_spill]] }
  0x47   : > { %s10905_s21 = scalar_lea.hbm %s15119_s11, 4608 }
  0x48   : > { %p10906_p6 = scmp.ne.s32.totalorder %s15119_s11, %s10905_s21  ;;  %p10912_p3 = scmp.lt.u32.totalorder %s10905_s21, %s15119_s11 }
  0x4a   : > { %p10908_p9 = pnand %p10906_p6, %p11362_p0 }
  0x4c   : > { %p10909_p2 = pneg %p10908_p9 }
  0x4e   : > { %p10914_p4 = pnand %p10912_p3, %p10909_p2 }
  0x50   : > { %10917 = shalt.err (!%p10914_p4)
}
  0x51   : > { %s10918_s29 = scalar_lea.vmem %s11350_s24, 4608  ;;  %p10926_p13 = scmp.lt.s32.totalorder %s11350_s24, %s11350_s24 }
  0x52   : > { %p10919_p7 = scmp.ne.s32.totalorder %s11350_s24, %s10918_s29  ;;  %p10927_p1 = scmp.lt.s32.totalorder %s10918_s29, %s10918_s29 }
  0x54   : > { %p10921_p8 = pnand %p10919_p7, %p11362_p0  ;;  %p10928_p6 = por %p10927_p1, %p10926_p13 }
  0x56   : > { %p10922_p11 = pneg %p10921_p8 }
  0x58   : > { %p10929_p9 = pnand %p10928_p6, %p10922_p11 }
  0x5a   : > { %10932 = shalt.err (!%p10929_p9)
}
  0x5b   : > { %10371 = dma.hbm_to_vmem [thread:$0]  (!%p11346_p12), %s15119_s11, 4608, %s11350_s24, [#allocation18], %s15095_s2, %s15095_s2, %s11157_s0  }
  0x5c   : > { %s10933_s26 = scalar_lea.hbm %s15075_s16, 640 }
  0x5d   : > { %p10934_p2 = scmp.ne.s32.totalorder %s15075_s16, %s10933_s26  ;;  %p10940_p7 = scmp.lt.u32.totalorder %s10933_s26, %s15075_s16 }
  0x5f   : > { %p10936_p3 = pnand %p10934_p2, %p11362_p0 }
  0x61   : > { %p10937_p4 = pneg %p10936_p3 }
  0x63   : > { %p10942_p8 = pnand %p10940_p7, %p10937_p4 }
  0x65   : > { %10945 = shalt.err (!%p10942_p8)
}
  0x66   : > { %s10946_s29 = scalar_lea.vmem %s579_s20, 640  ;;  %p10954_p6 = scmp.lt.s32.totalorder %s579_s20, %s579_s20 }
  0x67   : > { %p10947_p11 = scmp.ne.s32.totalorder %s579_s20, %s10946_s29  ;;  %p10955_p9 = scmp.lt.s32.totalorder %s10946_s29, %s10946_s29 }
  0x69   : > { %p10949_p13 = pnand %p10947_p11, %p11362_p0  ;;  %p10956_p5 = por %p10955_p9, %p10954_p6 }
  0x6b   : > { %p10950_p1 = pneg %p10949_p13 }
  0x6d   : > { %p10957_p10 = pnand %p10956_p5, %p10950_p1 }
  0x6f   : > { %10960 = shalt.err (!%p10957_p10)
}
  0x70   : > { %10377 = dma.hbm_to_vmem [thread:$0]  (!%p11346_p12), %s15075_s16, 640, %s579_s20, [#allocation21], %s15095_s2, %s15095_s2, %s11157_s0  }
  0x71   : > { %s11158_s18 = smov [#allocation11]   ;;  %s11159_s3 = smov [#allocation16]  }
  0x72   : > { %s489_s30 = sshll.u32 %s11158_s18, 4  ;;  %s527_s26 = sshll.u32 %s11159_s3, 4  ;;  %s490_s30 = int_to_ptr.vmem [resolvable:$true] %s489_s30  ;;  %s528_s26 = int_to_ptr.vmem [resolvable:$true] %s527_s26 }
  0x73   : > { %s15120_s25 = sld [smem:[#allocation40_spill]] }
  0x79   : > { %s10961_s21 = scalar_lea.hbm %s15120_s25, 1152 }
  0x7a   : > { %p10962_p5 = scmp.ne.s32.totalorder %s15120_s25, %s10961_s21  ;;  %p10968_p3 = scmp.lt.u32.totalorder %s10961_s21, %s15120_s25 }
  0x7c   : > { %p10964_p10 = pnand %p10962_p5, %p11362_p0 }
  0x7e   : > { %p10965_p2 = pneg %p10964_p10 }
  0x80   : > { %p10970_p4 = pnand %p10968_p3, %p10965_p2 }
  0x82   : > { %10973 = shalt.err (!%p10970_p4)
}
  0x83   : > { %s10974_s20 = scalar_lea.vmem %s490_s30, 1152  ;;  %p10982_p13 = scmp.lt.s32.totalorder %s490_s30, %s490_s30 }
  0x84   : > { %p10975_p7 = scmp.ne.s32.totalorder %s490_s30, %s10974_s20  ;;  %p10983_p1 = scmp.lt.s32.totalorder %s10974_s20, %s10974_s20 }
  0x86   : > { %p10977_p8 = pnand %p10975_p7, %p11362_p0  ;;  %p10984_p6 = por %p10983_p1, %p10982_p13 }
  0x88   : > { %p10978_p11 = pneg %p10977_p8 }
  0x8a   : > { %p10985_p9 = pnand %p10984_p6, %p10978_p11 }
  0x8c   : > { %10988 = shalt.err (!%p10985_p9)
}
  0x8d   : > { %10362 = dma.hbm_to_vmem [thread:$0]  (!%p11346_p12), %s15120_s25, 1152, %s490_s30, [#allocation12], %s15095_s2, %s15095_s2, %s11157_s0  }
  0x8e   : > { %s10989_s3 = scalar_lea.hbm %s15068_s9, 4608 }
  0x8f   : > { %p10990_p5 = scmp.ne.s32.totalorder %s15068_s9, %s10989_s3  ;;  %p10996_p3 = scmp.lt.u32.totalorder %s10989_s3, %s15068_s9 }
  0x91   : > { %p10992_p10 = pnand %p10990_p5, %p11362_p0 }
  0x93   : > { %p10993_p2 = pneg %p10992_p10 }
  0x95   : > { %p10998_p4 = pnand %p10996_p3, %p10993_p2 }
  0x97   : > { %11001 = shalt.err (!%p10998_p4)
}
  0x98   : > { %s11002_s24 = scalar_lea.vmem %s528_s26, 4608  ;;  %p11010_p13 = scmp.lt.s32.totalorder %s528_s26, %s528_s26 }
  0x99   : > { %p11003_p7 = scmp.ne.s32.totalorder %s528_s26, %s11002_s24  ;;  %p11011_p1 = scmp.lt.s32.totalorder %s11002_s24, %s11002_s24 }
  0x9b   : > { %p11005_p8 = pnand %p11003_p7, %p11362_p0  ;;  %p11012_p6 = por %p11011_p1, %p11010_p13 }
  0x9d   : > { %p11006_p11 = pneg %p11005_p8 }
  0x9f   : > { %p11013_p9 = pnand %p11012_p6, %p11006_p11 }
  0xa1   : > { %11016 = shalt.err (!%p11013_p9)
}
  0xa2   : > { %10368 = dma.hbm_to_vmem [thread:$0]  (!%p11346_p12), %s15068_s9, 4608, %s528_s26, [#allocation15], %s15095_s2, %s15095_s2, %s11157_s0  }
  0xa3   : > { %s11160_s7 = smov [#allocation19]   ;;  %s11017_s3 = scalar_lea.hbm %s15073_s14, 4992 }
  0xa4   : > { %s562_s11 = sshll.u32 %s11160_s7, 4  ;;  %p11018_p5 = scmp.ne.s32.totalorder %s15073_s14, %s11017_s3  ;;  %s563_s11 = int_to_ptr.vmem [resolvable:$true] %s562_s11 }
  0xa5   : > { %p11024_p3 = scmp.lt.u32.totalorder %s11017_s3, %s15073_s14 }
  0xa6   : > { %p11020_p10 = pnand %p11018_p5, %p11362_p0 }
  0xa8   : > { %p11021_p2 = pneg %p11020_p10 }
  0xaa   : > { %p11026_p4 = pnand %p11024_p3, %p11021_p2 }
  0xac   : > { %11029 = shalt.err (!%p11026_p4)
}
  0xad   : > { %s11030_s26 = scalar_lea.vmem %s563_s11, 4992  ;;  %p11038_p13 = scmp.lt.s32.totalorder %s563_s11, %s563_s11 }
  0xae   : > { %p11031_p7 = scmp.ne.s32.totalorder %s563_s11, %s11030_s26  ;;  %p11039_p1 = scmp.lt.s32.totalorder %s11030_s26, %s11030_s26 }
  0xb0   : > { %p11033_p8 = pnand %p11031_p7, %p11362_p0  ;;  %p11040_p6 = por %p11039_p1, %p11038_p13 }
  0xb2   : > { %p11034_p11 = pneg %p11033_p8 }
  0xb4   : > { %p11041_p9 = pnand %p11040_p6, %p11034_p11 }
  0xb6   : > { %11044 = shalt.err (!%p11041_p9)
}
  0xb7   : > { %s11161_s24 = smov 384   ;;  %s11162_s30 = smov 24  }
  0xb8   : > { %10374 = dma.hbm_to_vmem [thread:$0]  (!%p11346_p12), %s15073_s14, 4992, %s563_s11, [#allocation18], %s11161_s24, %s11161_s24, %s11162_s30  }
  0xb9   : > { %s11163_s12 = smov [#allocation22]   ;;  %s11045_s23 = scalar_lea.hbm %s15076_s17, 640 }
  0xba   : > { %s591_s18 = sshll.u32 %s11163_s12, 4  ;;  %p11046_p5 = scmp.ne.s32.totalorder %s15076_s17, %s11045_s23  ;;  %s592_s18 = int_to_ptr.vmem [resolvable:$true] %s591_s18 }
  0xbb   : > { %p11052_p3 = scmp.lt.u32.totalorder %s11045_s23, %s15076_s17 }
  0xbc   : > { %p11048_p10 = pnand %p11046_p5, %p11362_p0 }
  0xbe   : > { %p11049_p2 = pneg %p11048_p10 }
  0xc0   : > { %p11054_p4 = pnand %p11052_p3, %p11049_p2 }
  0xc2   : > { %11057 = shalt.err (!%p11054_p4)
}
  0xc3   : > { %s11058_s11 = scalar_lea.vmem %s592_s18, 640  ;;  %p11066_p13 = scmp.lt.s32.totalorder %s592_s18, %s592_s18 }
  0xc4   : > { %p11059_p7 = scmp.ne.s32.totalorder %s592_s18, %s11058_s11  ;;  %p11067_p1 = scmp.lt.s32.totalorder %s11058_s11, %s11058_s11 }
  0xc6   : > { %p11061_p8 = pnand %p11059_p7, %p11362_p0  ;;  %p11068_p6 = por %p11067_p1, %p11066_p13 }
  0xc8   : > { %p11062_p11 = pneg %p11061_p8 }
  0xca   : > { %p11069_p9 = pnand %p11068_p6, %p11062_p11 }
  0xcc   : > { %11072 = shalt.err (!%p11069_p9)
}
  0xcd   : > { %s15121_s24 = smov 128   ;;  %p15122_p5 = scmp.ne.s32.totalorder %s15115_s27, 0 }
  0xce   : > { %10380 = dma.hbm_to_vmem [thread:$0]  (!%p11346_p12), %s15076_s17, 640, %s592_s18, [#allocation21], %s15121_s24, %s15121_s24, %s11157_s0  }
  0xcf   : > { %618 = sbr.rel (%p15122_p5) target bundleno = 5178 (0x143a), region = 96  ;;  %p15123_p0 = scmp.eq.s32.totalorder (!%p15122_p5), %s11308_s1, 0 }
  0xd6   : > { %11118 = dma.done.wait (%p15123_p0), [#allocation12], 1152   ;;  %p15124_p10 = pmov %p15123_p0 }
  0xd7   : > { %p15125_p2 = pmov %p15123_p0 }
  0xd8   : > { %11120 = vsyncadd (%p15124_p10), [#allocation12], 4294966144 }
  0xd9   : > { %11122 = dma.done.wait (%p15125_p2), [#allocation15], 6912   ;;  %p15126_p3 = pmov %p15123_p0 }
  0xda   : > { %p15127_p4 = pmov %p15123_p0 }
  0xdb   : > { %11124 = vsyncadd (%p15126_p3), [#allocation15], 4294960384 }
  0xdc   : > { %11126 = dma.done.wait (%p15127_p4), [#allocation18], 9600   ;;  %p15128_p12 = pmov %p15123_p0 }
  0xdd   : > { %p15129_p7 = pmov %p15123_p0 }
  0xde   : > { %11128 = vsyncadd (%p15128_p12), [#allocation18], 4294957696 }
  0xdf   : > { %11130 = dma.done.wait (%p15129_p7), [#allocation21], 1280   ;;  %p15130_p8 = pmov %p15123_p0 }
  0xe0   : > { %p698_p11 = scmp.lt.s32.totalorder %s11308_s1, 1  ;;  %vm744_vm0 = vcmask 23552   ;;  %s15131_s20 = sld [smem:[#allocation37_spill]]  ;;  %vm2546_vm1 = vcmask 1042432   ;;  %vm11171_vm2 = vmmov 1   ;;  %vm2167_vm4 = vcmask 48128  }
  0xe1   : > { %11132 = vsyncadd (%p15130_p8), [#allocation21], 4294966016  ;;  %s11164_s12 = smov 6   ;;  %s11165_s18 = smov 3   ;;  %vm2204_vm5 = vcmask 72704   ;;  %vm2241_vm6 = vcmask 97280  }
  0xe2   : > { %s699_s19 = scalar_select %p698_p11, %s11308_s1, 1  ;;  %vm11602_vm3 = vmpackc.low %vm2546_vm1, %vm11171_vm2  ;;  %vm2278_vm7 = vcmask 121856   ;;  %vm2315_vm8 = vcmask 146432   ;;  %vm2352_vm9 = vcmask 171008   ;;  %vm2389_vm10 = vcmask 195584   ;;  %v5999_v37 = vld [vmem:[#allocation19 + $0x78] sm:$0xff] }
  0xe3   : > { %s11166_s3 = smov 9   ;;  %s11167_s28 = smov 12   ;;  %vm2437_vm11 = vcmask 220160   ;;  %vm785_vm12 = vcmask 19456   ;;  %vm3078_vm13 = vcmask 1045504   ;;  %vm11174_vm15 = vmmov 0  }
  0xe4   : > { %s10328_s27 = smul.u32 328, %s699_s19  ;;  %s11168_s23 = smov 15   ;;  %vm12787_vm14 = vmpackc.low %vm3078_vm13, %vm11171_vm2 }
  0xe5   : > { %s11169_s21 = smov 18   ;;  %s15132_s11 = sld [smem:[#allocation38_spill]] }
  0xe6   : > { %s11538_s7 = scalar_lea.vmem %s15131_s20, %s10328_s27  ;;  %s11170_s0 = smov 21  }
  0xe7   : > { %v703_v0 = vld [vmem:[%s11538_s7] sm:$0xff]  ;;  %v704_v1 = vld [vmem:[%s11538_s7 + $0x8] sm:$0xff]  ;;  %v705_v2 = vld [vmem:[%s11538_s7 + $0x10] sm:$0xff]  ;;  %s11172_s20 = smov 24   ;;  %s15135_s24 = sld [smem:[#allocation39_spill]] }
  0xe8   : > { %745 = vst.msk [vmem:[#allocation2] sm:$0xff] %vm744_vm0, %v703_v0  ;;  %746 = vst.msk [vmem:[#allocation2 + $0x8] sm:$0xff] %vm744_vm0, %v704_v1  ;;  %v706_v3 = vld [vmem:[%s11538_s7 + $0x18] sm:$0xff]  ;;  %v707_v4 = vld [vmem:[%s11538_s7 + $0x20] sm:$0xff]  ;;  %s11176_s30 = smov 8   ;;  %s11177_s19 = smov 16  }
  0xe9   : > { %747 = vst.msk [vmem:[#allocation2 + $0x10] sm:$0xff] %vm744_vm0, %v705_v2  ;;  %v708_v5 = vld [vmem:[%s11538_s7 + $0x28] sm:$0xff]  ;;  %748 = vst.msk [vmem:[#allocation2 + $0x18] sm:$0xff] %vm744_vm0, %v706_v3  ;;  %v709_v6 = vld [vmem:[%s11538_s7 + $0x30] sm:$0xff]  ;;  %s11178_s27 = smov 32   ;;  %s11179_s22 = smov 40  }
  0xea   : > { %749 = vst.msk [vmem:[#allocation2 + $0x20] sm:$0xff] %vm744_vm0, %v707_v4  ;;  %750 = vst.msk [vmem:[#allocation2 + $0x28] sm:$0xff] %vm744_vm0, %v708_v5  ;;  %v710_v7 = vld [vmem:[%s11538_s7 + $0x38] sm:$0xff]  ;;  %v711_v8 = vld [vmem:[%s11538_s7 + $0x40] sm:$0xff]  ;;  %s11181_s29 = smov 56   ;;  %s11182_s26 = smov 64  }
  0xeb   : > { %751 = vst.msk [vmem:[#allocation2 + $0x30] sm:$0xff] %vm744_vm0, %v709_v6  ;;  %752 = vst.msk [vmem:[#allocation2 + $0x38] sm:$0xff] %vm744_vm0, %v710_v7  ;;  %v712_v9 = vld [vmem:[%s11538_s7 + $0x48] sm:$0xff]  ;;  %v713_v10 = vld [vmem:[%s11538_s7 + $0x50] sm:$0xff]  ;;  %s15139_s2 = sld [smem:[#allocation30_spill]] }
  0xec   : > { %753 = vst.msk [vmem:[#allocation2 + $0x40] sm:$0xff] %vm744_vm0, %v711_v8  ;;  %v714_v11 = vld [vmem:[%s11538_s7 + $0x58] sm:$0xff]  ;;  %754 = vst.msk [vmem:[#allocation2 + $0x48] sm:$0xff] %vm744_vm0, %v712_v9  ;;  %v715_v12 = vld [vmem:[%s11538_s7 + $0x60] sm:$0xff] }
  0xed   : > { %755 = vst.msk [vmem:[#allocation2 + $0x50] sm:$0xff] %vm744_vm0, %v713_v10  ;;  %756 = vst.msk [vmem:[#allocation2 + $0x58] sm:$0xff] %vm744_vm0, %v714_v11  ;;  %v716_v24 = vld [vmem:[%s11538_s7 + $0x68] sm:$0xff]  ;;  %v717_v27 = vld [vmem:[%s11538_s7 + $0x70] sm:$0xff] }
  0xee   : > { %757 = vst.msk [vmem:[#allocation2 + $0x60] sm:$0xff] %vm744_vm0, %v715_v12  ;;  %758 = vst.msk [vmem:[#allocation2 + $0x68] sm:$0xff] %vm744_vm0, %v716_v24  ;;  %v2426_v29 = vld [vmem:[%s15132_s11] sm:$0xff]  ;;  %v2427_v30 = vld [vmem:[%s15132_s11 + $0x8] sm:$0xff] }
  0xef   : > { %v859_v13 = vld [vmem:[#allocation2 + $0x2] sm:$0xff]  ;;  %759 = vst.msk [vmem:[#allocation2 + $0x70] sm:$0xff] %vm744_vm0, %v717_v27  ;;  %v9964_v31 = vpack.c.bf16 %v2427_v30, %v2426_v29  ;;  %v2428_v34 = vld [vmem:[%s15132_s11 + $0x10] sm:$0xff]  ;;  %v2429_v35 = vld [vmem:[%s15132_s11 + $0x18] sm:$0x7] }
  0xf0   : > { %v823_v14 = vld [vmem:[#allocation2 + $0x1] sm:$0xff]  ;;  %1225 = vrot.lane.b32.xlu1 %v859_v13, %s11164_s12  ;;  %v860_v15 = vld [vmem:[#allocation2 + $0xa] sm:$0xff]  ;;  %v861_v18 = vld [vmem:[#allocation2 + $0x12] sm:$0xff]  ;;  %v9968_v36 = vpack.c.bf16 %v2429_v35, %v2428_v34 }
  0xf1   : > { %1081 = vrot.lane.b32.xlu0 %v823_v14, %s11165_s18  ;;  %v824_v16 = vld [vmem:[#allocation2 + $0x9] sm:$0xff]  ;;  %v862_v17 = vld [vmem:[#allocation2 + $0x1a] sm:$0xff]  ;;  %v825_v19 = vld [vmem:[#allocation2 + $0x11] sm:$0xff]  ;;  %9965 = vmatprep.subr.bf16.mxu0 %v9964_v31 }
  0xf2   : > { %v898_v20 = vld [vmem:[#allocation2 + $0x13] sm:$0xff]  ;;  %v899_v22 = vld [vmem:[#allocation2 + $0x1b] sm:$0xff]  ;;  %v936_v25 = vld [vmem:[#allocation2 + $0x24] sm:$0xff]  ;;  %9967 = vmatpush3.bf16.msra.mxu0 %v9964_v31 }
  0xf3   : > { %v934_v21 = vld [vmem:[#allocation2 + $0x14] sm:$0xff]  ;;  %v935_v26 = vld [vmem:[#allocation2 + $0x1c] sm:$0xff]  ;;  %v973_v32 = vld [vmem:[#allocation2 + $0x25] sm:$0xff]  ;;  %9970 = vmatprep.subr.msk.bf16.mxu0 %vm11602_vm3, %v9968_v36 }
  0xf4   : > { %1227 = vrot.lane.b32.xlu1 %v860_v15, %s11164_s12  ;;  %v826_v23 = vld [vmem:[#allocation2 + $0x19] sm:$0xff]  ;;  %v863_v28 = vld [vmem:[#allocation2 + $0x22] sm:$0xff]  ;;  %v937_v33 = vld [vmem:[#allocation2 + $0x2c] sm:$0xff] }
  0xf5   : > { %1083 = vrot.lane.b32.xlu0 %v824_v16, %s11165_s18  ;;  %v900_v38 = vld [vmem:[#allocation2 + $0x23] sm:$0xff]  ;;  %v974_v41 = vld [vmem:[#allocation2 + $0x2d] sm:$0xff]  ;;  %v718_v45 = vld [vmem:[%s11538_s7 + $0x78] sm:$0xff] }
  0xf6   : > { %v864_v39 = vld [vmem:[#allocation2 + $0x2a] sm:$0xff]  ;;  %9973 = vmatpush3.bf16.msk.msra.mxu0 %vm11602_vm3, %v9968_v36  ;;  %v827_v43 = vld [vmem:[#allocation2 + $0x21] sm:$0xff]  ;;  %760 = vst.msk [vmem:[#allocation2 + $0x78] sm:$0xff] %vm744_vm0, %v718_v45  ;;  %v938_v47 = vld [vmem:[#allocation2 + $0x34] sm:$0xff] }
  0xf7   : > { %v1009_v40 = vld [vmem:[#allocation2 + $0x26] sm:$0xff]  ;;  %v1010_v44 = vld [vmem:[#allocation2 + $0x2e] sm:$0xff]  ;;  %v939_v51 = vld [vmem:[#allocation2 + $0x3c] sm:$0xff] }
  0xf8   : > { %1338 = vrot.lane.b32.xlu1 %v862_v17, %s11166_s3  ;;  %v901_v42 = vld [vmem:[#allocation2 + $0x2b] sm:$0xff]  ;;  %v719_v48 = vld [vmem:[%s11538_s7 + $0x80] sm:$0xff]  ;;  %v975_v50 = vld [vmem:[#allocation2 + $0x35] sm:$0xff] }
  0xf9   : > { %1336 = vrot.lane.b32.xlu0 %v861_v18, %s11166_s3  ;;  %v828_v46 = vld [vmem:[#allocation2 + $0x29] sm:$0xff]  ;;  %v865_v49 = vld [vmem:[#allocation2 + $0x32] sm:$0xff]  ;;  %761 = vst.msk [vmem:[#allocation2 + $0x80] sm:$0xff] %vm744_vm0, %v719_v48  ;;  %v866_v53 = vld [vmem:[#allocation2 + $0x3a] sm:$0xff] }
  0xfa   : > { %v902_v52 = vld [vmem:[#allocation2 + $0x33] sm:$0xff]  ;;  %v976_v55 = vld [vmem:[#allocation2 + $0x3d] sm:$0xff]  ;;  %v720_v59 = vld [vmem:[%s11538_s7 + $0x88] sm:$0xff] }
  0xfb   : > { %v1011_v54 = vld [vmem:[#allocation2 + $0x36] sm:$0xff]  ;;  %v1012_v58 = vld [vmem:[#allocation2 + $0x3e] sm:$0xff]  ;;  %762 = vst.msk [vmem:[#allocation2 + $0x88] sm:$0xff] %vm744_vm0, %v720_v59  ;;  %v941_v1 = vld [vmem:[#allocation2 + $0x4c] sm:$0xff] }
  0xfc   : > { %1085 = vrot.lane.b32.xlu1 %v825_v19, %s11165_s18  ;;  %v903_v56 = vld [vmem:[#allocation2 + $0x3b] sm:$0xff]  ;;  %v829_v57 = vld [vmem:[#allocation2 + $0x31] sm:$0xff]  ;;  %v940_v61 = vld [vmem:[#allocation2 + $0x44] sm:$0xff] }
  0xfd   : > { %1480 = vrot.lane.b32.xlu0 %v898_v20, %s11167_s28  ;;  %v830_v60 = vld [vmem:[#allocation2 + $0x39] sm:$0xff]  ;;  %v721_v62 = vld [vmem:[%s11538_s7 + $0x90] sm:$0xff]  ;;  %v867_v63 = vld [vmem:[#allocation2 + $0x42] sm:$0xff] }
  0xfe   : > { %763 = vst.msk [vmem:[#allocation2 + $0x90] sm:$0xff] %vm744_vm0, %v721_v62  ;;  %v977_v0 = vld [vmem:[#allocation2 + $0x45] sm:$0xff]  ;;  %v978_v5 = vld [vmem:[#allocation2 + $0x4d] sm:$0xff]  ;;  %v722_v9 = vld [vmem:[%s11538_s7 + $0x98] sm:$0xff] }
  0xff   : > { %v904_v2 = vld [vmem:[#allocation2 + $0x43] sm:$0xff]  ;;  %v905_v6 = vld [vmem:[#allocation2 + $0x4b] sm:$0xff]  ;;  %764 = vst.msk [vmem:[#allocation2 + $0x98] sm:$0xff] %vm744_vm0, %v722_v9  ;;  %v942_v13 = vld [vmem:[#allocation2 + $0x54] sm:$0xff] }
 0x100   : > { %1624 = vrot.lane.b32.xlu1 %v934_v21, %s11168_s23  ;;  %v868_v3 = vld [vmem:[#allocation2 + $0x4a] sm:$0xff]  ;;  %v831_v7 = vld [vmem:[#allocation2 + $0x41] sm:$0xff]  ;;  %v979_v20 = vld [vmem:[#allocation2 + $0x55] sm:$0xff] }
 0x101   : > { %1482 = vrot.lane.b32.xlu0 %v899_v22, %s11167_s28  ;;  %v1013_v4 = vld [vmem:[#allocation2 + $0x46] sm:$0xff]  ;;  %v1014_v8 = vld [vmem:[#allocation2 + $0x4e] sm:$0xff]  ;;  %v943_v21 = vld [vmem:[#allocation2 + $0x5c] sm:$0xff] }
 0x102   : > { %v832_v10 = vld [vmem:[#allocation2 + $0x49] sm:$0xff]  ;;  %v723_v16 = vld [vmem:[%s11538_s7 + $0xa0] sm:$0xff]  ;;  %v906_v24 = vld [vmem:[#allocation2 + $0x53] sm:$0xff] }
 0x103   : > { %765 = vst.msk [vmem:[#allocation2 + $0xa0] sm:$0xff] %vm744_vm0, %v723_v16  ;;  %v980_v29 = vld [vmem:[#allocation2 + $0x5d] sm:$0xff] }
 0x104   : > { %1229 = vrot.lane.b32.xlu1 %v861_v18, %s11164_s12  ;;  %v1016_v36 = vld [vmem:[#allocation2 + $0x5e] sm:$0xff] }
 0x105   : > { %1087 = vrot.lane.b32.xlu0 %v826_v23, %s11165_s18 }
 0x108   : > { %1735 = vrot.lane.b32.xlu1 %v936_v25, %s11169_s21 }
 0x109   : > { %1626 = vrot.lane.b32.xlu0 %v935_v26, %s11168_s23 }
 0x10c   : > { %1340 = vrot.lane.b32.xlu1 %v863_v28, %s11166_s3 }
 0x10d   : > { %1231 = vrot.lane.b32.xlu0 %v862_v17, %s11164_s12  ;;  %v869_v17 = vld [vmem:[#allocation2 + $0x52] sm:$0xff] }
 0x110   : > { %1879 = vrot.lane.b32.xlu1 %v973_v32, %s11170_s0  ;;  %v907_v32 = vld [vmem:[#allocation2 + $0x5b] sm:$0xff] }
 0x111   : > { %1737 = vrot.lane.b32.xlu0 %v937_v33, %s11169_s21 }
 0x114   : > { %1484 = vrot.lane.b32.xlu1 %v900_v38, %s11167_s28 }
 0x115   : > { %1342 = vrot.lane.b32.xlu0 %v864_v39, %s11166_s3 }
 0x118   : > { %2023 = vrot.lane.b32.xlu1 %v1009_v40, %s11172_s20  ;;  %v787_v40 = vld [vmem:[#allocation2] sm:$0xff] }
 0x119   : > { %1881 = vrot.lane.b32.xlu0 %v974_v41, %s11170_s0  ;;  %v724_v41 = vld [vmem:[%s11538_s7 + $0xa8] sm:$0xff] }
 0x11a   : > { %766 = vst.msk [vmem:[#allocation2 + $0xa8] sm:$0xff] %vm744_vm0, %v724_v41 }
 0x11c   : > { %1486 = vrot.lane.b32.xlu1 %v901_v42, %s11167_s28  ;;  %v834_v42 = vld [vmem:[#allocation2 + $0x59] sm:$0xff] }
 0x11d   : > { %1089 = vrot.lane.b32.xlu0 %v827_v43, %s11165_s18 }
 0x120   : > { %2025 = vrot.lane.b32.xlu1 %v1010_v44, %s11172_s20 }
 0x121   : > { %1628 = vrot.lane.b32.xlu0 %v936_v25, %s11168_s23  ;;  %v870_v25 = vld [vmem:[#allocation2 + $0x5a] sm:$0xff] }
 0x124   : > { %1233 = vrot.lane.b32.xlu1 %v863_v28, %s11164_s12  ;;  %v1015_v28 = vld [vmem:[#allocation2 + $0x56] sm:$0xff] }
 0x125   : > { %1091 = vrot.lane.b32.xlu0 %v828_v46, %s11165_s18 }
 0x128   : > { %1739 = vrot.lane.b32.xlu1 %v938_v47, %s11169_s21 }
 0x129   : > { %1630 = vrot.lane.b32.xlu0 %v937_v33, %s11168_s23  ;;  %v833_v33 = vld [vmem:[#allocation2 + $0x51] sm:$0xff] }
 0x12c   : > { %1344 = vrot.lane.b32.xlu1 %v865_v49, %s11166_s3 }
 0x12d   : > { %1235 = vrot.lane.b32.xlu0 %v864_v39, %s11164_s12 }
 0x130   : > { %1883 = vrot.lane.b32.xlu1 %v975_v50, %s11170_s0 }
 0x131   : > { %1741 = vrot.lane.b32.xlu0 %v939_v51, %s11169_s21 }
 0x134   : > { %1488 = vrot.lane.b32.xlu1 %v902_v52, %s11167_s28 }
 0x135   : > { %1346 = vrot.lane.b32.xlu0 %v866_v53, %s11166_s3 }
 0x138   : > { %2027 = vrot.lane.b32.xlu1 %v1011_v54, %s11172_s20  ;;  %v725_v54 = vld [vmem:[%s11538_s7 + $0xb0] sm:$0xff] }
 0x139   : > { %1885 = vrot.lane.b32.xlu0 %v976_v55, %s11170_s0  ;;  %767 = vst.msk [vmem:[#allocation2 + $0xb0] sm:$0xff] %vm744_vm0, %v725_v54 }
 0x13c   : > { %1490 = vrot.lane.b32.xlu1 %v903_v56, %s11167_s28  ;;  %v871_v56 = vld [vmem:[#allocation2 + $0x62] sm:$0xff] }
 0x13d   : > { %1093 = vrot.lane.b32.xlu0 %v829_v57, %s11165_s18 }
 0x140   : > { %2029 = vrot.lane.b32.xlu1 %v1012_v58, %s11172_s20 }
 0x141   : > { %1632 = vrot.lane.b32.xlu0 %v938_v47, %s11168_s23  ;;  %v944_v47 = vld [vmem:[#allocation2 + $0x64] sm:$0xff] }
 0x144   : > { %1237 = vrot.lane.b32.xlu1 %v865_v49, %s11164_s12 }
 0x145   : > { %1095 = vrot.lane.b32.xlu0 %v830_v60, %s11165_s18 }
 0x148   : > { %1743 = vrot.lane.b32.xlu1 %v940_v61, %s11169_s21 }
 0x149   : > { %1634 = vrot.lane.b32.xlu0 %v939_v51, %s11168_s23  ;;  %v788_v51 = vld [vmem:[#allocation2 + $0x8] sm:$0xff] }
 0x14c   : > { %1348 = vrot.lane.b32.xlu1 %v867_v63, %s11166_s3 }
 0x14d   : > { %1239 = vrot.lane.b32.xlu0 %v866_v53, %s11164_s12 }
 0x150   : > { %1887 = vrot.lane.b32.xlu1 %v977_v0, %s11170_s0  ;;  %v945_v0 = vld [vmem:[#allocation2 + $0x6c] sm:$0xff] }
 0x151   : > { %1745 = vrot.lane.b32.xlu0 %v941_v1, %s11169_s21 }
 0x154   : > { %1492 = vrot.lane.b32.xlu1 %v904_v2, %s11167_s28 }
 0x155   : > { %1350 = vrot.lane.b32.xlu0 %v868_v3, %s11166_s3 }
 0x158   : > { %2031 = vrot.lane.b32.xlu1 %v1013_v4, %s11172_s20 }
 0x159   : > { %1889 = vrot.lane.b32.xlu0 %v978_v5, %s11170_s0 }
 0x15c   : > { %1494 = vrot.lane.b32.xlu1 %v905_v6, %s11167_s28 }
 0x15d   : > { %1097 = vrot.lane.b32.xlu0 %v831_v7, %s11165_s18  ;;  %v908_v7 = vld [vmem:[#allocation2 + $0x63] sm:$0xff] }
 0x160   : > { %2033 = vrot.lane.b32.xlu1 %v1014_v8, %s11172_s20  ;;  %v872_v8 = vld [vmem:[#allocation2 + $0x6a] sm:$0xff] }
 0x161   : > { %1636 = vrot.lane.b32.xlu0 %v940_v61, %s11168_s23 }
 0x162   : > { %v1226_v11 = vpop.permute.xlu1 %1225 }
 0x163   : > { %v1082_v12 = vpop.permute.xlu0 %1081 }
 0x164   : > { %1241 = vrot.lane.b32.xlu1 %v867_v63, %s11164_s12  ;;  %v2131_v43 = vsel %vm744_vm0, %v787_v40, %v1082_v12  ;;  %v981_v63 = vld [vmem:[#allocation2 + $0x65] sm:$0xff] }
 0x165   : > { %1099 = vrot.lane.b32.xlu0 %v832_v10, %s11165_s18  ;;  %v2168_v46 = vsel %vm2167_vm4, %v2131_v43, %v1226_v11  ;;  %v790_v43 = vld [vmem:[#allocation2 + $0x18] sm:$0xff] }
 0x166   : > { %v11662_v14 = vpop.permute.xlu1 %1227 }
 0x167   : > { %v11664_v15 = vpop.permute.xlu0 %1083 }
 0x168   : > { %1747 = vrot.lane.b32.xlu1 %v942_v13, %s11169_s21  ;;  %v2132_v57 = vsel %vm744_vm0, %v788_v51, %v11664_v15  ;;  %v983_v51 = vld [vmem:[#allocation2 + $0x75] sm:$0xff] }
 0x169   : > { %1638 = vrot.lane.b32.xlu0 %v941_v1, %s11168_s23  ;;  %v2169_v62 = vsel %vm2167_vm4, %v2132_v57, %v11662_v14  ;;  %v982_v14 = vld [vmem:[#allocation2 + $0x6d] sm:$0xff] }
 0x16a   : > { %v11670_v18 = vpop.permute.xlu1 %1338  ;;  %v910_v57 = vld [vmem:[#allocation2 + $0x73] sm:$0xff] }
 0x16b   : > { %v1337_v19 = vpop.permute.xlu0 %1336  ;;  %v2206_v1 = vsel %vm2204_vm5, %v2169_v62, %v11670_v18  ;;  %v835_v18 = vld [vmem:[#allocation2 + $0x61] sm:$0xff]  ;;  %v1019_v62 = vld [vmem:[#allocation2 + $0x76] sm:$0xff] }
 0x16c   : > { %1352 = vrot.lane.b32.xlu1 %v869_v17, %s11166_s3  ;;  %v2205_v48 = vsel %vm2204_vm5, %v2168_v46, %v1337_v19 }
 0x16d   : > { %1243 = vrot.lane.b32.xlu0 %v868_v3, %s11164_s12 }
 0x16e   : > { %v11674_v22 = vpop.permute.xlu1 %1085 }
 0x16f   : > { %v1481_v23 = vpop.permute.xlu0 %1480 }
 0x170   : > { %1891 = vrot.lane.b32.xlu1 %v979_v20, %s11170_s0  ;;  %v2242_v52 = vsel %vm2241_vm6, %v2205_v48, %v1481_v23 }
 0x171   : > { %1749 = vrot.lane.b32.xlu0 %v943_v21, %s11169_s21 }
 0x172   : > { %v1625_v26 = vpop.permute.xlu1 %1624 }
 0x173   : > { %v11678_v27 = vpop.permute.xlu0 %1482  ;;  %v2279_v53 = vsel %vm2278_vm7, %v2242_v52, %v1625_v26  ;;  %v789_v26 = vld [vmem:[#allocation2 + $0x10] sm:$0xff]  ;;  %v947_v52 = vld [vmem:[#allocation2 + $0x7c] sm:$0xff] }
 0x174   : > { %1496 = vrot.lane.b32.xlu1 %v906_v24, %s11167_s28  ;;  %v2243_v4 = vsel %vm2241_vm6, %v2206_v1, %v11678_v27  ;;  %v836_v27 = vld [vmem:[#allocation2 + $0x69] sm:$0xff] }
 0x175   : > { %1354 = vrot.lane.b32.xlu0 %v870_v25, %s11166_s3 }
 0x176   : > { %v11682_v30 = vpop.permute.xlu1 %1229 }
 0x177   : > { %v11684_v31 = vpop.permute.xlu0 %1087 }
 0x178   : > { %2035 = vrot.lane.b32.xlu1 %v1015_v28, %s11172_s20  ;;  %v2134_v48 = vsel %vm744_vm0, %v790_v43, %v11684_v31 }
 0x179   : > { %1893 = vrot.lane.b32.xlu0 %v980_v29, %s11170_s0 }
 0x17a   : > { %v1736_v34 = vpop.permute.xlu1 %1735 }
 0x17b   : > { %v1627_v35 = vpop.permute.xlu0 %1626  ;;  %v2316_v55 = vsel %vm2315_vm8, %v2279_v53, %v1736_v34  ;;  %v946_v34 = vld [vmem:[#allocation2 + $0x74] sm:$0xff] }
 0x17c   : > { %1498 = vrot.lane.b32.xlu1 %v907_v32, %s11167_s28  ;;  %v2280_v5 = vsel %vm2278_vm7, %v2243_v4, %v1627_v35  ;;  %v2133_v32 = vsel %vm744_vm0, %v789_v26, %v11674_v22  ;;  %v837_v4 = vld [vmem:[#allocation2 + $0x71] sm:$0xff] }
 0x17d   : > { %1101 = vrot.lane.b32.xlu0 %v833_v33, %s11165_s18  ;;  %v2170_v33 = vsel %vm2167_vm4, %v2133_v32, %v11682_v30 }
 0x17e   : > { %v11690_v38 = vpop.permute.xlu1 %1340 }
 0x17f   : > { %v11692_v39 = vpop.permute.xlu0 %1231  ;;  %v2207_v35 = vsel %vm2204_vm5, %v2170_v33, %v11690_v38 }
 0x180   : > { %2037 = vrot.lane.b32.xlu1 %v1016_v36, %s11172_s20 }
 0x181   : > { %1640 = vrot.lane.b32.xlu0 %v942_v13, %s11168_s23  ;;  %v1017_v13 = vld [vmem:[#allocation2 + $0x66] sm:$0xff] }
 0x182   : > { %v1880_v44 = vpop.permute.xlu1 %1879 }
 0x183   : > { %v1738_v45 = vpop.permute.xlu0 %1737  ;;  %v2353_v58 = vsel %vm2352_vm9, %v2316_v55, %v1880_v44  ;;  %v873_v44 = vld [vmem:[#allocation2 + $0x72] sm:$0xff] }
 0x184   : > { %1245 = vrot.lane.b32.xlu1 %v869_v17, %s11164_s12  ;;  %v2317_v6 = vsel %vm2315_vm8, %v2280_v5, %v1738_v45  ;;  %v909_v17 = vld [vmem:[#allocation2 + $0x6b] sm:$0xff] }
 0x185   : > { %1103 = vrot.lane.b32.xlu0 %v834_v42, %s11165_s18  ;;  %v727_v42 = vld [vmem:[%s11538_s7 + $0xc0] sm:$0xff] }
 0x186   : > { %v11703_v49 = vpop.permute.xlu1 %1484  ;;  %769 = vst.msk [vmem:[#allocation2 + $0xc0] sm:$0xff] %vm744_vm0, %v727_v42 }
 0x187   : > { %v11705_v50 = vpop.permute.xlu0 %1342  ;;  %v2244_v41 = vsel %vm2241_vm6, %v2207_v35, %v11703_v49  ;;  %v2171_v49 = vsel %vm2167_vm4, %v2134_v48, %v11692_v39 }
 0x188   : > { %1751 = vrot.lane.b32.xlu1 %v944_v47, %s11169_s21  ;;  %v2208_v53 = vsel %vm2204_vm5, %v2171_v49, %v11705_v50  ;;  %v1021_v49 = vld [vmem:[#allocation2 + $0x86] sm:$0xff] }
 0x189   : > { %1642 = vrot.lane.b32.xlu0 %v943_v21, %s11168_s23  ;;  %v1018_v21 = vld [vmem:[#allocation2 + $0x6e] sm:$0xff] }
 0x18a   : > { %v2024_v59 = vpop.permute.xlu1 %2023 }
 0x18b   : > { %v1882_v60 = vpop.permute.xlu0 %1881  ;;  %v2390_v61 = vsel %vm2389_vm10, %v2353_v58, %v2024_v59  ;;  %v874_v58 = vld [vmem:[#allocation2 + $0x7a] sm:$0xff] }
 0x18c   : > { %1356 = vrot.lane.b32.xlu1 %v871_v56, %s11166_s3  ;;  %9510 = vmatprep.mubr.msk.f32.mxu0 %vm2437_vm11, %v2390_v61  ;;  %v2354_v9 = vsel %vm2352_vm9, %v2317_v6, %v1882_v60 }
 0x18d   : > { %1247 = vrot.lane.b32.xlu0 %v870_v25, %s11164_s12  ;;  %v726_v25 = vld [vmem:[%s11538_s7 + $0xb8] sm:$0xff] }
 0x18e   : > { %v11725_v2 = vpop.permute.xlu1 %1486  ;;  %768 = vst.msk [vmem:[#allocation2 + $0xb8] sm:$0xff] %vm744_vm0, %v726_v25 }
 0x18f   : > { %v11727_v3 = vpop.permute.xlu0 %1089  ;;  %v2245_v31 = vsel %vm2241_vm6, %v2208_v53, %v11725_v2  ;;  %v911_v2 = vld [vmem:[#allocation2 + $0x7b] sm:$0xff] }
 0x190   : > { %1895 = vrot.lane.b32.xlu1 %v981_v63, %s11170_s0  ;;  %v984_v63 = vld [vmem:[#allocation2 + $0x7d] sm:$0xff] }
 0x191   : > { %1753 = vrot.lane.b32.xlu0 %v945_v0, %s11169_s21 }
 0x192   : > { %v2026_v10 = vpop.permute.xlu1 %2025 }
 0x193   : > { %v1629_v11 = vpop.permute.xlu0 %1628  ;;  %v2391_v12 = vsel %vm2389_vm10, %v2354_v9, %v2026_v10  ;;  %v728_v10 = vld [vmem:[%s11538_s7 + $0xc8] sm:$0xff] }
 0x194   : > { %1500 = vrot.lane.b32.xlu1 %v908_v7, %s11167_s28  ;;  %9511 = vmatmul.mubr.msk.f32.vlgmr.msra.gmra.mrb[0].mxu0 %vm2437_vm11, %v2391_v12  ;;  %v2281_v22 = vsel %vm2278_vm7, %v2244_v41, %v1629_v11  ;;  %v1020_v7 = vld [vmem:[#allocation2 + $0x7e] sm:$0xff]  ;;  %770 = vst.msk [vmem:[#allocation2 + $0xc8] sm:$0xff] %vm744_vm0, %v728_v10 }
 0x195   : > { %1358 = vrot.lane.b32.xlu0 %v872_v8, %s11166_s3  ;;  %v791_v11 = vld [vmem:[#allocation2 + $0x20] sm:$0xff] }
 0x196   : > { %v11740_v15 = vpop.permute.xlu1 %1233  ;;  %v838_v12 = vld [vmem:[#allocation2 + $0x79] sm:$0xff]  ;;  %v985_v41 = vld [vmem:[#allocation2 + $0x85] sm:$0xff] }
 0x197   : > { %v11742_v16 = vpop.permute.xlu0 %1091 }
 0x198   : > { %2039 = vrot.lane.b32.xlu1 %v1017_v13, %s11172_s20 }
 0x199   : > { %1897 = vrot.lane.b32.xlu0 %v982_v14, %s11170_s0 }
 0x19a   : > { %v1740_v19 = vpop.permute.xlu1 %1739 }
 0x19b   : > { %v1631_v20 = vpop.permute.xlu0 %1630  ;;  %v2318_v30 = vsel %vm2315_vm8, %v2281_v22, %v1740_v19  ;;  %v948_v19 = vld [vmem:[#allocation2 + $0x84] sm:$0xff]  ;;  %v949_v22 = vld [vmem:[#allocation2 + $0x8c] sm:$0xff] }
 0x19c   : > { %1502 = vrot.lane.b32.xlu1 %v909_v17, %s11167_s28  ;;  %v2135_v17 = vsel %vm744_vm0, %v791_v11, %v11727_v3 }
 0x19d   : > { %1105 = vrot.lane.b32.xlu0 %v835_v18, %s11165_s18  ;;  %v2172_v18 = vsel %vm2167_vm4, %v2135_v17, %v11740_v15 }
 0x19e   : > { %v11748_v23 = vpop.permute.xlu1 %1344 }
 0x19f   : > { %v11750_v24 = vpop.permute.xlu0 %1235 }
 0x1a0   : > { %2041 = vrot.lane.b32.xlu1 %v1018_v21, %s11172_s20 }
 0x1a1   : > { %1644 = vrot.lane.b32.xlu0 %v944_v47, %s11168_s23 }
 0x1a2   : > { %v1884_v28 = vpop.permute.xlu1 %1883 }
 0x1a3   : > { %v1742_v29 = vpop.permute.xlu0 %1741  ;;  %v2355_v38 = vsel %vm2352_vm9, %v2318_v30, %v1884_v28  ;;  %v792_v28 = vld [vmem:[#allocation2 + $0x28] sm:$0xff] }
 0x1a4   : > { %1249 = vrot.lane.b32.xlu1 %v871_v56, %s11164_s12  ;;  %v2282_v56 = vsel %vm2278_vm7, %v2245_v31, %v1631_v20  ;;  %v2209_v20 = vsel %vm2204_vm5, %v2172_v18, %v11748_v23  ;;  %v2136_v35 = vsel %vm744_vm0, %v792_v28, %v11742_v16  ;;  %v839_v31 = vld [vmem:[#allocation2 + $0x81] sm:$0xff] }
 0x1a5   : > { %1107 = vrot.lane.b32.xlu0 %v836_v27, %s11165_s18  ;;  %v2319_v39 = vsel %vm2315_vm8, %v2282_v56, %v1742_v29  ;;  %v729_v27 = vld [vmem:[%s11538_s7 + $0xd0] sm:$0xff]  ;;  %v875_v29 = vld [vmem:[#allocation2 + $0x82] sm:$0xff] }
 0x1a6   : > { %v11764_v36 = vpop.permute.xlu1 %1488  ;;  %771 = vst.msk [vmem:[#allocation2 + $0xd0] sm:$0xff] %vm744_vm0, %v729_v27 }
 0x1a7   : > { %v11766_v40 = vpop.permute.xlu0 %1346  ;;  %v2246_v26 = vsel %vm2241_vm6, %v2209_v20, %v11764_v36  ;;  %v2173_v36 = vsel %vm2167_vm4, %v2136_v35, %v11750_v24 }
 0x1a8   : > { %1755 = vrot.lane.b32.xlu1 %v946_v34, %s11169_s21  ;;  %v2210_v42 = vsel %vm2204_vm5, %v2173_v36, %v11766_v40 }
 0x1a9   : > { %1646 = vrot.lane.b32.xlu0 %v945_v0, %s11168_s23 }
 0x1aa   : > { %v2028_v45 = vpop.permute.xlu1 %2027 }
 0x1ab   : > { %v1886_v46 = vpop.permute.xlu0 %1885  ;;  %v2392_v47 = vsel %vm2389_vm10, %v2355_v38, %v2028_v45  ;;  %v912_v38 = vld [vmem:[#allocation2 + $0x83] sm:$0xff] }
 0x1ac   : > { %1360 = vrot.lane.b32.xlu1 %v873_v44, %s11166_s3  ;;  %9513 = vmatprep.mubr.msk.f32.mxu0 %vm2437_vm11, %v2392_v47  ;;  %v2356_v59 = vsel %vm2352_vm9, %v2319_v39, %v1886_v46  ;;  %v876_v45 = vld [vmem:[#allocation2 + $0x8a] sm:$0xff] }
 0x1ad   : > { %1251 = vrot.lane.b32.xlu0 %v872_v8, %s11164_s12 }
 0x1ae   : > { %v11787_v54 = vpop.permute.xlu1 %1490 }
 0x1af   : > { %v11789_v55 = vpop.permute.xlu0 %1093  ;;  %v2247_v16 = vsel %vm2241_vm6, %v2210_v42, %v11787_v54  ;;  %v913_v54 = vld [vmem:[#allocation2 + $0x8b] sm:$0xff] }
 0x1b0   : > { %1899 = vrot.lane.b32.xlu1 %v983_v51, %s11170_s0  ;;  %v986_v51 = vld [vmem:[#allocation2 + $0x8d] sm:$0xff] }
 0x1b1   : > { %1757 = vrot.lane.b32.xlu0 %v947_v52, %s11169_s21 }
 0x1b2   : > { %v2030_v50 = vpop.permute.xlu1 %2029 }
 0x1b3   : > { %v1633_v60 = vpop.permute.xlu0 %1632  ;;  %v2393_v61 = vsel %vm2389_vm10, %v2356_v59, %v2030_v50  ;;  %v730_v50 = vld [vmem:[%s11538_s7 + $0xd8] sm:$0xff] }
 0x1b4   : > { %1504 = vrot.lane.b32.xlu1 %v910_v57, %s11167_s28  ;;  %9514 = vmatmul.mubr.msk.f32.gmra.mrb[2].mxu0 %vm2437_vm11, %v2393_v61  ;;  %v2283_v3 = vsel %vm2278_vm7, %v2246_v26, %v1633_v60  ;;  %v1022_v57 = vld [vmem:[#allocation2 + $0x8e] sm:$0xff]  ;;  %772 = vst.msk [vmem:[#allocation2 + $0xd8] sm:$0xff] %vm744_vm0, %v730_v50 }
 0x1b5   : > { %1362 = vrot.lane.b32.xlu0 %v874_v58, %s11166_s3  ;;  %v793_v60 = vld [vmem:[#allocation2 + $0x30] sm:$0xff] }
 0x1b6   : > { %v11802_v0 = vpop.permute.xlu1 %1237  ;;  %v840_v61 = vld [vmem:[#allocation2 + $0x89] sm:$0xff]  ;;  %v987_v26 = vld [vmem:[#allocation2 + $0x95] sm:$0xff] }
 0x1b7   : > { %v11804_v1 = vpop.permute.xlu0 %1095 }
 0x1b8   : > { %2043 = vrot.lane.b32.xlu1 %v1019_v62, %s11172_s20 }
 0x1b9   : > { %1901 = vrot.lane.b32.xlu0 %v984_v63, %s11170_s0 }
 0x1ba   : > { %v1744_v5 = vpop.permute.xlu1 %1743 }
 0x1bb   : > { %v1635_v6 = vpop.permute.xlu0 %1634  ;;  %v2320_v15 = vsel %vm2315_vm8, %v2283_v3, %v1744_v5  ;;  %v950_v5 = vld [vmem:[#allocation2 + $0x94] sm:$0xff]  ;;  %v951_v3 = vld [vmem:[#allocation2 + $0x9c] sm:$0xff] }
 0x1bc   : > { %1506 = vrot.lane.b32.xlu1 %v911_v2, %s11167_s28  ;;  %v2137_v2 = vsel %vm744_vm0, %v793_v60, %v11789_v55 }
 0x1bd   : > { %1109 = vrot.lane.b32.xlu0 %v837_v4, %s11165_s18  ;;  %v2174_v4 = vsel %vm2167_vm4, %v2137_v2, %v11802_v0  ;;  %v879_v2 = vld [vmem:[#allocation2 + $0xa2] sm:$0xff] }
 0x1be   : > { %v11810_v8 = vpop.permute.xlu1 %1348 }
 0x1bf   : > { %v11812_v9 = vpop.permute.xlu0 %1239 }
 0x1c0   : > { %2045 = vrot.lane.b32.xlu1 %v1020_v7, %s11172_s20 }
 0x1c1   : > { %1648 = vrot.lane.b32.xlu0 %v946_v34, %s11168_s23 }
 0x1c2   : > { %v1888_v13 = vpop.permute.xlu1 %1887 }
 0x1c3   : > { %v1746_v14 = vpop.permute.xlu0 %1745  ;;  %v2357_v23 = vsel %vm2352_vm9, %v2320_v15, %v1888_v13  ;;  %v794_v13 = vld [vmem:[#allocation2 + $0x38] sm:$0xff] }
 0x1c4   : > { %1253 = vrot.lane.b32.xlu1 %v873_v44, %s11164_s12  ;;  %v2284_v44 = vsel %vm2278_vm7, %v2247_v16, %v1635_v6  ;;  %v2211_v6 = vsel %vm2204_vm5, %v2174_v4, %v11810_v8  ;;  %v2138_v20 = vsel %vm744_vm0, %v794_v13, %v11804_v1  ;;  %v915_v16 = vld [vmem:[#allocation2 + $0x9b] sm:$0xff] }
 0x1c5   : > { %1111 = vrot.lane.b32.xlu0 %v838_v12, %s11165_s18  ;;  %v2321_v24 = vsel %vm2315_vm8, %v2284_v44, %v1746_v14  ;;  %v731_v12 = vld [vmem:[%s11538_s7 + $0xe0] sm:$0xff]  ;;  %v877_v14 = vld [vmem:[#allocation2 + $0x92] sm:$0xff] }
 0x1c6   : > { %v11826_v21 = vpop.permute.xlu1 %1492  ;;  %773 = vst.msk [vmem:[#allocation2 + $0xe0] sm:$0xff] %vm744_vm0, %v731_v12  ;;  %v841_v44 = vld [vmem:[#allocation2 + $0x91] sm:$0xff] }
 0x1c7   : > { %v11828_v25 = vpop.permute.xlu0 %1350  ;;  %v2248_v11 = vsel %vm2241_vm6, %v2211_v6, %v11826_v21  ;;  %v2175_v21 = vsel %vm2167_vm4, %v2138_v20, %v11812_v9  ;;  %v953_v12 = vld [vmem:[#allocation2 + $0xac] sm:$0xff] }
 0x1c8   : > { %1759 = vrot.lane.b32.xlu1 %v948_v19, %s11169_s21  ;;  %v2212_v27 = vsel %vm2204_vm5, %v2175_v21, %v11828_v25  ;;  %v878_v25 = vld [vmem:[#allocation2 + $0x9a] sm:$0xff] }
 0x1c9   : > { %1650 = vrot.lane.b32.xlu0 %v947_v52, %s11168_s23 }
 0x1ca   : > { %v2032_v32 = vpop.permute.xlu1 %2031 }
 0x1cb   : > { %v1890_v33 = vpop.permute.xlu0 %1889  ;;  %v2394_v34 = vsel %vm2389_vm10, %v2357_v23, %v2032_v32  ;;  %v914_v32 = vld [vmem:[#allocation2 + $0x93] sm:$0xff] }
 0x1cc   : > { %1364 = vrot.lane.b32.xlu1 %v875_v29, %s11166_s3  ;;  %9516 = vmatprep.mubr.msk.f32.mxu0 %vm2437_vm11, %v2394_v34  ;;  %v2358_v46 = vsel %vm2352_vm9, %v2321_v24, %v1890_v33 }
 0x1cd   : > { %1255 = vrot.lane.b32.xlu0 %v874_v58, %s11164_s12 }
 0x1ce   : > { %v11849_v43 = vpop.permute.xlu1 %1494 }
 0x1cf   : > { %v11851_v30 = vpop.permute.xlu0 %1097  ;;  %v2249_v1 = vsel %vm2241_vm6, %v2212_v27, %v11849_v43 }
 0x1d0   : > { %1903 = vrot.lane.b32.xlu1 %v985_v41, %s11170_s0  ;;  %v1023_v41 = vld [vmem:[#allocation2 + $0x96] sm:$0xff] }
 0x1d1   : > { %1761 = vrot.lane.b32.xlu0 %v949_v22, %s11169_s21 }
 0x1d2   : > { %v2034_v40 = vpop.permute.xlu1 %2033 }
 0x1d3   : > { %v1637_v47 = vpop.permute.xlu0 %1636  ;;  %v2395_v48 = vsel %vm2389_vm10, %v2358_v46, %v2034_v40 }
 0x1d4   : > { %1508 = vrot.lane.b32.xlu1 %v912_v38, %s11167_s28  ;;  %9517 = vmatmul.mubr.msk.f32.gmra.mrb[4].mxu0 %vm2437_vm11, %v2395_v48  ;;  %v2285_v55 = vsel %vm2278_vm7, %v2248_v11, %v1637_v47  ;;  %v732_v47 = vld [vmem:[%s11538_s7 + $0xe8] sm:$0xff]  ;;  %v795_v48 = vld [vmem:[#allocation2 + $0x40] sm:$0xff] }
 0x1d5   : > { %1366 = vrot.lane.b32.xlu0 %v876_v45, %s11166_s3  ;;  %774 = vst.msk [vmem:[#allocation2 + $0xe8] sm:$0xff] %vm744_vm0, %v732_v47 }
 0x1d6   : > { %v11864_v52 = vpop.permute.xlu1 %1241 }
 0x1d7   : > { %v11866_v53 = vpop.permute.xlu0 %1099 }
 0x1d8   : > { %2047 = vrot.lane.b32.xlu1 %v1021_v49, %s11172_s20  ;;  %v842_v49 = vld [vmem:[#allocation2 + $0x99] sm:$0xff] }
 0x1d9   : > { %1905 = vrot.lane.b32.xlu0 %v986_v51, %s11170_s0 }
 0x1da   : > { %v1748_v56 = vpop.permute.xlu1 %1747 }
 0x1db   : > { %v1639_v39 = vpop.permute.xlu0 %1638  ;;  %v2322_v0 = vsel %vm2315_vm8, %v2285_v55, %v1748_v56  ;;  %v989_v55 = vld [vmem:[#allocation2 + $0xa5] sm:$0xff] }
 0x1dc   : > { %1510 = vrot.lane.b32.xlu1 %v913_v54, %s11167_s28  ;;  %v2286_v23 = vsel %vm2278_vm7, %v2249_v1, %v1639_v39  ;;  %v952_v39 = vld [vmem:[#allocation2 + $0xa4] sm:$0xff] }
 0x1dd   : > { %1113 = vrot.lane.b32.xlu0 %v839_v31, %s11165_s18  ;;  %v2139_v31 = vsel %vm744_vm0, %v795_v48, %v11851_v30  ;;  %v917_v1 = vld [vmem:[#allocation2 + $0xab] sm:$0xff] }
 0x1de   : > { %v11872_v58 = vpop.permute.xlu1 %1352  ;;  %v2176_v56 = vsel %vm2167_vm4, %v2139_v31, %v11864_v52  ;;  %v881_v31 = vld [vmem:[#allocation2 + $0xb2] sm:$0xff] }
 0x1df   : > { %v11874_v59 = vpop.permute.xlu0 %1243 }
 0x1e0   : > { %2049 = vrot.lane.b32.xlu1 %v1022_v57, %s11172_s20  ;;  %v2213_v57 = vsel %vm2204_vm5, %v2176_v56, %v11872_v58 }
 0x1e1   : > { %1652 = vrot.lane.b32.xlu0 %v948_v19, %s11168_s23 }
 0x1e2   : > { %v1892_v62 = vpop.permute.xlu1 %1891 }
 0x1e3   : > { %v1750_v63 = vpop.permute.xlu0 %1749  ;;  %v2359_v8 = vsel %vm2352_vm9, %v2322_v0, %v1892_v62  ;;  %v733_v62 = vld [vmem:[%s11538_s7 + $0xf0] sm:$0xff] }
 0x1e4   : > { %1257 = vrot.lane.b32.xlu1 %v875_v29, %s11164_s12  ;;  %v11173_v29 = vmov 0.0|0.0   ;;  %v2323_v9 = vsel %vm2315_vm8, %v2286_v23, %v1750_v63  ;;  %v796_v63 = vld [vmem:[#allocation2 + $0x48] sm:$0xff]  ;;  %775 = vst.msk [vmem:[#allocation2 + $0xf0] sm:$0xff] %vm744_vm0, %v733_v62  ;;  %v955_v62 = vld [vmem:[#allocation2 + $0xbc] sm:$0xff] }
 0x1e5   : > { %1115 = vrot.lane.b32.xlu0 %v840_v61, %s11165_s18  ;;  %9974 = vmatprep.subr.bf16.mxu1 %v11173_v29  ;;  %v843_v23 = vld [vmem:[#allocation2 + $0xa1] sm:$0xff] }
 0x1e6   : > { %v11888_v7 = vpop.permute.xlu1 %1496 }
 0x1e7   : > { %v11890_v10 = vpop.permute.xlu0 %1354  ;;  %v2250_v61 = vsel %vm2241_vm6, %v2213_v57, %v11888_v7  ;;  %v2140_v7 = vsel %vm744_vm0, %v796_v63, %v11866_v53 }
 0x1e8   : > { %1763 = vrot.lane.b32.xlu1 %v950_v5, %s11169_s21  ;;  %v2177_v11 = vsel %vm2167_vm4, %v2140_v7, %v11874_v59 }
 0x1e9   : > { %1654 = vrot.lane.b32.xlu0 %v949_v22, %s11168_s23  ;;  %v988_v22 = vld [vmem:[#allocation2 + $0x9d] sm:$0xff]  ;;  %v2214_v13 = vsel %vm2204_vm5, %v2177_v11, %v11890_v10 }
 0x1ea   : > { %v2036_v17 = vpop.permute.xlu1 %2035 }
 0x1eb   : > { %v1894_v18 = vpop.permute.xlu0 %1893  ;;  %v2396_v19 = vsel %vm2389_vm10, %v2359_v8, %v2036_v17  ;;  %v916_v17 = vld [vmem:[#allocation2 + $0xa3] sm:$0xff] }
 0x1ec   : > { %1368 = vrot.lane.b32.xlu1 %v877_v14, %s11166_s3  ;;  %9519 = vmatprep.mubr.msk.f32.mxu0 %vm2437_vm11, %v2396_v19  ;;  %v2360_v33 = vsel %vm2352_vm9, %v2323_v9, %v1894_v18  ;;  %v880_v18 = vld [vmem:[#allocation2 + $0xaa] sm:$0xff] }
 0x1ed   : > { %1259 = vrot.lane.b32.xlu0 %v876_v45, %s11164_s12  ;;  %v1024_v45 = vld [vmem:[#allocation2 + $0x9e] sm:$0xff] }
 0x1ee   : > { %v11911_v28 = vpop.permute.xlu1 %1498 }
 0x1ef   : > { %v11913_v15 = vpop.permute.xlu0 %1101  ;;  %v2251_v53 = vsel %vm2241_vm6, %v2214_v13, %v11911_v28 }
 0x1f0   : > { %1907 = vrot.lane.b32.xlu1 %v987_v26, %s11170_s0  ;;  %v1025_v26 = vld [vmem:[#allocation2 + $0xa6] sm:$0xff] }
 0x1f1   : > { %1765 = vrot.lane.b32.xlu0 %v951_v3, %s11169_s21 }
 0x1f2   : > { %v2038_v34 = vpop.permute.xlu1 %2037 }
 0x1f3   : > { %v1641_v35 = vpop.permute.xlu0 %1640  ;;  %v2397_v36 = vsel %vm2389_vm10, %v2360_v33, %v2038_v34 }
 0x1f4   : > { %1512 = vrot.lane.b32.xlu1 %v914_v32, %s11167_s28  ;;  %9520 = vmatmul.mubr.msk.f32.gmra.mrb[6].mxu0 %vm2437_vm11, %v2397_v36  ;;  %v2287_v30 = vsel %vm2278_vm7, %v2250_v61, %v1641_v35  ;;  %v734_v35 = vld [vmem:[%s11538_s7 + $0xf8] sm:$0xff]  ;;  %v797_v36 = vld [vmem:[#allocation2 + $0x50] sm:$0xff] }
 0x1f5   : > { %1370 = vrot.lane.b32.xlu0 %v878_v25, %s11166_s3  ;;  %776 = vst.msk [vmem:[#allocation2 + $0xf8] sm:$0xff] %vm744_vm0, %v734_v35 }
 0x1f6   : > { %v11927_v42 = vpop.permute.xlu1 %1245 }
 0x1f7   : > { %v11929_v43 = vpop.permute.xlu0 %1103 }
 0x1f8   : > { %2051 = vrot.lane.b32.xlu1 %v1023_v41, %s11172_s20  ;;  %v844_v41 = vld [vmem:[#allocation2 + $0xa9] sm:$0xff] }
 0x1f9   : > { %1909 = vrot.lane.b32.xlu0 %v988_v22, %s11170_s0 }
 0x1fa   : > { %v1752_v24 = vpop.permute.xlu1 %1751 }
 0x1fb   : > { %v1643_v38 = vpop.permute.xlu0 %1642  ;;  %v2324_v52 = vsel %vm2315_vm8, %v2287_v30, %v1752_v24  ;;  %v991_v30 = vld [vmem:[#allocation2 + $0xb5] sm:$0xff] }
 0x1fc   : > { %1514 = vrot.lane.b32.xlu1 %v915_v16, %s11167_s28  ;;  %v2288_v8 = vsel %vm2278_vm7, %v2251_v53, %v1643_v38  ;;  %v954_v38 = vld [vmem:[#allocation2 + $0xb4] sm:$0xff] }
 0x1fd   : > { %1117 = vrot.lane.b32.xlu0 %v841_v44, %s11165_s18  ;;  %v2141_v44 = vsel %vm744_vm0, %v797_v36, %v11913_v15  ;;  %v919_v53 = vld [vmem:[#allocation2 + $0xbb] sm:$0xff] }
 0x1fe   : > { %v11935_v46 = vpop.permute.xlu1 %1356  ;;  %v2178_v24 = vsel %vm2167_vm4, %v2141_v44, %v11927_v42  ;;  %v883_v44 = vld [vmem:[#allocation2 + $0xc2] sm:$0xff] }
 0x1ff   : > { %v11937_v40 = vpop.permute.xlu0 %1247 }
 0x200   : > { %2053 = vrot.lane.b32.xlu1 %v1024_v45, %s11172_s20  ;;  %v2215_v45 = vsel %vm2204_vm5, %v2178_v24, %v11935_v46 }
 0x201   : > { %1656 = vrot.lane.b32.xlu0 %v950_v5, %s11168_s23 }
 0x202   : > { %v1896_v51 = vpop.permute.xlu1 %1895 }
 0x203   : > { %v1754_v54 = vpop.permute.xlu0 %1753  ;;  %v2361_v58 = vsel %vm2352_vm9, %v2324_v52, %v1896_v51  ;;  %v735_v51 = vld [vmem:[%s11538_s7 + $0x100] sm:$0xff] }
 0x204   : > { %1261 = vrot.lane.b32.xlu1 %v877_v14, %s11164_s12  ;;  %v2325_v59 = vsel %vm2315_vm8, %v2288_v8, %v1754_v54  ;;  %v798_v54 = vld [vmem:[#allocation2 + $0x58] sm:$0xff]  ;;  %777 = vst.msk [vmem:[#allocation2 + $0x100] sm:$0xff] %vm744_vm0, %v735_v51  ;;  %v957_v51 = vld [vmem:[#allocation2 + $0xcc] sm:$0xff] }
 0x205   : > { %1119 = vrot.lane.b32.xlu0 %v842_v49, %s11165_s18  ;;  %v845_v8 = vld [vmem:[#allocation2 + $0xb1] sm:$0xff] }
 0x206   : > { %v11951_v50 = vpop.permute.xlu1 %1500 }
 0x207   : > { %v11953_v60 = vpop.permute.xlu0 %1358  ;;  %v2252_v49 = vsel %vm2241_vm6, %v2215_v45, %v11951_v50  ;;  %v2142_v50 = vsel %vm744_vm0, %v798_v54, %v11929_v43 }
 0x208   : > { %1767 = vrot.lane.b32.xlu1 %v952_v39, %s11169_s21  ;;  %v2179_v61 = vsel %vm2167_vm4, %v2142_v50, %v11937_v40 }
 0x209   : > { %1658 = vrot.lane.b32.xlu0 %v951_v3, %s11168_s23  ;;  %v990_v3 = vld [vmem:[#allocation2 + $0xad] sm:$0xff]  ;;  %v2216_v63 = vsel %vm2204_vm5, %v2179_v61, %v11953_v60 }
 0x20a   : > { %v2040_v4 = vpop.permute.xlu1 %2039 }
 0x20b   : > { %v1898_v5 = vpop.permute.xlu0 %1897  ;;  %v2398_v6 = vsel %vm2389_vm10, %v2361_v58, %v2040_v4  ;;  %v918_v4 = vld [vmem:[#allocation2 + $0xb3] sm:$0xff] }
 0x20c   : > { %1372 = vrot.lane.b32.xlu1 %v879_v2, %s11166_s3  ;;  %9522 = vmatprep.mubr.msk.f32.mxu0 %vm2437_vm11, %v2398_v6  ;;  %v2362_v19 = vsel %vm2352_vm9, %v2325_v59, %v1898_v5  ;;  %v882_v5 = vld [vmem:[#allocation2 + $0xba] sm:$0xff] }
 0x20d   : > { %1263 = vrot.lane.b32.xlu0 %v878_v25, %s11164_s12  ;;  %v1026_v25 = vld [vmem:[#allocation2 + $0xae] sm:$0xff] }
 0x20e   : > { %v11974_v0 = vpop.permute.xlu1 %1502 }
 0x20f   : > { %v11976_v14 = vpop.permute.xlu0 %1105  ;;  %v2253_v43 = vsel %vm2241_vm6, %v2216_v63, %v11974_v0 }
 0x210   : > { %1911 = vrot.lane.b32.xlu1 %v989_v55, %s11170_s0  ;;  %v1027_v55 = vld [vmem:[#allocation2 + $0xb6] sm:$0xff] }
 0x211   : > { %1769 = vrot.lane.b32.xlu0 %v953_v12, %s11169_s21 }
 0x212   : > { %v2042_v10 = vpop.permute.xlu1 %2041 }
 0x213   : > { %v1645_v20 = vpop.permute.xlu0 %1644  ;;  %v2399_v21 = vsel %vm2389_vm10, %v2362_v19, %v2042_v10 }
 0x214   : > { %1516 = vrot.lane.b32.xlu1 %v916_v17, %s11167_s28  ;;  %9523 = vmatmul.mubr.msk.f32.gmra.mrb[8].mxu0 %vm2437_vm11, %v2399_v21  ;;  %v2289_v15 = vsel %vm2278_vm7, %v2252_v49, %v1645_v20  ;;  %v736_v20 = vld [vmem:[%s11538_s7 + $0x108] sm:$0xff]  ;;  %v799_v21 = vld [vmem:[#allocation2 + $0x60] sm:$0xff] }
 0x215   : > { %1374 = vrot.lane.b32.xlu0 %v880_v18, %s11166_s3  ;;  %778 = vst.msk [vmem:[#allocation2 + $0x108] sm:$0xff] %vm744_vm0, %v736_v20 }
 0x216   : > { %v11989_v27 = vpop.permute.xlu1 %1249 }
 0x217   : > { %v11991_v28 = vpop.permute.xlu0 %1107 }
 0x218   : > { %2055 = vrot.lane.b32.xlu1 %v1025_v26, %s11172_s20  ;;  %v846_v26 = vld [vmem:[#allocation2 + $0xb9] sm:$0xff] }
 0x219   : > { %1913 = vrot.lane.b32.xlu0 %v990_v3, %s11170_s0 }
 0x21a   : > { %v1756_v9 = vpop.permute.xlu1 %1755 }
 0x21b   : > { %v1647_v32 = vpop.permute.xlu0 %1646  ;;  %v2326_v42 = vsel %vm2315_vm8, %v2289_v15, %v1756_v9  ;;  %v993_v15 = vld [vmem:[#allocation2 + $0xc5] sm:$0xff] }
 0x21c   : > { %1518 = vrot.lane.b32.xlu1 %v917_v1, %s11167_s28  ;;  %v2290_v58 = vsel %vm2278_vm7, %v2253_v43, %v1647_v32  ;;  %v956_v32 = vld [vmem:[#allocation2 + $0xc4] sm:$0xff] }
 0x21d   : > { %1121 = vrot.lane.b32.xlu0 %v843_v23, %s11165_s18  ;;  %v2143_v23 = vsel %vm744_vm0, %v799_v21, %v11976_v14  ;;  %v921_v43 = vld [vmem:[#allocation2 + $0xcb] sm:$0xff] }
 0x21e   : > { %v11997_v33 = vpop.permute.xlu1 %1360  ;;  %v2180_v9 = vsel %vm2167_vm4, %v2143_v23, %v11989_v27 }
 0x21f   : > { %v11999_v34 = vpop.permute.xlu0 %1251 }
 0x220   : > { %2057 = vrot.lane.b32.xlu1 %v1026_v25, %s11172_s20  ;;  %v2217_v25 = vsel %vm2204_vm5, %v2180_v9, %v11997_v33 }
 0x221   : > { %1660 = vrot.lane.b32.xlu0 %v952_v39, %s11168_s23 }
 0x222   : > { %v1900_v22 = vpop.permute.xlu1 %1899 }
 0x223   : > { %v1758_v16 = vpop.permute.xlu0 %1757  ;;  %v2363_v46 = vsel %vm2352_vm9, %v2326_v42, %v1900_v22  ;;  %v737_v22 = vld [vmem:[%s11538_s7 + $0x110] sm:$0xff] }
 0x224   : > { %1265 = vrot.lane.b32.xlu1 %v879_v2, %s11164_s12  ;;  %v2327_v40 = vsel %vm2315_vm8, %v2290_v58, %v1758_v16  ;;  %v800_v16 = vld [vmem:[#allocation2 + $0x68] sm:$0xff]  ;;  %779 = vst.msk [vmem:[#allocation2 + $0x110] sm:$0xff] %vm744_vm0, %v737_v22 }
 0x225   : > { %1123 = vrot.lane.b32.xlu0 %v844_v41, %s11165_s18  ;;  %v847_v58 = vld [vmem:[#allocation2 + $0xc1] sm:$0xff] }
 0x226   : > { %v12013_v47 = vpop.permute.xlu1 %1504 }
 0x227   : > { %v12015_v48 = vpop.permute.xlu0 %1362  ;;  %v2254_v41 = vsel %vm2241_vm6, %v2217_v25, %v12013_v47  ;;  %v2144_v47 = vsel %vm744_vm0, %v800_v16, %v11991_v28  ;;  %v885_v25 = vld [vmem:[#allocation2 + $0xd2] sm:$0xff] }
 0x228   : > { %1771 = vrot.lane.b32.xlu1 %v954_v38, %s11169_s21  ;;  %v2181_v49 = vsel %vm2167_vm4, %v2144_v47, %v11999_v34 }
 0x229   : > { %1662 = vrot.lane.b32.xlu0 %v953_v12, %s11168_s23  ;;  %v992_v12 = vld [vmem:[#allocation2 + $0xbd] sm:$0xff]  ;;  %v2218_v54 = vsel %vm2204_vm5, %v2181_v49, %v12015_v48 }
 0x22a   : > { %v2044_v56 = vpop.permute.xlu1 %2043 }
 0x22b   : > { %v1902_v39 = vpop.permute.xlu0 %1901  ;;  %v2400_v57 = vsel %vm2389_vm10, %v2363_v46, %v2044_v56  ;;  %v920_v56 = vld [vmem:[#allocation2 + $0xc3] sm:$0xff] }
 0x22c   : > { %1376 = vrot.lane.b32.xlu1 %v881_v31, %s11166_s3  ;;  %9525 = vmatprep.mubr.msk.f32.mxu0 %vm2437_vm11, %v2400_v57  ;;  %v2364_v6 = vsel %vm2352_vm9, %v2327_v40, %v1902_v39  ;;  %v884_v39 = vld [vmem:[#allocation2 + $0xca] sm:$0xff] }
 0x22d   : > { %1267 = vrot.lane.b32.xlu0 %v880_v18, %s11164_s12  ;;  %v1028_v18 = vld [vmem:[#allocation2 + $0xbe] sm:$0xff] }
 0x22e   : > { %v12036_v52 = vpop.permute.xlu1 %1506 }
 0x22f   : > { %v12038_v2 = vpop.permute.xlu0 %1109  ;;  %v2255_v28 = vsel %vm2241_vm6, %v2218_v54, %v12036_v52 }
 0x230   : > { %1915 = vrot.lane.b32.xlu1 %v991_v30, %s11170_s0  ;;  %v1029_v30 = vld [vmem:[#allocation2 + $0xc6] sm:$0xff] }
 0x231   : > { %1773 = vrot.lane.b32.xlu0 %v955_v62, %s11169_s21 }
 0x232   : > { %v2046_v60 = vpop.permute.xlu1 %2045 }
 0x233   : > { %v1649_v7 = vpop.permute.xlu0 %1648  ;;  %v2401_v11 = vsel %vm2389_vm10, %v2364_v6, %v2046_v60  ;;  %v739_v6 = vld [vmem:[%s11538_s7 + $0x120] sm:$0xff]  ;;  %v1030_v60 = vld [vmem:[#allocation2 + $0xce] sm:$0xff] }
 0x234   : > { %1520 = vrot.lane.b32.xlu1 %v918_v4, %s11167_s28  ;;  %9526 = vmatmul.mubr.msk.f32.gmra.mrb[10].mxu0 %vm2437_vm11, %v2401_v11  ;;  %v2291_v14 = vsel %vm2278_vm7, %v2254_v41, %v1649_v7  ;;  %781 = vst.msk [vmem:[#allocation2 + $0x120] sm:$0xff] %vm744_vm0, %v739_v6 }
 0x235   : > { %1378 = vrot.lane.b32.xlu0 %v882_v5, %s11166_s3 }
 0x236   : > { %v12051_v13 = vpop.permute.xlu1 %1253 }
 0x237   : > { %v12053_v0 = vpop.permute.xlu0 %1111 }
 0x238   : > { %2059 = vrot.lane.b32.xlu1 %v1027_v55, %s11172_s20  ;;  %v801_v55 = vld [vmem:[#allocation2 + $0x70] sm:$0xff] }
 0x239   : > { %1917 = vrot.lane.b32.xlu0 %v992_v12, %s11170_s0  ;;  %v848_v12 = vld [vmem:[#allocation2 + $0xc9] sm:$0xff] }
 0x23a   : > { %v1760_v59 = vpop.permute.xlu1 %1759 }
 0x23b   : > { %v1651_v17 = vpop.permute.xlu0 %1650  ;;  %v2328_v27 = vsel %vm2315_vm8, %v2291_v14, %v1760_v59  ;;  %v2145_v59 = vsel %vm744_vm0, %v801_v55, %v12038_v2  ;;  %v12148_v2 = vld [vmem:[%s15135_s24] ss:$0 sm:$0xff] }
 0x23c   : > { %1522 = vrot.lane.b32.xlu1 %v919_v53, %s11167_s28  ;;  %v2292_v46 = vsel %vm2278_vm7, %v2255_v28, %v1651_v17  ;;  %v2182_v17 = vsel %vm2167_vm4, %v2145_v59, %v12051_v13  ;;  %v922_v28 = vld [vmem:[#allocation2 + $0xd3] sm:$0xff] }
 0x23d   : > { %1125 = vrot.lane.b32.xlu0 %v845_v8, %s11165_s18  ;;  %v850_v55 = vld [vmem:[#allocation2 + $0xd9] sm:$0xff] }
 0x23e   : > { %v12059_v19 = vpop.permute.xlu1 %1364 }
 0x23f   : > { %v12061_v10 = vpop.permute.xlu0 %1255  ;;  %v2219_v20 = vsel %vm2204_vm5, %v2182_v17, %v12059_v19  ;;  %v802_v19 = vld [vmem:[#allocation2 + $0x78] sm:$0xff] }
 0x240   : > { %2061 = vrot.lane.b32.xlu1 %v1028_v18, %s11172_s20  ;;  %v12137_v18 = vld [vmem:[#allocation2 + $0xd4] sm:$0xff] }
 0x241   : > { %1664 = vrot.lane.b32.xlu0 %v954_v38, %s11168_s23 }
 0x242   : > { %v1904_v3 = vpop.permute.xlu1 %1903 }
 0x243   : > { %v1762_v1 = vpop.permute.xlu0 %1761  ;;  %v2365_v33 = vsel %vm2352_vm9, %v2328_v27, %v1904_v3 }
 0x244   : > { %1269 = vrot.lane.b32.xlu1 %v881_v31, %s11164_s12  ;;  %v2329_v34 = vsel %vm2315_vm8, %v2292_v46, %v1762_v1 }
 0x245   : > { %1127 = vrot.lane.b32.xlu0 %v846_v26, %s11165_s18 }
 0x246   : > { %v12075_v35 = vpop.permute.xlu1 %1508 }
 0x247   : > { %v12077_v36 = vpop.permute.xlu0 %1366  ;;  %v2256_v3 = vsel %vm2241_vm6, %v2219_v20, %v12075_v35 }
 0x248   : > { %1775 = vrot.lane.b32.xlu1 %v956_v32, %s11169_s21 }
 0x249   : > { %1666 = vrot.lane.b32.xlu0 %v955_v62, %s11168_s23  ;;  %v994_v62 = vld [vmem:[#allocation2 + $0xcd] sm:$0xff] }
 0x24a   : > { %v2048_v24 = vpop.permute.xlu1 %2047 }
 0x24b   : > { %v1906_v38 = vpop.permute.xlu0 %1905  ;;  %v2402_v45 = vsel %vm2389_vm10, %v2365_v33, %v2048_v24 }
 0x24c   : > { %1380 = vrot.lane.b32.xlu1 %v883_v44, %s11166_s3  ;;  %9528 = vmatprep.mubr.msk.f32.mxu0 %vm2437_vm11, %v2402_v45  ;;  %v2366_v57 = vsel %vm2352_vm9, %v2329_v34, %v1906_v38  ;;  %v995_v38 = vld [vmem:[#allocation2 + $0xd5] sm:$0xff] }
 0x24d   : > { %1271 = vrot.lane.b32.xlu0 %v882_v5, %s11164_s12  ;;  %v738_v5 = vld [vmem:[%s11538_s7 + $0x118] sm:$0xff] }
 0x24e   : > { %v12098_v42 = vpop.permute.xlu1 %1510  ;;  %780 = vst.msk [vmem:[#allocation2 + $0x118] sm:$0xff] %vm744_vm0, %v738_v5  ;;  %v803_v5 = vld [vmem:[#allocation2 + $0x80] sm:$0xff] }
 0x24f   : > { %v12100_v31 = vpop.permute.xlu0 %1113 }
 0x250   : > { %1919 = vrot.lane.b32.xlu1 %v993_v15, %s11170_s0 }
 0x251   : > { %1777 = vrot.lane.b32.xlu0 %v957_v51, %s11169_s21 }
 0x252   : > { %v2050_v48 = vpop.permute.xlu1 %2049 }
 0x253   : > { %v1653_v50 = vpop.permute.xlu0 %1652  ;;  %v2403_v61 = vsel %vm2389_vm10, %v2366_v57, %v2050_v48 }
 0x254   : > { %1524 = vrot.lane.b32.xlu1 %v920_v56, %s11167_s28  ;;  %9529 = vmatmul.mubr.msk.f32.gmra.mrb[12].mxu0 %vm2437_vm11, %v2403_v61  ;;  %v2293_v1 = vsel %vm2278_vm7, %v2256_v3, %v1653_v50  ;;  %v886_v56 = vld [vmem:[#allocation2 + $0xda] sm:$0xff] }
 0x255   : > { %1382 = vrot.lane.b32.xlu0 %v884_v39, %s11166_s3  ;;  %v996_v50 = vld [vmem:[#allocation2 + $0xdd] sm:$0xff] }
 0x256   : > { %v12113_v63 = vpop.permute.xlu1 %1257  ;;  %v923_v61 = vld [vmem:[#allocation2 + $0xdb] sm:$0xff] }
 0x257   : > { %v12115_v52 = vpop.permute.xlu0 %1115 }
 0x258   : > { %2063 = vrot.lane.b32.xlu1 %v1029_v30, %s11172_s20 }
 0x259   : > { %1921 = vrot.lane.b32.xlu0 %v994_v62, %s11170_s0 }
 0x25a   : > { %v1764_v40 = vpop.permute.xlu1 %1763 }
 0x25b   : > { %v1655_v4 = vpop.permute.xlu0 %1654  ;;  %v2330_v23 = vsel %vm2315_vm8, %v2293_v1, %v1764_v40 }
 0x25c   : > { %1526 = vrot.lane.b32.xlu1 %v921_v43, %s11167_s28  ;;  %v849_v43 = vld [vmem:[#allocation2 + $0xd1] sm:$0xff] }
 0x25d   : > { %1129 = vrot.lane.b32.xlu0 %v847_v58, %s11165_s18  ;;  %v1032_v58 = vld [vmem:[#allocation2 + $0xde] sm:$0xff] }
 0x25e   : > { %v12125_v7 = vpop.permute.xlu1 %1368 }
 0x25f   : > { %v12127_v11 = vpop.permute.xlu0 %1259 }
 0x260   : > { %2065 = vrot.lane.b32.xlu1 %v1030_v60, %s11172_s20 }
 0x261   : > { %1668 = vrot.lane.b32.xlu0 %v956_v32, %s11168_s23 }
 0x262   : > { %v1908_v53 = vpop.permute.xlu1 %1907 }
 0x263   : > { %v1766_v8 = vpop.permute.xlu0 %1765  ;;  %v2367_v41 = vsel %vm2352_vm9, %v2330_v23, %v1908_v53 }
 0x264   : > { %1273 = vrot.lane.b32.xlu1 %v883_v44, %s11164_s12  ;;  %v2146_v44 = vsel %vm744_vm0, %v802_v19, %v12053_v0  ;;  %v959_v0 = vld [vmem:[#allocation2 + $0xdc] sm:$0xff] }
 0x265   : > { %1131 = vrot.lane.b32.xlu0 %v848_v12, %s11165_s18  ;;  %v2183_v24 = vsel %vm2167_vm4, %v2146_v44, %v12061_v10  ;;  %v2147_v12 = vsel %vm744_vm0, %v803_v5, %v12100_v31  ;;  %v887_v19 = vld [vmem:[#allocation2 + $0xe2] sm:$0xff] }
 0x266   : > { %v12141_v21 = vpop.permute.xlu1 %1512  ;;  %v2220_v45 = vsel %vm2204_vm5, %v2183_v24, %v12077_v36  ;;  %v2184_v53 = vsel %vm2167_vm4, %v2147_v12, %v12113_v63  ;;  %v804_v63 = vld [vmem:[#allocation2 + $0x88] sm:$0xff]  ;;  %v742_v12 = vld [vmem:[%s11538_s7 + $0x138] sm:$0xff] }
 0x267   : > { %v12143_v26 = vpop.permute.xlu0 %1370  ;;  %v9512_v13 = vpop.f32.mrb[0].mxu0  ;;  %v2221_v59 = vsel %vm2204_vm5, %v2184_v53, %v12125_v7  ;;  %v743_v53 = vld [vmem:[%s11538_s7 + $0x140] sm:$0xf]  ;;  %784 = vst.msk [vmem:[#allocation2 + $0x138] sm:$0xff] %vm744_vm0, %v742_v12  ;;  %v964_v12 = vld [vmem:[#allocation2 + $0x104] sm:$0xff] }
 0x268   : > { %1779 = vrot.lane.b32.xlu1 %v12137_v18, %s11169_s21  ;;  %v2622_v9 = vadd.f32 %v9512_v13, %v12148_v2  ;;  %v2616_v32 = vpop.f32.mrb[1].mxu0  ;;  %v2258_v20 = vsel %vm2241_vm6, %v2221_v59, %v12141_v21  ;;  %786 = vst.msk [vmem:[#allocation2 + $0x140] sm:$0xf] %vm785_vm12, %v743_v53  ;;  %vm5229_vm12 = vcmask 457728  }
 0x269   : > { %1670 = vrot.lane.b32.xlu0 %v957_v51, %s11168_s23  ;;  %v2617_v14 = vadd.f32 %v12148_v2, %v2616_v32  ;;  %v2257_v51 = vsel %vm2241_vm6, %v2220_v45, %v12098_v42  ;;  %v1031_v42 = vld [vmem:[#allocation2 + $0xd6] sm:$0xff] }
 0x26a   : > { %v2052_v35 = vpop.permute.xlu1 %2051  ;;  %v2796_v16 = vmax.f32 %v2622_v9, 0.0  ;;  %v2294_v54 = vsel %vm2278_vm7, %v2257_v51, %v1655_v4 }
 0x26b   : > { %v1910_v22 = vpop.permute.xlu0 %1909  ;;  %v2404_v27 = vsel %vm2389_vm10, %v2367_v41, %v2052_v35  ;;  %v2795_v33 = vmax.f32 %v2617_v14, 0.0  ;;  %v2331_v10 = vsel %vm2315_vm8, %v2294_v54, %v1766_v8  ;;  %v12207_v8 = vld [vmem:[#allocation2 + $0xe4] sm:$0xff]  ;;  %v2148_v35 = vsel %vm744_vm0, %v804_v63, %v12115_v52 }
 0x26c   : > { %1384 = vrot.lane.b32.xlu1 %v885_v25, %s11166_s3  ;;  %9531 = vmatprep.mubr.msk.f32.mxu0 %vm2437_vm11, %v2404_v27  ;;  %v2368_v36 = vsel %vm2352_vm9, %v2331_v10, %v1910_v22  ;;  %v740_v14 = vld [vmem:[%s11538_s7 + $0x128] sm:$0xff] }
 0x26d   : > { %1275 = vrot.lane.b32.xlu0 %v884_v39, %s11164_s12  ;;  %v9975_v15 = vpack.c.bf16 %v2796_v16, %v2795_v33  ;;  %782 = vst.msk [vmem:[#allocation2 + $0x128] sm:$0xff] %vm744_vm0, %v740_v14  ;;  %v2185_v16 = vsel %vm2167_vm4, %v2148_v35, %v12127_v11  ;;  %v997_v27 = vld [vmem:[#allocation2 + $0xe5] sm:$0xff]  ;;  %v741_v11 = vld [vmem:[%s11538_s7 + $0x130] sm:$0xff]  ;;  %s15141_s7 = sld [smem:[#allocation35_spill]] }
 0x26e   : > { %v12170_v47 = vpop.permute.xlu1 %1514  ;;  %v2222_v44 = vsel %vm2204_vm5, %v2185_v16, %v12143_v26  ;;  %v924_v26 = vld [vmem:[#allocation2 + $0xe3] sm:$0xff]  ;;  %783 = vst.msk [vmem:[#allocation2 + $0x130] sm:$0xff] %vm744_vm0, %v741_v11 }
 0x26f   : > { %v12172_v49 = vpop.permute.xlu0 %1117  ;;  %9976 = vmatpush1.bf16.msra.mxu1 %v9975_v15  ;;  %v2259_v45 = vsel %vm2241_vm6, %v2222_v44, %v12170_v47  ;;  %v888_v47 = vld [vmem:[#allocation2 + $0xea] sm:$0xff] }
 0x270   : > { %1923 = vrot.lane.b32.xlu1 %v995_v38, %s11170_s0  ;;  %9977 = vmatprep.subr.bf16.mxu1 %v11173_v29  ;;  %v961_v38 = vld [vmem:[#allocation2 + $0xec] sm:$0xff] }
 0x271   : > { %1781 = vrot.lane.b32.xlu0 %v959_v0, %s11169_s21 }
 0x272   : > { %v2054_v46 = vpop.permute.xlu1 %2053 }
 0x273   : > { %v1657_v34 = vpop.permute.xlu0 %1656  ;;  %v2405_v39 = vsel %vm2389_vm10, %v2368_v36, %v2054_v46  ;;  %v1033_v36 = vld [vmem:[#allocation2 + $0xe6] sm:$0xff]  ;;  %p15143_p1 = scmp.ne.s32.totalorder %s15141_s7, 0 }
 0x274   : > { %1528 = vrot.lane.b32.xlu1 %v922_v28, %s11167_s28  ;;  %9532 = vmatmul.mubr.msk.f32.gmra.mrb[14].mxu0 %vm2437_vm11, %v2405_v39  ;;  %v2295_v31 = vsel %vm2278_vm7, %v2258_v20, %v1657_v34  ;;  %v925_v39 = vld [vmem:[#allocation2 + $0xeb] sm:$0xff]  ;;  %v12278_v20 = vld [vmem:[#allocation2 + $0xf4] sm:$0xff] }
 0x275   : > { %1386 = vrot.lane.b32.xlu0 %v886_v56, %s11166_s3 }
 0x276   : > { %v12186_v57 = vpop.permute.xlu1 %1261 }
 0x277   : > { %v12188_v48 = vpop.permute.xlu0 %1119 }
 0x278   : > { %2067 = vrot.lane.b32.xlu1 %v1031_v42, %s11172_s20 }
 0x279   : > { %1925 = vrot.lane.b32.xlu0 %v996_v50, %s11170_s0 }
 0x27a   : > { %v1768_v30 = vpop.permute.xlu1 %1767 }
 0x27b   : > { %v1659_v62 = vpop.permute.xlu0 %1658  ;;  %v2332_v1 = vsel %vm2315_vm8, %v2295_v31, %v1768_v30  ;;  %v1034_v30 = vld [vmem:[#allocation2 + $0xee] sm:$0xff] }
 0x27c   : > { %1530 = vrot.lane.b32.xlu1 %v923_v61, %s11167_s28  ;;  %v2296_v15 = vsel %vm2278_vm7, %v2259_v45, %v1659_v62  ;;  %v851_v61 = vld [vmem:[#allocation2 + $0xe1] sm:$0xff] }
 0x27d   : > { %1133 = vrot.lane.b32.xlu0 %v849_v43, %s11165_s18 }
 0x27e   : > { %v12194_v40 = vpop.permute.xlu1 %1372 }
 0x27f   : > { %v12196_v4 = vpop.permute.xlu0 %1263 }
 0x280   : > { %2069 = vrot.lane.b32.xlu1 %v1032_v58, %s11172_s20  ;;  %v805_v58 = vld [vmem:[#allocation2 + $0x90] sm:$0xff] }
 0x281   : > { %1672 = vrot.lane.b32.xlu0 %v12137_v18, %s11168_s23 }
 0x282   : > { %v1912_v6 = vpop.permute.xlu1 %1911 }
 0x283   : > { %v1770_v60 = vpop.permute.xlu0 %1769  ;;  %v2369_v23 = vsel %vm2352_vm9, %v2332_v1, %v1912_v6  ;;  %v806_v1 = vld [vmem:[#allocation2 + $0x98] sm:$0xff] }
 0x284   : > { %1277 = vrot.lane.b32.xlu1 %v885_v25, %s11164_s12 }
 0x285   : > { %1135 = vrot.lane.b32.xlu0 %v850_v55, %s11165_s18  ;;  %v2149_v55 = vsel %vm744_vm0, %v805_v58, %v12172_v49 }
 0x286   : > { %v12211_v17 = vpop.permute.xlu1 %1516  ;;  %v2186_v59 = vsel %vm2167_vm4, %v2149_v55, %v12186_v57 }
 0x287   : > { %v12213_v18 = vpop.permute.xlu0 %1374  ;;  %v9515_v3 = vpop.f32.mrb[2].mxu0 }
 0x288   : > { %1783 = vrot.lane.b32.xlu1 %v12207_v8, %s11169_s21  ;;  %v2632_v13 = vadd.f32 %v9515_v3, %v12148_v2  ;;  %v2626_v7 = vpop.f32.mrb[3].mxu0 }
 0x289   : > { %1674 = vrot.lane.b32.xlu0 %v959_v0, %s11168_s23  ;;  %v2627_v21 = vadd.f32 %v12148_v2, %v2626_v7  ;;  %v2333_v0 = vsel %vm2315_vm8, %v2296_v15, %v1770_v60  ;;  %v852_v60 = vld [vmem:[#allocation2 + $0xe9] sm:$0xff]  ;;  %v926_v15 = vld [vmem:[#allocation2 + $0xf3] sm:$0xff] }
 0x28a   : > { %v2056_v9 = vpop.permute.xlu1 %2055  ;;  %v2798_v25 = vmax.f32 %v2632_v13, 0.0 }
 0x28b   : > { %v1914_v32 = vpop.permute.xlu0 %1913  ;;  %v2406_v41 = vsel %vm2389_vm10, %v2369_v23, %v2056_v9  ;;  %v2797_v22 = vmax.f32 %v2627_v21, 0.0 }
 0x28c   : > { %1388 = vrot.lane.b32.xlu1 %v887_v19, %s11166_s3  ;;  %9534 = vmatprep.mubr.msk.f32.mxu0 %vm2437_vm11, %v2406_v41  ;;  %v2370_v51 = vsel %vm2352_vm9, %v2333_v0, %v1914_v32  ;;  %v2150_v41 = vsel %vm744_vm0, %v806_v1, %v12188_v48  ;;  %v963_v48 = vld [vmem:[#allocation2 + $0xfc] sm:$0xff] }
 0x28d   : > { %1279 = vrot.lane.b32.xlu0 %v886_v56, %s11164_s12  ;;  %v9978_v33 = vpack.c.bf16 %v2798_v25, %v2797_v22  ;;  %v998_v56 = vld [vmem:[#allocation2 + $0xed] sm:$0xff]  ;;  %v2187_v35 = vsel %vm2167_vm4, %v2150_v41, %v12196_v4  ;;  %v999_v22 = vld [vmem:[#allocation2 + $0xf5] sm:$0xff]  ;;  %v12357_v1 = vld [vmem:[#allocation2 + $0x102] sm:$0xff] }
 0x28e   : > { %v12237_v24 = vpop.permute.xlu1 %1518  ;;  %v2224_v16 = vsel %vm2204_vm5, %v2187_v35, %v12213_v18 }
 0x28f   : > { %v12239_v52 = vpop.permute.xlu0 %1121  ;;  %9979 = vmatpush1.bf16.msra.mxu1 %v9978_v33 }
 0x290   : > { %1927 = vrot.lane.b32.xlu1 %v997_v27, %s11170_s0  ;;  %9980 = vmatprep.subr.bf16.mxu1 %v11173_v29 }
 0x291   : > { %1785 = vrot.lane.b32.xlu0 %v961_v38, %s11169_s21 }
 0x292   : > { %v2058_v54 = vpop.permute.xlu1 %2057 }
 0x293   : > { %v1661_v10 = vpop.permute.xlu0 %1660  ;;  %v2407_v28 = vsel %vm2389_vm10, %v2370_v51, %v2058_v54 }
 0x294   : > { %1532 = vrot.lane.b32.xlu1 %v924_v26, %s11167_s28  ;;  %9535 = vmatmul.mubr.msk.f32.gmra.mrb[16].mxu0 %vm2437_vm11, %v2407_v28  ;;  %v890_v26 = vld [vmem:[#allocation2 + $0xfa] sm:$0xff] }
 0x295   : > { %1390 = vrot.lane.b32.xlu0 %v888_v47, %s11166_s3  ;;  %v927_v28 = vld [vmem:[#allocation2 + $0xfb] sm:$0xff] }
 0x296   : > { %v12255_v46 = vpop.permute.xlu1 %1265 }
 0x297   : > { %v12257_v34 = vpop.permute.xlu0 %1123 }
 0x298   : > { %2071 = vrot.lane.b32.xlu1 %v1033_v36, %s11172_s20 }
 0x299   : > { %1929 = vrot.lane.b32.xlu0 %v998_v56, %s11170_s0 }
 0x29a   : > { %v1772_v42 = vpop.permute.xlu1 %1771 }
 0x29b   : > { %v1663_v50 = vpop.permute.xlu0 %1662 }
 0x29c   : > { %1534 = vrot.lane.b32.xlu1 %v925_v39, %s11167_s28  ;;  %v853_v39 = vld [vmem:[#allocation2 + $0xf1] sm:$0xff] }
 0x29d   : > { %1137 = vrot.lane.b32.xlu0 %v851_v61, %s11165_s18 }
 0x29e   : > { %v12263_v62 = vpop.permute.xlu1 %1376 }
 0x29f   : > { %v12265_v43 = vpop.permute.xlu0 %1267 }
 0x2a0   : > { %2073 = vrot.lane.b32.xlu1 %v1034_v30, %s11172_s20  ;;  %v807_v30 = vld [vmem:[#allocation2 + $0xa0] sm:$0xff] }
 0x2a1   : > { %1676 = vrot.lane.b32.xlu0 %v12207_v8, %s11168_s23  ;;  %v2223_v8 = vsel %vm2204_vm5, %v2186_v59, %v12194_v40 }
 0x2a2   : > { %v1916_v5 = vpop.permute.xlu1 %1915  ;;  %v2260_v3 = vsel %vm2241_vm6, %v2223_v8, %v12211_v17 }
 0x2a3   : > { %v1774_v6 = vpop.permute.xlu0 %1773  ;;  %v2297_v63 = vsel %vm2278_vm7, %v2260_v3, %v1661_v10 }
 0x2a4   : > { %1281 = vrot.lane.b32.xlu1 %v887_v19, %s11164_s12  ;;  %v2334_v13 = vsel %vm2315_vm8, %v2297_v63, %v1772_v42  ;;  %v889_v19 = vld [vmem:[#allocation2 + $0xf2] sm:$0xff]  ;;  %v1036_v42 = vld [vmem:[#allocation2 + $0xfe] sm:$0xff]  ;;  %v808_v63 = vld [vmem:[#allocation2 + $0xa8] sm:$0xff] }
 0x2a5   : > { %1139 = vrot.lane.b32.xlu0 %v852_v60, %s11165_s18  ;;  %v2371_v23 = vsel %vm2352_vm9, %v2334_v13, %v1916_v5  ;;  %v2151_v60 = vsel %vm744_vm0, %v807_v30, %v12239_v52 }
 0x2a6   : > { %v12283_v31 = vpop.permute.xlu1 %1520  ;;  %v2188_v55 = vsel %vm2167_vm4, %v2151_v60, %v12255_v46 }
 0x2a7   : > { %v12285_v49 = vpop.permute.xlu0 %1378  ;;  %v9518_v57 = vpop.f32.mrb[4].mxu0  ;;  %v2225_v53 = vsel %vm2204_vm5, %v2188_v55, %v12263_v62 }
 0x2a8   : > { %1787 = vrot.lane.b32.xlu1 %v12278_v20, %s11169_s21  ;;  %v2642_v7 = vadd.f32 %v9518_v57, %v12148_v2  ;;  %v2636_v40 = vpop.f32.mrb[5].mxu0  ;;  %v2262_v8 = vsel %vm2241_vm6, %v2225_v53, %v12283_v31 }
 0x2a9   : > { %1678 = vrot.lane.b32.xlu0 %v961_v38, %s11168_s23  ;;  %v2637_v21 = vadd.f32 %v12148_v2, %v2636_v40  ;;  %v2261_v38 = vsel %vm2241_vm6, %v2224_v16, %v12237_v24  ;;  %v1035_v24 = vld [vmem:[#allocation2 + $0xf6] sm:$0xff] }
 0x2aa   : > { %v2060_v17 = vpop.permute.xlu1 %2059  ;;  %v2800_v32 = vmax.f32 %v2642_v7, 0.0  ;;  %v2298_v45 = vsel %vm2278_vm7, %v2261_v38, %v1663_v50 }
 0x2ab   : > { %v1918_v9 = vpop.permute.xlu0 %1917  ;;  %v2408_v25 = vsel %vm2389_vm10, %v2371_v23, %v2060_v17  ;;  %v2799_v14 = vmax.f32 %v2637_v21, 0.0  ;;  %v2335_v4 = vsel %vm2315_vm8, %v2298_v45, %v1774_v6  ;;  %v854_v6 = vld [vmem:[#allocation2 + $0xf9] sm:$0xff]  ;;  %v2152_v21 = vsel %vm744_vm0, %v808_v63, %v12257_v34  ;;  %v965_v34 = vld [vmem:[#allocation2 + $0x10c] sm:$0xff] }
 0x2ac   : > { %1392 = vrot.lane.b32.xlu1 %v889_v19, %s11166_s3  ;;  %9537 = vmatprep.mubr.msk.f32.mxu0 %vm2437_vm11, %v2408_v25  ;;  %v2372_v18 = vsel %vm2352_vm9, %v2335_v4, %v1918_v9  ;;  %v2189_v9 = vsel %vm2167_vm4, %v2152_v21, %v12265_v43  ;;  %v12384_v45 = vld [vmem:[#allocation2 + $0x10a] sm:$0xff] }
 0x2ad   : > { %1283 = vrot.lane.b32.xlu0 %v888_v47, %s11164_s12  ;;  %v9981_v27 = vpack.c.bf16 %v2800_v32, %v2799_v14  ;;  %v1000_v47 = vld [vmem:[#allocation2 + $0xfd] sm:$0xff]  ;;  %v1001_v32 = vld [vmem:[#allocation2 + $0x105] sm:$0xff]  ;;  %v2226_v25 = vsel %vm2204_vm5, %v2189_v9, %v12285_v49 }
 0x2ae   : > { %v12307_v44 = vpop.permute.xlu1 %1522  ;;  %v1037_v4 = vld [vmem:[#allocation2 + $0x106] sm:$0xff] }
 0x2af   : > { %v12309_v33 = vpop.permute.xlu0 %1125  ;;  %9982 = vmatpush1.bf16.msra.mxu1 %v9981_v27  ;;  %v928_v27 = vld [vmem:[#allocation2 + $0x103] sm:$0xff] }
 0x2b0   : > { %1931 = vrot.lane.b32.xlu1 %v999_v22, %s11170_s0  ;;  %9983 = vmatprep.subr.bf16.mxu1 %v11173_v29  ;;  %v2263_v22 = vsel %vm2241_vm6, %v2226_v25, %v12307_v44 }
 0x2b1   : > { %1789 = vrot.lane.b32.xlu0 %v963_v48, %s11169_s21 }
 0x2b2   : > { %v2062_v11 = vpop.permute.xlu1 %2061 }
 0x2b3   : > { %v1665_v0 = vpop.permute.xlu0 %1664  ;;  %v2409_v51 = vsel %vm2389_vm10, %v2372_v18, %v2062_v11  ;;  %v1002_v11 = vld [vmem:[#allocation2 + $0x10d] sm:$0xff] }
 0x2b4   : > { %1536 = vrot.lane.b32.xlu1 %v926_v15, %s11167_s28  ;;  %9538 = vmatmul.mubr.msk.f32.gmra.mrb[18].mxu0 %vm2437_vm11, %v2409_v51  ;;  %v2299_v52 = vsel %vm2278_vm7, %v2262_v8, %v1665_v0  ;;  %v929_v51 = vld [vmem:[#allocation2 + $0x10b] sm:$0xff] }
 0x2b5   : > { %1394 = vrot.lane.b32.xlu0 %v890_v26, %s11166_s3 }
 0x2b6   : > { %v12323_v54 = vpop.permute.xlu1 %1269 }
 0x2b7   : > { %v12325_v10 = vpop.permute.xlu0 %1127 }
 0x2b8   : > { %2075 = vrot.lane.b32.xlu1 %v1035_v24, %s11172_s20 }
 0x2b9   : > { %1933 = vrot.lane.b32.xlu0 %v1000_v47, %s11170_s0 }
 0x2ba   : > { %v1776_v36 = vpop.permute.xlu1 %1775 }
 0x2bb   : > { %v1667_v56 = vpop.permute.xlu0 %1666  ;;  %v2336_v46 = vsel %vm2315_vm8, %v2299_v52, %v1776_v36  ;;  %v809_v36 = vld [vmem:[#allocation2 + $0xb0] sm:$0xff] }
 0x2bc   : > { %1538 = vrot.lane.b32.xlu1 %v927_v28, %s11167_s28  ;;  %v2300_v16 = vsel %vm2278_vm7, %v2263_v22, %v1667_v56  ;;  %v1038_v28 = vld [vmem:[#allocation2 + $0x10e] sm:$0xff]  ;;  %v12405_v56 = vld [vmem:[#allocation2 + $0x11c] sm:$0xff] }
 0x2bd   : > { %1141 = vrot.lane.b32.xlu0 %v853_v39, %s11165_s18 }
 0x2be   : > { %v12331_v50 = vpop.permute.xlu1 %1380 }
 0x2bf   : > { %v12333_v61 = vpop.permute.xlu0 %1271 }
 0x2c0   : > { %2077 = vrot.lane.b32.xlu1 %v1036_v42, %s11172_s20  ;;  %v12407_v42 = vld [vmem:[#allocation2 + $0x114] sm:$0xff] }
 0x2c1   : > { %1680 = vrot.lane.b32.xlu0 %v12278_v20, %s11168_s23 }
 0x2c2   : > { %v1920_v58 = vpop.permute.xlu1 %1919 }
 0x2c3   : > { %v1778_v5 = vpop.permute.xlu0 %1777  ;;  %v2373_v13 = vsel %vm2352_vm9, %v2336_v46, %v1920_v58  ;;  %v2153_v58 = vsel %vm744_vm0, %v809_v36, %v12309_v33  ;;  %v1040_v46 = vld [vmem:[#allocation2 + $0x11e] sm:$0xff] }
 0x2c4   : > { %1285 = vrot.lane.b32.xlu1 %v889_v19, %s11164_s12  ;;  %v2337_v43 = vsel %vm2315_vm8, %v2300_v16, %v1778_v5  ;;  %v2190_v5 = vsel %vm2167_vm4, %v2153_v58, %v12323_v54  ;;  %v810_v54 = vld [vmem:[#allocation2 + $0xb8] sm:$0xff] }
 0x2c5   : > { %1143 = vrot.lane.b32.xlu0 %v854_v6, %s11165_s18  ;;  %v1004_v6 = vld [vmem:[#allocation2 + $0x11d] sm:$0xff]  ;;  %v2227_v60 = vsel %vm2204_vm5, %v2190_v5, %v12331_v50 }
 0x2c6   : > { %v12346_v59 = vpop.permute.xlu1 %1524  ;;  %v858_v36 = vld [vmem:[#allocation2 + $0x119] sm:$0x3f]  ;;  %v968_v5 = vld [vmem:[#allocation2 + $0x124] sm:$0xff] }
 0x2c7   : > { %v12348_v20 = vpop.permute.xlu0 %1382  ;;  %v9521_v3 = vpop.f32.mrb[6].mxu0  ;;  %v2264_v53 = vsel %vm2241_vm6, %v2227_v60, %v12346_v59 }
 0x2c8   : > { %1791 = vrot.lane.b32.xlu1 %v964_v12, %s11169_s21  ;;  %v2652_v57 = vadd.f32 %v9521_v3, %v12148_v2  ;;  %v2646_v62 = vpop.f32.mrb[7].mxu0 }
 0x2c9   : > { %1682 = vrot.lane.b32.xlu0 %v963_v48, %s11168_s23  ;;  %v2647_v7 = vadd.f32 %v12148_v2, %v2646_v62 }
 0x2ca   : > { %v2064_v31 = vpop.permute.xlu1 %2063  ;;  %v2802_v19 = vmax.f32 %v2652_v57, 0.0 }
 0x2cb   : > { %v1922_v40 = vpop.permute.xlu0 %1921  ;;  %v2410_v23 = vsel %vm2389_vm10, %v2373_v13, %v2064_v31  ;;  %v2801_v17 = vmax.f32 %v2647_v7, 0.0  ;;  %v1039_v13 = vld [vmem:[#allocation2 + $0x116] sm:$0xff] }
 0x2cc   : > { %1396 = vrot.lane.b32.xlu1 %v12357_v1, %s11166_s3  ;;  %9540 = vmatprep.mubr.msk.f32.mxu0 %vm2437_vm11, %v2410_v23  ;;  %v2374_v49 = vsel %vm2352_vm9, %v2337_v43, %v1922_v40 }
 0x2cd   : > { %1287 = vrot.lane.b32.xlu0 %v890_v26, %s11164_s12  ;;  %v9984_v41 = vpack.c.bf16 %v2802_v19, %v2801_v17  ;;  %v2154_v19 = vsel %vm744_vm0, %v810_v54, %v12325_v10  ;;  %v856_v17 = vld [vmem:[#allocation2 + $0x109] sm:$0xff] }
 0x2ce   : > { %v12372_v14 = vpop.permute.xlu1 %1526  ;;  %v2191_v21 = vsel %vm2167_vm4, %v2154_v19, %v12333_v61  ;;  %v896_v54 = vld [vmem:[#allocation2 + $0x122] sm:$0xff] }
 0x2cf   : > { %v12374_v35 = vpop.permute.xlu0 %1129  ;;  %9985 = vmatpush1.bf16.msra.mxu1 %v9984_v41  ;;  %v2228_v9 = vsel %vm2204_vm5, %v2191_v21, %v12348_v20  ;;  %v855_v41 = vld [vmem:[#allocation2 + $0x101] sm:$0xff] }
 0x2d0   : > { %1935 = vrot.lane.b32.xlu1 %v1001_v32, %s11170_s0  ;;  %9986 = vmatprep.subr.bf16.mxu1 %v11173_v29  ;;  %v2265_v10 = vsel %vm2241_vm6, %v2228_v9, %v12372_v14  ;;  %v895_v14 = vld [vmem:[#allocation2 + $0x11a] sm:$0xff]  ;;  %v932_v9 = vld [vmem:[#allocation2 + $0x123] sm:$0xff] }
 0x2d1   : > { %1793 = vrot.lane.b32.xlu0 %v965_v34, %s11169_s21 }
 0x2d2   : > { %v2066_v48 = vpop.permute.xlu1 %2065 }
 0x2d3   : > { %v1669_v38 = vpop.permute.xlu0 %1668  ;;  %v2411_v44 = vsel %vm2389_vm10, %v2374_v49, %v2066_v48  ;;  %v893_v48 = vld [vmem:[#allocation2 + $0x112] sm:$0xff] }
 0x2d4   : > { %1540 = vrot.lane.b32.xlu1 %v928_v27, %s11167_s28  ;;  %9541 = vmatmul.mubr.msk.f32.gmra.mrb[20].mxu0 %vm2437_vm11, %v2411_v44  ;;  %v2301_v8 = vsel %vm2278_vm7, %v2264_v53, %v1669_v38  ;;  %v857_v44 = vld [vmem:[#allocation2 + $0x111] sm:$0xff] }
 0x2d5   : > { %1398 = vrot.lane.b32.xlu0 %v12384_v45, %s11166_s3 }
 0x2d6   : > { %v12391_v15 = vpop.permute.xlu1 %1273 }
 0x2d7   : > { %v12393_v18 = vpop.permute.xlu0 %1131 }
 0x2d8   : > { %2079 = vrot.lane.b32.xlu1 %v1037_v4, %s11172_s20 }
 0x2d9   : > { %1937 = vrot.lane.b32.xlu0 %v1002_v11, %s11170_s0  ;;  %v930_v11 = vld [vmem:[#allocation2 + $0x113] sm:$0xff] }
 0x2da   : > { %v1780_v0 = vpop.permute.xlu1 %1779 }
 0x2db   : > { %v1671_v26 = vpop.permute.xlu0 %1670  ;;  %v2338_v3 = vsel %vm2315_vm8, %v2301_v8, %v1780_v0  ;;  %v812_v8 = vld [vmem:[#allocation2 + $0xc8] sm:$0xff] }
 0x2dc   : > { %1684 = vrot.lane.b32.xlu1 %v964_v12, %s11168_s23  ;;  %v1003_v12 = vld [vmem:[#allocation2 + $0x115] sm:$0xff]  ;;  %v2302_v22 = vsel %vm2278_vm7, %v2265_v10, %v1671_v26 }
 0x2dd   : > { %1542 = vrot.lane.b32.xlu0 %v929_v51, %s11167_s28  ;;  %v811_v51 = vld [vmem:[#allocation2 + $0xc0] sm:$0xff] }
 0x2de   : > { %v12399_v24 = vpop.permute.xlu1 %1384 }
 0x2df   : > { %v12401_v47 = vpop.permute.xlu0 %1275 }
 0x2e0   : > { %1686 = vrot.lane.b32.xlu1 %v965_v34, %s11168_s23 }
 0x2e1   : > { %2081 = vrot.lane.b32.xlu0 %v1038_v28, %s11172_s20 }
 0x2e2   : > { %v1924_v39 = vpop.permute.xlu1 %1923 }
 0x2e3   : > { %v1782_v30 = vpop.permute.xlu0 %1781  ;;  %v2375_v57 = vsel %vm2352_vm9, %v2338_v3, %v1924_v39 }
 0x2e4   : > { %1797 = vrot.lane.b32.xlu1 %v12405_v56, %s11169_s21  ;;  %v2339_v61 = vsel %vm2315_vm8, %v2302_v22, %v1782_v30  ;;  %v2155_v30 = vsel %vm744_vm0, %v811_v51, %v12374_v35  ;;  %v1041_v22 = vld [vmem:[#allocation2 + $0x126] sm:$0xff] }
 0x2e5   : > { %1795 = vrot.lane.b32.xlu0 %v12407_v42, %s11169_s21  ;;  %v2192_v58 = vsel %vm2167_vm4, %v2155_v30, %v12391_v15 }
 0x2e6   : > { %v12419_v55 = vpop.permute.xlu1 %1528 }
 0x2e7   : > { %v12423_v33 = vpop.permute.xlu0 %1386  ;;  %v9524_v52 = vpop.f32.mrb[8].mxu0 }
 0x2e8   : > { %1941 = vrot.lane.b32.xlu1 %v1004_v6, %s11170_s0  ;;  %v2662_v63 = vadd.f32 %v9524_v52, %v12148_v2  ;;  %v2656_v50 = vpop.f32.mrb[9].mxu0 }
 0x2e9   : > { %1939 = vrot.lane.b32.xlu0 %v1003_v12, %s11170_s0  ;;  %v2657_v59 = vadd.f32 %v12148_v2, %v2656_v50  ;;  %v894_v50 = vld [vmem:[#allocation2 + $0x11a] sm:$0x3f] }
 0x2ea   : > { %v2068_v62 = vpop.permute.xlu1 %2067  ;;  %v2804_v7 = vmax.f32 %v2662_v63, 0.0 }
 0x2eb   : > { %v2412_v31 = vsel %vm2389_vm10, %v2375_v57, %v2068_v62  ;;  %v1926_v40 = vpop.permute.xlu0 %1925  ;;  %v2803_v23 = vmax.f32 %v2657_v59, 0.0  ;;  %v2156_v62 = vsel %vm744_vm0, %v812_v8, %v12393_v18 }
 0x2ec   : > { %2085 = vrot.lane.b32.xlu1 %v1040_v46, %s11172_s20  ;;  %9543 = vmatprep.mubr.msk.f32.mxu0 %vm2437_vm11, %v2412_v31  ;;  %v2376_v20 = vsel %vm2352_vm9, %v2339_v61, %v1926_v40 }
 0x2ed   : > { %2083 = vrot.lane.b32.xlu0 %v1039_v13, %s11172_s20  ;;  %v9987_v32 = vpack.c.bf16 %v2804_v7, %v2803_v23  ;;  %v1005_v7 = vld [vmem:[#allocation2 + $0x125] sm:$0xff] }
 0x2ee   : > { %v12442_v25 = vpop.permute.xlu1 %1530  ;;  %v970_v23 = vld [vmem:[#allocation2 + $0x12c] sm:$0xff] }
 0x2ef   : > { %v12446_v34 = vpop.permute.xlu0 %1133  ;;  %9988 = vmatpush1.bf16.msra.mxu1 %v9987_v32 }
 0x2f0   : > { %1147 = vrot.lane.b32.xlu1 %v856_v17, %s11165_s18  ;;  %9989 = vmatprep.subr.bf16.mxu1 %v11173_v29 }
 0x2f1   : > { %1145 = vrot.lane.b32.xlu0 %v855_v41, %s11165_s18  ;;  %v897_v41 = vld [vmem:[#allocation2 + $0x12a] sm:$0x3f] }
 0x2f2   : > { %v2070_v16 = vpop.permute.xlu1 %2069 }
 0x2f3   : > { %v2413_v43 = vsel %vm2389_vm10, %v2376_v20, %v2070_v16  ;;  %v1673_v27 = vpop.permute.xlu0 %1672  ;;  %v1006_v20 = vld [vmem:[#allocation2 + $0x12d] sm:$0xff] }
 0x2f4   : > { %1291 = vrot.lane.b32.xlu1 %v12384_v45, %s11164_s12  ;;  %9544 = vmatmul.mubr.msk.f32.gmra.mrb[22].mxu0 %vm2437_vm11, %v2413_v43 }
 0x2f5   : > { %1289 = vrot.lane.b32.xlu0 %v12357_v1, %s11164_s12  ;;  %v931_v1 = vld [vmem:[#allocation2 + $0x11b] sm:$0xff] }
 0x2f6   : > { %v12460_v49 = vpop.permute.xlu1 %1277 }
 0x2f7   : > { %v12462_v38 = vpop.permute.xlu0 %1135 }
 0x2f8   : > { %1402 = vrot.lane.b32.xlu1 %v895_v14, %s11166_s3 }
 0x2f9   : > { %1400 = vrot.lane.b32.xlu0 %v893_v48, %s11166_s3 }
 0x2fa   : > { %v1784_v4 = vpop.permute.xlu1 %1783 }
 0x2fb   : > { %v1675_v0 = vpop.permute.xlu0 %1674 }
 0x2fc   : > { %1149 = vrot.lane.b32.xlu1 %v857_v44, %s11165_s18 }
 0x2fd   : > { %1544 = vrot.lane.b32.xlu0 %v930_v11, %s11167_s28 }
 0x2fe   : > { %v12468_v45 = vpop.permute.xlu1 %1388 }
 0x2ff   : > { %v12470_v26 = vpop.permute.xlu0 %1279 }
 0x300   : > { %1688 = vrot.lane.b32.xlu1 %v12407_v42, %s11168_s23  ;;  %v2229_v42 = vsel %vm2204_vm5, %v2192_v58, %v12399_v24  ;;  %v1008_v58 = vld [vmem:[#allocation2 + $0x13d] sm:$0x3f] }
 0x301   : > { %1546 = vrot.lane.b32.xlu0 %v931_v1, %s11167_s28  ;;  %v2266_v60 = vsel %vm2241_vm6, %v2229_v42, %v12419_v55  ;;  %v972_v1 = vld [vmem:[#allocation2 + $0x13c] sm:$0x3f] }
 0x302   : > { %v1928_v28 = vpop.permute.xlu1 %1927  ;;  %v2303_v35 = vsel %vm2278_vm7, %v2266_v60, %v1673_v27  ;;  %v933_v27 = vld [vmem:[#allocation2 + $0x12b] sm:$0x3f]  ;;  %v1007_v60 = vld [vmem:[#allocation2 + $0x135] sm:$0xff] }
 0x303   : > { %v1786_v39 = vpop.permute.xlu0 %1785  ;;  %v2340_v15 = vsel %vm2315_vm8, %v2303_v35, %v1784_v4  ;;  %v1042_v4 = vld [vmem:[#allocation2 + $0x12e] sm:$0xff] }
 0x304   : > { %1293 = vrot.lane.b32.xlu1 %v893_v48, %s11164_s12  ;;  %v2377_v3 = vsel %vm2352_vm9, %v2340_v15, %v1928_v28  ;;  %v969_v48 = vld [vmem:[#allocation2 + $0x12c] sm:$0x3f]  ;;  %v971_v28 = vld [vmem:[#allocation2 + $0x134] sm:$0xff] }
 0x305   : > { %1151 = vrot.lane.b32.xlu0 %v858_v36, %s11165_s18  ;;  %v814_v15 = vld [vmem:[#allocation2 + $0xd8] sm:$0xff]  ;;  %s9139_s18 = sshll.u32 %s11308_s1, 6  ;;  %s11186_s1 = smov [#allocation23]  }
 0x306   : > { %v12483_v6 = vpop.permute.xlu1 %1532 }
 0x307   : > { %v12487_v12 = vpop.permute.xlu0 %1390  ;;  %v9527_v53 = vpop.f32.mrb[10].mxu0 }
 0x308   : > { %1799 = vrot.lane.b32.xlu1 %v968_v5, %s11169_s21  ;;  %v2672_v52 = vadd.f32 %v9527_v53, %v12148_v2  ;;  %v2666_v24 = vpop.f32.mrb[11].mxu0 }
 0x309   : > { %1690 = vrot.lane.b32.xlu0 %v12405_v56, %s11168_s23  ;;  %v2667_v55 = vadd.f32 %v12148_v2, %v2666_v24  ;;  %v2193_v56 = vsel %vm2167_vm4, %v2156_v62, %v12401_v47  ;;  %v1044_v24 = vld [vmem:[#allocation2 + $0x13e] sm:$0x3f] }
 0x30a   : > { %v2072_v63 = vpop.permute.xlu1 %2071  ;;  %v2806_v46 = vmax.f32 %v2672_v52, 0.0  ;;  %v2230_v31 = vsel %vm2204_vm5, %v2193_v56, %v12423_v33 }
 0x30b   : > { %v2414_v57 = vsel %vm2389_vm10, %v2377_v3, %v2072_v63  ;;  %v1930_v59 = vpop.permute.xlu0 %1929  ;;  %v2805_v13 = vmax.f32 %v2667_v55, 0.0  ;;  %v2267_v18 = vsel %vm2241_vm6, %v2230_v31, %v12442_v25  ;;  %v1043_v55 = vld [vmem:[#allocation2 + $0x136] sm:$0xff] }
 0x30c   : > { %1404 = vrot.lane.b32.xlu1 %v896_v54, %s11166_s3  ;;  %9546 = vmatprep.mubr.msk.f32.mxu0 %vm2437_vm11, %v2414_v57  ;;  %v2304_v17 = vsel %vm2278_vm7, %v2267_v18, %v1675_v0  ;;  %v813_v0 = vld [vmem:[#allocation2 + $0xd0] sm:$0xff]  ;;  %v2158_v57 = vsel %vm744_vm0, %v814_v15, %v12462_v38 }
 0x30d   : > { %1295 = vrot.lane.b32.xlu0 %v894_v50, %s11164_s12  ;;  %v9990_v40 = vpack.c.bf16 %v2806_v46, %v2805_v13  ;;  %v2341_v47 = vsel %vm2315_vm8, %v2304_v17, %v1786_v39  ;;  %v2157_v39 = vsel %vm744_vm0, %v813_v0, %v12446_v34  ;;  %v2195_v62 = vsel %vm2167_vm4, %v2158_v57, %v12470_v26  ;;  %s695_s12 = sand.u32 1, %s15139_s2   ;;  %s11077_s2 = sshll.u32 %s11186_s1, 4  ;;  %s11078_s2 = int_to_ptr.vmem [resolvable:$false] %s11077_s2 }
 0x30e   : > { %v12507_v19 = vpop.permute.xlu1 %1534  ;;  %v2378_v33 = vsel %vm2352_vm9, %v2341_v47, %v1930_v59  ;;  %v2194_v30 = vsel %vm2167_vm4, %v2157_v39, %v12460_v49  ;;  %v2232_v13 = vsel %vm2204_vm5, %v2195_v62, %v12487_v12  ;;  %v816_v39 = vld [vmem:[#allocation2 + $0xe8] sm:$0xff] }
 0x30f   : > { %v12511_v21 = vpop.permute.xlu0 %1137  ;;  %9991 = vmatpush1.bf16.msra.mxu1 %v9990_v40  ;;  %v2269_v31 = vsel %vm2241_vm6, %v2232_v13, %v12507_v19 }
 0x310   : > { %1943 = vrot.lane.b32.xlu1 %v1005_v7, %s11170_s0  ;;  %9992 = vmatprep.subr.bf16.mxu1 %v11173_v29 }
 0x311   : > { %1801 = vrot.lane.b32.xlu0 %v970_v23, %s11169_s21 }
 0x312   : > { %v2074_v32 = vpop.permute.xlu1 %2073 }
 0x313   : > { %v2415_v25 = vsel %vm2389_vm10, %v2378_v33, %v2074_v32  ;;  %v1677_v10 = vpop.permute.xlu0 %1676 }
 0x314   : > { %1548 = vrot.lane.b32.xlu1 %v932_v9, %s11167_s28  ;;  %9547 = vmatmul.mubr.msk.f32.gmra.mrb[24].mxu0 %vm2437_vm11, %v2415_v25  ;;  %v815_v25 = vld [vmem:[#allocation2 + $0xe0] sm:$0xff] }
 0x315   : > { %1406 = vrot.lane.b32.xlu0 %v897_v41, %s11166_s3  ;;  %s11183_s3 = smov 96  }
 0x316   : > { %v12523_v61 = vpop.permute.xlu1 %1281 }
 0x317   : > { %v12525_v16 = vpop.permute.xlu0 %1139 }
 0x318   : > { %2087 = vrot.lane.b32.xlu1 %v1041_v22, %s11172_s20 }
 0x319   : > { %1945 = vrot.lane.b32.xlu0 %v1006_v20, %s11170_s0  ;;  %v2159_v20 = vsel %vm744_vm0, %v815_v25, %v12511_v21 }
 0x31a   : > { %v1788_v43 = vpop.permute.xlu1 %1787 }
 0x31b   : > { %v1679_v14 = vpop.permute.xlu0 %1678 }
 0x31c   : > { %1692 = vrot.lane.b32.xlu1 %v968_v5, %s11168_s23  ;;  %v2231_v5 = vsel %vm2204_vm5, %v2194_v30, %v12468_v45  ;;  %v2306_v38 = vsel %vm2278_vm7, %v2269_v31, %v1679_v14 }
 0x31d   : > { %1550 = vrot.lane.b32.xlu0 %v933_v27, %s11167_s28  ;;  %v2268_v35 = vsel %vm2241_vm6, %v2231_v5, %v12483_v6  ;;  %s11184_s28 = smov 80  }
 0x31e   : > { %v12531_v44 = vpop.permute.xlu1 %1392  ;;  %v2305_v34 = vsel %vm2278_vm7, %v2268_v35, %v1677_v10 }
 0x31f   : > { %v12533_v11 = vpop.permute.xlu0 %1283  ;;  %v2342_v49 = vsel %vm2315_vm8, %v2305_v34, %v1788_v43  ;;  %v2196_v43 = vsel %vm2167_vm4, %v2159_v20, %v12523_v61 }
 0x320   : > { %1694 = vrot.lane.b32.xlu1 %v969_v48, %s11168_s23  ;;  %v2233_v27 = vsel %vm2204_vm5, %v2196_v43, %v12531_v44  ;;  %s11185_s23 = smov 112  }
 0x321   : > { %2089 = vrot.lane.b32.xlu0 %v1042_v4, %s11172_s20 }
 0x322   : > { %v1932_v51 = vpop.permute.xlu1 %1931 }
 0x323   : > { %v1790_v36 = vpop.permute.xlu0 %1789  ;;  %v2379_v54 = vsel %vm2352_vm9, %v2342_v49, %v1932_v51 }
 0x324   : > { %1805 = vrot.lane.b32.xlu1 %v972_v1, %s11169_s21  ;;  %v2343_v23 = vsel %vm2315_vm8, %v2306_v38, %v1790_v36 }
 0x325   : > { %1803 = vrot.lane.b32.xlu0 %v971_v28, %s11169_s21 }
 0x326   : > { %v1537_v42 = vpop.permute.xlu1 %1536 }
 0x327   : > { %v12547_v53 = vpop.permute.xlu0 %1394  ;;  %v9530_v8 = vpop.f32.mrb[12].mxu0  ;;  %v2270_v48 = vsel %vm2241_vm6, %v2233_v27, %v1537_v42 }
 0x328   : > { %1949 = vrot.lane.b32.xlu1 %v1008_v58, %s11170_s0  ;;  %v2682_v52 = vadd.f32 %v9530_v8, %v12148_v2  ;;  %v2676_v45 = vpop.f32.mrb[13].mxu0 }
 0x329   : > { %1947 = vrot.lane.b32.xlu0 %v1007_v60, %s11170_s0  ;;  %v2677_v6 = vadd.f32 %v12148_v2, %v2676_v45  ;;  %v2160_v60 = vsel %vm744_vm0, %v816_v39, %v12525_v16  ;;  %s11180_s0 = smov 48  }
 0x32a   : > { %v2076_v3 = vpop.permute.xlu1 %2075  ;;  %v2808_v63 = vmax.f32 %v2682_v52, 0.0  ;;  %v2197_v34 = vsel %vm2167_vm4, %v2160_v60, %v12533_v11  ;;  %v820_v60 = vld [vmem:[#allocation2 + $0x108] sm:$0xff] }
 0x32b   : > { %v2416_v50 = vsel %vm2389_vm10, %v2379_v54, %v2076_v3  ;;  %v1934_v46 = vpop.permute.xlu0 %1933  ;;  %v2807_v59 = vmax.f32 %v2677_v6, 0.0  ;;  %v818_v6 = vld [vmem:[#allocation2 + $0xf8] sm:$0xff] }
 0x32c   : > { %2093 = vrot.lane.b32.xlu1 %v1044_v24, %s11172_s20  ;;  %9549 = vmatprep.mubr.msk.f32.mxu0 %vm2437_vm11, %v2416_v50  ;;  %v2380_v26 = vsel %vm2352_vm9, %v2343_v23, %v1934_v46 }
 0x32d   : > { %2091 = vrot.lane.b32.xlu0 %v1043_v55, %s11172_s20  ;;  %v9993_v56 = vpack.c.bf16 %v2808_v63, %v2807_v59 }
 0x32e   : > { %v1539_v7 = vpop.permute.xlu1 %1538 }
 0x32f   : > { %v1142_v40 = vpop.permute.xlu0 %1141  ;;  %9994 = vmatpush1.bf16.msra.mxu1 %v9993_v56 }
 0x330   : > { %9995 = vmatprep.subr.bf16.mxu1 %v11173_v29 }
 0x332   : > { %v2078_v18 = vpop.permute.xlu1 %2077 }
 0x333   : > { %v2417_v17 = vsel %vm2389_vm10, %v2380_v26, %v2078_v18  ;;  %v1681_v47 = vpop.permute.xlu0 %1680 }
 0x334   : > { %9550 = vmatmul.mubr.msk.f32.gmra.mrb[26].mxu0 %vm2437_vm11, %v2417_v17  ;;  %v2307_v1 = vsel %vm2278_vm7, %v2270_v48, %v1681_v47 }
 0x336   : > { %v1286_v12 = vpop.permute.xlu1 %1285 }
 0x337   : > { %v1144_v9 = vpop.permute.xlu0 %1143 }
 0x338   : > { %v2162_v63 = vsel %vm744_vm0, %v818_v6, %v1144_v9  ;;  %v822_v6 = vld [vmem:[#allocation2 + $0x118] sm:$0x3f] }
 0x33a   : > { %v1792_v33 = vpop.permute.xlu1 %1791 }
 0x33b   : > { %v1683_v19 = vpop.permute.xlu0 %1682  ;;  %v2344_v36 = vsel %vm2315_vm8, %v2307_v1, %v1792_v33 }
 0x33e   : > { %v1397_v32 = vpop.permute.xlu1 %1396 }
 0x33f   : > { %v1288_v41 = vpop.permute.xlu0 %1287 }
 0x340   : > { %v2199_v46 = vsel %vm2167_vm4, %v2162_v63, %v1288_v41 }
 0x342   : > { %v1936_v10 = vpop.permute.xlu1 %1935 }
 0x343   : > { %v1794_v22 = vpop.permute.xlu0 %1793  ;;  %v2381_v61 = vsel %vm2352_vm9, %v2344_v36, %v1936_v10 }
 0x346   : > { %v1541_v14 = vpop.permute.xlu1 %1540 }
 0x347   : > { %v1399_v4 = vpop.permute.xlu0 %1398  ;;  %v9533_v0 = vpop.f32.mrb[14].mxu0 }
 0x348   : > { %v2692_v51 = vadd.f32 %v9533_v0, %v12148_v2  ;;  %v2686_v28 = vpop.f32.mrb[15].mxu0  ;;  %v2236_v59 = vsel %vm2204_vm5, %v2199_v46, %v1399_v4 }
 0x349   : > { %v2687_v21 = vadd.f32 %v12148_v2, %v2686_v28  ;;  %v2234_v2 = vsel %vm2204_vm5, %v2197_v34, %v12547_v53  ;;  %v817_v53 = vld [vmem:[#allocation2 + $0xf0] sm:$0xff] }
 0x34a   : > { %v2810_v30 = vmax.f32 %v2692_v51, 0.0  ;;  %v2080_v58 = vpop.permute.xlu1 %2079  ;;  %v2271_v49 = vsel %vm2241_vm6, %v2234_v2, %v1539_v7  ;;  %v2161_v50 = vsel %vm744_vm0, %v817_v53, %v1142_v40 }
 0x34b   : > { %v2809_v44 = vmax.f32 %v2687_v21, 0.0  ;;  %v2418_v5 = vsel %vm2389_vm10, %v2381_v61, %v2080_v58  ;;  %v1938_v42 = vpop.permute.xlu0 %1937  ;;  %v2308_v52 = vsel %vm2278_vm7, %v2271_v49, %v1683_v19  ;;  %v2198_v57 = vsel %vm2167_vm4, %v2161_v50, %v1286_v12  ;;  %v819_v21 = vld [vmem:[#allocation2 + $0x100] sm:$0xff] }
 0x34c   : > { %9552 = vmatprep.mubr.msk.f32.mxu0 %vm2437_vm11, %v2418_v5  ;;  %v2345_v45 = vsel %vm2315_vm8, %v2308_v52, %v1794_v22  ;;  %v2235_v13 = vsel %vm2204_vm5, %v2198_v57, %v1397_v32  ;;  %v12622_v22 = vld [vmem:[%s15135_s24] ss:$0 sm:$0xff] }
 0x34d   : > { %v9996_v35 = vpack.c.bf16 %v2810_v30, %v2809_v44  ;;  %v2382_v16 = vsel %vm2352_vm9, %v2345_v45, %v1938_v42  ;;  %v2272_v31 = vsel %vm2241_vm6, %v2235_v13, %v1541_v14 }
 0x34e   : > { %v1685_v8 = vpop.permute.xlu1 %1684 }
 0x34f   : > { %v1543_v15 = vpop.permute.xlu0 %1542  ;;  %9997 = vmatpush1.bf16.msra.mxu1 %v9996_v35  ;;  %v2309_v23 = vsel %vm2278_vm7, %v2272_v31, %v1685_v8 }
 0x350   : > { %9998 = vmatprep.subr.bf16.mxu1 %v11173_v29  ;;  %v2273_v56 = vsel %vm2241_vm6, %v2236_v59, %v1543_v15 }
 0x352   : > { %v1687_v24 = vpop.permute.xlu1 %1686 }
 0x353   : > { %v2082_v54 = vpop.permute.xlu0 %2081  ;;  %v2310_v38 = vsel %vm2278_vm7, %v2273_v56, %v1687_v24 }
 0x354   : > { %v2419_v11 = vsel %vm2389_vm10, %v2382_v16, %v2082_v54 }
 0x355   : > { %9553 = vmatmul.mubr.msk.f32.gmra.mrb[28].mxu0 %vm2437_vm11, %v2419_v11 }
 0x356   : > { %v1798_v3 = vpop.permute.xlu1 %1797 }
 0x357   : > { %v1796_v55 = vpop.permute.xlu0 %1795  ;;  %v2347_v40 = vsel %vm2315_vm8, %v2310_v38, %v1798_v3 }
 0x358   : > { %v2346_v26 = vsel %vm2315_vm8, %v2309_v23, %v1796_v55  ;;  %v821_v55 = vld [vmem:[#allocation2 + $0x110] sm:$0xff] }
 0x35a   : > { %v1942_v62 = vpop.permute.xlu1 %1941 }
 0x35b   : > { %v1940_v7 = vpop.permute.xlu0 %1939  ;;  %v2384_v18 = vsel %vm2352_vm9, %v2347_v40, %v1942_v62 }
 0x35c   : > { %v2383_v47 = vsel %vm2352_vm9, %v2346_v26, %v1940_v7 }
 0x35e   : > { %v2086_v17 = vpop.permute.xlu1 %2085 }
 0x35f   : > { %v2421_v12 = vsel %vm2389_vm10, %v2384_v18, %v2086_v17  ;;  %v2084_v9 = vpop.permute.xlu0 %2083 }
 0x360   : > { %v2420_v33 = vsel %vm2389_vm10, %v2383_v47, %v2084_v9 }
 0x361   : > { %9555 = vmatprep.mubr.msk.f32.mxu0 %vm2437_vm11, %v2420_v33 }
 0x362   : > { %9556 = vmatmul.mubr.msk.f32.gmra.mrb[30].mxu0 %vm2437_vm11, %v2421_v12  ;;  %v1148_v19 = vpop.permute.xlu1 %1147 }
 0x363   : > { %v1146_v32 = vpop.permute.xlu0 %1145  ;;  %v2164_v8 = vsel %vm744_vm0, %v820_v60, %v1148_v19 }
 0x364   : > { %v2163_v61 = vsel %vm744_vm0, %v819_v21, %v1146_v32 }
 0x366   : > { %v1292_v41 = vpop.permute.xlu1 %1291 }
 0x367   : > { %v1290_v25 = vpop.permute.xlu0 %1289  ;;  %v9536_v10 = vpop.f32.mrb[16].mxu0  ;;  %v2201_v49 = vsel %vm2167_vm4, %v2164_v8, %v1292_v41 }
 0x368   : > { %v2702_v20 = vadd.f32 %v12622_v22, %v9536_v10  ;;  %v2696_v43 = vpop.f32.mrb[17].mxu0  ;;  %v2200_v44 = vsel %vm2167_vm4, %v2163_v61, %v1290_v25 }
 0x369   : > { %v2697_v27 = vadd.f32 %v12622_v22, %v2696_v43 }
 0x36a   : > { %v2812_v14 = vmax.f32 %v2702_v20, 0.0  ;;  %v1403_v48 = vpop.permute.xlu1 %1402 }
 0x36b   : > { %v2811_v4 = vmax.f32 %v2697_v27, 0.0  ;;  %v1401_v0 = vpop.permute.xlu0 %1400  ;;  %v2238_v16 = vsel %vm2204_vm5, %v2201_v49, %v1403_v48 }
 0x36c   : > { %v2237_v35 = vsel %vm2204_vm5, %v2200_v44, %v1401_v0 }
 0x36d   : > { %v9999_v1 = vpack.c.bf16 %v2812_v14, %v2811_v4 }
 0x36e   : > { %v1150_v51 = vpop.permute.xlu1 %1149 }
 0x36f   : > { %v1545_v28 = vpop.permute.xlu0 %1544  ;;  %10000 = vmatpush1.bf16.msra.mxu1 %v9999_v1  ;;  %v2165_v7 = vsel %vm744_vm0, %v821_v55, %v1150_v51 }
 0x370   : > { %10001 = vmatprep.subr.bf16.mxu1 %v11173_v29  ;;  %v2274_v2 = vsel %vm2241_vm6, %v2237_v35, %v1545_v28 }
 0x372   : > { %v1689_v36 = vpop.permute.xlu1 %1688 }
 0x373   : > { %v1547_v39 = vpop.permute.xlu0 %1546  ;;  %v2311_v52 = vsel %vm2278_vm7, %v2274_v2, %v1689_v36  ;;  %v2832_v2 = vld [vmem:[%s15072_s13 + $0x8] sm:$0xff] }
 0x374   : > { %v2275_v63 = vsel %vm2241_vm6, %v2238_v16, %v1547_v39  ;;  %3146 = vmatprep.mubr.f32.mxu1 %v2832_v2  ;;  %v2864_v2 = vld [vmem:[%s15072_s13 + $0x108] sm:$0xff] }
 0x376   : > { %v1294_v30 = vpop.permute.xlu1 %1293 }
 0x377   : > { %v1152_v58 = vpop.permute.xlu0 %1151  ;;  %v2202_v17 = vsel %vm2167_vm4, %v2165_v7, %v1294_v30 }
 0x378   : > { %v2166_v62 = vsel %vm744_vm0, %v822_v6, %v1152_v58  ;;  %vm2954_vm0 = vcmask 244736  }
 0x37a   : > { %v1800_v5 = vpop.permute.xlu1 %1799 }
 0x37b   : > { %v1691_v42 = vpop.permute.xlu0 %1690  ;;  %v2348_v54 = vsel %vm2315_vm8, %v2311_v52, %v1800_v5 }
 0x37c   : > { %v2312_v31 = vsel %vm2278_vm7, %v2275_v63, %v1691_v42 }
 0x37e   : > { %v1405_v34 = vpop.permute.xlu1 %1404 }
 0x37f   : > { %v1296_v15 = vpop.permute.xlu0 %1295  ;;  %v2239_v19 = vsel %vm2204_vm5, %v2202_v17, %v1405_v34 }
 0x380   : > { %v2203_v26 = vsel %vm2167_vm4, %v2166_v62, %v1296_v15  ;;  %vm3622_vm4 = vcmask 64512  }
 0x382   : > { %v1944_v45 = vpop.permute.xlu1 %1943 }
 0x383   : > { %v1802_v24 = vpop.permute.xlu0 %1801  ;;  %v2385_v50 = vsel %vm2352_vm9, %v2348_v54, %v1944_v45 }
 0x384   : > { %v2349_v47 = vsel %vm2315_vm8, %v2312_v31, %v1802_v24 }
 0x386   : > { %v1549_v11 = vpop.permute.xlu1 %1548 }
 0x387   : > { %v1407_v53 = vpop.permute.xlu0 %1406  ;;  %v9539_v3 = vpop.f32.mrb[18].mxu0  ;;  %v2276_v20 = vsel %vm2241_vm6, %v2239_v19, %v1549_v11 }
 0x388   : > { %v2712_v46 = vadd.f32 %v12622_v22, %v9539_v3  ;;  %v2706_v57 = vpop.f32.mrb[19].mxu0  ;;  %v2240_v33 = vsel %vm2204_vm5, %v2203_v26, %v1407_v53  ;;  %vm3663_vm5 = vcmask 60416  }
 0x389   : > { %v2707_v59 = vadd.f32 %v12622_v22, %v2706_v57 }
 0x38a   : > { %v2814_v13 = vmax.f32 %v2712_v46, 0.0  ;;  %v2088_v56 = vpop.permute.xlu1 %2087 }
 0x38b   : > { %v2813_v38 = vmax.f32 %v2707_v59, 0.0  ;;  %v2422_v23 = vsel %vm2389_vm10, %v2385_v50, %v2088_v56  ;;  %v1946_v40 = vpop.permute.xlu0 %1945 }
 0x38c   : > { %9558 = vmatprep.mubr.msk.f32.mxu0 %vm2437_vm11, %v2422_v23  ;;  %v2386_v32 = vsel %vm2352_vm9, %v2349_v47, %v1946_v40 }
 0x38d   : > { %v10002_v18 = vpack.c.bf16 %v2814_v13, %v2813_v38 }
 0x38e   : > { %v1693_v12 = vpop.permute.xlu1 %1692 }
 0x38f   : > { %v1551_v9 = vpop.permute.xlu0 %1550  ;;  %10003 = vmatpush1.bf16.msra.mxu1 %v10002_v18  ;;  %v2313_v48 = vsel %vm2278_vm7, %v2276_v20, %v1693_v12  ;;  %v2834_v20 = vld [vmem:[%s15072_s13 + $0x18] sm:$0xff] }
 0x390   : > { %10004 = vmatprep.subr.bf16.mxu1 %v11173_v29  ;;  %v2277_v25 = vsel %vm2241_vm6, %v2240_v33, %v1551_v9  ;;  %vm5045_vm6 = vcmask 130048  }
 0x392   : > { %v1695_v41 = vpop.permute.xlu1 %1694 }
 0x393   : > { %v2090_v10 = vpop.permute.xlu0 %2089  ;;  %v2314_v27 = vsel %vm2278_vm7, %v2277_v25, %v1695_v41  ;;  %v2831_v25 = vld [vmem:[%s15072_s13] sm:$0xff] }
 0x394   : > { %v2423_v43 = vsel %vm2389_vm10, %v2386_v32, %v2090_v10  ;;  %v2835_v10 = vld [vmem:[%s15072_s13 + $0x20] sm:$0xff] }
 0x395   : > { %9559 = vmatmul.mubr.msk.f32.gmra.mrb[32].mxu0 %vm2437_vm11, %v2423_v43  ;;  %v2838_v43 = vld [vmem:[%s15072_s13 + $0x38] sm:$0xff] }
 0x396   : > { %v1806_v14 = vpop.permute.xlu1 %1805 }
 0x397   : > { %v1804_v4 = vpop.permute.xlu0 %1803  ;;  %v2351_v0 = vsel %vm2315_vm8, %v2314_v27, %v1806_v14  ;;  %v2837_v27 = vld [vmem:[%s15072_s13 + $0x30] sm:$0xff] }
 0x398   : > { %v2350_v1 = vsel %vm2315_vm8, %v2313_v48, %v1804_v4  ;;  %v2841_v14 = vld [vmem:[%s15072_s13 + $0x50] sm:$0xff]  ;;  %v2840_v48 = vld [vmem:[%s15072_s13 + $0x48] sm:$0xff]  ;;  %vm5118_vm8 = vcmask 261120  }
 0x399   : > { %v2844_v4 = vld [vmem:[%s15072_s13 + $0x68] sm:$0xff] }
 0x39a   : > { %v1950_v51 = vpop.permute.xlu1 %1949 }
 0x39b   : > { %v1948_v28 = vpop.permute.xlu0 %1947  ;;  %v2388_v36 = vsel %vm2352_vm9, %v2351_v0, %v1950_v51  ;;  %v2843_v0 = vld [vmem:[%s15072_s13 + $0x60] sm:$0xff]  ;;  %v2846_v51 = vld [vmem:[%s15072_s13 + $0x78] sm:$0xff] }
 0x39c   : > { %v2387_v21 = vsel %vm2352_vm9, %v2350_v1, %v1948_v28  ;;  %v2847_v1 = vld [vmem:[%s15072_s13 + $0x80] sm:$0xff]  ;;  %v2850_v28 = vld [vmem:[%s15072_s13 + $0x98] sm:$0xff]  ;;  %vm5155_vm9 = vcmask 326656  }
 0x39e   : > { %v2094_v39 = vpop.permute.xlu1 %2093 }
 0x39f   : > { %v2425_v61 = vsel %vm2389_vm10, %v2388_v36, %v2094_v39  ;;  %v2092_v30 = vpop.permute.xlu0 %2091  ;;  %v2849_v36 = vld [vmem:[%s15072_s13 + $0x90] sm:$0xff]  ;;  %v2852_v39 = vld [vmem:[%s15072_s13 + $0xa8] sm:$0xff] }
 0x3a0   : > { %v2424_v58 = vsel %vm2389_vm10, %v2387_v21, %v2092_v30  ;;  %v2853_v21 = vld [vmem:[%s15072_s13 + $0xb0] sm:$0xff]  ;;  %v2855_v30 = vld [vmem:[%s15072_s13 + $0xc0] sm:$0xff] }
 0x3a1   : > { %9561 = vmatprep.mubr.msk.f32.mxu0 %vm2437_vm11, %v2424_v58  ;;  %v2859_v58 = vld [vmem:[%s15072_s13 + $0xe0] sm:$0xff] }
 0x3a2   : > { %9562 = vmatmul.mubr.msk.f32.gmra.mrb[34].mxu0 %vm2437_vm11, %v2425_v61  ;;  %v2856_v61 = vld [vmem:[%s15072_s13 + $0xc8] sm:$0xff]  ;;  %vm5192_vm11 = vcmask 392192  }
 0x3a7   : > { %v9542_v44 = vpop.f32.mrb[20].mxu0 }
 0x3a8   : > { %v2722_v5 = vadd.f32 %v12622_v22, %v9542_v44  ;;  %v2716_v42 = vpop.f32.mrb[21].mxu0  ;;  %v2858_v44 = vld [vmem:[%s15072_s13 + $0xd8] sm:$0xff] }
 0x3a9   : > { %v2717_v60 = vadd.f32 %v12622_v22, %v2716_v42  ;;  %v2861_v42 = vld [vmem:[%s15072_s13 + $0xf0] sm:$0xff] }
 0x3aa   : > { %v2816_v35 = vmax.f32 %v2722_v5, 0.0  ;;  %v2862_v5 = vld [vmem:[%s15072_s13 + $0xf8] sm:$0xff] }
 0x3ab   : > { %v2815_v34 = vmax.f32 %v2717_v60, 0.0  ;;  %v2865_v60 = vld [vmem:[%s15072_s13 + $0x110] sm:$0xff] }
 0x3ad   : > { %v10005_v8 = vpack.c.bf16 %v2816_v35, %v2815_v34 }
 0x3af   : > { %10006 = vmatpush1.bf16.msra.mxu1 %v10005_v8 }
 0x3b0   : > { %10007 = vmatprep.subr.bf16.mxu1 %v11173_v29 }
 0x3c7   : > { %v9545_v15 = vpop.f32.mrb[22].mxu0 }
 0x3c8   : > { %v2732_v49 = vadd.f32 %v12622_v22, %v9545_v15  ;;  %v2726_v52 = vpop.f32.mrb[23].mxu0 }
 0x3c9   : > { %v2727_v45 = vadd.f32 %v12622_v22, %v2726_v52 }
 0x3ca   : > { %v2818_v24 = vmax.f32 %v2732_v49, 0.0  ;;  %v2868_v49 = vld [vmem:[%s15072_s13 + $0x128] sm:$0xff] }
 0x3cb   : > { %v2817_v16 = vmax.f32 %v2727_v45, 0.0 }
 0x3cd   : > { %v10008_v54 = vpack.c.bf16 %v2818_v24, %v2817_v16  ;;  %v2867_v24 = vld [vmem:[%s15072_s13 + $0x120] sm:$0xff] }
 0x3cf   : > { %10009 = vmatpush1.bf16.msra.mxu1 %v10008_v54  ;;  %v2871_v54 = vld [vmem:[%s15072_s13 + $0x140] sm:$0xff] }
 0x3d0   : > { %10010 = vmatprep.subr.bf16.mxu1 %v11173_v29 }
 0x3e7   : > { %v9548_v11 = vpop.f32.mrb[24].mxu0 }
 0x3e8   : > { %v2742_v6 = vadd.f32 %v12622_v22, %v9548_v11  ;;  %v2736_v53 = vpop.f32.mrb[25].mxu0  ;;  %v2870_v11 = vld [vmem:[%s15072_s13 + $0x138] sm:$0xff] }
 0x3e9   : > { %v2737_v3 = vadd.f32 %v12622_v22, %v2736_v53 }
 0x3ea   : > { %v2820_v55 = vmax.f32 %v2742_v6, 0.0  ;;  %v2874_v6 = vld [vmem:[%s15072_s13 + $0x158] sm:$0xff] }
 0x3eb   : > { %v2819_v63 = vmax.f32 %v2737_v3, 0.0  ;;  %v2873_v3 = vld [vmem:[%s15072_s13 + $0x150] sm:$0xff] }
 0x3ed   : > { %v10011_v50 = vpack.c.bf16 %v2820_v55, %v2819_v63 }
 0x3ef   : > { %10012 = vmatpush1.bf16.msra.mxu1 %v10011_v50  ;;  %v2877_v50 = vld [vmem:[%s15072_s13 + $0x170] sm:$0xff] }
 0x3f0   : > { %10013 = vmatprep.subr.bf16.mxu1 %v11173_v29 }
 0x407   : > { %v9551_v46 = vpop.f32.mrb[26].mxu0 }
 0x408   : > { %v2752_v57 = vadd.f32 %v12622_v22, %v9551_v46  ;;  %v2746_v59 = vpop.f32.mrb[27].mxu0 }
 0x409   : > { %v2747_v62 = vadd.f32 %v12622_v22, %v2746_v59 }
 0x40a   : > { %v2822_v13 = vmax.f32 %v2752_v57, 0.0 }
 0x40b   : > { %v2821_v56 = vmax.f32 %v2747_v62, 0.0  ;;  %v2876_v62 = vld [vmem:[%s15072_s13 + $0x168] sm:$0xff] }
 0x40d   : > { %v10014_v7 = vpack.c.bf16 %v2822_v13, %v2821_v56  ;;  %v2880_v56 = vld [vmem:[%s15072_s13 + $0x188] sm:$0xff]  ;;  %v6933_v13 = vld [vmem:[%s15074_s15 + $0x10] sm:$0xff] }
 0x40f   : > { %10015 = vmatpush1.bf16.msra.mxu1 %v10014_v7  ;;  %v2879_v7 = vld [vmem:[%s15072_s13 + $0x180] sm:$0xff] }
 0x410   : > { %10016 = vmatprep.subr.bf16.mxu1 %v11173_v29 }
 0x428   : > { %v9554_v31 = vpop.f32.mrb[28].mxu0 }
 0x429   : > { %v2762_v38 = vadd.f32 %v12622_v22, %v9554_v31  ;;  %v2756_v23 = vpop.f32.mrb[29].mxu0  ;;  %v2883_v31 = vld [vmem:[%s15072_s13 + $0x1a0] sm:$0xff] }
 0x42a   : > { %v2757_v40 = vadd.f32 %v12622_v22, %v2756_v23  ;;  %v2886_v23 = vld [vmem:[%s15072_s13 + $0x1b8] sm:$0xff] }
 0x42b   : > { %v2824_v26 = vmax.f32 %v2762_v38, 0.0  ;;  %v2882_v38 = vld [vmem:[%s15072_s13 + $0x198] sm:$0xff] }
 0x42c   : > { %v2823_v18 = vmax.f32 %v2757_v40, 0.0  ;;  %v2885_v40 = vld [vmem:[%s15072_s13 + $0x1b0] sm:$0xff] }
 0x42e   : > { %v10017_v17 = vpack.c.bf16 %v2824_v26, %v2823_v18  ;;  %v2889_v26 = vld [vmem:[%s15072_s13 + $0x1d0] sm:$0xff]  ;;  %v2888_v18 = vld [vmem:[%s15072_s13 + $0x1c8] sm:$0xff] }
 0x430   : > { %10018 = vmatpush1.bf16.msra.mxu1 %v10017_v17  ;;  %v2892_v17 = vld [vmem:[%s15072_s13 + $0x1e8] sm:$0xff] }
 0x431   : > { %10019 = vmatprep.subr.bf16.mxu1 %v11173_v29 }
 0x435   : > { %v9557_v47 = vpop.f32.mrb[30].mxu0 }
 0x436   : > { %v2772_v12 = vadd.f32 %v12622_v22, %v9557_v47  ;;  %v2766_v9 = vpop.f32.mrb[31].mxu0  ;;  %v2891_v47 = vld [vmem:[%s15072_s13 + $0x1e0] sm:$0xff] }
 0x437   : > { %v2767_v33 = vadd.f32 %v12622_v22, %v2766_v9  ;;  %v2894_v9 = vld [vmem:[%s15072_s13 + $0x1f8] sm:$0xff] }
 0x438   : > { %v2826_v19 = vmax.f32 %v2772_v12, 0.0  ;;  %v2895_v12 = vld [vmem:[%s15072_s13 + $0x200] sm:$0xff] }
 0x439   : > { %v2825_v32 = vmax.f32 %v2767_v33, 0.0  ;;  %v2898_v33 = vld [vmem:[%s15072_s13 + $0x218] sm:$0xff] }
 0x43b   : > { %v10020_v41 = vpack.c.bf16 %v2826_v19, %v2825_v32  ;;  %v2897_v19 = vld [vmem:[%s15072_s13 + $0x210] sm:$0xff] }
 0x43c   : > { %v2901_v32 = vld [vmem:[%s15072_s13 + $0x230] sm:$0xff] }
 0x43d   : > { %10021 = vmatpush1.bf16.msra.mxu1 %v10020_v41  ;;  %v2900_v41 = vld [vmem:[%s15072_s13 + $0x228] sm:$0xff] }
 0x43e   : > { %10022 = vmatprep.subr.bf16.mxu1 %v11173_v29 }
 0x440   : > { %3147 = vmatmul.mubr.f32.vlgmr.msra.gmra.mrb[0].mxu1 %v2831_v25  ;;  %v2904_v25 = vld [vmem:[%s15072_s13 + $0x248] sm:$0xff] }
 0x441   : > { %3151 = vmatprep.mubr.f32.mxu1 %v2835_v10  ;;  %v2903_v10 = vld [vmem:[%s15072_s13 + $0x240] sm:$0xff] }
 0x444   : > { %3152 = vmatmul.mubr.f32.gmra.mrb[2].mxu1 %v2834_v20  ;;  %v2907_v20 = vld [vmem:[%s15072_s13 + $0x260] sm:$0xff] }
 0x445   : > { %3156 = vmatprep.mubr.f32.mxu1 %v2838_v43  ;;  %v2906_v43 = vld [vmem:[%s15072_s13 + $0x258] sm:$0xff] }
 0x448   : > { %3157 = vmatmul.mubr.f32.gmra.mrb[4].mxu1 %v2837_v27  ;;  %v2910_v27 = vld [vmem:[%s15072_s13 + $0x278] sm:$0xff] }
 0x449   : > { %3161 = vmatprep.mubr.f32.mxu1 %v2841_v14  ;;  %v2909_v14 = vld [vmem:[%s15072_s13 + $0x270] sm:$0xff] }
 0x44c   : > { %3162 = vmatmul.mubr.f32.gmra.mrb[6].mxu1 %v2840_v48  ;;  %v2913_v48 = vld [vmem:[%s15072_s13 + $0x290] sm:$0xff] }
 0x44d   : > { %3166 = vmatprep.mubr.f32.mxu1 %v2844_v4  ;;  %v2912_v4 = vld [vmem:[%s15072_s13 + $0x288] sm:$0xff] }
 0x450   : > { %3167 = vmatmul.mubr.f32.gmra.mrb[8].mxu1 %v2843_v0  ;;  %v2916_v0 = vld [vmem:[%s15072_s13 + $0x2a8] sm:$0xff] }
 0x451   : > { %3171 = vmatprep.mubr.f32.mxu1 %v2847_v1  ;;  %v2915_v1 = vld [vmem:[%s15072_s13 + $0x2a0] sm:$0xff] }
 0x454   : > { %3172 = vmatmul.mubr.f32.gmra.mrb[10].mxu1 %v2846_v51  ;;  %v2919_v51 = vld [vmem:[%s15072_s13 + $0x2c0] sm:$0xff] }
 0x455   : > { %3176 = vmatprep.mubr.f32.mxu1 %v2850_v28  ;;  %v2918_v28 = vld [vmem:[%s15072_s13 + $0x2b8] sm:$0xff] }
 0x458   : > { %3177 = vmatmul.mubr.f32.gmra.mrb[12].mxu1 %v2849_v36  ;;  %v2922_v36 = vld [vmem:[%s15072_s13 + $0x2d8] sm:$0xff] }
 0x459   : > { %3181 = vmatprep.mubr.f32.mxu1 %v2853_v21  ;;  %v2921_v21 = vld [vmem:[%s15072_s13 + $0x2d0] sm:$0xff] }
 0x45c   : > { %3182 = vmatmul.mubr.f32.gmra.mrb[14].mxu1 %v2852_v39  ;;  %v2925_v39 = vld [vmem:[%s15072_s13 + $0x2f0] sm:$0xff] }
 0x45d   : > { %3186 = vmatprep.mubr.f32.mxu1 %v2856_v61  ;;  %v2924_v61 = vld [vmem:[%s15072_s13 + $0x2e8] sm:$0xff] }
 0x460   : > { %3187 = vmatmul.mubr.f32.gmra.mrb[16].mxu1 %v2855_v30  ;;  %v2928_v30 = vld [vmem:[%s15072_s13 + $0x308] sm:$0xff] }
 0x461   : > { %3191 = vmatprep.mubr.f32.mxu1 %v2859_v58  ;;  %v2927_v58 = vld [vmem:[%s15072_s13 + $0x300] sm:$0xff] }
 0x464   : > { %3192 = vmatmul.mubr.f32.gmra.mrb[18].mxu1 %v2858_v44  ;;  %v2931_v44 = vld [vmem:[%s15072_s13 + $0x320] sm:$0xff] }
 0x465   : > { %3196 = vmatprep.mubr.f32.mxu1 %v2862_v5  ;;  %v2930_v5 = vld [vmem:[%s15072_s13 + $0x318] sm:$0xff] }
 0x468   : > { %v9560_v35 = vpop.f32.mrb[32].mxu0  ;;  %3197 = vmatmul.mubr.f32.gmra.mrb[20].mxu1 %v2861_v42  ;;  %v2934_v42 = vld [vmem:[%s15072_s13 + $0x338] sm:$0xff] }
 0x469   : > { %v2782_v34 = vadd.f32 %v12622_v22, %v9560_v35  ;;  %v2776_v8 = vpop.f32.mrb[33].mxu0  ;;  %3201 = vmatprep.mubr.f32.mxu1 %v2865_v60  ;;  %v2933_v60 = vld [vmem:[%s15072_s13 + $0x330] sm:$0xff] }
 0x46a   : > { %v2777_v15 = vadd.f32 %v12622_v22, %v2776_v8  ;;  %v2937_v35 = vld [vmem:[%s15072_s13 + $0x350] sm:$0xff]  ;;  %v2940_v8 = vld [vmem:[%s15072_s13 + $0x368] sm:$0xff] }
 0x46b   : > { %v2828_v52 = vmax.f32 %v2782_v34, 0.0  ;;  %v2936_v34 = vld [vmem:[%s15072_s13 + $0x348] sm:$0xff] }
 0x46c   : > { %v2827_v45 = vmax.f32 %v2777_v15, 0.0  ;;  %3202 = vmatmul.mubr.f32.gmra.mrb[22].mxu1 %v2864_v2  ;;  %v2939_v2 = vld [vmem:[%s15072_s13 + $0x360] sm:$0xff] }
 0x46d   : > { %3206 = vmatprep.mubr.f32.mxu1 %v2868_v49  ;;  %v2943_v15 = vld [vmem:[%s15072_s13 + $0x380] sm:$0xff]  ;;  %v2942_v49 = vld [vmem:[%s15072_s13 + $0x378] sm:$0xff] }
 0x46e   : > { %v10023_v16 = vpack.c.bf16 %v2828_v52, %v2827_v45  ;;  %v2946_v52 = vld [vmem:[%s15072_s13 + $0x398] sm:$0xff]  ;;  %v2945_v45 = vld [vmem:[%s15072_s13 + $0x390] sm:$0xff] }
 0x470   : > { %3207 = vmatmul.mubr.f32.gmra.mrb[24].mxu1 %v2867_v24  ;;  %v2949_v24 = vld [vmem:[%s15072_s13 + $0x3b0] sm:$0xff] }
 0x471   : > { %10024 = vmatpush3.bf16.msra.mxu1 %v10023_v16  ;;  %3211 = vmatprep.mubr.f32.mxu1 %v2871_v54  ;;  %v2948_v16 = vld [vmem:[%s15072_s13 + $0x3a8] sm:$0xff] }
 0x472   : > { %10025 = vmatprep.subr.bf16.mxu1 %v11173_v29  ;;  %v2952_v54 = vld [vmem:[%s15072_s13 + $0x3c8] sm:$0xf] }
 0x474   : > { %3212 = vmatmul.mubr.f32.gmra.mrb[26].mxu1 %v2870_v11  ;;  %v2951_v11 = vld [vmem:[%s15072_s13 + $0x3c0] sm:$0xf] }
 0x475   : > { %v9563_v53 = vpop.f32.mrb[34].mxu0  ;;  %3216 = vmatprep.mubr.f32.mxu1 %v2874_v6  ;;  %v11175_v6 = vmov 0.0  }
 0x476   : > { %v2792_v55 = vadd.f32 %v12622_v22, %v9563_v53  ;;  %v2786_v63 = vpop.f32.mrb[35].mxu0  ;;  %v2833_v53 = vld [vmem:[%s15072_s13 + $0x10] sm:$0xff] }
 0x477   : > { %v2787_v46 = vadd.f32 %v12622_v22, %v2786_v63  ;;  %v2842_v63 = vld [vmem:[%s15072_s13 + $0x58] sm:$0xff] }
 0x478   : > { %v2830_v57 = vmax.f32 %v2792_v55, 0.0  ;;  %3217 = vmatmul.mubr.f32.gmra.mrb[28].mxu1 %v2873_v3  ;;  %v2836_v3 = vld [vmem:[%s15072_s13 + $0x28] sm:$0xff]  ;;  %v2839_v55 = vld [vmem:[%s15072_s13 + $0x40] sm:$0xff] }
 0x479   : > { %v2829_v59 = vmax.f32 %v2787_v46, 0.0  ;;  %3221 = vmatprep.mubr.f32.mxu1 %v2877_v50  ;;  %v2845_v50 = vld [vmem:[%s15072_s13 + $0x70] sm:$0xff]  ;;  %v2848_v46 = vld [vmem:[%s15072_s13 + $0x88] sm:$0xff] }
 0x47b   : > { %v10026_v22 = vpack.c.bf16 %v2830_v57, %v2829_v59  ;;  %v2851_v57 = vld [vmem:[%s15072_s13 + $0xa0] sm:$0xff]  ;;  %v2854_v59 = vld [vmem:[%s15072_s13 + $0xb8] sm:$0xff] }
 0x47c   : > { %3222 = vmatmul.mubr.f32.gmra.mrb[30].mxu1 %v2876_v62  ;;  %v2857_v62 = vld [vmem:[%s15072_s13 + $0xd0] sm:$0xff] }
 0x47d   : > { %10028 = vmatpush3.bf16.msk.msra.mxu1 %vm12787_vm14, %v10026_v22  ;;  %3226 = vmatprep.mubr.f32.mxu1 %v2880_v56  ;;  %v2860_v56 = vld [vmem:[%s15072_s13 + $0xe8] sm:$0xff]  ;;  %v2863_v22 = vld [vmem:[%s15072_s13 + $0x100] sm:$0xff] }
 0x480   : > { %3227 = vmatmul.mubr.f32.gmra.mrb[32].mxu1 %v2879_v7  ;;  %v2866_v7 = vld [vmem:[%s15072_s13 + $0x118] sm:$0xff] }
 0x481   : > { %3231 = vmatprep.mubr.f32.mxu1 %v2883_v31  ;;  %v2869_v31 = vld [vmem:[%s15072_s13 + $0x130] sm:$0xff] }
 0x484   : > { %3232 = vmatmul.mubr.f32.gmra.mrb[34].mxu1 %v2882_v38  ;;  %v2872_v38 = vld [vmem:[%s15072_s13 + $0x148] sm:$0xff] }
 0x485   : > { %3236 = vmatprep.mubr.f32.mxu1 %v2886_v23  ;;  %v2875_v23 = vld [vmem:[%s15072_s13 + $0x160] sm:$0xff] }
 0x488   : > { %3237 = vmatmul.mubr.f32.gmra.mrb[36].mxu1 %v2885_v40  ;;  %v2878_v40 = vld [vmem:[%s15072_s13 + $0x178] sm:$0xff] }
 0x489   : > { %3241 = vmatprep.mubr.f32.mxu1 %v2889_v26  ;;  %v2881_v26 = vld [vmem:[%s15072_s13 + $0x190] sm:$0xff] }
 0x48c   : > { %3242 = vmatmul.mubr.f32.gmra.mrb[38].mxu1 %v2888_v18  ;;  %v2884_v18 = vld [vmem:[%s15072_s13 + $0x1a8] sm:$0xff] }
 0x48d   : > { %3246 = vmatprep.mubr.f32.mxu1 %v2892_v17  ;;  %v2887_v17 = vld [vmem:[%s15072_s13 + $0x1c0] sm:$0xff] }
 0x490   : > { %3247 = vmatmul.mubr.f32.gmra.mrb[40].mxu1 %v2891_v47  ;;  %v2890_v47 = vld [vmem:[%s15072_s13 + $0x1d8] sm:$0xff] }
 0x491   : > { %3251 = vmatprep.mubr.f32.mxu1 %v2895_v12  ;;  %v2893_v12 = vld [vmem:[%s15072_s13 + $0x1f0] sm:$0xff] }
 0x494   : > { %3252 = vmatmul.mubr.f32.gmra.mrb[42].mxu1 %v2894_v9  ;;  %v2896_v9 = vld [vmem:[%s15072_s13 + $0x208] sm:$0xff] }
 0x495   : > { %3256 = vmatprep.mubr.f32.mxu1 %v2898_v33  ;;  %v2899_v33 = vld [vmem:[%s15072_s13 + $0x220] sm:$0xff] }
 0x498   : > { %3257 = vmatmul.mubr.f32.gmra.mrb[44].mxu1 %v2897_v19  ;;  %v2902_v19 = vld [vmem:[%s15072_s13 + $0x238] sm:$0xff] }
 0x499   : > { %3261 = vmatprep.mubr.f32.mxu1 %v2901_v32  ;;  %v2905_v32 = vld [vmem:[%s15072_s13 + $0x250] sm:$0xff] }
 0x49c   : > { %3262 = vmatmul.mubr.f32.gmra.mrb[46].mxu1 %v2900_v41  ;;  %v2908_v41 = vld [vmem:[%s15072_s13 + $0x268] sm:$0xff] }
 0x49d   : > { %3266 = vmatprep.mubr.f32.mxu1 %v2904_v25  ;;  %v2911_v25 = vld [vmem:[%s15072_s13 + $0x280] sm:$0xff] }
 0x4a0   : > { %3267 = vmatmul.mubr.f32.gmra.mrb[48].mxu1 %v2903_v10  ;;  %v2914_v10 = vld [vmem:[%s15072_s13 + $0x298] sm:$0xff] }
 0x4a1   : > { %3271 = vmatprep.mubr.f32.mxu1 %v2907_v20  ;;  %v2917_v20 = vld [vmem:[%s15072_s13 + $0x2b0] sm:$0xff] }
 0x4a4   : > { %3272 = vmatmul.mubr.f32.gmra.mrb[50].mxu1 %v2906_v43  ;;  %v2920_v43 = vld [vmem:[%s15072_s13 + $0x2c8] sm:$0xff] }
 0x4a5   : > { %3276 = vmatprep.mubr.f32.mxu1 %v2910_v27  ;;  %v2923_v27 = vld [vmem:[%s15072_s13 + $0x2e0] sm:$0xff] }
 0x4a8   : > { %3277 = vmatmul.mubr.f32.gmra.mrb[52].mxu1 %v2909_v14  ;;  %v2926_v14 = vld [vmem:[%s15072_s13 + $0x2f8] sm:$0xff] }
 0x4a9   : > { %3281 = vmatprep.mubr.f32.mxu1 %v2913_v48  ;;  %v2929_v48 = vld [vmem:[%s15072_s13 + $0x310] sm:$0xff] }
 0x4ac   : > { %3282 = vmatmul.mubr.f32.gmra.mrb[54].mxu1 %v2912_v4  ;;  %v2932_v4 = vld [vmem:[%s15072_s13 + $0x328] sm:$0xff] }
 0x4ad   : > { %3286 = vmatprep.mubr.f32.mxu1 %v2916_v0  ;;  %v2935_v0 = vld [vmem:[%s15072_s13 + $0x340] sm:$0xff] }
 0x4b0   : > { %3287 = vmatmul.mubr.f32.gmra.mrb[56].mxu1 %v2915_v1  ;;  %v2938_v1 = vld [vmem:[%s15072_s13 + $0x358] sm:$0xff] }
 0x4b1   : > { %3291 = vmatprep.mubr.f32.mxu1 %v2919_v51  ;;  %v2941_v51 = vld [vmem:[%s15072_s13 + $0x370] sm:$0xff] }
 0x4b4   : > { %3292 = vmatmul.mubr.f32.gmra.mrb[58].mxu1 %v2918_v28  ;;  %v2944_v28 = vld [vmem:[%s15072_s13 + $0x388] sm:$0xff] }
 0x4b5   : > { %3296 = vmatprep.mubr.f32.mxu1 %v2922_v36  ;;  %v2947_v36 = vld [vmem:[%s15072_s13 + $0x3a0] sm:$0xff] }
 0x4b8   : > { %3297 = vmatmul.mubr.f32.gmra.mrb[60].mxu1 %v2921_v21  ;;  %v2950_v21 = vld [vmem:[%s15072_s13 + $0x3b8] sm:$0xff] }
 0x4b9   : > { %3301 = vmatprep.mubr.f32.mxu1 %v2925_v39  ;;  %v2953_v39 = vld [vmem:[%s15072_s13 + $0x3d0] sm:$0xf] }
 0x4bc   : > { %3302 = vmatmul.mubr.f32.gmra.mrb[62].mxu1 %v2924_v61 }
 0x4bd   : > { %3306 = vmatprep.mubr.f32.mxu1 %v2928_v30 }
 0x4c0   : > { %3307 = vmatmul.mubr.f32.gmra.mrb[64].mxu1 %v2927_v58 }
 0x4c1   : > { %3311 = vmatprep.mubr.f32.mxu1 %v2931_v44 }
 0x4c4   : > { %3312 = vmatmul.mubr.f32.gmra.mrb[66].mxu1 %v2930_v5 }
 0x4c5   : > { %3316 = vmatprep.mubr.f32.mxu1 %v2934_v42 }
 0x4c8   : > { %3317 = vmatmul.mubr.f32.gmra.mrb[68].mxu1 %v2933_v60 }
 0x4c9   : > { %3321 = vmatprep.mubr.f32.mxu1 %v2937_v35 }
 0x4cc   : > { %3322 = vmatmul.mubr.f32.gmra.mrb[70].mxu1 %v2936_v34 }
 0x4cd   : > { %3326 = vmatprep.mubr.f32.mxu1 %v2940_v8 }
 0x4d0   : > { %3327 = vmatmul.mubr.f32.gmra.mrb[72].mxu1 %v2939_v2 }
 0x4d1   : > { %3331 = vmatprep.mubr.f32.mxu1 %v2943_v15 }
 0x4d4   : > { %3332 = vmatmul.mubr.f32.gmra.mrb[74].mxu1 %v2942_v49 }
 0x4d5   : > { %3336 = vmatprep.mubr.f32.mxu1 %v2946_v52 }
 0x4d8   : > { %3337 = vmatmul.mubr.f32.gmra.mrb[76].mxu1 %v2945_v45 }
 0x4d9   : > { %3341 = vmatprep.mubr.f32.mxu1 %v2949_v24 }
 0x4dc   : > { %3342 = vmatmul.mubr.f32.gmra.mrb[78].mxu1 %v2948_v16 }
 0x4dd   : > { %3346 = vmatprep.mubr.f32.mxu1 %v2952_v54 }
 0x4e0   : > { %3347 = vmatmul.mubr.f32.gmra.mrb[80].mxu1 %v2951_v11 }
 0x4e1   : > { %9572 = vmatprep.mubr.msk.f32.mxu1 %vm11174_vm15, %v11175_v6 }
 0x4e4   : > { %9573 = vmatmul.mubr.msk.f32.vlgmr.msra.gmra.mrb[0].mxu1 %vm2954_vm0, %v2833_v53 }
 0x4e5   : > { %9575 = vmatprep.mubr.msk.f32.mxu1 %vm11174_vm15, %v11175_v6 }
 0x4e8   : > { %9576 = vmatmul.mubr.msk.f32.gmra.mrb[2].mxu1 %vm2954_vm0, %v2836_v3 }
 0x4e9   : > { %9578 = vmatprep.mubr.msk.f32.mxu1 %vm11174_vm15, %v11175_v6 }
 0x4ec   : > { %9579 = vmatmul.mubr.msk.f32.gmra.mrb[4].mxu1 %vm2954_vm0, %v2839_v55 }
 0x4ed   : > { %9581 = vmatprep.mubr.msk.f32.mxu1 %vm11174_vm15, %v11175_v6 }
 0x4f0   : > { %9582 = vmatmul.mubr.msk.f32.gmra.mrb[6].mxu1 %vm2954_vm0, %v2842_v63 }
 0x4f1   : > { %9584 = vmatprep.mubr.msk.f32.mxu1 %vm11174_vm15, %v11175_v6 }
 0x4f4   : > { %9585 = vmatmul.mubr.msk.f32.gmra.mrb[8].mxu1 %vm2954_vm0, %v2845_v50 }
 0x4f5   : > { %9587 = vmatprep.mubr.msk.f32.mxu1 %vm11174_vm15, %v11175_v6 }
 0x4f8   : > { %9588 = vmatmul.mubr.msk.f32.gmra.mrb[10].mxu1 %vm2954_vm0, %v2848_v46 }
 0x4f9   : > { %9590 = vmatprep.mubr.msk.f32.mxu1 %vm11174_vm15, %v11175_v6 }
 0x4fc   : > { %9591 = vmatmul.mubr.msk.f32.gmra.mrb[12].mxu1 %vm2954_vm0, %v2851_v57 }
 0x4fd   : > { %9593 = vmatprep.mubr.msk.f32.mxu1 %vm11174_vm15, %v11175_v6 }
 0x500   : > { %9594 = vmatmul.mubr.msk.f32.gmra.mrb[14].mxu1 %vm2954_vm0, %v2854_v59 }
 0x501   : > { %9596 = vmatprep.mubr.msk.f32.mxu1 %vm11174_vm15, %v11175_v6 }
 0x504   : > { %9597 = vmatmul.mubr.msk.f32.gmra.mrb[16].mxu1 %vm2954_vm0, %v2857_v62 }
 0x505   : > { %9599 = vmatprep.mubr.msk.f32.mxu1 %vm11174_vm15, %v11175_v6 }
 0x508   : > { %9600 = vmatmul.mubr.msk.f32.gmra.mrb[18].mxu1 %vm2954_vm0, %v2860_v56 }
 0x509   : > { %9602 = vmatprep.mubr.msk.f32.mxu1 %vm11174_vm15, %v11175_v6 }
 0x50c   : > { %9603 = vmatmul.mubr.msk.f32.gmra.mrb[20].mxu1 %vm2954_vm0, %v2863_v22 }
 0x50d   : > { %9605 = vmatprep.mubr.msk.f32.mxu1 %vm11174_vm15, %v11175_v6 }
 0x510   : > { %9606 = vmatmul.mubr.msk.f32.gmra.mrb[22].mxu1 %vm2954_vm0, %v2866_v7 }
 0x511   : > { %9608 = vmatprep.mubr.msk.f32.mxu1 %vm11174_vm15, %v11175_v6 }
 0x514   : > { %9609 = vmatmul.mubr.msk.f32.gmra.mrb[24].mxu1 %vm2954_vm0, %v2869_v31 }
 0x515   : > { %9611 = vmatprep.mubr.msk.f32.mxu1 %vm11174_vm15, %v11175_v6 }
 0x518   : > { %9612 = vmatmul.mubr.msk.f32.gmra.mrb[26].mxu1 %vm2954_vm0, %v2872_v38  ;;  %v5303_v38 = vld [vmem:[#allocation11] sm:$0xff] }
 0x519   : > { %9614 = vmatprep.mubr.msk.f32.mxu1 %vm11174_vm15, %v11175_v6 }
 0x51c   : > { %9615 = vmatmul.mubr.msk.f32.gmra.mrb[28].mxu1 %vm2954_vm0, %v2875_v23  ;;  %v5304_v23 = vld [vmem:[#allocation11 + $0x8] sm:$0xff] }
 0x51d   : > { %9617 = vmatprep.mubr.msk.f32.mxu1 %vm11174_vm15, %v11175_v6 }
 0x520   : > { %9618 = vmatmul.mubr.msk.f32.gmra.mrb[30].mxu1 %vm2954_vm0, %v2878_v40  ;;  %v10029_v40 = vpack.c.bf16 %v5304_v23, %v5303_v38 }
 0x521   : > { %9620 = vmatprep.mubr.msk.f32.mxu1 %vm11174_vm15, %v11175_v6 }
 0x522   : > { %10030 = vmatprep.subr.bf16.mxu0 %v10029_v40 }
 0x523   : > { %10032 = vmatpush3.bf16.msra.mxu0 %v10029_v40 }
 0x524   : > { %9621 = vmatmul.mubr.msk.f32.gmra.mrb[32].mxu1 %vm2954_vm0, %v2881_v26 }
 0x525   : > { %9623 = vmatprep.mubr.msk.f32.mxu1 %vm11174_vm15, %v11175_v6 }
 0x528   : > { %9624 = vmatmul.mubr.msk.f32.gmra.mrb[34].mxu1 %vm2954_vm0, %v2884_v18 }
 0x529   : > { %9626 = vmatprep.mubr.msk.f32.mxu1 %vm11174_vm15, %v11175_v6 }
 0x52c   : > { %9627 = vmatmul.mubr.msk.f32.gmra.mrb[36].mxu1 %vm2954_vm0, %v2887_v17 }
 0x52d   : > { %9629 = vmatprep.mubr.msk.f32.mxu1 %vm11174_vm15, %v11175_v6 }
 0x530   : > { %9630 = vmatmul.mubr.msk.f32.gmra.mrb[38].mxu1 %vm2954_vm0, %v2890_v47  ;;  %v5305_v47 = vld [vmem:[#allocation11 + $0x10] sm:$0xff] }
 0x531   : > { %9632 = vmatprep.mubr.msk.f32.mxu1 %vm11174_vm15, %v11175_v6 }
 0x534   : > { %9633 = vmatmul.mubr.msk.f32.gmra.mrb[40].mxu1 %vm2954_vm0, %v2893_v12  ;;  %v5306_v12 = vld [vmem:[#allocation11 + $0x18] sm:$0xff] }
 0x535   : > { %9635 = vmatprep.mubr.msk.f32.mxu1 %vm11174_vm15, %v11175_v6 }
 0x538   : > { %9636 = vmatmul.mubr.msk.f32.gmra.mrb[42].mxu1 %vm2954_vm0, %v2896_v9  ;;  %v10033_v9 = vpack.c.bf16 %v5306_v12, %v5305_v47 }
 0x539   : > { %9638 = vmatprep.mubr.msk.f32.mxu1 %vm11174_vm15, %v11175_v6 }
 0x53a   : > { %10034 = vmatprep.subr.bf16.mxu0 %v10033_v9 }
 0x53b   : > { %10036 = vmatpush3.bf16.msra.mxu0 %v10033_v9 }
 0x53c   : > { %9639 = vmatmul.mubr.msk.f32.gmra.mrb[44].mxu1 %vm2954_vm0, %v2899_v33 }
 0x53d   : > { %9641 = vmatprep.mubr.msk.f32.mxu1 %vm11174_vm15, %v11175_v6 }
 0x540   : > { %9642 = vmatmul.mubr.msk.f32.gmra.mrb[46].mxu1 %vm2954_vm0, %v2902_v19 }
 0x541   : > { %9644 = vmatprep.mubr.msk.f32.mxu1 %vm11174_vm15, %v11175_v6 }
 0x544   : > { %9645 = vmatmul.mubr.msk.f32.gmra.mrb[48].mxu1 %vm2954_vm0, %v2905_v32 }
 0x545   : > { %9647 = vmatprep.mubr.msk.f32.mxu1 %vm11174_vm15, %v11175_v6 }
 0x548   : > { %9648 = vmatmul.mubr.msk.f32.gmra.mrb[50].mxu1 %vm2954_vm0, %v2908_v41 }
 0x549   : > { %9650 = vmatprep.mubr.msk.f32.mxu1 %vm11174_vm15, %v11175_v6 }
 0x54c   : > { %9651 = vmatmul.mubr.msk.f32.gmra.mrb[52].mxu1 %vm2954_vm0, %v2911_v25  ;;  %v5307_v25 = vld [vmem:[#allocation11 + $0x20] sm:$0xff] }
 0x54d   : > { %9653 = vmatprep.mubr.msk.f32.mxu1 %vm11174_vm15, %v11175_v6 }
 0x550   : > { %9654 = vmatmul.mubr.msk.f32.gmra.mrb[54].mxu1 %vm2954_vm0, %v2914_v10  ;;  %v5308_v10 = vld [vmem:[#allocation11 + $0x28] sm:$0xff] }
 0x551   : > { %9656 = vmatprep.mubr.msk.f32.mxu1 %vm11174_vm15, %v11175_v6 }
 0x554   : > { %9657 = vmatmul.mubr.msk.f32.gmra.mrb[56].mxu1 %vm2954_vm0, %v2917_v20  ;;  %v10037_v20 = vpack.c.bf16 %v5308_v10, %v5307_v25 }
 0x555   : > { %9659 = vmatprep.mubr.msk.f32.mxu1 %vm11174_vm15, %v11175_v6 }
 0x556   : > { %10038 = vmatprep.subr.bf16.mxu0 %v10037_v20 }
 0x557   : > { %10040 = vmatpush3.bf16.msra.mxu0 %v10037_v20 }
 0x558   : > { %9660 = vmatmul.mubr.msk.f32.gmra.mrb[58].mxu1 %vm2954_vm0, %v2920_v43 }
 0x559   : > { %9662 = vmatprep.mubr.msk.f32.mxu1 %vm11174_vm15, %v11175_v6 }
 0x55c   : > { %9663 = vmatmul.mubr.msk.f32.gmra.mrb[60].mxu1 %vm2954_vm0, %v2923_v27 }
 0x55d   : > { %9665 = vmatprep.mubr.msk.f32.mxu1 %vm11174_vm15, %v11175_v6 }
 0x560   : > { %9666 = vmatmul.mubr.msk.f32.gmra.mrb[62].mxu1 %vm2954_vm0, %v2926_v14 }
 0x561   : > { %9668 = vmatprep.mubr.msk.f32.mxu1 %vm11174_vm15, %v11175_v6 }
 0x564   : > { %9669 = vmatmul.mubr.msk.f32.gmra.mrb[64].mxu1 %vm2954_vm0, %v2929_v48  ;;  %v5309_v48 = vld [vmem:[#allocation11 + $0x30] sm:$0xff] }
 0x565   : > { %9671 = vmatprep.mubr.msk.f32.mxu1 %vm11174_vm15, %v11175_v6 }
 0x568   : > { %9672 = vmatmul.mubr.msk.f32.gmra.mrb[66].mxu1 %vm2954_vm0, %v2932_v4  ;;  %v5310_v4 = vld [vmem:[#allocation11 + $0x38] sm:$0xff] }
 0x569   : > { %9674 = vmatprep.mubr.msk.f32.mxu1 %vm11174_vm15, %v11175_v6 }
 0x56c   : > { %9675 = vmatmul.mubr.msk.f32.gmra.mrb[68].mxu1 %vm2954_vm0, %v2935_v0  ;;  %v10041_v0 = vpack.c.bf16 %v5310_v4, %v5309_v48 }
 0x56d   : > { %9677 = vmatprep.mubr.msk.f32.mxu1 %vm11174_vm15, %v11175_v6 }
 0x56e   : > { %10042 = vmatprep.subr.bf16.mxu0 %v10041_v0 }
 0x56f   : > { %10044 = vmatpush3.bf16.msra.mxu0 %v10041_v0 }
 0x570   : > { %9678 = vmatmul.mubr.msk.f32.gmra.mrb[70].mxu1 %vm2954_vm0, %v2938_v1 }
 0x571   : > { %9680 = vmatprep.mubr.msk.f32.mxu1 %vm11174_vm15, %v11175_v6 }
 0x574   : > { %9681 = vmatmul.mubr.msk.f32.gmra.mrb[72].mxu1 %vm2954_vm0, %v2941_v51 }
 0x575   : > { %9683 = vmatprep.mubr.msk.f32.mxu1 %vm11174_vm15, %v11175_v6 }
 0x578   : > { %9684 = vmatmul.mubr.msk.f32.gmra.mrb[74].mxu1 %vm2954_vm0, %v2944_v28 }
 0x579   : > { %9686 = vmatprep.mubr.msk.f32.mxu1 %vm11174_vm15, %v11175_v6 }
 0x57c   : > { %9687 = vmatmul.mubr.msk.f32.gmra.mrb[76].mxu1 %vm2954_vm0, %v2947_v36 }
 0x57d   : > { %9689 = vmatprep.mubr.msk.f32.mxu1 %vm11174_vm15, %v11175_v6 }
 0x580   : > { %9690 = vmatmul.mubr.msk.f32.gmra.mrb[78].mxu1 %vm2954_vm0, %v2950_v21  ;;  %v5311_v21 = vld [vmem:[#allocation11 + $0x40] sm:$0xff] }
 0x581   : > { %9692 = vmatprep.mubr.msk.f32.mxu1 %vm11174_vm15, %v11175_v6  ;;  %9711 = vmatprep.subr.mxu0 %v5311_v21 }
 0x582   : > { %9712 = vmatpush3.msra.mxu0 %v5311_v21 }
 0x584   : > { %9693 = vmatmul.mubr.msk.f32.gmra.mrb[80].mxu1 %vm2954_vm0, %v2953_v39  ;;  %vm5266_vm0 = vcmask 523264  }
 0x5b7   : > { %v3418_v61 = vpop.f32.mrb[0].mxu1 }
 0x5b8   : > { %3623 = vst.msk [vmem:[#allocation3] sm:$0xff] %vm3622_vm4, %v3418_v61  ;;  %v9574_v30 = vpop.f32.mrb[1].mxu1 }
 0x5bb   : > { %v3423_v58 = vpop.f32.mrb[2].mxu1 }
 0x5bc   : > { %3624 = vst.msk [vmem:[#allocation3 + $0x8] sm:$0xff] %vm3622_vm4, %v3423_v58  ;;  %v9577_v44 = vpop.f32.mrb[3].mxu1 }
 0x5bf   : > { %v3428_v5 = vpop.f32.mrb[4].mxu1 }
 0x5c0   : > { %3625 = vst.msk [vmem:[#allocation3 + $0x10] sm:$0xff] %vm3622_vm4, %v3428_v5  ;;  %v9580_v42 = vpop.f32.mrb[5].mxu1 }
 0x5c3   : > { %v3433_v60 = vpop.f32.mrb[6].mxu1  ;;  %v3701_v35 = vld [vmem:[#allocation3 + $0x1] sm:$0xff] }
 0x5c4   : > { %3626 = vst.msk [vmem:[#allocation3 + $0x18] sm:$0xff] %vm3622_vm4, %v3433_v60  ;;  %3959 = vrot.lane.b32.xlu0 %v3701_v35, %s11176_s30  ;;  %v9583_v34 = vpop.f32.mrb[7].mxu1  ;;  %v3737_v2 = vld [vmem:[#allocation3 + $0x2] sm:$0xff] }
 0x5c7   : > { %v3438_v8 = vpop.f32.mrb[8].mxu1  ;;  %v3702_v15 = vld [vmem:[#allocation3 + $0x9] sm:$0xff] }
 0x5c8   : > { %3627 = vst.msk [vmem:[#allocation3 + $0x20] sm:$0xff] %vm3622_vm4, %v3438_v8  ;;  %4103 = vrot.lane.b32.xlu0 %v3737_v2, %s11177_s19  ;;  %3961 = vrot.lane.b32.xlu1 %v3702_v15, %s11176_s30  ;;  %v9586_v49 = vpop.f32.mrb[9].mxu1  ;;  %v3738_v45 = vld [vmem:[#allocation3 + $0xa] sm:$0xff] }
 0x5cb   : > { %v3443_v52 = vpop.f32.mrb[10].mxu1  ;;  %v3739_v24 = vld [vmem:[#allocation3 + $0x12] sm:$0xff] }
 0x5cc   : > { %3628 = vst.msk [vmem:[#allocation3 + $0x28] sm:$0xff] %vm3622_vm4, %v3443_v52  ;;  %4105 = vrot.lane.b32.xlu1 %v3738_v45, %s11177_s19  ;;  %4214 = vrot.lane.b32.xlu0 %v3739_v24, %s11172_s20  ;;  %v9589_v16 = vpop.f32.mrb[11].mxu1  ;;  %v3776_v11 = vld [vmem:[#allocation3 + $0x13] sm:$0xff] }
 0x5cd   : > { %v3703_v53 = vld [vmem:[#allocation3 + $0x11] sm:$0xff] }
 0x5ce   : > { %v3812_v63 = vld [vmem:[#allocation3 + $0x14] sm:$0xff] }
 0x5cf   : > { %v3448_v54 = vpop.f32.mrb[12].mxu1  ;;  %v3777_v50 = vld [vmem:[#allocation3 + $0x1b] sm:$0xff] }
 0x5d0   : > { %3629 = vst.msk [vmem:[#allocation3 + $0x30] sm:$0xff] %vm3622_vm4, %v3448_v54  ;;  %4358 = vrot.lane.b32.xlu0 %v3776_v11, %s11178_s27  ;;  %3963 = vrot.lane.b32.xlu1 %v3703_v53, %s11176_s30  ;;  %v9592_v3 = vpop.f32.mrb[13].mxu1  ;;  %v3704_v59 = vld [vmem:[#allocation3 + $0x19] sm:$0xff] }
 0x5d1   : > { %v3740_v22 = vld [vmem:[#allocation3 + $0x1a] sm:$0xff] }
 0x5d2   : > { %v3813_v7 = vld [vmem:[#allocation3 + $0x1c] sm:$0xff] }
 0x5d3   : > { %v3453_v55 = vpop.f32.mrb[14].mxu1  ;;  %v3814_v18 = vld [vmem:[#allocation3 + $0x24] sm:$0xff] }
 0x5d4   : > { %3630 = vst.msk [vmem:[#allocation3 + $0x38] sm:$0xff] %vm3622_vm4, %v3453_v55  ;;  %4502 = vrot.lane.b32.xlu1 %v3812_v63, %s11179_s22  ;;  %4360 = vrot.lane.b32.xlu0 %v3777_v50, %s11178_s27  ;;  %v9595_v46 = vpop.f32.mrb[15].mxu1  ;;  %v3741_v19 = vld [vmem:[#allocation3 + $0x22] sm:$0xff] }
 0x5d5   : > { %v3705_v32 = vld [vmem:[#allocation3 + $0x21] sm:$0xff] }
 0x5d6   : > { %v3851_v27 = vld [vmem:[#allocation3 + $0x25] sm:$0xff] }
 0x5d7   : > { %v3458_v57 = vpop.f32.mrb[16].mxu1  ;;  %v3778_v51 = vld [vmem:[#allocation3 + $0x23] sm:$0xff]  ;;  %v3815_v28 = vld [vmem:[#allocation3 + $0x2c] sm:$0xff] }
 0x5d8   : > { %3631 = vst.msk [vmem:[#allocation3 + $0x40] sm:$0xff] %vm3622_vm4, %v3458_v57  ;;  %4107 = vrot.lane.b32.xlu1 %v3739_v24, %s11177_s19  ;;  %3965 = vrot.lane.b32.xlu0 %v3704_v59, %s11176_s30  ;;  %v9598_v62 = vpop.f32.mrb[17].mxu1  ;;  %v3887_v61 = vld [vmem:[#allocation3 + $0x26] sm:$0xff]  ;;  %v3888_v15 = vld [vmem:[#allocation3 + $0x2e] sm:$0xff] }
 0x5d9   : > { %v3742_v30 = vld [vmem:[#allocation3 + $0x2a] sm:$0xff] }
 0x5da   : > { %v3852_v5 = vld [vmem:[#allocation3 + $0x2d] sm:$0xff] }
 0x5db   : > { %v3463_v56 = vpop.f32.mrb[18].mxu1  ;;  %v3779_v35 = vld [vmem:[#allocation3 + $0x2b] sm:$0xff]  ;;  %v3816_v45 = vld [vmem:[#allocation3 + $0x34] sm:$0xff] }
 0x5dc   : > { %3632 = vst.msk [vmem:[#allocation3 + $0x48] sm:$0xff] %vm3622_vm4, %v3463_v56  ;;  %4216 = vrot.lane.b32.xlu1 %v3740_v22, %s11172_s20  ;;  %4504 = vrot.lane.b32.xlu0 %v3813_v7, %s11179_s22  ;;  %v9601_v31 = vpop.f32.mrb[19].mxu1  ;;  %v3706_v34 = vld [vmem:[#allocation3 + $0x29] sm:$0xff]  ;;  %v3743_v54 = vld [vmem:[#allocation3 + $0x32] sm:$0xff] }
 0x5dd   : > { %v3707_v11 = vld [vmem:[#allocation3 + $0x31] sm:$0xff] }
 0x5de   : > { %v3853_v55 = vld [vmem:[#allocation3 + $0x35] sm:$0xff] }
 0x5df   : > { %v3468_v26 = vpop.f32.mrb[20].mxu1  ;;  %v3780_v46 = vld [vmem:[#allocation3 + $0x33] sm:$0xff]  ;;  %v3817_v57 = vld [vmem:[#allocation3 + $0x3c] sm:$0xff] }
 0x5e0   : > { %3633 = vst.msk [vmem:[#allocation3 + $0x50] sm:$0xff] %vm3622_vm4, %v3468_v26  ;;  %4109 = vrot.lane.b32.xlu0 %v3740_v22, %s11177_s19  ;;  %4613 = vrot.lane.b32.xlu1 %v3814_v18, %s11180_s0  ;;  %v9604_v17 = vpop.f32.mrb[21].mxu1  ;;  %v3889_v56 = vld [vmem:[#allocation3 + $0x36] sm:$0xff]  ;;  %v3890_v12 = vld [vmem:[#allocation3 + $0x3e] sm:$0xff] }
 0x5e1   : > { %v3744_v22 = vld [vmem:[#allocation3 + $0x3a] sm:$0xff] }
 0x5e2   : > { %v3854_v38 = vld [vmem:[#allocation3 + $0x3d] sm:$0xff] }
 0x5e3   : > { %v3473_v33 = vpop.f32.mrb[22].mxu1  ;;  %v3781_v26 = vld [vmem:[#allocation3 + $0x3b] sm:$0xff]  ;;  %v3782_v4 = vld [vmem:[#allocation3 + $0x43] sm:$0xff] }
 0x5e4   : > { %3634 = vst.msk [vmem:[#allocation3 + $0x58] sm:$0xff] %vm3622_vm4, %v3473_v33  ;;  %4218 = vrot.lane.b32.xlu1 %v3741_v19, %s11172_s20  ;;  %3967 = vrot.lane.b32.xlu0 %v3705_v32, %s11176_s30  ;;  %v9607_v41 = vpop.f32.mrb[23].mxu1  ;;  %v3745_v25 = vld [vmem:[#allocation3 + $0x42] sm:$0xff] }
 0x5e5   : > { %v3709_v10 = vld [vmem:[#allocation3 + $0x41] sm:$0xff] }
 0x5e7   : > { %v3478_v43 = vpop.f32.mrb[24].mxu1  ;;  %v3819_v0 = vld [vmem:[#allocation3 + $0x4c] sm:$0xff] }
 0x5e8   : > { %3635 = vst.msk [vmem:[#allocation3 + $0x60] sm:$0xff] %vm3622_vm4, %v3478_v43  ;;  %4757 = vrot.lane.b32.xlu1 %v3851_v27, %s11181_s29  ;;  %4506 = vrot.lane.b32.xlu0 %v3814_v18, %s11179_s22  ;;  %v9610_v14 = vpop.f32.mrb[25].mxu1  ;;  %v3708_v18 = vld [vmem:[#allocation3 + $0x39] sm:$0xff]  ;;  %v3855_v27 = vld [vmem:[#allocation3 + $0x45] sm:$0xff] }
 0x5eb   : > { %v3483_v1 = vpop.f32.mrb[26].mxu1 }
 0x5ec   : > { %3636 = vst.msk [vmem:[#allocation3 + $0x68] sm:$0xff] %vm3622_vm4, %v3483_v1  ;;  %4362 = vrot.lane.b32.xlu1 %v3778_v51, %s11178_s27  ;;  %4615 = vrot.lane.b32.xlu0 %v3815_v28, %s11180_s0  ;;  %v9613_v36 = vpop.f32.mrb[27].mxu1 }
 0x5ed   : > { %v3746_v36 = vld [vmem:[#allocation3 + $0x4a] sm:$0xff] }
 0x5ef   : > { %v3488_v39 = vpop.f32.mrb[28].mxu1 }
 0x5f0   : > { %3637 = vst.msk [vmem:[#allocation3 + $0x70] sm:$0xff] %vm3622_vm4, %v3488_v39  ;;  %4901 = vrot.lane.b32.xlu1 %v3887_v61, %s11182_s26  ;;  %4220 = vrot.lane.b32.xlu0 %v3742_v30, %s11172_s20  ;;  %v9616_v58 = vpop.f32.mrb[29].mxu1  ;;  %v3856_v61 = vld [vmem:[#allocation3 + $0x4d] sm:$0xff] }
 0x5f3   : > { %v3493_v44 = vpop.f32.mrb[30].mxu1 }
 0x5f4   : > { %3638 = vst.msk [vmem:[#allocation3 + $0x78] sm:$0xff] %vm3622_vm4, %v3493_v44  ;;  %4111 = vrot.lane.b32.xlu1 %v3741_v19, %s11177_s19  ;;  %4759 = vrot.lane.b32.xlu0 %v3852_v5, %s11181_s29  ;;  %v9619_v42 = vpop.f32.mrb[31].mxu1  ;;  %v3818_v19 = vld [vmem:[#allocation3 + $0x44] sm:$0xff] }
 0x5f5   : > { %v3783_v5 = vld [vmem:[#allocation3 + $0x4b] sm:$0xff] }
 0x5f6   : > { %v3710_v42 = vld [vmem:[#allocation3 + $0x49] sm:$0xff] }
 0x5f7   : > { %v3498_v60 = vpop.f32.mrb[32].mxu1 }
 0x5f8   : > { %3639 = vst.msk [vmem:[#allocation3 + $0x80] sm:$0xff] %vm3622_vm4, %v3498_v60  ;;  %4364 = vrot.lane.b32.xlu1 %v3779_v35, %s11178_s27  ;;  %3969 = vrot.lane.b32.xlu0 %v3706_v34, %s11176_s30  ;;  %v9622_v8 = vpop.f32.mrb[33].mxu1 }
 0x5fb   : > { %v3503_v2 = vpop.f32.mrb[34].mxu1 }
 0x5fc   : > { %3640 = vst.msk [vmem:[#allocation3 + $0x88] sm:$0xff] %vm3622_vm4, %v3503_v2  ;;  %4903 = vrot.lane.b32.xlu1 %v3888_v15, %s11182_s26  ;;  %4508 = vrot.lane.b32.xlu0 %v3815_v28, %s11179_s22  ;;  %v9625_v49 = vpop.f32.mrb[35].mxu1  ;;  %v3891_v28 = vld [vmem:[#allocation3 + $0x46] sm:$0xff]  ;;  %v3892_v2 = vld [vmem:[#allocation3 + $0x4e] sm:$0xff] }
 0x5ff   : > { %v3508_v52 = vpop.f32.mrb[36].mxu1 }
 0x600   : > { %3641 = vst.msk [vmem:[#allocation3 + $0x90] sm:$0xff] %vm3622_vm4, %v3508_v52  ;;  %4113 = vrot.lane.b32.xlu0 %v3742_v30, %s11177_s19  ;;  %4617 = vrot.lane.b32.xlu1 %v3816_v45, %s11180_s0  ;;  %v9628_v24 = vpop.f32.mrb[37].mxu1 }
 0x601   : > { %v3820_v24 = vld [vmem:[#allocation3 + $0x54] sm:$0xff] }
 0x603   : > { %v3513_v16 = vpop.f32.mrb[38].mxu1 }
 0x604   : > { %3642 = vst.msk [vmem:[#allocation3 + $0x98] sm:$0xff] %vm3622_vm4, %v3513_v16  ;;  %4222 = vrot.lane.b32.xlu1 %v3743_v54, %s11172_s20  ;;  %3971 = vrot.lane.b32.xlu0 %v3707_v11, %s11176_s30  ;;  %v9631_v53 = vpop.f32.mrb[39].mxu1 }
 0x607   : > { %v3518_v3 = vpop.f32.mrb[40].mxu1 }
 0x608   : > { %3643 = vst.msk [vmem:[#allocation3 + $0xa0] sm:$0xff] %vm3622_vm4, %v3518_v3  ;;  %4761 = vrot.lane.b32.xlu1 %v3853_v55, %s11181_s29  ;;  %4510 = vrot.lane.b32.xlu0 %v3816_v45, %s11179_s22  ;;  %v9634_v63 = vpop.f32.mrb[41].mxu1  ;;  %v3747_v3 = vld [vmem:[#allocation3 + $0x52] sm:$0xff] }
 0x609   : > { %v3711_v55 = vld [vmem:[#allocation3 + $0x51] sm:$0xff] }
 0x60b   : > { %v3523_v50 = vpop.f32.mrb[42].mxu1 }
 0x60c   : > { %3644 = vst.msk [vmem:[#allocation3 + $0xa8] sm:$0xff] %vm3622_vm4, %v3523_v50  ;;  %4366 = vrot.lane.b32.xlu1 %v3780_v46, %s11178_s27  ;;  %4619 = vrot.lane.b32.xlu0 %v3817_v57, %s11180_s0  ;;  %v9637_v59 = vpop.f32.mrb[43].mxu1 }
 0x60d   : > { %v3857_v59 = vld [vmem:[#allocation3 + $0x55] sm:$0xff] }
 0x60f   : > { %v3528_v62 = vpop.f32.mrb[44].mxu1 }
 0x610   : > { %3645 = vst.msk [vmem:[#allocation3 + $0xb0] sm:$0xff] %vm3622_vm4, %v3528_v62  ;;  %4905 = vrot.lane.b32.xlu1 %v3889_v56, %s11182_s26  ;;  %4224 = vrot.lane.b32.xlu0 %v3744_v22, %s11172_s20  ;;  %v9640_v7 = vpop.f32.mrb[45].mxu1 }
 0x613   : > { %v3533_v31 = vpop.f32.mrb[46].mxu1 }
 0x614   : > { %3646 = vst.msk [vmem:[#allocation3 + $0xb8] sm:$0xff] %vm3622_vm4, %v3533_v31  ;;  %4115 = vrot.lane.b32.xlu1 %v3743_v54, %s11177_s19  ;;  %4763 = vrot.lane.b32.xlu0 %v3854_v38, %s11181_s29  ;;  %v9643_v23 = vpop.f32.mrb[47].mxu1  ;;  %v3784_v31 = vld [vmem:[#allocation3 + $0x53] sm:$0xff]  ;;  %v3821_v38 = vld [vmem:[#allocation3 + $0x5c] sm:$0xff] }
 0x617   : > { %v3538_v40 = vpop.f32.mrb[48].mxu1 }
 0x618   : > { %3647 = vst.msk [vmem:[#allocation3 + $0xc0] sm:$0xff] %vm3622_vm4, %v3538_v40  ;;  %4368 = vrot.lane.b32.xlu1 %v3781_v26, %s11178_s27  ;;  %3973 = vrot.lane.b32.xlu0 %v3708_v18, %s11176_s30  ;;  %v9646_v17 = vpop.f32.mrb[49].mxu1 }
 0x619   : > { %v3893_v17 = vld [vmem:[#allocation3 + $0x56] sm:$0xff] }
 0x61b   : > { %v3543_v47 = vpop.f32.mrb[50].mxu1 }
 0x61c   : > { %3648 = vst.msk [vmem:[#allocation3 + $0xc8] sm:$0xff] %vm3622_vm4, %v3543_v47  ;;  %4907 = vrot.lane.b32.xlu1 %v3890_v12, %s11182_s26  ;;  %4512 = vrot.lane.b32.xlu0 %v3817_v57, %s11179_s22  ;;  %v9649_v9 = vpop.f32.mrb[51].mxu1  ;;  %v3748_v47 = vld [vmem:[#allocation3 + $0x5a] sm:$0xff] }
 0x61f   : > { %v3548_v33 = vpop.f32.mrb[52].mxu1 }
 0x620   : > { %3649 = vst.msk [vmem:[#allocation3 + $0xd0] sm:$0xff] %vm3622_vm4, %v3548_v33  ;;  %4117 = vrot.lane.b32.xlu0 %v3744_v22, %s11177_s19  ;;  %4621 = vrot.lane.b32.xlu1 %v3818_v19, %s11180_s0  ;;  %v9652_v32 = vpop.f32.mrb[53].mxu1 }
 0x621   : > { %v3858_v32 = vld [vmem:[#allocation3 + $0x5d] sm:$0xff] }
 0x623   : > { %v3553_v41 = vpop.f32.mrb[54].mxu1 }
 0x624   : > { %3650 = vst.msk [vmem:[#allocation3 + $0xd8] sm:$0xff] %vm3622_vm4, %v3553_v41  ;;  %4226 = vrot.lane.b32.xlu1 %v3745_v25, %s11172_s20  ;;  %3975 = vrot.lane.b32.xlu0 %v3709_v10, %s11176_s30  ;;  %v9655_v20 = vpop.f32.mrb[55].mxu1 }
 0x627   : > { %v3558_v43 = vpop.f32.mrb[56].mxu1 }
 0x628   : > { %3651 = vst.msk [vmem:[#allocation3 + $0xe0] sm:$0xff] %vm3622_vm4, %v3558_v43  ;;  %4765 = vrot.lane.b32.xlu1 %v3855_v27, %s11181_s29  ;;  %4514 = vrot.lane.b32.xlu0 %v3818_v19, %s11179_s22  ;;  %v9658_v14 = vpop.f32.mrb[57].mxu1  ;;  %v3785_v43 = vld [vmem:[#allocation3 + $0x5b] sm:$0xff] }
 0x629   : > { %v3712_v27 = vld [vmem:[#allocation3 + $0x59] sm:$0xff] }
 0x62b   : > { %v3563_v48 = vpop.f32.mrb[58].mxu1 }
 0x62c   : > { %3652 = vst.msk [vmem:[#allocation3 + $0xe8] sm:$0xff] %vm3622_vm4, %v3563_v48  ;;  %4370 = vrot.lane.b32.xlu1 %v3782_v4, %s11178_s27  ;;  %4623 = vrot.lane.b32.xlu0 %v3819_v0, %s11180_s0  ;;  %v9661_v1 = vpop.f32.mrb[59].mxu1 }
 0x62d   : > { %v3894_v1 = vld [vmem:[#allocation3 + $0x5e] sm:$0xff] }
 0x62f   : > { %v3568_v51 = vpop.f32.mrb[60].mxu1 }
 0x630   : > { %3653 = vst.msk [vmem:[#allocation3 + $0xf0] sm:$0xff] %vm3622_vm4, %v3568_v51  ;;  %4909 = vrot.lane.b32.xlu1 %v3891_v28, %s11182_s26  ;;  %4228 = vrot.lane.b32.xlu0 %v3746_v36, %s11172_s20  ;;  %v9664_v21 = vpop.f32.mrb[61].mxu1 }
 0x633   : > { %v3573_v39 = vpop.f32.mrb[62].mxu1 }
 0x634   : > { %3654 = vst.msk [vmem:[#allocation3 + $0xf8] sm:$0xff] %vm3622_vm4, %v3573_v39  ;;  %4119 = vrot.lane.b32.xlu1 %v3745_v25, %s11177_s19  ;;  %4767 = vrot.lane.b32.xlu0 %v3856_v61, %s11181_s29  ;;  %v9667_v30 = vpop.f32.mrb[63].mxu1 }
 0x635   : > { %v3822_v30 = vld [vmem:[#allocation3 + $0x64] sm:$0xff] }
 0x636   : > { %v13278_v58 = vpop.permute.xlu0 %3959 }
 0x637   : > { %v3578_v44 = vpop.f32.mrb[64].mxu1 }
 0x638   : > { %3655 = vst.msk [vmem:[#allocation3 + $0x100] sm:$0xff] %vm3622_vm4, %v3578_v44  ;;  %4372 = vrot.lane.b32.xlu1 %v3783_v5, %s11178_s27  ;;  %3977 = vrot.lane.b32.xlu0 %v3710_v42, %s11176_s30  ;;  %v9670_v60 = vpop.f32.mrb[65].mxu1 }
 0x63a   : > { %v13283_v35 = vpop.permute.xlu0 %4103  ;;  %v13285_v34 = vpop.permute.xlu1 %3961 }
 0x63b   : > { %v3583_v8 = vpop.f32.mrb[66].mxu1 }
 0x63c   : > { %3656 = vst.msk [vmem:[#allocation3 + $0x108] sm:$0xff] %vm3622_vm4, %v3583_v8  ;;  %4911 = vrot.lane.b32.xlu1 %v3892_v2, %s11182_s26  ;;  %4516 = vrot.lane.b32.xlu0 %v3819_v0, %s11179_s22  ;;  %v9673_v15 = vpop.f32.mrb[67].mxu1  ;;  %v3665_v0 = vld [vmem:[#allocation3] sm:$0xff] }
 0x63d   : > { %v5009_v51 = vsel %vm3622_vm4, %v3665_v0, %v13278_v58  ;;  %v3749_v2 = vld [vmem:[#allocation3 + $0x62] sm:$0xff]  ;;  %v3824_v0 = vld [vmem:[#allocation3 + $0x74] sm:$0xff] }
 0x63e   : > { %v13290_v49 = vpop.permute.xlu1 %4105  ;;  %v13292_v52 = vpop.permute.xlu0 %4214  ;;  %v5046_v28 = vsel %vm5045_vm6, %v5009_v51, %v13283_v35  ;;  %v3666_v35 = vld [vmem:[#allocation3 + $0x8] sm:$0xff] }
 0x63f   : > { %v3588_v45 = vpop.f32.mrb[68].mxu1  ;;  %v5010_v15 = vsel %vm3622_vm4, %v3666_v35, %v13285_v34 }
 0x640   : > { %3657 = vst.msk [vmem:[#allocation3 + $0x110] sm:$0xff] %vm3622_vm4, %v3588_v45  ;;  %4121 = vrot.lane.b32.xlu0 %v3746_v36, %s11177_s19  ;;  %4625 = vrot.lane.b32.xlu1 %v3820_v24, %s11180_s0  ;;  %v9676_v16 = vpop.f32.mrb[69].mxu1  ;;  %v5082_v36 = vsel %vm2389_vm10, %v5046_v28, %v13292_v52  ;;  %v3713_v52 = vld [vmem:[#allocation3 + $0x61] sm:$0xff]  ;;  %v5047_v45 = vsel %vm5045_vm6, %v5010_v15, %v13290_v49  ;;  %v3788_v15 = vld [vmem:[#allocation3 + $0x73] sm:$0xff] }
 0x641   : > { %v3786_v49 = vld [vmem:[#allocation3 + $0x63] sm:$0xff] }
 0x642   : > { %v13297_v54 = vpop.permute.xlu0 %4358  ;;  %v13299_v11 = vpop.permute.xlu1 %3963 }
 0x643   : > { %v3593_v53 = vpop.f32.mrb[70].mxu1  ;;  %v5119_v61 = vsel %vm5118_vm8, %v5082_v36, %v13297_v54 }
 0x644   : > { %3658 = vst.msk [vmem:[#allocation3 + $0x118] sm:$0xff] %vm3622_vm4, %v3593_v53  ;;  %4230 = vrot.lane.b32.xlu1 %v3747_v3, %s11172_s20  ;;  %3979 = vrot.lane.b32.xlu0 %v3711_v55, %s11176_s30  ;;  %v9679_v63 = vpop.f32.mrb[71].mxu1  ;;  %v3859_v53 = vld [vmem:[#allocation3 + $0x65] sm:$0xff] }
 0x646   : > { %v13304_v50 = vpop.permute.xlu1 %4502  ;;  %v13306_v46 = vpop.permute.xlu0 %4360 }
 0x647   : > { %v3598_v57 = vpop.f32.mrb[72].mxu1  ;;  %v5156_v58 = vsel %vm5155_vm9, %v5119_v61, %v13304_v50  ;;  %v3823_v50 = vld [vmem:[#allocation3 + $0x6c] sm:$0xff] }
 0x648   : > { %3659 = vst.msk [vmem:[#allocation3 + $0x120] sm:$0xff] %vm3622_vm4, %v3598_v57  ;;  %4769 = vrot.lane.b32.xlu1 %v3857_v59, %s11181_s29  ;;  %4518 = vrot.lane.b32.xlu0 %v3820_v24, %s11179_s22  ;;  %v9682_v62 = vpop.f32.mrb[73].mxu1 }
 0x64a   : > { %v13311_v56 = vpop.permute.xlu1 %4107  ;;  %v13313_v22 = vpop.permute.xlu0 %3965 }
 0x64b   : > { %v3603_v7 = vpop.f32.mrb[74].mxu1 }
 0x64c   : > { %3660 = vst.msk [vmem:[#allocation3 + $0x128] sm:$0xff] %vm3622_vm4, %v3603_v7  ;;  %4374 = vrot.lane.b32.xlu1 %v3784_v31, %s11178_s27  ;;  %4627 = vrot.lane.b32.xlu0 %v3821_v38, %s11180_s0  ;;  %v9685_v23 = vpop.f32.mrb[75].mxu1  ;;  %v3895_v31 = vld [vmem:[#allocation3 + $0x66] sm:$0xff] }
 0x64e   : > { %v13318_v40 = vpop.permute.xlu1 %4216  ;;  %v13320_v26 = vpop.permute.xlu0 %4504 }
 0x64f   : > { %v3608_v18 = vpop.f32.mrb[76].mxu1  ;;  %v5083_v24 = vsel %vm2389_vm10, %v5047_v45, %v13318_v40 }
 0x650   : > { %3661 = vst.msk [vmem:[#allocation3 + $0x130] sm:$0xff] %vm3622_vm4, %v3608_v18  ;;  %4913 = vrot.lane.b32.xlu1 %v3893_v17, %s11182_s26  ;;  %4232 = vrot.lane.b32.xlu0 %v3748_v47, %s11172_s20  ;;  %v9688_v12 = vpop.f32.mrb[77].mxu1  ;;  %v5120_v34 = vsel %vm5118_vm8, %v5083_v24, %v13306_v46 }
 0x651   : > { %v5157_v63 = vsel %vm5155_vm9, %v5120_v34, %v13320_v26  ;;  %v3860_v26 = vld [vmem:[#allocation3 + $0x6d] sm:$0xff]  ;;  %v3752_v34 = vld [vmem:[#allocation3 + $0x7a] sm:$0xff] }
 0x652   : > { %v13325_v9 = vpop.permute.xlu0 %4109  ;;  %v4614_v33 = vpop.permute.xlu1 %4613  ;;  %v3714_v12 = vld [vmem:[#allocation3 + $0x69] sm:$0xff] }
 0x653   : > { %v3613_v19 = vpop.f32.mrb[78].mxu1  ;;  %v5193_v44 = vsel %vm5192_vm11, %v5156_v58, %v4614_v33  ;;  %v3667_v33 = vld [vmem:[#allocation3 + $0x10] sm:$0xff] }
 0x654   : > { %3662 = vst.msk [vmem:[#allocation3 + $0x138] sm:$0xff] %vm3622_vm4, %v3613_v19  ;;  %4123 = vrot.lane.b32.xlu1 %v3747_v3, %s11177_s19  ;;  %4771 = vrot.lane.b32.xlu0 %v3858_v32, %s11181_s29  ;;  %v9691_v41 = vpop.f32.mrb[79].mxu1  ;;  %v5011_v19 = vsel %vm3622_vm4, %v3667_v33, %v13299_v11  ;;  %v3861_v58 = vld [vmem:[#allocation3 + $0x75] sm:$0xff] }
 0x656   : > { %v13330_v25 = vpop.permute.xlu1 %4218  ;;  %v13332_v10 = vpop.permute.xlu0 %3967 }
 0x657   : > { %v3618_v20 = vpop.f32.mrb[80].mxu1 }
 0x658   : > { %3664 = vst.msk [vmem:[#allocation3 + $0x140] sm:$0xf] %vm3663_vm5, %v3618_v20  ;;  %4376 = vrot.lane.b32.xlu1 %v3785_v43, %s11178_s27  ;;  %3981 = vrot.lane.b32.xlu0 %v3712_v27, %s11176_s30  ;;  %v9694_v14 = vpop.f32.mrb[81].mxu1  ;;  %vm5319_vm5 = vcmask 588800   ;;  %v5048_v20 = vsel %vm5045_vm6, %v5011_v19, %v13311_v56  ;;  %v3896_v43 = vld [vmem:[#allocation3 + $0x6e] sm:$0xff]  ;;  %v3826_v19 = vld [vmem:[#allocation3 + $0x84] sm:$0xff] }
 0x659   : > { %v5084_v27 = vsel %vm2389_vm10, %v5048_v20, %v13330_v25 }
 0x65a   : > { %v4758_v48 = vpop.permute.xlu1 %4757  ;;  %v13336_v4 = vpop.permute.xlu0 %4506 }
 0x65b   : > { %v5230_v5 = vsel %vm5229_vm12, %v5193_v44, %v4758_v48 }
 0x65c   : > { %4915 = vrot.lane.b32.xlu1 %v3894_v1, %s11182_s26  ;;  %4520 = vrot.lane.b32.xlu0 %v3821_v38, %s11179_s22  ;;  %v3750_v38 = vld [vmem:[#allocation3 + $0x6a] sm:$0xff] }
 0x65e   : > { %v13346_v21 = vpop.permute.xlu1 %4362  ;;  %v4616_v39 = vpop.permute.xlu0 %4615 }
 0x65f   : > { %v5194_v57 = vsel %vm5192_vm11, %v5157_v63, %v4616_v39  ;;  %v5121_v14 = vsel %vm5118_vm8, %v5084_v27, %v13346_v21  ;;  %v3751_v21 = vld [vmem:[#allocation3 + $0x72] sm:$0xff]  ;;  %v3862_v63 = vld [vmem:[#allocation3 + $0x7d] sm:$0xff] }
 0x660   : > { %4125 = vrot.lane.b32.xlu0 %v3748_v47, %s11177_s19  ;;  %4629 = vrot.lane.b32.xlu1 %v3822_v30, %s11180_s0  ;;  %v3787_v47 = vld [vmem:[#allocation3 + $0x6b] sm:$0xff]  ;;  %v5158_v1 = vsel %vm5155_vm9, %v5121_v14, %v13336_v4  ;;  %v3753_v14 = vld [vmem:[#allocation3 + $0x82] sm:$0xff] }
 0x661   : > { %v3715_v39 = vld [vmem:[#allocation3 + $0x71] sm:$0xff] }
 0x662   : > { %v4902_v42 = vpop.permute.xlu1 %4901  ;;  %v13356_v60 = vpop.permute.xlu0 %4220 }
 0x663   : > { %v5267_v8 = vsel %vm5266_vm0, %v5230_v5, %v4902_v42 }
 0x664   : > { %9713 = vmatprep.mubr.msk.f32.mxu0 %vm5319_vm5, %v5267_v8  ;;  %4234 = vrot.lane.b32.xlu1 %v3749_v2, %s11172_s20 }
 0x665   : > { %3983 = vrot.lane.b32.xlu0 %v3713_v52, %s11176_s30  ;;  %v3825_v52 = vld [vmem:[#allocation3 + $0x7c] sm:$0xff] }
 0x666   : > { %v13368_v16 = vpop.permute.xlu1 %4111  ;;  %v4760_v54 = vpop.permute.xlu0 %4759 }
 0x667   : > { %v5231_v59 = vsel %vm5229_vm12, %v5194_v57, %v4760_v54 }
 0x668   : > { %4773 = vrot.lane.b32.xlu1 %v3859_v53, %s11181_s29  ;;  %v3897_v53 = vld [vmem:[#allocation3 + $0x76] sm:$0xff] }
 0x669   : > { %4522 = vrot.lane.b32.xlu0 %v3822_v30, %s11179_s22  ;;  %v3668_v30 = vld [vmem:[#allocation3 + $0x18] sm:$0xff] }
 0x66a   : > { %v13374_v3 = vpop.permute.xlu1 %4364  ;;  %v13376_v55 = vpop.permute.xlu0 %3969  ;;  %v5012_v44 = vsel %vm3622_vm4, %v3668_v30, %v13313_v22  ;;  %v3827_v30 = vld [vmem:[#allocation3 + $0x8c] sm:$0xff] }
 0x66b   : > { %v5049_v5 = vsel %vm5045_vm6, %v5012_v44, %v13325_v9 }
 0x66c   : > { %4378 = vrot.lane.b32.xlu1 %v3786_v49, %s11178_s27  ;;  %v5085_v42 = vsel %vm2389_vm10, %v5049_v5, %v13356_v60 }
 0x66d   : > { %4631 = vrot.lane.b32.xlu0 %v3823_v50, %s11180_s0 }
 0x66e   : > { %v4904_v46 = vpop.permute.xlu1 %4903  ;;  %v4509_v62 = vpop.permute.xlu0 %4508 }
 0x66f   : > { %v5268_v7 = vsel %vm5266_vm0, %v5231_v59, %v4904_v46  ;;  %v3789_v59 = vld [vmem:[#allocation3 + $0x7b] sm:$0xff] }
 0x670   : > { %9714 = vmatmul.mubr.msk.f32.vlgmr.msra.gmra.mrb[36].mxu0 %vm5319_vm5, %v5268_v7  ;;  %4917 = vrot.lane.b32.xlu1 %v3895_v31, %s11182_s26  ;;  %v3716_v46 = vld [vmem:[#allocation3 + $0x79] sm:$0xff] }
 0x671   : > { %4236 = vrot.lane.b32.xlu0 %v3750_v38, %s11172_s20 }
 0x672   : > { %v13388_v23 = vpop.permute.xlu0 %4113  ;;  %v4618_v40 = vpop.permute.xlu1 %4617 }
 0x673   : > { %v5195_v56 = vsel %vm5192_vm11, %v5158_v1, %v4618_v40  ;;  %v3863_v1 = vld [vmem:[#allocation3 + $0x85] sm:$0xff] }
 0x674   : > { %4127 = vrot.lane.b32.xlu1 %v3749_v2, %s11177_s19  ;;  %v5122_v2 = vsel %vm5118_vm8, %v5085_v42, %v13374_v3  ;;  %v3899_v42 = vld [vmem:[#allocation3 + $0x86] sm:$0xff] }
 0x675   : > { %4775 = vrot.lane.b32.xlu0 %v3860_v26, %s11181_s29  ;;  %v5159_v22 = vsel %vm5155_vm9, %v5122_v2, %v4509_v62  ;;  %v3669_v62 = vld [vmem:[#allocation3 + $0x20] sm:$0xff] }
 0x676   : > { %v13392_v18 = vpop.permute.xlu1 %4222  ;;  %v13394_v17 = vpop.permute.xlu0 %3971  ;;  %v5013_v7 = vsel %vm3622_vm4, %v3669_v62, %v13332_v10  ;;  %v3898_v26 = vld [vmem:[#allocation3 + $0x7e] sm:$0xff] }
 0x677   : > { %v5050_v40 = vsel %vm5045_vm6, %v5013_v7, %v13368_v16  ;;  %v3828_v7 = vld [vmem:[#allocation3 + $0x94] sm:$0xff] }
 0x678   : > { %4380 = vrot.lane.b32.xlu1 %v3787_v47, %s11178_s27  ;;  %v5086_v47 = vsel %vm2389_vm10, %v5050_v40, %v13392_v18 }
 0x679   : > { %3985 = vrot.lane.b32.xlu0 %v3714_v12, %s11176_s30 }
 0x67a   : > { %v4762_v32 = vpop.permute.xlu1 %4761  ;;  %v13400_v41 = vpop.permute.xlu0 %4510 }
 0x67b   : > { %v5232_v25 = vsel %vm5229_vm12, %v5195_v56, %v4762_v32 }
 0x67c   : > { %4919 = vrot.lane.b32.xlu1 %v3896_v43, %s11182_s26 }
 0x67d   : > { %4524 = vrot.lane.b32.xlu0 %v3823_v50, %s11179_s22 }
 0x67e   : > { %v13410_v48 = vpop.permute.xlu1 %4366  ;;  %v4620_v11 = vpop.permute.xlu0 %4619 }
 0x67f   : > { %v5196_v9 = vsel %vm5192_vm11, %v5159_v22, %v4620_v11  ;;  %v5123_v12 = vsel %vm5118_vm8, %v5086_v47, %v13410_v48  ;;  %v3717_v48 = vld [vmem:[#allocation3 + $0x81] sm:$0xff]  ;;  %v3864_v22 = vld [vmem:[#allocation3 + $0x8d] sm:$0xff] }
 0x680   : > { %4633 = vrot.lane.b32.xlu1 %v3824_v0, %s11180_s0  ;;  %v5160_v32 = vsel %vm5155_vm9, %v5123_v12, %v13400_v41  ;;  %v3755_v12 = vld [vmem:[#allocation3 + $0x92] sm:$0xff] }
 0x681   : > { %4129 = vrot.lane.b32.xlu0 %v3750_v38, %s11177_s19 }
 0x682   : > { %v4906_v51 = vpop.permute.xlu1 %4905  ;;  %v13418_v28 = vpop.permute.xlu0 %4224 }
 0x683   : > { %v5269_v36 = vsel %vm5266_vm0, %v5232_v25, %v4906_v51 }
 0x684   : > { %9716 = vmatprep.mubr.msk.f32.mxu0 %vm5319_vm5, %v5269_v36  ;;  %4238 = vrot.lane.b32.xlu1 %v3751_v21, %s11172_s20 }
 0x685   : > { %3987 = vrot.lane.b32.xlu0 %v3715_v39, %s11176_s30 }
 0x686   : > { %v13424_v4 = vpop.permute.xlu1 %4115  ;;  %v4764_v61 = vpop.permute.xlu0 %4763 }
 0x687   : > { %v5233_v45 = vsel %vm5229_vm12, %v5196_v9, %v4764_v61  ;;  %v3790_v61 = vld [vmem:[#allocation3 + $0x83] sm:$0xff] }
 0x688   : > { %4777 = vrot.lane.b32.xlu1 %v3861_v58, %s11181_s29 }
 0x689   : > { %4526 = vrot.lane.b32.xlu0 %v3824_v0, %s11179_s22  ;;  %v3670_v0 = vld [vmem:[#allocation3 + $0x28] sm:$0xff] }
 0x68a   : > { %v13434_v35 = vpop.permute.xlu1 %4368  ;;  %v13436_v8 = vpop.permute.xlu0 %3973  ;;  %v5014_v56 = vsel %vm3622_vm4, %v3670_v0, %v13376_v55  ;;  %v3829_v0 = vld [vmem:[#allocation3 + $0x9c] sm:$0xff] }
 0x68b   : > { %v5051_v25 = vsel %vm5045_vm6, %v5014_v56, %v13388_v23 }
 0x68c   : > { %4382 = vrot.lane.b32.xlu1 %v3788_v15, %s11178_s27  ;;  %v5087_v51 = vsel %vm2389_vm10, %v5051_v25, %v13418_v28 }
 0x68d   : > { %4635 = vrot.lane.b32.xlu0 %v3825_v52, %s11180_s0  ;;  %v5124_v39 = vsel %vm5118_vm8, %v5087_v51, %v13434_v35  ;;  %v3754_v35 = vld [vmem:[#allocation3 + $0x8a] sm:$0xff]  ;;  %v3901_v51 = vld [vmem:[#allocation3 + $0x96] sm:$0xff] }
 0x68e   : > { %v4908_v60 = vpop.permute.xlu1 %4907  ;;  %v4513_v24 = vpop.permute.xlu0 %4512 }
 0x68f   : > { %v5270_v54 = vsel %vm5266_vm0, %v5233_v45, %v4908_v60  ;;  %v5161_v55 = vsel %vm5155_vm9, %v5124_v39, %v4513_v24  ;;  %v3791_v45 = vld [vmem:[#allocation3 + $0x8b] sm:$0xff] }
 0x690   : > { %9717 = vmatmul.mubr.msk.f32.gmra.mrb[38].mxu0 %vm5319_vm5, %v5270_v54  ;;  %4921 = vrot.lane.b32.xlu1 %v3897_v53, %s11182_s26  ;;  %v3718_v60 = vld [vmem:[#allocation3 + $0x89] sm:$0xff] }
 0x691   : > { %4240 = vrot.lane.b32.xlu0 %v3752_v34, %s11172_s20  ;;  %v3671_v24 = vld [vmem:[#allocation3 + $0x30] sm:$0xff] }
 0x692   : > { %v13449_v3 = vpop.permute.xlu0 %4117  ;;  %v4622_v49 = vpop.permute.xlu1 %4621  ;;  %v5015_v54 = vsel %vm3622_vm4, %v3671_v24, %v13394_v17 }
 0x693   : > { %v5197_v16 = vsel %vm5192_vm11, %v5160_v32, %v4622_v49  ;;  %v5052_v49 = vsel %vm5045_vm6, %v5015_v54, %v13424_v4  ;;  %v3865_v32 = vld [vmem:[#allocation3 + $0x95] sm:$0xff]  ;;  %v3830_v54 = vld [vmem:[#allocation3 + $0xa4] sm:$0xff] }
 0x694   : > { %4131 = vrot.lane.b32.xlu1 %v3751_v21, %s11177_s19 }
 0x695   : > { %4779 = vrot.lane.b32.xlu0 %v3862_v63, %s11181_s29  ;;  %v3900_v63 = vld [vmem:[#allocation3 + $0x8e] sm:$0xff] }
 0x696   : > { %v13453_v50 = vpop.permute.xlu1 %4226  ;;  %v13455_v57 = vpop.permute.xlu0 %3975 }
 0x698   : > { %4384 = vrot.lane.b32.xlu1 %v3789_v59, %s11178_s27  ;;  %v5088_v59 = vsel %vm2389_vm10, %v5052_v49, %v13453_v50 }
 0x699   : > { %3989 = vrot.lane.b32.xlu0 %v3716_v46, %s11176_s30 }
 0x69a   : > { %v4766_v31 = vpop.permute.xlu1 %4765  ;;  %v13461_v38 = vpop.permute.xlu0 %4514 }
 0x69b   : > { %v5234_v18 = vsel %vm5229_vm12, %v5197_v16, %v4766_v31 }
 0x69c   : > { %4923 = vrot.lane.b32.xlu1 %v3898_v26, %s11182_s26 }
 0x69d   : > { %4528 = vrot.lane.b32.xlu0 %v3825_v52, %s11179_s22 }
 0x69e   : > { %v13471_v33 = vpop.permute.xlu1 %4370  ;;  %v4624_v10 = vpop.permute.xlu0 %4623 }
 0x69f   : > { %v5198_v23 = vsel %vm5192_vm11, %v5161_v55, %v4624_v10  ;;  %v5125_v46 = vsel %vm5118_vm8, %v5088_v59, %v13471_v33  ;;  %v3719_v33 = vld [vmem:[#allocation3 + $0x91] sm:$0xff]  ;;  %v3866_v55 = vld [vmem:[#allocation3 + $0x9d] sm:$0xff] }
 0x6a0   : > { %4637 = vrot.lane.b32.xlu1 %v3826_v19, %s11180_s0  ;;  %v5162_v31 = vsel %vm5155_vm9, %v5125_v46, %v13461_v38  ;;  %v3757_v46 = vld [vmem:[#allocation3 + $0xa2] sm:$0xff] }
 0x6a1   : > { %4133 = vrot.lane.b32.xlu0 %v3752_v34, %s11177_s19 }
 0x6a2   : > { %v4910_v20 = vpop.permute.xlu1 %4909  ;;  %v13479_v43 = vpop.permute.xlu0 %4228 }
 0x6a3   : > { %v5271_v27 = vsel %vm5266_vm0, %v5234_v18, %v4910_v20 }
 0x6a4   : > { %9719 = vmatprep.mubr.msk.f32.mxu0 %vm5319_vm5, %v5271_v27  ;;  %4242 = vrot.lane.b32.xlu1 %v3753_v14, %s11172_s20 }
 0x6a5   : > { %3991 = vrot.lane.b32.xlu0 %v3717_v48, %s11176_s30 }
 0x6a6   : > { %v13485_v41 = vpop.permute.xlu1 %4119  ;;  %v4768_v11 = vpop.permute.xlu0 %4767 }
 0x6a7   : > { %v5235_v58 = vsel %vm5229_vm12, %v5198_v23, %v4768_v11  ;;  %v3792_v11 = vld [vmem:[#allocation3 + $0x93] sm:$0xff] }
 0x6a8   : > { %4781 = vrot.lane.b32.xlu1 %v3863_v1, %s11181_s29 }
 0x6a9   : > { %4530 = vrot.lane.b32.xlu0 %v3826_v19, %s11179_s22  ;;  %v3672_v19 = vld [vmem:[#allocation3 + $0x38] sm:$0xff] }
 0x6aa   : > { %v13495_v36 = vpop.permute.xlu1 %4372  ;;  %v13497_v21 = vpop.permute.xlu0 %3977  ;;  %v5016_v16 = vsel %vm3622_vm4, %v3672_v19, %v13436_v8  ;;  %v3831_v19 = vld [vmem:[#allocation3 + $0xac] sm:$0xff] }
 0x6ab   : > { %v5053_v18 = vsel %vm5045_vm6, %v5016_v16, %v13449_v3 }
 0x6ac   : > { %4386 = vrot.lane.b32.xlu1 %v3790_v61, %s11178_s27  ;;  %v5089_v20 = vsel %vm2389_vm10, %v5053_v18, %v13479_v43 }
 0x6ad   : > { %4639 = vrot.lane.b32.xlu0 %v3827_v30, %s11180_s0  ;;  %v5126_v48 = vsel %vm5118_vm8, %v5089_v20, %v13495_v36  ;;  %v3756_v36 = vld [vmem:[#allocation3 + $0x9a] sm:$0xff]  ;;  %v3903_v20 = vld [vmem:[#allocation3 + $0xa6] sm:$0xff] }
 0x6ae   : > { %v4912_v28 = vpop.permute.xlu1 %4911  ;;  %v4517_v44 = vpop.permute.xlu0 %4516 }
 0x6af   : > { %v5272_v5 = vsel %vm5266_vm0, %v5235_v58, %v4912_v28  ;;  %v5163_v8 = vsel %vm5155_vm9, %v5126_v48, %v4517_v44  ;;  %v3793_v58 = vld [vmem:[#allocation3 + $0x9b] sm:$0xff] }
 0x6b0   : > { %9720 = vmatmul.mubr.msk.f32.gmra.mrb[40].mxu0 %vm5319_vm5, %v5272_v5  ;;  %4925 = vrot.lane.b32.xlu1 %v3899_v42, %s11182_s26  ;;  %v3720_v28 = vld [vmem:[#allocation3 + $0x99] sm:$0xff] }
 0x6b1   : > { %4244 = vrot.lane.b32.xlu0 %v3754_v35, %s11172_s20  ;;  %v3673_v44 = vld [vmem:[#allocation3 + $0x40] sm:$0xff] }
 0x6b2   : > { %v13510_v2 = vpop.permute.xlu0 %4121  ;;  %v4626_v15 = vpop.permute.xlu1 %4625  ;;  %v5017_v5 = vsel %vm3622_vm4, %v3673_v44, %v13455_v57 }
 0x6b3   : > { %v5199_v4 = vsel %vm5192_vm11, %v5162_v31, %v4626_v15  ;;  %v3867_v31 = vld [vmem:[#allocation3 + $0xa5] sm:$0xff] }
 0x6b4   : > { %4135 = vrot.lane.b32.xlu1 %v3753_v14, %s11177_s19 }
 0x6b5   : > { %4783 = vrot.lane.b32.xlu0 %v3864_v22, %s11181_s29  ;;  %v3902_v22 = vld [vmem:[#allocation3 + $0x9e] sm:$0xff] }
 0x6b6   : > { %v13514_v52 = vpop.permute.xlu1 %4230  ;;  %v13516_v9 = vpop.permute.xlu0 %3979 }
 0x6b8   : > { %4388 = vrot.lane.b32.xlu1 %v3791_v45, %s11178_s27 }
 0x6b9   : > { %3993 = vrot.lane.b32.xlu0 %v3718_v60, %s11176_s30 }
 0x6ba   : > { %v4770_v53 = vpop.permute.xlu1 %4769  ;;  %v13522_v34 = vpop.permute.xlu0 %4518 }
 0x6bb   : > { %v5236_v50 = vsel %vm5229_vm12, %v5199_v4, %v4770_v53 }
 0x6bc   : > { %4927 = vrot.lane.b32.xlu1 %v3900_v63, %s11182_s26 }
 0x6bd   : > { %4532 = vrot.lane.b32.xlu0 %v3827_v30, %s11179_s22 }
 0x6be   : > { %v13532_v62 = vpop.permute.xlu1 %4374  ;;  %v4628_v17 = vpop.permute.xlu0 %4627 }
 0x6bf   : > { %v5200_v3 = vsel %vm5192_vm11, %v5163_v8, %v4628_v17  ;;  %v3674_v17 = vld [vmem:[#allocation3 + $0x48] sm:$0xff] }
 0x6c0   : > { %4641 = vrot.lane.b32.xlu1 %v3828_v7, %s11180_s0  ;;  %v5018_v4 = vsel %vm3622_vm4, %v3674_v17, %v13497_v21  ;;  %v3868_v8 = vld [vmem:[#allocation3 + $0xad] sm:$0xff] }
 0x6c1   : > { %4137 = vrot.lane.b32.xlu0 %v3754_v35, %s11177_s19  ;;  %v5054_v35 = vsel %vm5045_vm6, %v5017_v5, %v13485_v41  ;;  %v3832_v5 = vld [vmem:[#allocation3 + $0xb4] sm:$0xff] }
 0x6c2   : > { %v4914_v40 = vpop.permute.xlu1 %4913  ;;  %v13540_v26 = vpop.permute.xlu0 %4232  ;;  %v5090_v45 = vsel %vm2389_vm10, %v5054_v35, %v13514_v52 }
 0x6c3   : > { %v5273_v47 = vsel %vm5266_vm0, %v5236_v50, %v4914_v40  ;;  %v5127_v60 = vsel %vm5118_vm8, %v5090_v45, %v13532_v62  ;;  %v3721_v62 = vld [vmem:[#allocation3 + $0xa1] sm:$0xff]  ;;  %v5055_v50 = vsel %vm5045_vm6, %v5018_v4, %v13510_v2 }
 0x6c4   : > { %9722 = vmatprep.mubr.msk.f32.mxu0 %vm5319_vm5, %v5273_v47  ;;  %4246 = vrot.lane.b32.xlu1 %v3755_v12, %s11172_s20  ;;  %v5164_v41 = vsel %vm5155_vm9, %v5127_v60, %v13522_v34  ;;  %v5091_v40 = vsel %vm2389_vm10, %v5055_v50, %v13540_v26  ;;  %v3759_v60 = vld [vmem:[#allocation3 + $0xb2] sm:$0xff] }
 0x6c5   : > { %3995 = vrot.lane.b32.xlu0 %v3719_v33, %s11176_s30 }
 0x6c6   : > { %v13546_v38 = vpop.permute.xlu1 %4123  ;;  %v4772_v10 = vpop.permute.xlu0 %4771 }
 0x6c7   : > { %v5237_v1 = vsel %vm5229_vm12, %v5200_v3, %v4772_v10  ;;  %v3794_v10 = vld [vmem:[#allocation3 + $0xa3] sm:$0xff] }
 0x6c8   : > { %4785 = vrot.lane.b32.xlu1 %v3865_v32, %s11181_s29 }
 0x6c9   : > { %4534 = vrot.lane.b32.xlu0 %v3828_v7, %s11179_s22 }
 0x6ca   : > { %v13556_v27 = vpop.permute.xlu1 %4376  ;;  %v13558_v14 = vpop.permute.xlu0 %3981 }
 0x6cc   : > { %4390 = vrot.lane.b32.xlu1 %v3792_v11, %s11178_s27 }
 0x6cd   : > { %4643 = vrot.lane.b32.xlu0 %v3829_v0, %s11180_s0 }
 0x6ce   : > { %v4916_v43 = vpop.permute.xlu1 %4915  ;;  %v4521_v56 = vpop.permute.xlu0 %4520 }
 0x6cf   : > { %v5274_v25 = vsel %vm5266_vm0, %v5237_v1, %v4916_v43  ;;  %v3795_v1 = vld [vmem:[#allocation3 + $0xab] sm:$0xff] }
 0x6d0   : > { %9723 = vmatmul.mubr.msk.f32.gmra.mrb[42].mxu0 %vm5319_vm5, %v5274_v25  ;;  %4929 = vrot.lane.b32.xlu1 %v3901_v51, %s11182_s26  ;;  %v3722_v43 = vld [vmem:[#allocation3 + $0xa9] sm:$0xff] }
 0x6d1   : > { %4248 = vrot.lane.b32.xlu0 %v3756_v36, %s11172_s20 }
 0x6d2   : > { %v13571_v39 = vpop.permute.xlu0 %4125  ;;  %v4630_v61 = vpop.permute.xlu1 %4629 }
 0x6d3   : > { %v5201_v53 = vsel %vm5192_vm11, %v5164_v41, %v4630_v61  ;;  %v3869_v41 = vld [vmem:[#allocation3 + $0xb5] sm:$0xff] }
 0x6d4   : > { %4139 = vrot.lane.b32.xlu1 %v3755_v12, %s11177_s19  ;;  %v5128_v12 = vsel %vm5118_vm8, %v5091_v40, %v13556_v27  ;;  %v3758_v27 = vld [vmem:[#allocation3 + $0xaa] sm:$0xff] }
 0x6d5   : > { %4787 = vrot.lane.b32.xlu0 %v3866_v55, %s11181_s29  ;;  %v5165_v21 = vsel %vm5155_vm9, %v5128_v12, %v4521_v56  ;;  %v3675_v56 = vld [vmem:[#allocation3 + $0x50] sm:$0xff] }
 0x6d6   : > { %v13575_v30 = vpop.permute.xlu1 %4234  ;;  %v5019_v25 = vsel %vm3622_vm4, %v3675_v56, %v13516_v9  ;;  %v3904_v55 = vld [vmem:[#allocation3 + $0xae] sm:$0xff]  ;;  %v3905_v12 = vld [vmem:[#allocation3 + $0xb6] sm:$0xff] }
 0x6d7   : > { %v13577_v23 = vpop.permute.xlu0 %3983 }
 0x6d8   : > { %4392 = vrot.lane.b32.xlu1 %v3793_v58, %s11178_s27 }
 0x6d9   : > { %3997 = vrot.lane.b32.xlu0 %v3720_v28, %s11176_s30 }
 0x6da   : > { %v4774_v42 = vpop.permute.xlu1 %4773 }
 0x6db   : > { %v13585_v15 = vpop.permute.xlu0 %4522  ;;  %v5238_v52 = vsel %vm5229_vm12, %v5201_v53, %v4774_v42 }
 0x6dc   : > { %4931 = vrot.lane.b32.xlu1 %v3902_v22, %s11182_s26 }
 0x6dd   : > { %4536 = vrot.lane.b32.xlu0 %v3829_v0, %s11179_s22 }
 0x6de   : > { %v13593_v24 = vpop.permute.xlu1 %4378 }
 0x6df   : > { %v4632_v57 = vpop.permute.xlu0 %4631 }
 0x6e0   : > { %4645 = vrot.lane.b32.xlu1 %v3830_v54, %s11180_s0  ;;  %v5202_v2 = vsel %vm5192_vm11, %v5165_v21, %v4632_v57  ;;  %v3676_v57 = vld [vmem:[#allocation3 + $0x58] sm:$0xff] }
 0x6e1   : > { %4141 = vrot.lane.b32.xlu0 %v3756_v36, %s11177_s19  ;;  %v5056_v36 = vsel %vm5045_vm6, %v5019_v25, %v13546_v38  ;;  %v5020_v53 = vsel %vm3622_vm4, %v3676_v57, %v13558_v14 }
 0x6e2   : > { %v4918_v49 = vpop.permute.xlu1 %4917  ;;  %v5092_v58 = vsel %vm2389_vm10, %v5056_v36, %v13575_v30 }
 0x6e3   : > { %v5275_v63 = vsel %vm5266_vm0, %v5238_v52, %v4918_v49  ;;  %v13602_v59 = vpop.permute.xlu0 %4236  ;;  %v5129_v28 = vsel %vm5118_vm8, %v5092_v58, %v13593_v24  ;;  %v3833_v24 = vld [vmem:[#allocation3 + $0xbc] sm:$0xff]  ;;  %v5057_v49 = vsel %vm5045_vm6, %v5020_v53, %v13571_v39 }
 0x6e4   : > { %9725 = vmatprep.mubr.msk.f32.mxu0 %vm5319_vm5, %v5275_v63  ;;  %4250 = vrot.lane.b32.xlu1 %v3757_v46, %s11172_s20  ;;  %v5166_v38 = vsel %vm5155_vm9, %v5129_v28, %v13585_v15  ;;  %v3760_v52 = vld [vmem:[#allocation3 + $0xba] sm:$0xff]  ;;  %v5093_v63 = vsel %vm2389_vm10, %v5057_v49, %v13602_v59  ;;  %v3761_v28 = vld [vmem:[#allocation3 + $0xc2] sm:$0xff] }
 0x6e5   : > { %3999 = vrot.lane.b32.xlu0 %v3721_v62, %s11176_s30 }
 0x6e6   : > { %v13607_v34 = vpop.permute.xlu1 %4127 }
 0x6e7   : > { %v4776_v7 = vpop.permute.xlu0 %4775 }
 0x6e8   : > { %4789 = vrot.lane.b32.xlu1 %v3867_v31, %s11181_s29  ;;  %v5239_v32 = vsel %vm5229_vm12, %v5202_v2, %v4776_v7  ;;  %v3796_v7 = vld [vmem:[#allocation3 + $0xb3] sm:$0xff]  ;;  %v3870_v31 = vld [vmem:[#allocation3 + $0xbd] sm:$0xff] }
 0x6e9   : > { %4538 = vrot.lane.b32.xlu0 %v3830_v54, %s11179_s22 }
 0x6ea   : > { %v13617_v47 = vpop.permute.xlu1 %4380 }
 0x6eb   : > { %v13621_v33 = vpop.permute.xlu0 %3985  ;;  %v5130_v62 = vsel %vm5118_vm8, %v5093_v63, %v13617_v47  ;;  %v3723_v47 = vld [vmem:[#allocation3 + $0xb1] sm:$0xff]  ;;  %v3907_v63 = vld [vmem:[#allocation3 + $0xc6] sm:$0xff] }
 0x6ec   : > { %4394 = vrot.lane.b32.xlu1 %v3794_v10, %s11178_s27 }
 0x6ed   : > { %4647 = vrot.lane.b32.xlu0 %v3831_v19, %s11180_s0 }
 0x6ee   : > { %v4920_v26 = vpop.permute.xlu1 %4919 }
 0x6ef   : > { %v5276_v16 = vsel %vm5266_vm0, %v5239_v32, %v4920_v26  ;;  %v4525_v18 = vpop.permute.xlu0 %4524  ;;  %v3906_v26 = vld [vmem:[#allocation3 + $0xbe] sm:$0xff] }
 0x6f0   : > { %9726 = vmatmul.mubr.msk.f32.gmra.mrb[44].mxu0 %vm5319_vm5, %v5276_v16  ;;  %4933 = vrot.lane.b32.xlu1 %v3903_v20, %s11182_s26  ;;  %v5167_v14 = vsel %vm5155_vm9, %v5130_v62, %v4525_v18  ;;  %v3724_v16 = vld [vmem:[#allocation3 + $0xb9] sm:$0xff] }
 0x6f1   : > { %4252 = vrot.lane.b32.xlu0 %v3758_v27, %s11172_s20  ;;  %v3677_v18 = vld [vmem:[#allocation3 + $0x60] sm:$0xff] }
 0x6f2   : > { %v4634_v48 = vpop.permute.xlu1 %4633  ;;  %v5021_v20 = vsel %vm3622_vm4, %v3677_v18, %v13577_v23  ;;  %v3834_v23 = vld [vmem:[#allocation3 + $0xc4] sm:$0xff] }
 0x6f3   : > { %v13632_v11 = vpop.permute.xlu0 %4129  ;;  %v5203_v42 = vsel %vm5192_vm11, %v5166_v38, %v4634_v48  ;;  %v5058_v48 = vsel %vm5045_vm6, %v5021_v20, %v13607_v34  ;;  %v3871_v38 = vld [vmem:[#allocation3 + $0xc5] sm:$0xff] }
 0x6f4   : > { %4143 = vrot.lane.b32.xlu1 %v3757_v46, %s11177_s19 }
 0x6f5   : > { %4791 = vrot.lane.b32.xlu0 %v3868_v8, %s11181_s29 }
 0x6f6   : > { %v13636_v0 = vpop.permute.xlu1 %4238 }
 0x6f7   : > { %v13638_v3 = vpop.permute.xlu0 %3987 }
 0x6f8   : > { %4396 = vrot.lane.b32.xlu1 %v3795_v1, %s11178_s27  ;;  %v5094_v1 = vsel %vm2389_vm10, %v5058_v48, %v13636_v0 }
 0x6f9   : > { %4001 = vrot.lane.b32.xlu0 %v3722_v43, %s11176_s30 }
 0x6fa   : > { %v4778_v51 = vpop.permute.xlu1 %4777 }
 0x6fb   : > { %v13646_v61 = vpop.permute.xlu0 %4526  ;;  %v5240_v30 = vsel %vm5229_vm12, %v5203_v42, %v4778_v51 }
 0x6fc   : > { %4935 = vrot.lane.b32.xlu1 %v3904_v55, %s11182_s26 }
 0x6fd   : > { %4540 = vrot.lane.b32.xlu0 %v3831_v19, %s11179_s22  ;;  %v3797_v19 = vld [vmem:[#allocation3 + $0xbb] sm:$0xff] }
 0x6fe   : > { %v13654_v44 = vpop.permute.xlu1 %4382 }
 0x6ff   : > { %v4636_v9 = vpop.permute.xlu0 %4635  ;;  %v5131_v43 = vsel %vm5118_vm8, %v5094_v1, %v13654_v44  ;;  %v3835_v44 = vld [vmem:[#allocation3 + $0xcc] sm:$0xff] }
 0x700   : > { %4649 = vrot.lane.b32.xlu1 %v3832_v5, %s11180_s0  ;;  %v5204_v39 = vsel %vm5192_vm11, %v5167_v14, %v4636_v9  ;;  %v5168_v51 = vsel %vm5155_vm9, %v5131_v43, %v13646_v61  ;;  %v3678_v9 = vld [vmem:[#allocation3 + $0x68] sm:$0xff] }
 0x701   : > { %4145 = vrot.lane.b32.xlu0 %v3758_v27, %s11177_s19  ;;  %v5022_v42 = vsel %vm3622_vm4, %v3678_v9, %v13621_v33  ;;  %v3799_v14 = vld [vmem:[#allocation3 + $0xcb] sm:$0xff]  ;;  %v3873_v9 = vld [vmem:[#allocation3 + $0xd5] sm:$0xff] }
 0x702   : > { %v4922_v35 = vpop.permute.xlu1 %4921 }
 0x703   : > { %v5277_v22 = vsel %vm5266_vm0, %v5240_v30, %v4922_v35  ;;  %v13663_v45 = vpop.permute.xlu0 %4240  ;;  %v3762_v30 = vld [vmem:[#allocation3 + $0xca] sm:$0xff]  ;;  %v5059_v35 = vsel %vm5045_vm6, %v5022_v42, %v13632_v11 }
 0x704   : > { %9728 = vmatprep.mubr.msk.f32.mxu0 %vm5319_vm5, %v5277_v22  ;;  %4254 = vrot.lane.b32.xlu1 %v3759_v60, %s11172_s20  ;;  %v5095_v22 = vsel %vm2389_vm10, %v5059_v35, %v13663_v45 }
 0x705   : > { %4651 = vrot.lane.b32.xlu0 %v3833_v24, %s11180_s0 }
 0x706   : > { %v13668_v15 = vpop.permute.xlu1 %4131 }
 0x707   : > { %v4780_v54 = vpop.permute.xlu0 %4779 }
 0x708   : > { %4793 = vrot.lane.b32.xlu1 %v3869_v41, %s11181_s29  ;;  %v5241_v4 = vsel %vm5229_vm12, %v5204_v39, %v4780_v54  ;;  %v3798_v54 = vld [vmem:[#allocation3 + $0xc3] sm:$0xff]  ;;  %v3872_v41 = vld [vmem:[#allocation3 + $0xcd] sm:$0xff] }
 0x709   : > { %4256 = vrot.lane.b32.xlu0 %v3760_v52, %s11172_s20 }
 0x70a   : > { %v13678_v46 = vpop.permute.xlu1 %4384 }
 0x70b   : > { %v13682_v17 = vpop.permute.xlu0 %3989 }
 0x70c   : > { %4398 = vrot.lane.b32.xlu1 %v3796_v7, %s11178_s27 }
 0x70d   : > { %4795 = vrot.lane.b32.xlu0 %v3870_v31, %s11181_s29 }
 0x70e   : > { %v4924_v59 = vpop.permute.xlu1 %4923 }
 0x70f   : > { %v5278_v50 = vsel %vm5266_vm0, %v5241_v4, %v4924_v59  ;;  %v4529_v40 = vpop.permute.xlu0 %4528  ;;  %v3908_v4 = vld [vmem:[#allocation3 + $0xce] sm:$0xff] }
 0x710   : > { %9729 = vmatmul.mubr.msk.f32.gmra.mrb[46].mxu0 %vm5319_vm5, %v5278_v50  ;;  %4937 = vrot.lane.b32.xlu1 %v3905_v12, %s11182_s26  ;;  %v3726_v59 = vld [vmem:[#allocation3 + $0xc9] sm:$0xff] }
 0x711   : > { %4003 = vrot.lane.b32.xlu0 %v3723_v47, %s11176_s30  ;;  %v3679_v50 = vld [vmem:[#allocation3 + $0x70] sm:$0xff] }
 0x712   : > { %v4638_v10 = vpop.permute.xlu1 %4637 }
 0x713   : > { %v13693_v21 = vpop.permute.xlu0 %4133  ;;  %v5205_v34 = vsel %vm5192_vm11, %v5168_v51, %v4638_v10  ;;  %v3837_v51 = vld [vmem:[#allocation3 + $0xdc] sm:$0xff] }
 0x714   : > { %4400 = vrot.lane.b32.xlu1 %v3797_v19, %s11178_s27 }
 0x715   : > { %4542 = vrot.lane.b32.xlu0 %v3832_v5, %s11179_s22 }
 0x716   : > { %v13697_v2 = vpop.permute.xlu1 %4242 }
 0x717   : > { %v13699_v32 = vpop.permute.xlu0 %3991 }
 0x718   : > { %4939 = vrot.lane.b32.xlu1 %v3906_v26, %s11182_s26 }
 0x719   : > { %4005 = vrot.lane.b32.xlu0 %v3724_v16, %s11176_s30 }
 0x71a   : > { %v4782_v27 = vpop.permute.xlu1 %4781 }
 0x71b   : > { %v13707_v8 = vpop.permute.xlu0 %4530  ;;  %v5242_v0 = vsel %vm5229_vm12, %v5205_v34, %v4782_v27 }
 0x71c   : > { %4147 = vrot.lane.b32.xlu1 %v3759_v60, %s11177_s19 }
 0x71d   : > { %4544 = vrot.lane.b32.xlu0 %v3833_v24, %s11179_s22  ;;  %v5132_v24 = vsel %vm5118_vm8, %v5095_v22, %v13678_v46  ;;  %v3725_v46 = vld [vmem:[#allocation3 + $0xc1] sm:$0xff] }
 0x71e   : > { %v13715_v56 = vpop.permute.xlu1 %4386  ;;  %v5169_v33 = vsel %vm5155_vm9, %v5132_v24, %v4529_v40  ;;  %v5023_v40 = vsel %vm3622_vm4, %v3679_v50, %v13638_v3  ;;  %v3836_v3 = vld [vmem:[#allocation3 + $0xd4] sm:$0xff] }
 0x71f   : > { %v4640_v25 = vpop.permute.xlu0 %4639  ;;  %v5060_v47 = vsel %vm5045_vm6, %v5023_v40, %v13668_v15  ;;  %v3800_v24 = vld [vmem:[#allocation3 + $0xd3] sm:$0xff] }
 0x720   : > { %4653 = vrot.lane.b32.xlu1 %v3834_v23, %s11180_s0  ;;  %v5206_v11 = vsel %vm5192_vm11, %v5169_v33, %v4640_v25  ;;  %v5096_v19 = vsel %vm2389_vm10, %v5060_v47, %v13697_v2  ;;  %v13788_v2 = vld [vmem:[%s15063_s4] ss:$0 sm:$0xff] }
 0x721   : > { %4149 = vrot.lane.b32.xlu0 %v3760_v52, %s11177_s19  ;;  %v5133_v26 = vsel %vm5118_vm8, %v5096_v19, %v13715_v56 }
 0x722   : > { %v4926_v36 = vpop.permute.xlu1 %4925  ;;  %v5170_v20 = vsel %vm5155_vm9, %v5133_v26, %v13707_v8  ;;  %v3763_v8 = vld [vmem:[#allocation3 + $0xd2] sm:$0xff] }
 0x723   : > { %v5279_v55 = vsel %vm5266_vm0, %v5242_v0, %v4926_v36  ;;  %v13724_v58 = vpop.permute.xlu0 %4244 }
 0x724   : > { %9731 = vmatprep.mubr.msk.f32.mxu0 %vm5319_vm5, %v5279_v55  ;;  %4258 = vrot.lane.b32.xlu1 %v3761_v28, %s11172_s20  ;;  %v3680_v55 = vld [vmem:[#allocation3 + $0x78] sm:$0xff] }
 0x725   : > { %4655 = vrot.lane.b32.xlu0 %v3835_v44, %s11180_s0 }
 0x726   : > { %v13729_v61 = vpop.permute.xlu1 %4135 }
 0x727   : > { %v4784_v5 = vpop.permute.xlu0 %4783 }
 0x728   : > { %4797 = vrot.lane.b32.xlu1 %v3871_v38, %s11181_s29  ;;  %v5243_v53 = vsel %vm5229_vm12, %v5206_v11, %v4784_v5  ;;  %v5024_v5 = vsel %vm3622_vm4, %v3680_v55, %v13682_v17  ;;  %v3764_v38 = vld [vmem:[#allocation3 + $0xda] sm:$0xff] }
 0x729   : > { %4260 = vrot.lane.b32.xlu0 %v3762_v30, %s11172_s20  ;;  %v5061_v42 = vsel %vm5045_vm6, %v5024_v5, %v13693_v21  ;;  %v3874_v21 = vld [vmem:[#allocation3 + $0xdd] sm:$0xff] }
 0x72a   : > { %v13739_v60 = vpop.permute.xlu1 %4388 }
 0x72b   : > { %v13743_v57 = vpop.permute.xlu0 %3993 }
 0x72c   : > { %4402 = vrot.lane.b32.xlu1 %v3798_v54, %s11178_s27 }
 0x72d   : > { %4799 = vrot.lane.b32.xlu0 %v3872_v41, %s11181_s29 }
 0x72e   : > { %v4928_v45 = vpop.permute.xlu1 %4927 }
 0x72f   : > { %v5280_v52 = vsel %vm5266_vm0, %v5243_v53, %v4928_v45  ;;  %v13751_v49 = vpop.permute.xlu0 %4532  ;;  %v3727_v45 = vld [vmem:[#allocation3 + $0xd1] sm:$0xff] }
 0x730   : > { %9732 = vmatmul.mubr.msk.f32.gmra.mrb[48].mxu0 %vm5319_vm5, %v5280_v52  ;;  %4941 = vrot.lane.b32.xlu1 %v3907_v63, %s11182_s26  ;;  %v3801_v63 = vld [vmem:[#allocation3 + $0xdb] sm:$0xff] }
 0x731   : > { %4007 = vrot.lane.b32.xlu0 %v3725_v46, %s11176_s30 }
 0x732   : > { %v4642_v62 = vpop.permute.xlu1 %4641 }
 0x733   : > { %v13756_v7 = vpop.permute.xlu0 %4137  ;;  %v5207_v15 = vsel %vm5192_vm11, %v5170_v20, %v4642_v62 }
 0x734   : > { %4404 = vrot.lane.b32.xlu1 %v3799_v14, %s11178_s27  ;;  %v3910_v14 = vld [vmem:[#allocation3 + $0xde] sm:$0xff] }
 0x735   : > { %4546 = vrot.lane.b32.xlu0 %v3834_v23, %s11179_s22 }
 0x736   : > { %v13760_v31 = vpop.permute.xlu1 %4246 }
 0x737   : > { %v13762_v39 = vpop.permute.xlu0 %3995 }
 0x738   : > { %4943 = vrot.lane.b32.xlu1 %v3908_v4, %s11182_s26  ;;  %v3728_v4 = vld [vmem:[#allocation3 + $0xd9] sm:$0xff] }
 0x739   : > { %4009 = vrot.lane.b32.xlu0 %v3726_v59, %s11176_s30  ;;  %v3681_v59 = vld [vmem:[#allocation3 + $0x80] sm:$0xff] }
 0x73a   : > { %v4786_v12 = vpop.permute.xlu1 %4785  ;;  %v5025_v50 = vsel %vm3622_vm4, %v3681_v59, %v13699_v32  ;;  %v3838_v32 = vld [vmem:[#allocation3 + $0xe4] sm:$0xff] }
 0x73b   : > { %v13770_v10 = vpop.permute.xlu0 %4534  ;;  %v5244_v27 = vsel %vm5229_vm12, %v5207_v15, %v4786_v12  ;;  %v5062_v12 = vsel %vm5045_vm6, %v5025_v50, %v13729_v61 }
 0x73c   : > { %4151 = vrot.lane.b32.xlu1 %v3761_v28, %s11177_s19  ;;  %v5098_v19 = vsel %vm2389_vm10, %v5062_v12, %v13760_v31 }
 0x73d   : > { %4548 = vrot.lane.b32.xlu0 %v3835_v44, %s11179_s22 }
 0x73e   : > { %v13778_v16 = vpop.permute.xlu1 %4390 }
 0x73f   : > { %v4644_v18 = vpop.permute.xlu0 %4643  ;;  %v5135_v26 = vsel %vm5118_vm8, %v5098_v19, %v13778_v16 }
 0x740   : > { %4657 = vrot.lane.b32.xlu1 %v3836_v3, %s11180_s0  ;;  %v5172_v20 = vsel %vm5155_vm9, %v5135_v26, %v13770_v10  ;;  %v3839_v10 = vld [vmem:[#allocation3 + $0xec] sm:$0xff] }
 0x741   : > { %4153 = vrot.lane.b32.xlu0 %v3762_v30, %s11177_s19  ;;  %v5097_v30 = vsel %vm2389_vm10, %v5061_v42, %v13724_v58 }
 0x742   : > { %v4930_v48 = vpop.permute.xlu1 %4929  ;;  %v5134_v17 = vsel %vm5118_vm8, %v5097_v30, %v13739_v60  ;;  %v3909_v60 = vld [vmem:[#allocation3 + $0xd6] sm:$0xff] }
 0x743   : > { %v5281_v1 = vsel %vm5266_vm0, %v5244_v27, %v4930_v48  ;;  %v13792_v43 = vpop.permute.xlu0 %4248  ;;  %v9715_v56 = vpop.f32.mrb[36].mxu0  ;;  %v5171_v54 = vsel %vm5155_vm9, %v5134_v17, %v13751_v49  ;;  %v3802_v17 = vld [vmem:[#allocation3 + $0xe3] sm:$0xff] }
 0x744   : > { %v5500_v25 = vadd.f32 %v9715_v56, %v13788_v2  ;;  %v5494_v23 = vpop.f32.mrb[37].mxu0  ;;  %9734 = vmatprep.mubr.msk.f32.mxu0 %vm5319_vm5, %v5281_v1  ;;  %4262 = vrot.lane.b32.xlu1 %v3763_v8, %s11172_s20  ;;  %v5208_v33 = vsel %vm5192_vm11, %v5171_v54, %v4644_v18  ;;  %v3765_v1 = vld [vmem:[#allocation3 + $0xe2] sm:$0xff] }
 0x745   : > { %v5495_v34 = vadd.f32 %v13788_v2, %v5494_v23  ;;  %4659 = vrot.lane.b32.xlu0 %v3837_v51, %s11180_s0 }
 0x746   : > { %v5674_v0 = vmax.f32 %v5500_v25, 0.0  ;;  %v13799_v36 = vpop.permute.xlu1 %4139 }
 0x747   : > { %v5673_v28 = vmax.f32 %v5495_v34, 0.0  ;;  %v4788_v44 = vpop.permute.xlu0 %4787  ;;  %v3682_v34 = vld [vmem:[#allocation3 + $0x88] sm:$0xff] }
 0x748   : > { %5710 = vst.msk [vmem:[#allocation4 + $0x8] sm:$0xff] %vm5045_vm6, %v5674_v0  ;;  %4801 = vrot.lane.b32.xlu1 %v3873_v9, %s11181_s29  ;;  %v5245_v58 = vsel %vm5229_vm12, %v5208_v33, %v4788_v44  ;;  %v5026_v44 = vsel %vm3622_vm4, %v3682_v34, %v13743_v57  ;;  %v3766_v9 = vld [vmem:[#allocation3 + $0xea] sm:$0xff] }
 0x749   : > { %5709 = vst.msk [vmem:[#allocation4] sm:$0xff] %vm5045_vm6, %v5673_v28  ;;  %4264 = vrot.lane.b32.xlu0 %v3764_v38, %s11172_s20  ;;  %v3875_v28 = vld [vmem:[#allocation3 + $0xe5] sm:$0xff]  ;;  %v5063_v5 = vsel %vm5045_vm6, %v5026_v44, %v13756_v7  ;;  %v3876_v7 = vld [vmem:[#allocation3 + $0xed] sm:$0xff]  ;;  %v3877_v44 = vld [vmem:[#allocation3 + $0xf5] sm:$0xff] }
 0x74a   : > { %v13811_v35 = vpop.permute.xlu1 %4392 }
 0x74b   : > { %v13815_v22 = vpop.permute.xlu0 %3997 }
 0x74c   : > { %4406 = vrot.lane.b32.xlu1 %v3800_v24, %s11178_s27 }
 0x74d   : > { %4803 = vrot.lane.b32.xlu0 %v3874_v21, %s11181_s29 }
 0x74e   : > { %v4932_v41 = vpop.permute.xlu1 %4931 }
 0x74f   : > { %v5282_v11 = vsel %vm5266_vm0, %v5245_v58, %v4932_v41  ;;  %v13824_v53 = vpop.permute.xlu0 %4536  ;;  %v3729_v41 = vld [vmem:[#allocation3 + $0xe1] sm:$0xff] }
 0x750   : > { %9735 = vmatmul.mubr.msk.f32.gmra.mrb[50].mxu0 %vm5319_vm5, %v5282_v11  ;;  %4945 = vrot.lane.b32.xlu1 %v3909_v60, %s11182_s26  ;;  %v3803_v60 = vld [vmem:[#allocation3 + $0xeb] sm:$0xff] }
 0x751   : > { %4011 = vrot.lane.b32.xlu0 %v3727_v45, %s11176_s30 }
 0x752   : > { %v4646_v52 = vpop.permute.xlu1 %4645 }
 0x753   : > { %v13829_v49 = vpop.permute.xlu0 %4141  ;;  %v5209_v61 = vsel %vm5192_vm11, %v5172_v20, %v4646_v52 }
 0x754   : > { %4408 = vrot.lane.b32.xlu1 %v3801_v63, %s11178_s27  ;;  %v3912_v63 = vld [vmem:[#allocation3 + $0xee] sm:$0xff] }
 0x755   : > { %4550 = vrot.lane.b32.xlu0 %v3836_v3, %s11179_s22 }
 0x756   : > { %v13833_v46 = vpop.permute.xlu1 %4250 }
 0x757   : > { %v13835_v62 = vpop.permute.xlu0 %3999 }
 0x758   : > { %4947 = vrot.lane.b32.xlu1 %v3910_v14, %s11182_s26  ;;  %v3730_v14 = vld [vmem:[#allocation3 + $0xe9] sm:$0xff] }
 0x759   : > { %4013 = vrot.lane.b32.xlu0 %v3728_v4, %s11176_s30  ;;  %v3683_v4 = vld [vmem:[#allocation3 + $0x90] sm:$0xff] }
 0x75a   : > { %v4790_v40 = vpop.permute.xlu1 %4789  ;;  %v5027_v59 = vsel %vm3622_vm4, %v3683_v4, %v13762_v39  ;;  %v3840_v39 = vld [vmem:[#allocation3 + $0xf4] sm:$0xff] }
 0x75b   : > { %v13843_v47 = vpop.permute.xlu0 %4538  ;;  %v5246_v31 = vsel %vm5229_vm12, %v5209_v61, %v4790_v40  ;;  %v5064_v40 = vsel %vm5045_vm6, %v5027_v59, %v13799_v36 }
 0x75c   : > { %4155 = vrot.lane.b32.xlu1 %v3763_v8, %s11177_s19  ;;  %v5100_v19 = vsel %vm2389_vm10, %v5064_v40, %v13833_v46 }
 0x75d   : > { %4552 = vrot.lane.b32.xlu0 %v3837_v51, %s11179_s22 }
 0x75e   : > { %v13851_v18 = vpop.permute.xlu1 %4394 }
 0x75f   : > { %v4648_v3 = vpop.permute.xlu0 %4647  ;;  %v5137_v26 = vsel %vm5118_vm8, %v5100_v19, %v13851_v18 }
 0x760   : > { %4661 = vrot.lane.b32.xlu1 %v3838_v32, %s11180_s0  ;;  %v5174_v20 = vsel %vm5155_vm9, %v5137_v26, %v13843_v47 }
 0x761   : > { %4157 = vrot.lane.b32.xlu0 %v3764_v38, %s11177_s19  ;;  %v5099_v38 = vsel %vm2389_vm10, %v5063_v5, %v13792_v43 }
 0x762   : > { %v4934_v15 = vpop.permute.xlu1 %4933  ;;  %v5136_v57 = vsel %vm5118_vm8, %v5099_v38, %v13811_v35  ;;  %v3911_v35 = vld [vmem:[#allocation3 + $0xe6] sm:$0xff] }
 0x763   : > { %v5283_v16 = vsel %vm5266_vm0, %v5246_v31, %v4934_v15  ;;  %v13860_v27 = vpop.permute.xlu0 %4252  ;;  %v9718_v48 = vpop.f32.mrb[38].mxu0  ;;  %v5173_v24 = vsel %vm5155_vm9, %v5136_v57, %v13824_v53  ;;  %v3684_v31 = vld [vmem:[#allocation3 + $0x98] sm:$0xff] }
 0x764   : > { %v5510_v56 = vadd.f32 %v9718_v48, %v13788_v2  ;;  %v5504_v8 = vpop.f32.mrb[39].mxu0  ;;  %9737 = vmatprep.mubr.msk.f32.mxu0 %vm5319_vm5, %v5283_v16  ;;  %4266 = vrot.lane.b32.xlu1 %v3765_v1, %s11172_s20  ;;  %v5210_v54 = vsel %vm5192_vm11, %v5173_v24, %v4648_v3  ;;  %v3767_v48 = vld [vmem:[#allocation3 + $0xf2] sm:$0xff]  ;;  %v3878_v24 = vld [vmem:[#allocation3 + $0xfd] sm:$0xff] }
 0x765   : > { %v5505_v25 = vadd.f32 %v13788_v2, %v5504_v8  ;;  %4663 = vrot.lane.b32.xlu0 %v3839_v10, %s11180_s0  ;;  %v3841_v8 = vld [vmem:[#allocation3 + $0xfc] sm:$0xff] }
 0x766   : > { %v5676_v23 = vmax.f32 %v5510_v56, 0.0  ;;  %v13867_v51 = vpop.permute.xlu1 %4143 }
 0x767   : > { %v5675_v0 = vmax.f32 %v5505_v25, 0.0  ;;  %v4792_v55 = vpop.permute.xlu0 %4791 }
 0x768   : > { %5712 = vst.msk [vmem:[#allocation4 + $0x18] sm:$0xff] %vm5045_vm6, %v5676_v23  ;;  %4805 = vrot.lane.b32.xlu1 %v3875_v28, %s11181_s29  ;;  %v5247_v43 = vsel %vm5229_vm12, %v5210_v54, %v4792_v55 }
 0x769   : > { %5711 = vst.msk [vmem:[#allocation4 + $0x10] sm:$0xff] %vm5045_vm6, %v5675_v0  ;;  %4268 = vrot.lane.b32.xlu0 %v3766_v9, %s11172_s20 }
 0x76a   : > { %v13879_v42 = vpop.permute.xlu1 %4396 }
 0x76b   : > { %v13883_v30 = vpop.permute.xlu0 %4001 }
 0x76c   : > { %4410 = vrot.lane.b32.xlu1 %v3802_v17, %s11178_s27  ;;  %v3804_v17 = vld [vmem:[#allocation3 + $0xf3] sm:$0xff] }
 0x76d   : > { %4807 = vrot.lane.b32.xlu0 %v3876_v7, %s11181_s29 }
 0x76e   : > { %v4936_v21 = vpop.permute.xlu1 %4935 }
 0x76f   : > { %v5284_v33 = vsel %vm5266_vm0, %v5247_v43, %v4936_v21  ;;  %v4541_v58 = vpop.permute.xlu0 %4540  ;;  %v3913_v43 = vld [vmem:[#allocation3 + $0xf6] sm:$0xff] }
 0x770   : > { %9738 = vmatmul.mubr.msk.f32.gmra.mrb[52].mxu0 %vm5319_vm5, %v5284_v33  ;;  %4949 = vrot.lane.b32.xlu1 %v3911_v35, %s11182_s26  ;;  %v3731_v21 = vld [vmem:[#allocation3 + $0xf1] sm:$0xff]  ;;  %v3805_v35 = vld [vmem:[#allocation3 + $0xfb] sm:$0xff] }
 0x771   : > { %4015 = vrot.lane.b32.xlu0 %v3729_v41, %s11176_s30 }
 0x772   : > { %v4650_v11 = vpop.permute.xlu1 %4649 }
 0x773   : > { %v13895_v53 = vpop.permute.xlu0 %4145  ;;  %v5211_v36 = vsel %vm5192_vm11, %v5174_v20, %v4650_v11 }
 0x774   : > { %4412 = vrot.lane.b32.xlu1 %v3803_v60, %s11178_s27  ;;  %v3914_v60 = vld [vmem:[#allocation3 + $0xfe] sm:$0xff] }
 0x775   : > { %4554 = vrot.lane.b32.xlu0 %v3838_v32, %s11179_s22 }
 0x776   : > { %v13899_v45 = vpop.permute.xlu1 %4254 }
 0x777   : > { %v4652_v52 = vpop.permute.xlu0 %4651 }
 0x778   : > { %4951 = vrot.lane.b32.xlu1 %v3912_v63, %s11182_s26 }
 0x779   : > { %4017 = vrot.lane.b32.xlu0 %v3730_v14, %s11176_s30  ;;  %v3685_v14 = vld [vmem:[#allocation3 + $0xa0] sm:$0xff] }
 0x77a   : > { %v4794_v50 = vpop.permute.xlu1 %4793  ;;  %v5029_v59 = vsel %vm3622_vm4, %v3685_v14, %v13835_v62 }
 0x77b   : > { %v13907_v12 = vpop.permute.xlu0 %4256  ;;  %v5248_v46 = vsel %vm5229_vm12, %v5211_v36, %v4794_v50  ;;  %v5066_v50 = vsel %vm5045_vm6, %v5029_v59, %v13867_v51 }
 0x77c   : > { %4159 = vrot.lane.b32.xlu1 %v3765_v1, %s11177_s19  ;;  %v5028_v1 = vsel %vm3622_vm4, %v3684_v31, %v13815_v22  ;;  %v5102_v40 = vsel %vm2389_vm10, %v5066_v50, %v13899_v45 }
 0x77d   : > { %4556 = vrot.lane.b32.xlu0 %v3839_v10, %s11179_s22  ;;  %v5065_v10 = vsel %vm5045_vm6, %v5028_v1, %v13829_v49  ;;  %v3768_v49 = vld [vmem:[#allocation3 + $0xfa] sm:$0xff]  ;;  %v3843_v1 = vld [vmem:[#allocation3 + $0x10c] sm:$0xff] }
 0x77e   : > { %v13915_v3 = vpop.permute.xlu1 %4398  ;;  %v5101_v23 = vsel %vm2389_vm10, %v5065_v10, %v13860_v27 }
 0x77f   : > { %v4796_v32 = vpop.permute.xlu0 %4795  ;;  %v5138_v0 = vsel %vm5118_vm8, %v5101_v23, %v13879_v42  ;;  %v5139_v26 = vsel %vm5118_vm8, %v5102_v40, %v13915_v3  ;;  %v3769_v3 = vld [vmem:[#allocation3 + $0x102] sm:$0xff] }
 0x780   : > { %4665 = vrot.lane.b32.xlu1 %v3840_v39, %s11180_s0 }
 0x781   : > { %4161 = vrot.lane.b32.xlu0 %v3766_v9, %s11177_s19  ;;  %v5175_v9 = vsel %vm5155_vm9, %v5138_v0, %v4541_v58  ;;  %v3879_v0 = vld [vmem:[#allocation3 + $0x105] sm:$0xff] }
 0x782   : > { %v4938_v61 = vpop.permute.xlu1 %4937  ;;  %v5212_v5 = vsel %vm5192_vm11, %v5175_v9, %v4652_v52  ;;  %v3732_v52 = vld [vmem:[#allocation3 + $0xf9] sm:$0xff] }
 0x783   : > { %v5285_v18 = vsel %vm5266_vm0, %v5248_v46, %v4938_v61  ;;  %v13924_v15 = vpop.permute.xlu0 %4003  ;;  %v9721_v16 = vpop.f32.mrb[40].mxu0  ;;  %v5249_v27 = vsel %vm5229_vm12, %v5212_v5, %v4796_v32  ;;  %v3686_v46 = vld [vmem:[#allocation3 + $0xa8] sm:$0xff] }
 0x784   : > { %v5520_v47 = vadd.f32 %v9721_v16, %v13788_v2  ;;  %v5514_v56 = vpop.f32.mrb[41].mxu0  ;;  %9740 = vmatprep.mubr.msk.f32.mxu0 %vm5319_vm5, %v5285_v18  ;;  %4270 = vrot.lane.b32.xlu1 %v3767_v48, %s11172_s20  ;;  %v5030_v18 = vsel %vm3622_vm4, %v3686_v46, %v13883_v30  ;;  %v3880_v5 = vld [vmem:[#allocation3 + $0x10d] sm:$0xff] }
 0x785   : > { %v5515_v25 = vadd.f32 %v13788_v2, %v5514_v56  ;;  %4667 = vrot.lane.b32.xlu0 %v3841_v8, %s11180_s0 }
 0x786   : > { %v5678_v34 = vmax.f32 %v5520_v47, 0.0  ;;  %v13937_v22 = vpop.permute.xlu1 %4400  ;;  %v5067_v47 = vsel %vm5045_vm6, %v5030_v18, %v13895_v53  ;;  %v3770_v53 = vld [vmem:[#allocation3 + $0x10a] sm:$0xff]  ;;  %v3845_v18 = vld [vmem:[#allocation3 + $0x11c] sm:$0xff] }
 0x787   : > { %v5677_v55 = vmax.f32 %v5515_v25, 0.0  ;;  %v4543_v28 = vpop.permute.xlu0 %4542 }
 0x788   : > { %5714 = vst.msk [vmem:[#allocation4 + $0x28] sm:$0xff] %vm5045_vm6, %v5678_v34  ;;  %4809 = vrot.lane.b32.xlu1 %v3877_v44, %s11181_s29  ;;  %v5176_v20 = vsel %vm5155_vm9, %v5139_v26, %v4543_v28 }
 0x789   : > { %5713 = vst.msk [vmem:[#allocation4 + $0x20] sm:$0xff] %vm5045_vm6, %v5677_v55  ;;  %4272 = vrot.lane.b32.xlu0 %v3768_v49, %s11172_s20 }
 0x78a   : > { %v4940_v38 = vpop.permute.xlu1 %4939 }
 0x78b   : > { %v5286_v42 = vsel %vm5266_vm0, %v5249_v27, %v4940_v38  ;;  %v13949_v57 = vpop.permute.xlu0 %4005 }
 0x78c   : > { %9741 = vmatmul.mubr.msk.f32.gmra.mrb[54].mxu0 %vm5319_vm5, %v5286_v42  ;;  %4414 = vrot.lane.b32.xlu1 %v3804_v17, %s11178_s27  ;;  %v3915_v42 = vld [vmem:[#allocation3 + $0x106] sm:$0xff] }
 0x78d   : > { %4811 = vrot.lane.b32.xlu0 %v3878_v24, %s11181_s29  ;;  %v3733_v17 = vld [vmem:[#allocation3 + $0x101] sm:$0xff] }
 0x78e   : > { %v13954_v7 = vpop.permute.xlu1 %4147 }
 0x78f   : > { %v4545_v54 = vpop.permute.xlu0 %4544 }
 0x790   : > { %4953 = vrot.lane.b32.xlu1 %v3913_v43, %s11182_s26  ;;  %v3807_v43 = vld [vmem:[#allocation3 + $0x10b] sm:$0xff] }
 0x791   : > { %4019 = vrot.lane.b32.xlu0 %v3731_v21, %s11176_s30 }
 0x792   : > { %v4654_v33 = vpop.permute.xlu1 %4653 }
 0x793   : > { %v13958_v58 = vpop.permute.xlu0 %4149  ;;  %v5213_v62 = vsel %vm5192_vm11, %v5176_v20, %v4654_v33 }
 0x794   : > { %4416 = vrot.lane.b32.xlu1 %v3805_v35, %s11178_s27  ;;  %v3916_v35 = vld [vmem:[#allocation3 + $0x10e] sm:$0xff] }
 0x795   : > { %4558 = vrot.lane.b32.xlu0 %v3840_v39, %s11179_s22  ;;  %v3842_v39 = vld [vmem:[#allocation3 + $0x104] sm:$0xff] }
 0x796   : > { %v13962_v41 = vpop.permute.xlu1 %4258 }
 0x797   : > { %v4656_v11 = vpop.permute.xlu0 %4655 }
 0x798   : > { %4955 = vrot.lane.b32.xlu1 %v3914_v60, %s11182_s26 }
 0x799   : > { %4021 = vrot.lane.b32.xlu0 %v3732_v52, %s11176_s30  ;;  %v3687_v52 = vld [vmem:[#allocation3 + $0xb0] sm:$0xff] }
 0x79a   : > { %v4798_v63 = vpop.permute.xlu1 %4797  ;;  %v5031_v14 = vsel %vm3622_vm4, %v3687_v52, %v13924_v15 }
 0x79b   : > { %v13966_v4 = vpop.permute.xlu0 %4260  ;;  %v5250_v51 = vsel %vm5229_vm12, %v5213_v62, %v4798_v63  ;;  %v5068_v59 = vsel %vm5045_vm6, %v5031_v14, %v13954_v7 }
 0x79c   : > { %4163 = vrot.lane.b32.xlu1 %v3767_v48, %s11177_s19  ;;  %v5104_v50 = vsel %vm2389_vm10, %v5068_v59, %v13962_v41 }
 0x79d   : > { %4560 = vrot.lane.b32.xlu0 %v3841_v8, %s11179_s22  ;;  %v5103_v8 = vsel %vm2389_vm10, %v5067_v47, %v13907_v12 }
 0x79e   : > { %v13976_v19 = vpop.permute.xlu1 %4402  ;;  %v5140_v25 = vsel %vm5118_vm8, %v5103_v8, %v13937_v22 }
 0x79f   : > { %v4800_v32 = vpop.permute.xlu0 %4799  ;;  %v5177_v55 = vsel %vm5155_vm9, %v5140_v25, %v4545_v54  ;;  %v5141_v26 = vsel %vm5118_vm8, %v5104_v50, %v13976_v19  ;;  %v3771_v19 = vld [vmem:[#allocation3 + $0x112] sm:$0xff] }
 0x7a0   : > { %4669 = vrot.lane.b32.xlu1 %v3842_v39, %s11180_s0  ;;  %v5214_v28 = vsel %vm5192_vm11, %v5177_v55, %v4656_v11  ;;  %v3734_v11 = vld [vmem:[#allocation3 + $0x109] sm:$0xff]  ;;  %v3881_v25 = vld [vmem:[#allocation3 + $0x115] sm:$0xff] }
 0x7a1   : > { %4165 = vrot.lane.b32.xlu0 %v3768_v49, %s11177_s19  ;;  %v5251_v12 = vsel %vm5229_vm12, %v5214_v28, %v4800_v32  ;;  %v3806_v49 = vld [vmem:[#allocation3 + $0x103] sm:$0xff] }
 0x7a2   : > { %v4942_v36 = vpop.permute.xlu1 %4941  ;;  %v3882_v28 = vld [vmem:[#allocation3 + $0x11d] sm:$0xff] }
 0x7a3   : > { %v5287_v45 = vsel %vm5266_vm0, %v5250_v51, %v4942_v36  ;;  %v13986_v61 = vpop.permute.xlu0 %4007  ;;  %v9724_v31 = vpop.f32.mrb[42].mxu0  ;;  %v3688_v51 = vld [vmem:[#allocation3 + $0xb8] sm:$0xff] }
 0x7a4   : > { %v5530_v16 = vadd.f32 %v9724_v31, %v13788_v2  ;;  %v5524_v48 = vpop.f32.mrb[43].mxu0  ;;  %9743 = vmatprep.mubr.msk.f32.mxu0 %vm5319_vm5, %v5287_v45  ;;  %4274 = vrot.lane.b32.xlu1 %v3769_v3, %s11172_s20  ;;  %v5032_v45 = vsel %vm3622_vm4, %v3688_v51, %v13949_v57 }
 0x7a5   : > { %v5525_v56 = vadd.f32 %v13788_v2, %v5524_v48  ;;  %4671 = vrot.lane.b32.xlu0 %v3843_v1, %s11180_s0 }
 0x7a6   : > { %v5680_v10 = vmax.f32 %v5530_v16, 0.0  ;;  %v13999_v30 = vpop.permute.xlu1 %4404  ;;  %v5069_v16 = vsel %vm5045_vm6, %v5032_v45, %v13958_v58  ;;  %v3773_v58 = vld [vmem:[#allocation3 + $0x11a] sm:$0xff] }
 0x7a7   : > { %v5679_v23 = vmax.f32 %v5525_v56, 0.0  ;;  %v4547_v34 = vpop.permute.xlu0 %4546 }
 0x7a8   : > { %5716 = vst.msk [vmem:[#allocation4 + $0x38] sm:$0xff] %vm5045_vm6, %v5680_v10  ;;  %4813 = vrot.lane.b32.xlu1 %v3879_v0, %s11181_s29  ;;  %v5178_v20 = vsel %vm5155_vm9, %v5141_v26, %v4547_v34 }
 0x7a9   : > { %5715 = vst.msk [vmem:[#allocation4 + $0x30] sm:$0xff] %vm5045_vm6, %v5679_v23  ;;  %4276 = vrot.lane.b32.xlu0 %v3770_v53, %s11172_s20 }
 0x7aa   : > { %v4944_v44 = vpop.permute.xlu1 %4943 }
 0x7ab   : > { %v5288_v22 = vsel %vm5266_vm0, %v5251_v12, %v4944_v44  ;;  %v14011_v9 = vpop.permute.xlu0 %4009 }
 0x7ac   : > { %9744 = vmatmul.mubr.msk.f32.gmra.mrb[56].mxu0 %vm5319_vm5, %v5288_v22  ;;  %4418 = vrot.lane.b32.xlu1 %v3806_v49, %s11178_s27  ;;  %v3917_v22 = vld [vmem:[#allocation3 + $0x116] sm:$0xff] }
 0x7ad   : > { %4815 = vrot.lane.b32.xlu0 %v3880_v5, %s11181_s29  ;;  %v3735_v49 = vld [vmem:[#allocation3 + $0x111] sm:$0xff] }
 0x7ae   : > { %v14016_v27 = vpop.permute.xlu1 %4151 }
 0x7af   : > { %v4549_v38 = vpop.permute.xlu0 %4548 }
 0x7b0   : > { %4957 = vrot.lane.b32.xlu1 %v3915_v42, %s11182_s26  ;;  %v3809_v42 = vld [vmem:[#allocation3 + $0x11b] sm:$0xff] }
 0x7b1   : > { %4023 = vrot.lane.b32.xlu0 %v3733_v17, %s11176_s30 }
 0x7b2   : > { %v4658_v24 = vpop.permute.xlu1 %4657 }
 0x7b3   : > { %v14020_v54 = vpop.permute.xlu0 %4153  ;;  %v5215_v15 = vsel %vm5192_vm11, %v5178_v20, %v4658_v24 }
 0x7b4   : > { %4420 = vrot.lane.b32.xlu1 %v3807_v43, %s11178_s27  ;;  %v3918_v43 = vld [vmem:[#allocation3 + $0x11e] sm:$0xff] }
 0x7b5   : > { %4562 = vrot.lane.b32.xlu0 %v3842_v39, %s11179_s22  ;;  %v3844_v39 = vld [vmem:[#allocation3 + $0x114] sm:$0xff] }
 0x7b6   : > { %v14024_v21 = vpop.permute.xlu1 %4262 }
 0x7b7   : > { %v4660_v33 = vpop.permute.xlu0 %4659 }
 0x7b8   : > { %4959 = vrot.lane.b32.xlu1 %v3916_v35, %s11182_s26 }
 0x7b9   : > { %4025 = vrot.lane.b32.xlu0 %v3734_v11, %s11176_s30  ;;  %v3689_v11 = vld [vmem:[#allocation3 + $0xc0] sm:$0xff] }
 0x7ba   : > { %v4802_v60 = vpop.permute.xlu1 %4801  ;;  %v5033_v52 = vsel %vm3622_vm4, %v3689_v11, %v13986_v61  ;;  %v3772_v61 = vld [vmem:[#allocation3 + $0x11a] sm:$0x3f] }
 0x7bb   : > { %v14028_v63 = vpop.permute.xlu0 %4264  ;;  %v5252_v7 = vsel %vm5229_vm12, %v5215_v15, %v4802_v60  ;;  %v5070_v14 = vsel %vm5045_vm6, %v5033_v52, %v14016_v27  ;;  %v3850_v52 = vld [vmem:[#allocation3 + $0x13c] sm:$0x3f] }
 0x7bc   : > { %4167 = vrot.lane.b32.xlu1 %v3769_v3, %s11177_s19  ;;  %v5106_v59 = vsel %vm2389_vm10, %v5070_v14, %v14024_v21  ;;  %v3690_v21 = vld [vmem:[#allocation3 + $0xc8] sm:$0xff] }
 0x7bd   : > { %4564 = vrot.lane.b32.xlu0 %v3843_v1, %s11179_s22  ;;  %v5105_v1 = vsel %vm2389_vm10, %v5069_v16, %v13966_v4 }
 0x7be   : > { %v14038_v40 = vpop.permute.xlu1 %4406  ;;  %v5142_v56 = vsel %vm5118_vm8, %v5105_v1, %v13999_v30 }
 0x7bf   : > { %v4804_v32 = vpop.permute.xlu0 %4803  ;;  %v5179_v23 = vsel %vm5155_vm9, %v5142_v56, %v4549_v38  ;;  %v5143_v26 = vsel %vm5118_vm8, %v5106_v59, %v14038_v40  ;;  %v3885_v59 = vld [vmem:[#allocation3 + $0x135] sm:$0xff] }
 0x7c0   : > { %4673 = vrot.lane.b32.xlu1 %v3844_v39, %s11180_s0  ;;  %v5216_v34 = vsel %vm5192_vm11, %v5179_v23, %v4660_v33  ;;  %v3736_v33 = vld [vmem:[#allocation3 + $0x119] sm:$0x3f] }
 0x7c1   : > { %4169 = vrot.lane.b32.xlu0 %v3770_v53, %s11177_s19  ;;  %v5253_v4 = vsel %vm5229_vm12, %v5216_v34, %v4804_v32  ;;  %v3808_v53 = vld [vmem:[#allocation3 + $0x113] sm:$0xff]  ;;  %v3810_v34 = vld [vmem:[#allocation3 + $0x123] sm:$0xff] }
 0x7c2   : > { %v4946_v62 = vpop.permute.xlu1 %4945 }
 0x7c3   : > { %v5289_v41 = vsel %vm5266_vm0, %v5252_v7, %v4946_v62  ;;  %v14048_v36 = vpop.permute.xlu0 %4011  ;;  %v9727_v46 = vpop.f32.mrb[44].mxu0 }
 0x7c4   : > { %v5540_v31 = vadd.f32 %v9727_v46, %v13788_v2  ;;  %v5534_v3 = vpop.f32.mrb[45].mxu0  ;;  %9746 = vmatprep.mubr.msk.f32.mxu0 %vm5319_vm5, %v5289_v41  ;;  %4278 = vrot.lane.b32.xlu1 %v3771_v19, %s11172_s20  ;;  %v3774_v41 = vld [vmem:[#allocation3 + $0x122] sm:$0xff]  ;;  %v5034_v46 = vsel %vm3622_vm4, %v3690_v21, %v14011_v9 }
 0x7c5   : > { %v5535_v48 = vadd.f32 %v13788_v2, %v5534_v3  ;;  %4675 = vrot.lane.b32.xlu0 %v3845_v18, %s11180_s0  ;;  %v5071_v3 = vsel %vm5045_vm6, %v5034_v46, %v14020_v54  ;;  %v3775_v54 = vld [vmem:[#allocation3 + $0x12a] sm:$0x3f] }
 0x7c6   : > { %v5682_v47 = vmax.f32 %v5540_v31, 0.0  ;;  %v14061_v57 = vpop.permute.xlu1 %4408  ;;  %v3848_v31 = vld [vmem:[#allocation3 + $0x12c] sm:$0xff]  ;;  %v5107_v16 = vsel %vm2389_vm10, %v5071_v3, %v14028_v63 }
 0x7c7   : > { %v5681_v8 = vmax.f32 %v5535_v48, 0.0  ;;  %v4551_v10 = vpop.permute.xlu0 %4550  ;;  %v5144_v1 = vsel %vm5118_vm8, %v5107_v16, %v14061_v57 }
 0x7c8   : > { %5718 = vst.msk [vmem:[#allocation4 + $0x48] sm:$0xff] %vm5045_vm6, %v5682_v47  ;;  %4817 = vrot.lane.b32.xlu1 %v3881_v25, %s11181_s29  ;;  %v5180_v20 = vsel %vm5155_vm9, %v5143_v26, %v4551_v10 }
 0x7c9   : > { %5717 = vst.msk [vmem:[#allocation4 + $0x40] sm:$0xff] %vm5045_vm6, %v5681_v8  ;;  %4280 = vrot.lane.b32.xlu0 %v3773_v58, %s11172_s20  ;;  %v3883_v8 = vld [vmem:[#allocation3 + $0x125] sm:$0xff] }
 0x7ca   : > { %v4948_v0 = vpop.permute.xlu1 %4947 }
 0x7cb   : > { %v5290_v30 = vsel %vm5266_vm0, %v5253_v4, %v4948_v0  ;;  %v14073_v55 = vpop.permute.xlu0 %4013  ;;  %v3884_v4 = vld [vmem:[#allocation3 + $0x12d] sm:$0xff] }
 0x7cc   : > { %9747 = vmatmul.mubr.msk.f32.gmra.mrb[58].mxu0 %vm5319_vm5, %v5290_v30  ;;  %4422 = vrot.lane.b32.xlu1 %v3808_v53, %s11178_s27  ;;  %v3919_v53 = vld [vmem:[#allocation3 + $0x126] sm:$0xff] }
 0x7cd   : > { %4819 = vrot.lane.b32.xlu0 %v3882_v28, %s11181_s29  ;;  %v3811_v28 = vld [vmem:[#allocation3 + $0x12b] sm:$0x3f] }
 0x7ce   : > { %v14078_v12 = vpop.permute.xlu1 %4155 }
 0x7cf   : > { %v4553_v44 = vpop.permute.xlu0 %4552 }
 0x7d0   : > { %4961 = vrot.lane.b32.xlu1 %v3917_v22, %s11182_s26  ;;  %v5181_v10 = vsel %vm5155_vm9, %v5144_v1, %v4553_v44 }
 0x7d1   : > { %4027 = vrot.lane.b32.xlu0 %v3735_v49, %s11176_s30  ;;  %v3920_v49 = vld [vmem:[#allocation3 + $0x12e] sm:$0xff] }
 0x7d2   : > { %v4662_v5 = vpop.permute.xlu1 %4661 }
 0x7d3   : > { %v14082_v38 = vpop.permute.xlu0 %4157  ;;  %v5217_v15 = vsel %vm5192_vm11, %v5180_v20, %v4662_v5 }
 0x7d4   : > { %4424 = vrot.lane.b32.xlu1 %v3809_v42, %s11178_s27 }
 0x7d5   : > { %4566 = vrot.lane.b32.xlu0 %v3844_v39, %s11179_s22  ;;  %v3846_v39 = vld [vmem:[#allocation3 + $0x124] sm:$0xff] }
 0x7d6   : > { %v14086_v17 = vpop.permute.xlu1 %4266 }
 0x7d7   : > { %v4664_v24 = vpop.permute.xlu0 %4663 }
 0x7d8   : > { %4963 = vrot.lane.b32.xlu1 %v3918_v43, %s11182_s26  ;;  %v5218_v25 = vsel %vm5192_vm11, %v5181_v10, %v4664_v24  ;;  %v3847_v24 = vld [vmem:[#allocation3 + $0x12c] sm:$0x3f]  ;;  %v3849_v43 = vld [vmem:[#allocation3 + $0x134] sm:$0xff] }
 0x7d9   : > { %4029 = vrot.lane.b32.xlu0 %v3736_v33, %s11176_s30  ;;  %s11079_s30 = scalar_lea.vmem %s11078_s2, 128 }
 0x7da   : > { %v4806_v35 = vpop.permute.xlu1 %4805 }
 0x7db   : > { %v14090_v60 = vpop.permute.xlu0 %4268  ;;  %v5254_v27 = vsel %vm5229_vm12, %v5217_v15, %v4806_v35  ;;  %v3691_v35 = vld [vmem:[#allocation3 + $0xd0] sm:$0xff]  ;;  %v3886_v15 = vld [vmem:[#allocation3 + $0x13d] sm:$0x3f] }
 0x7dc   : > { %4171 = vrot.lane.b32.xlu1 %v3771_v19, %s11177_s19  ;;  %v5035_v14 = vsel %vm3622_vm4, %v3691_v35, %v14048_v36  ;;  %v3921_v36 = vld [vmem:[#allocation3 + $0x136] sm:$0xff] }
 0x7dd   : > { %4568 = vrot.lane.b32.xlu0 %v3845_v18, %s11179_s22  ;;  %v5072_v26 = vsel %vm5045_vm6, %v5035_v14, %v14078_v12 }
 0x7de   : > { %v14100_v50 = vpop.permute.xlu1 %4410 }
 0x7df   : > { %v4808_v32 = vpop.permute.xlu0 %4807 }
 0x7e0   : > { %4677 = vrot.lane.b32.xlu1 %v3846_v39, %s11180_s0  ;;  %v5255_v63 = vsel %vm5229_vm12, %v5218_v25, %v4808_v32  ;;  %v5108_v32 = vsel %vm2389_vm10, %v5072_v26, %v14086_v17 }
 0x7e1   : > { %4173 = vrot.lane.b32.xlu0 %v3772_v61, %s11177_s19  ;;  %v5145_v20 = vsel %vm5118_vm8, %v5108_v32, %v14100_v50 }
 0x7e2   : > { %v4950_v7 = vpop.permute.xlu1 %4949 }
 0x7e3   : > { %v5291_v62 = vsel %vm5266_vm0, %v5254_v27, %v4950_v7  ;;  %v14110_v51 = vpop.permute.xlu0 %4015  ;;  %v9730_v40 = vpop.f32.mrb[46].mxu0 }
 0x7e4   : > { %v5550_v19 = vadd.f32 %v9730_v40, %v13788_v2  ;;  %v5544_v45 = vpop.f32.mrb[47].mxu0  ;;  %9749 = vmatprep.mubr.msk.f32.mxu0 %vm5319_vm5, %v5291_v62  ;;  %4282 = vrot.lane.b32.xlu1 %v3774_v41, %s11172_s20  ;;  %v3692_v62 = vld [vmem:[#allocation3 + $0xd8] sm:$0xff] }
 0x7e5   : > { %v5545_v18 = vadd.f32 %v13788_v2, %v5544_v45  ;;  %4679 = vrot.lane.b32.xlu0 %v3848_v31, %s11180_s0  ;;  %v3922_v41 = vld [vmem:[#allocation3 + $0x13e] sm:$0x3f]  ;;  %v5036_v46 = vsel %vm3622_vm4, %v3692_v62, %v14073_v55 }
 0x7e6   : > { %v5684_v48 = vmax.f32 %v5550_v19, 0.0  ;;  %v14123_v9 = vpop.permute.xlu1 %4412  ;;  %v5073_v31 = vsel %vm5045_vm6, %v5036_v46, %v14082_v38 }
 0x7e7   : > { %v5683_v47 = vmax.f32 %v5545_v18, 0.0  ;;  %v4555_v56 = vpop.permute.xlu0 %4554  ;;  %v5109_v18 = vsel %vm2389_vm10, %v5073_v31, %v14090_v60 }
 0x7e8   : > { %5720 = vst.msk [vmem:[#allocation4 + $0x58] sm:$0xff] %vm5045_vm6, %v5684_v48  ;;  %4821 = vrot.lane.b32.xlu1 %v3883_v8, %s11181_s29  ;;  %v5182_v27 = vsel %vm5155_vm9, %v5145_v20, %v4555_v56  ;;  %v5146_v55 = vsel %vm5118_vm8, %v5109_v18, %v14123_v9  ;;  %v3695_v18 = vld [vmem:[#allocation3 + $0xf0] sm:$0xff] }
 0x7e9   : > { %5719 = vst.msk [vmem:[#allocation4 + $0x50] sm:$0xff] %vm5045_vm6, %v5683_v47  ;;  %4284 = vrot.lane.b32.xlu0 %v3775_v54, %s11172_s20  ;;  %s8947_s20 = sshll.u32 %s695_s12, 2 }
 0x7ea   : > { %v4952_v23 = vpop.permute.xlu1 %4951  ;;  %s697_s21 = scalar_lea.vmem [#allocation23], %s8947_s20 }
 0x7eb   : > { %v5292_v57 = vsel %vm5266_vm0, %v5255_v63, %v4952_v23  ;;  %v14135_v58 = vpop.permute.xlu0 %4017 }
 0x7ec   : > { %9750 = vmatmul.mubr.msk.f32.gmra.mrb[60].mxu0 %vm5319_vm5, %v5292_v57  ;;  %4426 = vrot.lane.b32.xlu1 %v3810_v34, %s11178_s27 }
 0x7ed   : > { %4823 = vrot.lane.b32.xlu0 %v3884_v4, %s11181_s29 }
 0x7ee   : > { %v14140_v0 = vpop.permute.xlu1 %4159 }
 0x7ef   : > { %v4557_v30 = vpop.permute.xlu0 %4556 }
 0x7f0   : > { %4965 = vrot.lane.b32.xlu1 %v3919_v53, %s11182_s26  ;;  %v5183_v56 = vsel %vm5155_vm9, %v5146_v55, %v4557_v30  ;;  %v3693_v30 = vld [vmem:[#allocation3 + $0xe0] sm:$0xff] }
 0x7f1   : > { %4428 = vrot.lane.b32.xlu0 %v3811_v28, %s11178_s27  ;;  %v5037_v28 = vsel %vm3622_vm4, %v3693_v30, %v14110_v51 }
 0x7f2   : > { %v4666_v44 = vpop.permute.xlu1 %4665 }
 0x7f3   : > { %v14144_v22 = vpop.permute.xlu0 %4161  ;;  %v5219_v7 = vsel %vm5192_vm11, %v5182_v27, %v4666_v44  ;;  %v5074_v44 = vsel %vm5045_vm6, %v5037_v28, %v14140_v0 }
 0x7f4   : > { %4570 = vrot.lane.b32.xlu1 %v3846_v39, %s11179_s22 }
 0x7f5   : > { %4967 = vrot.lane.b32.xlu0 %v3920_v49, %s11182_s26 }
 0x7f6   : > { %v14148_v5 = vpop.permute.xlu1 %4270 }
 0x7f7   : > { %v4668_v42 = vpop.permute.xlu0 %4667  ;;  %v5110_v49 = vsel %vm2389_vm10, %v5074_v44, %v14148_v5 }
 0x7f8   : > { %4572 = vrot.lane.b32.xlu1 %v3847_v24, %s11179_s22  ;;  %v5220_v8 = vsel %vm5192_vm11, %v5183_v56, %v4668_v42 }
 0x7f9   : > { %4681 = vrot.lane.b32.xlu0 %v3849_v43, %s11180_s0 }
 0x7fa   : > { %v4810_v33 = vpop.permute.xlu1 %4809 }
 0x7fb   : > { %v14152_v11 = vpop.permute.xlu0 %4272  ;;  %v5256_v12 = vsel %vm5229_vm12, %v5219_v7, %v4810_v33 }
 0x7fc   : > { %4683 = vrot.lane.b32.xlu1 %v3850_v52, %s11180_s0 }
 0x7fd   : > { %4825 = vrot.lane.b32.xlu0 %v3885_v59, %s11181_s29  ;;  %v3694_v59 = vld [vmem:[#allocation3 + $0xe8] sm:$0xff] }
 0x7fe   : > { %v4415_v39 = vpop.permute.xlu1 %4414  ;;  %v5038_v5 = vsel %vm3622_vm4, %v3694_v59, %v14135_v58 }
 0x7ff   : > { %v4812_v61 = vpop.permute.xlu0 %4811  ;;  %v5147_v24 = vsel %vm5118_vm8, %v5110_v49, %v4415_v39  ;;  %v5075_v20 = vsel %vm5045_vm6, %v5038_v5, %v14144_v22 }
 0x800   : > { %4827 = vrot.lane.b32.xlu1 %v3886_v15, %s11181_s29  ;;  %v5257_v38 = vsel %vm5229_vm12, %v5220_v8, %v4812_v61  ;;  %v5111_v15 = vsel %vm2389_vm10, %v5075_v20, %v14152_v11  ;;  %s15140_s29 = sld [smem:[#allocation44_spill]] }
 0x801   : > { %4969 = vrot.lane.b32.xlu0 %v3921_v36, %s11182_s26 }
 0x802   : > { %v4954_v21 = vpop.permute.xlu1 %4953 }
 0x803   : > { %v5293_v17 = vsel %vm5266_vm0, %v5256_v12, %v4954_v21  ;;  %v14170_v40 = vpop.permute.xlu0 %4019  ;;  %v9733_v50 = vpop.f32.mrb[48].mxu0 }
 0x804   : > { %v5560_v19 = vadd.f32 %v9733_v50, %v13788_v2  ;;  %v5554_v45 = vpop.f32.mrb[49].mxu0  ;;  %9752 = vmatprep.mubr.msk.f32.mxu0 %vm5319_vm5, %v5293_v17  ;;  %4971 = vrot.lane.b32.xlu1 %v3922_v41, %s11182_s26 }
 0x805   : > { %v5555_v3 = vadd.f32 %v13788_v2, %v5554_v45 }
 0x806   : > { %v5686_v16 = vmax.f32 %v5560_v19, 0.0  ;;  %v4417_v48 = vpop.permute.xlu1 %4416 }
 0x807   : > { %v5685_v1 = vmax.f32 %v5555_v3, 0.0  ;;  %v4559_v47 = vpop.permute.xlu0 %4558  ;;  %v5148_v7 = vsel %vm5118_vm8, %v5111_v15, %v4417_v48  ;;  %v5039_v48 = vsel %vm3622_vm4, %v3695_v18, %v14170_v40 }
 0x808   : > { %5722 = vst.msk [vmem:[#allocation4 + $0x68] sm:$0xff] %vm5045_vm6, %v5686_v16  ;;  %v5184_v33 = vsel %vm5155_vm9, %v5147_v24, %v4559_v47 }
 0x809   : > { %5721 = vst.msk [vmem:[#allocation4 + $0x60] sm:$0xff] %vm5045_vm6, %v5685_v1 }
 0x80a   : > { %v4956_v10 = vpop.permute.xlu1 %4955 }
 0x80b   : > { %v5294_v60 = vsel %vm5266_vm0, %v5257_v38, %v4956_v10  ;;  %v14190_v54 = vpop.permute.xlu0 %4021 }
 0x80c   : > { %9753 = vmatmul.mubr.msk.f32.gmra.mrb[62].mxu0 %vm5319_vm5, %v5294_v60 }
 0x80e   : > { %v4164_v9 = vpop.permute.xlu1 %4163 }
 0x80f   : > { %v4561_v25 = vpop.permute.xlu0 %4560  ;;  %v5076_v55 = vsel %vm5045_vm6, %v5039_v48, %v4164_v9 }
 0x810   : > { %v5185_v58 = vsel %vm5155_vm9, %v5148_v7, %v4561_v25 }
 0x812   : > { %v4670_v63 = vpop.permute.xlu1 %4669 }
 0x813   : > { %v14193_v23 = vpop.permute.xlu0 %4165  ;;  %v5221_v35 = vsel %vm5192_vm11, %v5184_v33, %v4670_v63  ;;  %v3696_v63 = vld [vmem:[#allocation3 + $0xf8] sm:$0xff] }
 0x814   : > { %v5040_v9 = vsel %vm3622_vm4, %v3696_v63, %v14190_v54 }
 0x815   : > { %v5077_v44 = vsel %vm5045_vm6, %v5040_v9, %v14193_v23 }
 0x816   : > { %v4275_v57 = vpop.permute.xlu1 %4274 }
 0x817   : > { %v4672_v34 = vpop.permute.xlu0 %4671  ;;  %v5112_v1 = vsel %vm2389_vm10, %v5076_v55, %v4275_v57  ;;  %v14249_v57 = vld [vmem:[%s15063_s4] ss:$0 sm:$0xff] }
 0x818   : > { %v5222_v62 = vsel %vm5192_vm11, %v5185_v58, %v4672_v34 }
 0x81a   : > { %v4814_v4 = vpop.permute.xlu1 %4813 }
 0x81b   : > { %v14195_v53 = vpop.permute.xlu0 %4276  ;;  %v5258_v52 = vsel %vm5229_vm12, %v5221_v35, %v4814_v4 }
 0x81e   : > { %v4419_v42 = vpop.permute.xlu1 %4418 }
 0x81f   : > { %v4816_v43 = vpop.permute.xlu0 %4815  ;;  %v5149_v56 = vsel %vm5118_vm8, %v5112_v1, %v4419_v42  ;;  %v5113_v42 = vsel %vm2389_vm10, %v5077_v44, %v14195_v53  ;;  %v3700_v44 = vld [vmem:[#allocation3 + $0x118] sm:$0x3f] }
 0x820   : > { %v5259_v22 = vsel %vm5229_vm12, %v5222_v62, %v4816_v43 }
 0x822   : > { %v4958_v14 = vpop.permute.xlu1 %4957 }
 0x823   : > { %v5295_v51 = vsel %vm5266_vm0, %v5258_v52, %v4958_v14  ;;  %v14208_v26 = vpop.permute.xlu0 %4023  ;;  %v9736_v0 = vpop.f32.mrb[50].mxu0 }
 0x824   : > { %v5570_v32 = vadd.f32 %v9736_v0, %v13788_v2  ;;  %v5564_v39 = vpop.f32.mrb[51].mxu0  ;;  %9755 = vmatprep.mubr.msk.f32.mxu0 %vm5319_vm5, %v5295_v51 }
 0x825   : > { %v5565_v61 = vadd.f32 %v13788_v2, %v5564_v39 }
 0x826   : > { %v5688_v27 = vmax.f32 %v5570_v32, 0.0  ;;  %v4421_v36 = vpop.permute.xlu1 %4420 }
 0x827   : > { %v5687_v12 = vmax.f32 %v5565_v61, 0.0  ;;  %v4563_v21 = vpop.permute.xlu0 %4562  ;;  %v5150_v43 = vsel %vm5118_vm8, %v5113_v42, %v4421_v36 }
 0x828   : > { %5724 = vst.msk [vmem:[#allocation4 + $0x78] sm:$0xff] %vm5045_vm6, %v5688_v27  ;;  %v5186_v38 = vsel %vm5155_vm9, %v5149_v56, %v4563_v21  ;;  %v3697_v27 = vld [vmem:[#allocation3 + $0x100] sm:$0xff] }
 0x829   : > { %5723 = vst.msk [vmem:[#allocation4 + $0x70] sm:$0xff] %vm5045_vm6, %v5687_v12  ;;  %v5041_v7 = vsel %vm3622_vm4, %v3697_v27, %v14208_v26 }
 0x82a   : > { %v4960_v2 = vpop.permute.xlu1 %4959 }
 0x82b   : > { %v5296_v17 = vsel %vm5266_vm0, %v5259_v22, %v4960_v2  ;;  %v14226_v11 = vpop.permute.xlu0 %4025 }
 0x82c   : > { %9756 = vmatmul.mubr.msk.f32.gmra.mrb[64].mxu0 %vm5319_vm5, %v5296_v17  ;;  %v3698_v17 = vld [vmem:[#allocation3 + $0x108] sm:$0xff] }
 0x82e   : > { %v4168_v50 = vpop.permute.xlu1 %4167 }
 0x82f   : > { %v4565_v41 = vpop.permute.xlu0 %4564  ;;  %v5078_v12 = vsel %vm5045_vm6, %v5041_v7, %v4168_v50 }
 0x830   : > { %v5187_v52 = vsel %vm5155_vm9, %v5150_v43, %v4565_v41 }
 0x832   : > { %v4674_v46 = vpop.permute.xlu1 %4673 }
 0x833   : > { %v14229_v19 = vpop.permute.xlu0 %4169  ;;  %v5223_v10 = vsel %vm5192_vm11, %v5186_v38, %v4674_v46 }
 0x836   : > { %v4279_v45 = vpop.permute.xlu1 %4278 }
 0x837   : > { %v4676_v31 = vpop.permute.xlu0 %4675  ;;  %v5114_v21 = vsel %vm2389_vm10, %v5078_v12, %v4279_v45  ;;  %v5849_v12 = vld [vmem:[#allocation4 + $0x1a] sm:$0xff] }
 0x838   : > { %v5224_v14 = vsel %vm5192_vm11, %v5187_v52, %v4676_v31 }
 0x83a   : > { %v4818_v3 = vpop.permute.xlu1 %4817 }
 0x83b   : > { %v14231_v16 = vpop.permute.xlu0 %4280  ;;  %v5260_v60 = vsel %vm5229_vm12, %v5223_v10, %v4818_v3  ;;  %v5042_v3 = vsel %vm3622_vm4, %v3698_v17, %v14226_v11  ;;  %v5882_v17 = vld [vmem:[#allocation4 + $0x13] sm:$0xff] }
 0x83c   : > { %v5079_v45 = vsel %vm5045_vm6, %v5042_v3, %v14229_v19 }
 0x83d   : > { %v5115_v1 = vsel %vm2389_vm10, %v5079_v45, %v14231_v16  ;;  %v5747_v45 = vld [vmem:[#allocation4 + $0x8] sm:$0xff] }
 0x83e   : > { %v4423_v47 = vpop.permute.xlu1 %4422 }
 0x83f   : > { %v4820_v8 = vpop.permute.xlu0 %4819  ;;  %v5151_v62 = vsel %vm5118_vm8, %v5114_v21, %v4423_v47  ;;  %v5883_v21 = vld [vmem:[#allocation4 + $0x1b] sm:$0xff] }
 0x840   : > { %v5261_v23 = vsel %vm5229_vm12, %v5224_v14, %v4820_v8  ;;  %v5917_v3 = vmax.f32 %v5849_v12, %v5883_v21 }
 0x842   : > { %v4962_v25 = vpop.permute.xlu1 %4961 }
 0x843   : > { %v5297_v34 = vsel %vm5266_vm0, %v5260_v60, %v4962_v25  ;;  %v14242_v4 = vpop.permute.xlu0 %4027  ;;  %v9739_v40 = vpop.f32.mrb[52].mxu0 }
 0x844   : > { %v5580_v30 = vadd.f32 %v14249_v57, %v9739_v40  ;;  %v5574_v28 = vpop.f32.mrb[53].mxu0  ;;  %9758 = vmatprep.mubr.msk.f32.mxu0 %vm5319_vm5, %v5297_v34  ;;  %v3699_v40 = vld [vmem:[#allocation3 + $0x110] sm:$0xff] }
 0x845   : > { %v5575_v49 = vadd.f32 %v14249_v57, %v5574_v28  ;;  %v5043_v9 = vsel %vm3622_vm4, %v3699_v40, %v14242_v4 }
 0x846   : > { %v5690_v24 = vmax.f32 %v5580_v30, 0.0  ;;  %v4425_v54 = vpop.permute.xlu1 %4424 }
 0x847   : > { %v5689_v33 = vmax.f32 %v5575_v49, 0.0  ;;  %v4567_v35 = vpop.permute.xlu0 %4566  ;;  %v5152_v11 = vsel %vm5118_vm8, %v5115_v1, %v4425_v54 }
 0x848   : > { %5726 = vst.msk [vmem:[#allocation4 + $0x88] sm:$0xff] %vm5045_vm6, %v5690_v24  ;;  %v5188_v41 = vsel %vm5155_vm9, %v5151_v62, %v4567_v35 }
 0x849   : > { %5725 = vst.msk [vmem:[#allocation4 + $0x80] sm:$0xff] %vm5045_vm6, %v5689_v33 }
 0x84a   : > { %v4964_v59 = vpop.permute.xlu1 %4963 }
 0x84b   : > { %v5298_v51 = vsel %vm5266_vm0, %v5261_v23, %v4964_v59  ;;  %v4030_v53 = vpop.permute.xlu0 %4029 }
 0x84c   : > { %9759 = vmatmul.mubr.msk.f32.gmra.mrb[66].mxu0 %vm5319_vm5, %v5298_v51  ;;  %v5044_v24 = vsel %vm3622_vm4, %v3700_v44, %v4030_v53  ;;  %vm6338_vm4 = vcmask 125952  }
 0x84e   : > { %v4172_v0 = vpop.permute.xlu1 %4171 }
 0x84f   : > { %v4569_v5 = vpop.permute.xlu0 %4568  ;;  %v5080_v30 = vsel %vm5045_vm6, %v5043_v9, %v4172_v0 }
 0x850   : > { %v5189_v38 = vsel %vm5155_vm9, %v5152_v11, %v4569_v5 }
 0x852   : > { %v4678_v32 = vpop.permute.xlu1 %4677 }
 0x853   : > { %v4174_v39 = vpop.permute.xlu0 %4173  ;;  %v5225_v26 = vsel %vm5192_vm11, %v5188_v41, %v4678_v32  ;;  %v5762_v41 = vld [vmem:[#allocation4 + $0x80] sm:$0xff] }
 0x854   : > { %v5081_v43 = vsel %vm5045_vm6, %v5044_v24, %v4174_v39  ;;  %v5885_v24 = vld [vmem:[#allocation4 + $0x2b] sm:$0xff] }
 0x856   : > { %v4283_v20 = vpop.permute.xlu1 %4282 }
 0x857   : > { %v4680_v61 = vpop.permute.xlu0 %4679  ;;  %v5116_v49 = vsel %vm2389_vm10, %v5080_v30, %v4283_v20 }
 0x858   : > { %v5226_v19 = vsel %vm5192_vm11, %v5189_v38, %v4680_v61 }
 0x85a   : > { %v4822_v15 = vpop.permute.xlu1 %4821 }
 0x85b   : > { %v4285_v36 = vpop.permute.xlu0 %4284  ;;  %v5262_v18 = vsel %vm5229_vm12, %v5225_v26, %v4822_v15 }
 0x85c   : > { %v5117_v35 = vsel %vm2389_vm10, %v5081_v43, %v4285_v36  ;;  %vm5744_vm10 = vcmask 128000  }
 0x85e   : > { %v4427_v58 = vpop.permute.xlu1 %4426 }
 0x85f   : > { %v4824_v22 = vpop.permute.xlu0 %4823  ;;  %v9742_v2 = vpop.f32.mrb[54].mxu0  ;;  %v5153_v54 = vsel %vm5118_vm8, %v5116_v49, %v4427_v58 }
 0x860   : > { %v5590_v46 = vadd.f32 %v14249_v57, %v9742_v2  ;;  %v5584_v31 = vpop.f32.mrb[55].mxu0  ;;  %v5263_v60 = vsel %vm5229_vm12, %v5226_v19, %v4824_v22  ;;  %v5781_v22 = vld [vmem:[#allocation4 + $0x9] sm:$0xff]  ;;  %v5848_v2 = vld [vmem:[#allocation4 + $0x12] sm:$0xff] }
 0x861   : > { %v5585_v50 = vadd.f32 %v14249_v57, %v5584_v31 }
 0x862   : > { %v5692_v48 = vmax.f32 %v5590_v46, 0.0  ;;  %v4966_v55 = vpop.permute.xlu1 %4965  ;;  %v5796_v46 = vld [vmem:[#allocation4 + $0x81] sm:$0xff] }
 0x863   : > { %v5691_v47 = vmax.f32 %v5585_v50, 0.0  ;;  %v5299_v56 = vsel %vm5266_vm0, %v5262_v18, %v4966_v55  ;;  %v4429_v8 = vpop.permute.xlu0 %4428  ;;  %v5746_v50 = vld [vmem:[#allocation4] sm:$0xff] }
 0x864   : > { %5728 = vst.msk [vmem:[#allocation4 + $0x98] sm:$0xff] %vm5045_vm6, %v5692_v48  ;;  %9761 = vmatprep.mubr.msk.f32.mxu0 %vm5319_vm5, %v5299_v56  ;;  %v5154_v14 = vsel %vm5118_vm8, %v5117_v35, %v4429_v8  ;;  %v5780_v18 = vld [vmem:[#allocation4 + $0x1] sm:$0xff]  ;;  %v5916_v56 = vmax.f32 %v5848_v2, %v5882_v17  ;;  %v5830_v8 = vmax.f32 %v5762_v41, %v5796_v46 }
 0x865   : > { %5727 = vst.msk [vmem:[#allocation4 + $0x90] sm:$0xff] %vm5045_vm6, %v5691_v47  ;;  %v5763_v48 = vld [vmem:[#allocation4 + $0x88] sm:$0xff]  ;;  %v5815_v47 = vmax.f32 %v5747_v45, %v5781_v22  ;;  %v5814_v19 = vmax.f32 %v5746_v50, %v5780_v18  ;;  %v5853_v45 = vld [vmem:[#allocation4 + $0x3a] sm:$0xff] }
 0x866   : > { %v4571_v10 = vpop.permute.xlu1 %4570  ;;  %v5850_v35 = vld [vmem:[#allocation4 + $0x22] sm:$0xff] }
 0x867   : > { %v4968_v16 = vpop.permute.xlu0 %4967  ;;  %v5190_v33 = vsel %vm5155_vm9, %v5153_v54, %v4571_v10  ;;  %v5951_v10 = vmax.f32 %v5815_v47, %v5917_v3  ;;  %v5887_v18 = vld [vmem:[#allocation4 + $0x3b] sm:$0xff]  ;;  %v5852_v47 = vld [vmem:[#allocation4 + $0x32] sm:$0xff] }
 0x868   : > { %v5300_v25 = vsel %vm5266_vm0, %v5263_v60, %v4968_v16 }
 0x869   : > { %9762 = vmatmul.mubr.msk.f32.gmra.mrb[68].mxu0 %vm5319_vm5, %v5300_v25  ;;  %v5950_v25 = vmax.f32 %v5814_v19, %v5916_v56  ;;  %v5886_v56 = vld [vmem:[#allocation4 + $0x33] sm:$0xff]  ;;  %v5921_v19 = vmax.f32 %v5853_v45, %v5887_v18 }
 0x86a   : > { %v4573_v63 = vpop.permute.xlu1 %4572 }
 0x86b   : > { %v4682_v34 = vpop.permute.xlu0 %4681  ;;  %v5191_v51 = vsel %vm5155_vm9, %v5154_v14, %v4573_v63  ;;  %vm6718_vm9 = vcmask 654336  }
 0x86c   : > { %v5227_v52 = vsel %vm5192_vm11, %v5190_v33, %v4682_v34  ;;  %v5864_v58 = vld [vmem:[#allocation4 + $0x92] sm:$0xff]  ;;  %v5797_v31 = vld [vmem:[#allocation4 + $0x89] sm:$0xff]  ;;  %v10047_v34 = vpack.c.bf16 %v5951_v10, %v5950_v25  ;;  %v5784_v25 = vld [vmem:[#allocation4 + $0x21] sm:$0xff] }
 0x86d   : > { %v5898_v62 = vld [vmem:[#allocation4 + $0x93] sm:$0xff]  ;;  %v5831_v11 = vmax.f32 %v5763_v48, %v5797_v31 }
 0x86e   : > { %v4684_v28 = vpop.permute.xlu1 %4683  ;;  %v5932_v26 = vmax.f32 %v5864_v58, %v5898_v62  ;;  %v5783_v33 = vld [vmem:[#allocation4 + $0x19] sm:$0xff]  ;;  %v5798_v14 = vld [vmem:[#allocation4 + $0x91] sm:$0xff] }
 0x86f   : > { %v4826_v42 = vpop.permute.xlu0 %4825  ;;  %v5228_v0 = vsel %vm5192_vm11, %v5191_v51, %v4684_v28 }
 0x870   : > { %v5264_v23 = vsel %vm5229_vm12, %v5227_v52, %v4826_v42  ;;  %v5966_v60 = vmax.f32 %v5830_v8, %v5932_v26  ;;  %v5851_v42 = vld [vmem:[#allocation4 + $0x2a] sm:$0xff] }
 0x871   : > { %v5884_v52 = vld [vmem:[#allocation4 + $0x23] sm:$0xff] }
 0x872   : > { %v4828_v4 = vpop.permute.xlu1 %4827 }
 0x873   : > { %v4970_v59 = vpop.permute.xlu0 %4969  ;;  %v5265_v5 = vsel %vm5229_vm12, %v5228_v0, %v4828_v4  ;;  %v5764_v4 = vld [vmem:[#allocation4 + $0x90] sm:$0xff]  ;;  %v5749_v0 = vld [vmem:[#allocation4 + $0x18] sm:$0xff]  ;;  %vm6729_vm12 = vcmask 785408  }
 0x874   : > { %v5301_v53 = vsel %vm5266_vm0, %v5264_v23, %v4970_v59  ;;  %v5919_v59 = vmax.f32 %v5851_v42, %v5885_v24 }
 0x875   : > { %9764 = vmatprep.mubr.msk.f32.mxu0 %vm5319_vm5, %v5301_v53  ;;  %v5748_v53 = vld [vmem:[#allocation4 + $0x10] sm:$0xff] }
 0x876   : > { %v4972_v32 = vpop.permute.xlu1 %4971 }
 0x877   : > { %v5302_v39 = vsel %vm5266_vm0, %v5265_v5, %v4972_v32  ;;  %v5782_v5 = vld [vmem:[#allocation4 + $0x11] sm:$0xff] }
 0x878   : > { %9765 = vmatmul.mubr.msk.f32.gmra.mrb[70].mxu0 %vm5319_vm5, %v5302_v39  ;;  %v5765_v32 = vld [vmem:[#allocation4 + $0x98] sm:$0xff]  ;;  %v5816_v12 = vmax.f32 %v5748_v53, %v5782_v5  ;;  %v5855_v5 = vld [vmem:[#allocation4 + $0x4a] sm:$0xff]  ;;  %vm6740_vm5 = vcmask 916480  }
 0x87f   : > { %v9745_v20 = vpop.f32.mrb[56].mxu0 }
 0x880   : > { %v5600_v61 = vadd.f32 %v14249_v57, %v9745_v20  ;;  %v5594_v15 = vpop.f32.mrb[57].mxu0 }
 0x881   : > { %v5595_v27 = vadd.f32 %v14249_v57, %v5594_v15  ;;  %v5918_v15 = vmax.f32 %v5850_v35, %v5884_v52 }
 0x882   : > { %v5694_v36 = vmax.f32 %v5600_v61, 0.0  ;;  %v5817_v61 = vmax.f32 %v5749_v0, %v5783_v33 }
 0x883   : > { %v5693_v7 = vmax.f32 %v5595_v27, 0.0  ;;  %v5832_v27 = vmax.f32 %v5764_v4, %v5798_v14  ;;  %v5952_v22 = vmax.f32 %v5816_v12, %v5918_v15  ;;  %v5854_v15 = vld [vmem:[#allocation4 + $0x42] sm:$0xff] }
 0x884   : > { %5730 = vst.msk [vmem:[#allocation4 + $0xa8] sm:$0xff] %vm5045_vm6, %v5694_v36  ;;  %v5953_v21 = vmax.f32 %v5817_v61, %v5919_v59  ;;  %v5985_v59 = vld [vmem:[#allocation19 + $0x8] sm:$0xff]  ;;  %v5787_v61 = vld [vmem:[#allocation4 + $0x39] sm:$0xff] }
 0x885   : > { %5729 = vst.msk [vmem:[#allocation4 + $0xa0] sm:$0xff] %vm5045_vm6, %v5693_v7  ;;  %6130 = vmatprep.mubr.f32.mxu0 %v5985_v59 }
 0x886   : > { %v10051_v17 = vpack.c.bf16 %v5953_v21, %v5952_v22  ;;  %v5753_v22 = vld [vmem:[#allocation4 + $0x38] sm:$0xff] }
 0x88c   : > { %v5865_v55 = vld [vmem:[#allocation4 + $0x9a] sm:$0xff]  ;;  %v5866_v54 = vld [vmem:[#allocation4 + $0xa2] sm:$0xff] }
 0x88d   : > { %v5899_v1 = vld [vmem:[#allocation4 + $0x9b] sm:$0xff]  ;;  %v5900_v43 = vld [vmem:[#allocation4 + $0xa3] sm:$0xff] }
 0x88e   : > { %v5933_v38 = vmax.f32 %v5865_v55, %v5899_v1  ;;  %v5799_v23 = vld [vmem:[#allocation4 + $0x99] sm:$0xff]  ;;  %v5934_v51 = vmax.f32 %v5866_v54, %v5900_v43  ;;  %v5785_v1 = vld [vmem:[#allocation4 + $0x29] sm:$0xff] }
 0x88f   : > { %v5833_v36 = vmax.f32 %v5765_v32, %v5799_v23  ;;  %v5766_v8 = vld [vmem:[#allocation4 + $0xa0] sm:$0xff]  ;;  %v5889_v32 = vld [vmem:[#allocation4 + $0x4b] sm:$0xff] }
 0x890   : > { %v5967_v16 = vmax.f32 %v5831_v11, %v5933_v38  ;;  %v5968_v58 = vmax.f32 %v5832_v27, %v5934_v51  ;;  %v5800_v11 = vld [vmem:[#allocation4 + $0xa1] sm:$0xff]  ;;  %v5923_v21 = vmax.f32 %v5855_v5, %v5889_v32 }
 0x891   : > { %v5888_v27 = vld [vmem:[#allocation4 + $0x43] sm:$0xff] }
 0x892   : > { %v10045_v63 = vpack.c.bf16 %v5967_v16, %v5966_v60  ;;  %v5750_v60 = vld [vmem:[#allocation4 + $0x20] sm:$0xff]  ;;  %v5751_v16 = vld [vmem:[#allocation4 + $0x28] sm:$0xff] }
 0x893   : > { %v5818_v42 = vmax.f32 %v5750_v60, %v5784_v25  ;;  %v5857_v25 = vld [vmem:[#allocation4 + $0x5a] sm:$0xff] }
 0x894   : > { %10046 = vmatprep.subr.bf16.mxu0 %v10045_v63  ;;  %v5767_v63 = vld [vmem:[#allocation4 + $0xa8] sm:$0xff] }
 0x895   : > { %10048 = vmatpush3.bf16.msra.mxu0 %v10047_v34 }
 0x89f   : > { %v9748_v40 = vpop.f32.mrb[58].mxu0 }
 0x8a0   : > { %v5610_v9 = vadd.f32 %v14249_v57, %v9748_v40  ;;  %v5604_v30 = vpop.f32.mrb[59].mxu0 }
 0x8a1   : > { %v5605_v28 = vadd.f32 %v14249_v57, %v5604_v30  ;;  %v5920_v30 = vmax.f32 %v5852_v47, %v5886_v56 }
 0x8a2   : > { %v5696_v44 = vmax.f32 %v5610_v9, 0.0  ;;  %v5819_v9 = vmax.f32 %v5751_v16, %v5785_v1 }
 0x8a3   : > { %v5695_v49 = vmax.f32 %v5605_v28, 0.0  ;;  %v5834_v28 = vmax.f32 %v5766_v8, %v5800_v11  ;;  %v5954_v33 = vmax.f32 %v5818_v42, %v5920_v30  ;;  %v5856_v30 = vld [vmem:[#allocation4 + $0x52] sm:$0xff] }
 0x8a4   : > { %5732 = vst.msk [vmem:[#allocation4 + $0xb8] sm:$0xff] %vm5045_vm6, %v5696_v44  ;;  %v5955_v24 = vmax.f32 %v5819_v9, %v5921_v19  ;;  %v5789_v9 = vld [vmem:[#allocation4 + $0x49] sm:$0xff] }
 0x8a5   : > { %5731 = vst.msk [vmem:[#allocation4 + $0xb0] sm:$0xff] %vm5045_vm6, %v5695_v49 }
 0x8a6   : > { %v10055_v52 = vpack.c.bf16 %v5955_v24, %v5954_v33  ;;  %v5755_v33 = vld [vmem:[#allocation4 + $0x48] sm:$0xff] }
 0x8ac   : > { %v5867_v39 = vld [vmem:[#allocation4 + $0xaa] sm:$0xff]  ;;  %v5868_v48 = vld [vmem:[#allocation4 + $0xb2] sm:$0xff] }
 0x8ad   : > { %v5901_v20 = vld [vmem:[#allocation4 + $0xab] sm:$0xff]  ;;  %v5902_v55 = vld [vmem:[#allocation4 + $0xb3] sm:$0xff] }
 0x8ae   : > { %v5935_v7 = vmax.f32 %v5867_v39, %v5901_v20  ;;  %v5801_v38 = vld [vmem:[#allocation4 + $0xa9] sm:$0xff]  ;;  %v5936_v10 = vmax.f32 %v5868_v48, %v5902_v55 }
 0x8af   : > { %v5835_v44 = vmax.f32 %v5767_v63, %v5801_v38  ;;  %v5891_v63 = vld [vmem:[#allocation4 + $0x5b] sm:$0xff] }
 0x8b0   : > { %v5969_v62 = vmax.f32 %v5833_v36, %v5935_v7  ;;  %v5970_v54 = vmax.f32 %v5834_v28, %v5936_v10  ;;  %v5768_v36 = vld [vmem:[#allocation4 + $0xb0] sm:$0xff]  ;;  %v5925_v24 = vmax.f32 %v5857_v25, %v5891_v63 }
 0x8b1   : > { %v5802_v7 = vld [vmem:[#allocation4 + $0xb1] sm:$0xff] }
 0x8b2   : > { %v10049_v2 = vpack.c.bf16 %v5969_v62, %v5968_v58  ;;  %v5752_v62 = vld [vmem:[#allocation4 + $0x30] sm:$0xff] }
 0x8b3   : > { %v5890_v28 = vld [vmem:[#allocation4 + $0x53] sm:$0xff] }
 0x8b4   : > { %10050 = vmatprep.subr.bf16.mxu0 %v10049_v2  ;;  %v5786_v2 = vld [vmem:[#allocation4 + $0x31] sm:$0xff]  ;;  %v5924_v59 = vmax.f32 %v5856_v30, %v5890_v28 }
 0x8b5   : > { %10052 = vmatpush3.bf16.msra.mxu0 %v10051_v17  ;;  %v5769_v17 = vld [vmem:[#allocation4 + $0xb8] sm:$0xff]  ;;  %v5820_v18 = vmax.f32 %v5752_v62, %v5786_v2  ;;  %v5893_v2 = vld [vmem:[#allocation4 + $0x6b] sm:$0xff] }
 0x8bf   : > { %v9751_v41 = vpop.f32.mrb[60].mxu0 }
 0x8c0   : > { %v5620_v46 = vadd.f32 %v14249_v57, %v9751_v41  ;;  %v5614_v31 = vpop.f32.mrb[61].mxu0 }
 0x8c1   : > { %v5615_v3 = vadd.f32 %v14249_v57, %v5614_v31  ;;  %v5821_v31 = vmax.f32 %v5753_v22, %v5787_v61  ;;  %v5859_v22 = vld [vmem:[#allocation4 + $0x6a] sm:$0xff] }
 0x8c2   : > { %v5698_v26 = vmax.f32 %v5620_v46, 0.0 }
 0x8c3   : > { %v5697_v50 = vmax.f32 %v5615_v3, 0.0  ;;  %v5922_v3 = vmax.f32 %v5854_v15, %v5888_v27  ;;  %v5957_v48 = vmax.f32 %v5821_v31, %v5923_v21  ;;  %v5858_v31 = vld [vmem:[#allocation4 + $0x62] sm:$0xff] }
 0x8c4   : > { %5734 = vst.msk [vmem:[#allocation4 + $0xc8] sm:$0xff] %vm5045_vm6, %v5698_v26  ;;  %v5836_v26 = vmax.f32 %v5768_v36, %v5802_v7 }
 0x8c5   : > { %5733 = vst.msk [vmem:[#allocation4 + $0xc0] sm:$0xff] %vm5045_vm6, %v5697_v50  ;;  %v5956_v47 = vmax.f32 %v5820_v18, %v5922_v3  ;;  %v5892_v3 = vld [vmem:[#allocation4 + $0x63] sm:$0xff]  ;;  %v5927_v18 = vmax.f32 %v5859_v22, %v5893_v2 }
 0x8c7   : > { %v10059_v8 = vpack.c.bf16 %v5957_v48, %v5956_v47  ;;  %v5790_v47 = vld [vmem:[#allocation4 + $0x51] sm:$0xff] }
 0x8cc   : > { %v5869_v34 = vld [vmem:[#allocation4 + $0xba] sm:$0xff]  ;;  %v5870_v39 = vld [vmem:[#allocation4 + $0xc2] sm:$0xff] }
 0x8cd   : > { %v5903_v40 = vld [vmem:[#allocation4 + $0xbb] sm:$0xff]  ;;  %v5904_v20 = vld [vmem:[#allocation4 + $0xc3] sm:$0xff] }
 0x8ce   : > { %v5937_v49 = vmax.f32 %v5869_v34, %v5903_v40  ;;  %v5803_v12 = vld [vmem:[#allocation4 + $0xb9] sm:$0xff]  ;;  %v5938_v58 = vmax.f32 %v5870_v39, %v5904_v20 }
 0x8cf   : > { %v5837_v50 = vmax.f32 %v5769_v17, %v5803_v12 }
 0x8d0   : > { %v5971_v43 = vmax.f32 %v5835_v44, %v5937_v49  ;;  %v5972_v55 = vmax.f32 %v5836_v26, %v5938_v58  ;;  %v5770_v44 = vld [vmem:[#allocation4 + $0xc0] sm:$0xff] }
 0x8d1   : > { %v5804_v49 = vld [vmem:[#allocation4 + $0xc1] sm:$0xff] }
 0x8d2   : > { %v10053_v35 = vpack.c.bf16 %v5971_v43, %v5970_v54  ;;  %v5754_v43 = vld [vmem:[#allocation4 + $0x40] sm:$0xff] }
 0x8d4   : > { %10054 = vmatprep.subr.bf16.mxu0 %v10053_v35  ;;  %v5788_v35 = vld [vmem:[#allocation4 + $0x41] sm:$0xff] }
 0x8d5   : > { %10056 = vmatpush3.bf16.msra.mxu0 %v10055_v52  ;;  %v5771_v52 = vld [vmem:[#allocation4 + $0xc8] sm:$0xff]  ;;  %v5822_v5 = vmax.f32 %v5754_v43, %v5788_v35  ;;  %v5895_v35 = vld [vmem:[#allocation4 + $0x7b] sm:$0xff] }
 0x8d7   : > { %v5958_v61 = vmax.f32 %v5822_v5, %v5924_v59  ;;  %v5894_v59 = vld [vmem:[#allocation4 + $0x73] sm:$0xff] }
 0x8df   : > { %v9754_v4 = vpop.f32.mrb[62].mxu0 }
 0x8e0   : > { %v5630_v14 = vadd.f32 %v14249_v57, %v9754_v4  ;;  %v5624_v23 = vpop.f32.mrb[63].mxu0 }
 0x8e1   : > { %v5625_v51 = vadd.f32 %v14249_v57, %v5624_v23  ;;  %v5823_v23 = vmax.f32 %v5755_v33, %v5789_v9  ;;  %v5861_v33 = vld [vmem:[#allocation4 + $0x7a] sm:$0xff] }
 0x8e2   : > { %v5700_v53 = vmax.f32 %v5630_v14, 0.0  ;;  %v5929_v5 = vmax.f32 %v5861_v33, %v5895_v35 }
 0x8e3   : > { %v5699_v0 = vmax.f32 %v5625_v51, 0.0  ;;  %v5838_v51 = vmax.f32 %v5770_v44, %v5804_v49  ;;  %v5959_v32 = vmax.f32 %v5823_v23, %v5925_v24  ;;  %v5860_v23 = vld [vmem:[#allocation4 + $0x72] sm:$0xff] }
 0x8e4   : > { %5736 = vst.msk [vmem:[#allocation4 + $0xd8] sm:$0xff] %vm5045_vm6, %v5700_v53 }
 0x8e5   : > { %5735 = vst.msk [vmem:[#allocation4 + $0xd0] sm:$0xff] %vm5045_vm6, %v5699_v0  ;;  %v10063_v27 = vpack.c.bf16 %v5959_v32, %v5958_v61  ;;  %v5792_v61 = vld [vmem:[#allocation4 + $0x61] sm:$0xff] }
 0x8ec   : > { %v5871_v41 = vld [vmem:[#allocation4 + $0xca] sm:$0xff]  ;;  %v5872_v34 = vld [vmem:[#allocation4 + $0xd2] sm:$0xff] }
 0x8ed   : > { %v5905_v46 = vld [vmem:[#allocation4 + $0xcb] sm:$0xff]  ;;  %v5906_v40 = vld [vmem:[#allocation4 + $0xd3] sm:$0xff] }
 0x8ee   : > { %v5939_v45 = vmax.f32 %v5871_v41, %v5905_v46  ;;  %v5805_v42 = vld [vmem:[#allocation4 + $0xc9] sm:$0xff]  ;;  %v5940_v54 = vmax.f32 %v5872_v34, %v5906_v40  ;;  %v5791_v46 = vld [vmem:[#allocation4 + $0x59] sm:$0xff] }
 0x8ef   : > { %v5839_v53 = vmax.f32 %v5771_v52, %v5805_v42  ;;  %v5772_v26 = vld [vmem:[#allocation4 + $0xd0] sm:$0xff] }
 0x8f0   : > { %v5973_v1 = vmax.f32 %v5837_v50, %v5939_v45  ;;  %v5974_v39 = vmax.f32 %v5838_v51, %v5940_v54  ;;  %v5806_v50 = vld [vmem:[#allocation4 + $0xd1] sm:$0xff] }
 0x8f2   : > { %v10057_v56 = vpack.c.bf16 %v5973_v1, %v5972_v55  ;;  %v5756_v55 = vld [vmem:[#allocation4 + $0x50] sm:$0xff]  ;;  %v5757_v1 = vld [vmem:[#allocation4 + $0x58] sm:$0xff] }
 0x8f3   : > { %v5824_v25 = vmax.f32 %v5756_v55, %v5790_v47  ;;  %v5897_v47 = vld [vmem:[#allocation4 + $0x8b] sm:$0xff] }
 0x8f4   : > { %10058 = vmatprep.subr.bf16.mxu0 %v10057_v56  ;;  %v5773_v56 = vld [vmem:[#allocation4 + $0xd8] sm:$0xff] }
 0x8f5   : > { %10060 = vmatpush3.bf16.msra.mxu0 %v10059_v8 }
 0x8ff   : > { %v9757_v11 = vpop.f32.mrb[64].mxu0 }
 0x900   : > { %v5640_v38 = vadd.f32 %v14249_v57, %v9757_v11  ;;  %v5634_v19 = vpop.f32.mrb[65].mxu0 }
 0x901   : > { %v5635_v10 = vadd.f32 %v14249_v57, %v5634_v19  ;;  %v5926_v19 = vmax.f32 %v5858_v31, %v5892_v3 }
 0x902   : > { %v5702_v60 = vmax.f32 %v5640_v38, 0.0  ;;  %v5825_v38 = vmax.f32 %v5757_v1, %v5791_v46  ;;  %v5863_v1 = vld [vmem:[#allocation4 + $0x8a] sm:$0xff] }
 0x903   : > { %v5701_v16 = vmax.f32 %v5635_v10, 0.0  ;;  %v5840_v10 = vmax.f32 %v5772_v26, %v5806_v50  ;;  %v5960_v9 = vmax.f32 %v5824_v25, %v5926_v19  ;;  %v5794_v19 = vld [vmem:[#allocation4 + $0x71] sm:$0xff] }
 0x904   : > { %5738 = vst.msk [vmem:[#allocation4 + $0xe8] sm:$0xff] %vm5045_vm6, %v5702_v60  ;;  %v5961_v63 = vmax.f32 %v5825_v38, %v5927_v18  ;;  %v5761_v38 = vld [vmem:[#allocation4 + $0x78] sm:$0xff] }
 0x905   : > { %5737 = vst.msk [vmem:[#allocation4 + $0xe0] sm:$0xff] %vm5045_vm6, %v5701_v16 }
 0x906   : > { %v10067_v28 = vpack.c.bf16 %v5961_v63, %v5960_v9 }
 0x90c   : > { %v5873_v4 = vld [vmem:[#allocation4 + $0xda] sm:$0xff]  ;;  %v5874_v17 = vld [vmem:[#allocation4 + $0xe2] sm:$0xff] }
 0x90d   : > { %v5907_v14 = vld [vmem:[#allocation4 + $0xdb] sm:$0xff]  ;;  %v5908_v41 = vld [vmem:[#allocation4 + $0xe3] sm:$0xff] }
 0x90e   : > { %v5941_v0 = vmax.f32 %v5873_v4, %v5907_v14  ;;  %v5807_v45 = vld [vmem:[#allocation4 + $0xd9] sm:$0xff]  ;;  %v5942_v48 = vmax.f32 %v5874_v17, %v5908_v41  ;;  %v5793_v14 = vld [vmem:[#allocation4 + $0x69] sm:$0xff] }
 0x90f   : > { %v5841_v60 = vmax.f32 %v5773_v56, %v5807_v45  ;;  %v5774_v51 = vld [vmem:[#allocation4 + $0xe0] sm:$0xff] }
 0x910   : > { %v5975_v20 = vmax.f32 %v5839_v53, %v5941_v0  ;;  %v5976_v34 = vmax.f32 %v5840_v10, %v5942_v48  ;;  %v5808_v53 = vld [vmem:[#allocation4 + $0xe1] sm:$0xff]  ;;  %v5795_v10 = vld [vmem:[#allocation4 + $0x79] sm:$0xff] }
 0x912   : > { %v10061_v15 = vpack.c.bf16 %v5975_v20, %v5974_v39  ;;  %v5758_v39 = vld [vmem:[#allocation4 + $0x60] sm:$0xff]  ;;  %v5759_v20 = vld [vmem:[#allocation4 + $0x68] sm:$0xff] }
 0x913   : > { %v5826_v2 = vmax.f32 %v5758_v39, %v5792_v61 }
 0x914   : > { %10062 = vmatprep.subr.bf16.mxu0 %v10061_v15  ;;  %v5775_v15 = vld [vmem:[#allocation4 + $0xe8] sm:$0xff] }
 0x915   : > { %10064 = vmatpush3.bf16.msra.mxu0 %v10063_v27 }
 0x91f   : > { %v9760_v36 = vpop.f32.mrb[66].mxu0 }
 0x920   : > { %v5650_v7 = vadd.f32 %v14249_v57, %v9760_v36  ;;  %v5644_v12 = vpop.f32.mrb[67].mxu0 }
 0x921   : > { %v5645_v21 = vadd.f32 %v14249_v57, %v5644_v12  ;;  %v5928_v12 = vmax.f32 %v5860_v23, %v5894_v59 }
 0x922   : > { %v5704_v58 = vmax.f32 %v5650_v7, 0.0  ;;  %v5827_v7 = vmax.f32 %v5759_v20, %v5793_v14 }
 0x923   : > { %v5703_v62 = vmax.f32 %v5645_v21, 0.0  ;;  %v5842_v21 = vmax.f32 %v5774_v51, %v5808_v53  ;;  %v5962_v50 = vmax.f32 %v5826_v2, %v5928_v12  ;;  %v5991_v2 = vld [vmem:[#allocation19 + $0x38] sm:$0xff] }
 0x924   : > { %5740 = vst.msk [vmem:[#allocation4 + $0xf8] sm:$0xff] %vm5045_vm6, %v5704_v58  ;;  %v5963_v17 = vmax.f32 %v5827_v7, %v5929_v5 }
 0x925   : > { %5739 = vst.msk [vmem:[#allocation4 + $0xf0] sm:$0xff] %vm5045_vm6, %v5703_v62 }
 0x926   : > { %v10071_v55 = vpack.c.bf16 %v5963_v17, %v5962_v50  ;;  %v5990_v17 = vld [vmem:[#allocation19 + $0x30] sm:$0xff]  ;;  %v6003_v50 = vld [vmem:[#allocation19 + $0x98] sm:$0xff] }
 0x92b   : > { %v5777_v25 = vld [vmem:[#allocation4 + $0xf8] sm:$0xff] }
 0x92c   : > { %v5875_v8 = vld [vmem:[#allocation4 + $0xea] sm:$0xff]  ;;  %v5876_v52 = vld [vmem:[#allocation4 + $0xf2] sm:$0xff] }
 0x92d   : > { %v5909_v11 = vld [vmem:[#allocation4 + $0xeb] sm:$0xff]  ;;  %v5910_v4 = vld [vmem:[#allocation4 + $0xf3] sm:$0xff] }
 0x92e   : > { %v5943_v16 = vmax.f32 %v5875_v8, %v5909_v11  ;;  %v5809_v0 = vld [vmem:[#allocation4 + $0xe9] sm:$0xff]  ;;  %v5944_v32 = vmax.f32 %v5876_v52, %v5910_v4  ;;  %v5810_v63 = vld [vmem:[#allocation4 + $0xf1] sm:$0xff] }
 0x92f   : > { %v5843_v58 = vmax.f32 %v5775_v15, %v5809_v0  ;;  %v5760_v11 = vld [vmem:[#allocation4 + $0x70] sm:$0xff] }
 0x930   : > { %v5977_v40 = vmax.f32 %v5841_v60, %v5943_v16  ;;  %v5978_v31 = vmax.f32 %v5842_v21, %v5944_v32  ;;  %v5862_v60 = vld [vmem:[#allocation4 + $0x82] sm:$0xff]  ;;  %v5776_v16 = vld [vmem:[#allocation4 + $0xf0] sm:$0xff]  ;;  %v5828_v51 = vmax.f32 %v5760_v11, %v5794_v19 }
 0x931   : > { %v5844_v35 = vmax.f32 %v5776_v16, %v5810_v63  ;;  %v5984_v21 = vld [vmem:[#allocation19] sm:$0xff]  ;;  %v6014_v11 = vld [vmem:[#allocation19 + $0xf0] sm:$0xff]  ;;  %v6017_v19 = vld [vmem:[#allocation19 + $0x108] sm:$0xff] }
 0x932   : > { %v10065_v30 = vpack.c.bf16 %v5977_v40, %v5976_v34  ;;  %v5931_v40 = vmax.f32 %v5863_v1, %v5897_v47  ;;  %v6008_v1 = vld [vmem:[#allocation19 + $0xc0] sm:$0xff]  ;;  %v5989_v16 = vld [vmem:[#allocation19 + $0x28] sm:$0xff]  ;;  %v5995_v63 = vld [vmem:[#allocation19 + $0x58] sm:$0xff] }
 0x933   : > { %v6012_v47 = vld [vmem:[#allocation19 + $0xe0] sm:$0xff] }
 0x934   : > { %10066 = vmatprep.subr.bf16.mxu0 %v10065_v30 }
 0x935   : > { %10068 = vmatpush3.bf16.msra.mxu0 %v10067_v28 }
 0x93c   : > { %v9763_v44 = vpop.f32.mrb[68].mxu0 }
 0x93d   : > { %v5660_v49 = vadd.f32 %v14249_v57, %v9763_v44  ;;  %v5654_v42 = vpop.f32.mrb[69].mxu0 }
 0x93e   : > { %v5655_v24 = vadd.f32 %v14249_v57, %v5654_v42 }
 0x93f   : > { %v5706_v54 = vmax.f32 %v5660_v49, 0.0 }
 0x940   : > { %v5705_v43 = vmax.f32 %v5655_v24, 0.0 }
 0x941   : > { %5742 = vst.msk [vmem:[#allocation4 + $0x108] sm:$0xff] %vm5045_vm6, %v5706_v54  ;;  %v5829_v54 = vmax.f32 %v5761_v38, %v5795_v10  ;;  %v6018_v38 = vld [vmem:[#allocation19 + $0x110] sm:$0xff]  ;;  %v6021_v10 = vld [vmem:[#allocation19 + $0x128] sm:$0xf] }
 0x942   : > { %5741 = vst.msk [vmem:[#allocation4 + $0x100] sm:$0xff] %vm5045_vm6, %v5705_v43 }
 0x943   : > { %v5965_v53 = vmax.f32 %v5829_v54, %v5931_v40  ;;  %v6001_v40 = vld [vmem:[#allocation19 + $0x88] sm:$0xff] }
 0x948   : > { %v5779_v30 = vld [vmem:[#allocation4 + $0x108] sm:$0x7] }
 0x949   : > { %v5877_v27 = vld [vmem:[#allocation4 + $0xfa] sm:$0xff]  ;;  %v5878_v56 = vld [vmem:[#allocation4 + $0x102] sm:$0xff] }
 0x94a   : > { %v5911_v36 = vld [vmem:[#allocation4 + $0xfb] sm:$0xff]  ;;  %v5912_v8 = vld [vmem:[#allocation4 + $0x103] sm:$0xff] }
 0x94b   : > { %v5945_v62 = vmax.f32 %v5877_v27, %v5911_v36  ;;  %v9766_v22 = vpop.f32.mrb[70].mxu0  ;;  %v5811_v34 = vld [vmem:[#allocation4 + $0xf9] sm:$0xff]  ;;  %v5946_v9 = vmax.f32 %v5878_v56, %v5912_v8  ;;  %v5813_v28 = vld [vmem:[#allocation4 + $0x109] sm:$0x7]  ;;  %v5812_v23 = vld [vmem:[#allocation4 + $0x101] sm:$0xff] }
 0x94c   : > { %v5670_v41 = vadd.f32 %v14249_v57, %v9766_v22  ;;  %v5664_v46 = vpop.f32.mrb[71].mxu0  ;;  %v5845_v52 = vmax.f32 %v5777_v25, %v5811_v34  ;;  %v5778_v14 = vld [vmem:[#allocation4 + $0x100] sm:$0xff]  ;;  %v5847_v15 = vmax.f32 %v5779_v30, %v5813_v28  ;;  %v5987_v22 = vld [vmem:[#allocation19 + $0x18] sm:$0xff]  ;;  %v5998_v34 = vld [vmem:[#allocation19 + $0x70] sm:$0xff] }
 0x94d   : > { %v5979_v3 = vmax.f32 %v5843_v58, %v5945_v62  ;;  %v5665_v26 = vadd.f32 %v14249_v57, %v5664_v46  ;;  %v5896_v57 = vld [vmem:[#allocation4 + $0x83] sm:$0xff]  ;;  %v5980_v32 = vmax.f32 %v5844_v35, %v5946_v9  ;;  %v5846_v61 = vmax.f32 %v5778_v14, %v5812_v23  ;;  %v6011_v56 = vld [vmem:[#allocation19 + $0xd8] sm:$0xff]  ;;  %v6010_v28 = vld [vmem:[#allocation19 + $0xd0] sm:$0xff] }
 0x94e   : > { %v5708_v45 = vmax.f32 %v5670_v41, 0.0  ;;  %v5930_v43 = vmax.f32 %v5862_v60, %v5896_v57  ;;  %v5988_v58 = vld [vmem:[#allocation19 + $0x20] sm:$0xff]  ;;  %v5994_v41 = vld [vmem:[#allocation19 + $0x50] sm:$0xff]  ;;  %v5993_v46 = vld [vmem:[#allocation19 + $0x48] sm:$0xff] }
 0x94f   : > { %v10069_v18 = vpack.c.bf16 %v5979_v3, %v5978_v31  ;;  %v5707_v48 = vmax.f32 %v5665_v26, 0.0  ;;  %v5997_v31 = vld [vmem:[#allocation19 + $0x68] sm:$0xff]  ;;  %v5996_v3 = vld [vmem:[#allocation19 + $0x60] sm:$0xff]  ;;  %v6015_v8 = vld [vmem:[#allocation19 + $0xf8] sm:$0xff] }
 0x950   : > { %5745 = vst.msk [vmem:[#allocation4 + $0x118] sm:$0x3f] %vm5744_vm10, %v5708_v45  ;;  %v5964_v20 = vmax.f32 %v5828_v51, %v5930_v43  ;;  %v6000_v26 = vld [vmem:[#allocation19 + $0x80] sm:$0xff]  ;;  %v6002_v45 = vld [vmem:[#allocation19 + $0x90] sm:$0xff]  ;;  %v6007_v30 = vld [vmem:[#allocation19 + $0xb8] sm:$0xff]  ;;  %vm6944_vm10 = vcmask 637952  }
 0x951   : > { %10070 = vmatprep.subr.bf16.mxu0 %v10069_v18  ;;  %5743 = vst.msk [vmem:[#allocation4 + $0x110] sm:$0xff] %vm5045_vm6, %v5707_v48  ;;  %v6006_v18 = vld [vmem:[#allocation19 + $0xb0] sm:$0xff]  ;;  %v6005_v48 = vld [vmem:[#allocation19 + $0xa8] sm:$0xff]  ;;  %v6020_v60 = vld [vmem:[#allocation19 + $0x120] sm:$0xf] }
 0x952   : > { %10072 = vmatpush3.bf16.msra.mxu0 %v10071_v55  ;;  %v10075_v36 = vpack.c.bf16 %v5965_v53, %v5964_v20  ;;  %v6009_v55 = vld [vmem:[#allocation19 + $0xc8] sm:$0xff]  ;;  %v5986_v57 = vld [vmem:[#allocation19 + $0x10] sm:$0xff]  ;;  %v5992_v25 = vld [vmem:[#allocation19 + $0x40] sm:$0xff] }
 0x953   : > { %v6004_v9 = vld [vmem:[#allocation19 + $0xa0] sm:$0xff]  ;;  %v6752_v20 = vld [vmem:[%s15064_s5 + $0x8] sm:$0xff] }
 0x957   : > { %v5881_v44 = vld [vmem:[#allocation4 + $0x11a] sm:$0x7] }
 0x958   : > { %v5915_v49 = vld [vmem:[#allocation4 + $0x11b] sm:$0x7]  ;;  %v5879_v42 = vld [vmem:[#allocation4 + $0x10a] sm:$0xff]  ;;  %v5880_v33 = vld [vmem:[#allocation4 + $0x112] sm:$0xff] }
 0x959   : > { %v5913_v24 = vld [vmem:[#allocation4 + $0x10b] sm:$0xff]  ;;  %v5914_v59 = vld [vmem:[#allocation4 + $0x113] sm:$0xff]  ;;  %v5949_v5 = vmax.f32 %v5881_v44, %v5915_v49  ;;  %v6016_v49 = vld [vmem:[#allocation19 + $0x100] sm:$0xff] }
 0x95a   : > { %v5947_v4 = vmax.f32 %v5879_v42, %v5913_v24  ;;  %v5948_v0 = vmax.f32 %v5880_v33, %v5914_v59  ;;  %v6013_v44 = vld [vmem:[#allocation19 + $0xe8] sm:$0xff]  ;;  %v6019_v42 = vld [vmem:[#allocation19 + $0x118] sm:$0xff]  ;;  %v6022_v24 = vld [vmem:[#allocation19 + $0x130] sm:$0xf] }
 0x95b   : > { %v5983_v12 = vmax.f32 %v5847_v15, %v5949_v5 }
 0x95c   : > { %v5981_v39 = vmax.f32 %v5845_v52, %v5947_v4  ;;  %v5982_v7 = vmax.f32 %v5846_v61, %v5948_v0  ;;  %v6753_v61 = vld [vmem:[%s15064_s5 + $0x10] sm:$0xff] }
 0x95e   : > { %v10073_v27 = vpack.c.bf16 %v5981_v39, %v5980_v32  ;;  %v10078_v62 = vpack.c.bf16 %v5983_v12, %v5982_v7  ;;  %v6751_v39 = vld [vmem:[%s15064_s5] sm:$0xff] }
 0x960   : > { %10074 = vmatprep.subr.bf16.mxu0 %v10073_v27  ;;  %v10082_v27 = vpack.c.bf16 %v6752_v20, %v6751_v39  ;;  %v6766_v39 = vld [vmem:[%s15064_s5 + $0x78] sm:$0xff] }
 0x961   : > { %10076 = vmatpush3.bf16.msra.mxu0 %v10075_v36  ;;  %v6754_v36 = vld [vmem:[%s15064_s5 + $0x18] sm:$0xff] }
 0x962   : > { %10077 = vmatprep.subr.bf16.mxu0 %v11173_v29  ;;  %v10085_v12 = vpack.c.bf16 %v6754_v36, %v6753_v61 }
 0x964   : > { %6131 = vmatmul.mubr.f32.vlgmr.msra.gmra.mrb[72].mxu0 %v5984_v21 }
 0x965   : > { %10080 = vmatpush3.bf16.msk.msra.mxu0 %vm11602_vm3, %v10078_v62  ;;  %6135 = vmatprep.mubr.f32.mxu0 %v5988_v58  ;;  %vm6023_vm3 = vcmask 89088   ;;  %v6755_v58 = vld [vmem:[%s15064_s5 + $0x20] sm:$0xff]  ;;  %v6756_v62 = vld [vmem:[%s15064_s5 + $0x28] sm:$0xff] }
 0x966   : > { %10081 = vmatprep.subr.bf16.mxu0 %v11173_v29 }
 0x968   : > { %6136 = vmatmul.mubr.f32.gmra.mrb[74].mxu0 %v5987_v22 }
 0x969   : > { %6140 = vmatprep.mubr.f32.mxu0 %v5991_v2 }
 0x96c   : > { %6141 = vmatmul.mubr.f32.gmra.mrb[76].mxu0 %v5990_v17  ;;  %v10088_v17 = vpack.c.bf16 %v6756_v62, %v6755_v58 }
 0x96d   : > { %6145 = vmatprep.mubr.f32.mxu0 %v5994_v41 }
 0x970   : > { %6146 = vmatmul.mubr.f32.gmra.mrb[78].mxu0 %v5993_v46  ;;  %v6757_v46 = vld [vmem:[%s15064_s5 + $0x30] sm:$0xff] }
 0x971   : > { %6150 = vmatprep.mubr.f32.mxu0 %v5997_v31  ;;  %v6758_v31 = vld [vmem:[%s15064_s5 + $0x38] sm:$0xff] }
 0x974   : > { %6151 = vmatmul.mubr.f32.gmra.mrb[80].mxu0 %v5996_v3 }
 0x975   : > { %6155 = vmatprep.mubr.f32.mxu0 %v6000_v26 }
 0x978   : > { %6156 = vmatmul.mubr.f32.gmra.mrb[82].mxu0 %v5999_v37  ;;  %v10091_v37 = vpack.c.bf16 %v6758_v31, %v6757_v46 }
 0x979   : > { %6160 = vmatprep.mubr.f32.mxu0 %v6003_v50 }
 0x97c   : > { %6161 = vmatmul.mubr.f32.gmra.mrb[84].mxu0 %v6002_v45  ;;  %v6759_v45 = vld [vmem:[%s15064_s5 + $0x40] sm:$0xff] }
 0x97d   : > { %6165 = vmatprep.mubr.f32.mxu0 %v6006_v18  ;;  %v6760_v18 = vld [vmem:[%s15064_s5 + $0x48] sm:$0xff] }
 0x980   : > { %6166 = vmatmul.mubr.f32.gmra.mrb[86].mxu0 %v6005_v48 }
 0x981   : > { %6170 = vmatprep.mubr.f32.mxu0 %v6009_v55 }
 0x984   : > { %6171 = vmatmul.mubr.f32.gmra.mrb[88].mxu0 %v6008_v1  ;;  %v10094_v1 = vpack.c.bf16 %v6760_v18, %v6759_v45 }
 0x985   : > { %6175 = vmatprep.mubr.f32.mxu0 %v6012_v47 }
 0x988   : > { %6176 = vmatmul.mubr.f32.gmra.mrb[90].mxu0 %v6011_v56 }
 0x989   : > { %6180 = vmatprep.mubr.f32.mxu0 %v6015_v8 }
 0x98c   : > { %6181 = vmatmul.mubr.f32.gmra.mrb[92].mxu0 %v6014_v11 }
 0x98d   : > { %6185 = vmatprep.mubr.f32.mxu0 %v6018_v38 }
 0x990   : > { %6186 = vmatmul.mubr.f32.gmra.mrb[94].mxu0 %v6017_v19 }
 0x991   : > { %6190 = vmatprep.mubr.f32.mxu0 %v6021_v10 }
 0x994   : > { %6191 = vmatmul.mubr.f32.gmra.mrb[96].mxu0 %v6020_v60 }
 0x995   : > { %9771 = vmatprep.mubr.msk.f32.mxu0 %vm11174_vm15, %v11175_v6 }
 0x998   : > { %9772 = vmatmul.mubr.msk.f32.vlgmr.msra.gmra.mrb[98].mxu0 %vm6023_vm3, %v5986_v57 }
 0x999   : > { %9774 = vmatprep.mubr.msk.f32.mxu0 %vm11174_vm15, %v11175_v6  ;;  %10083 = vmatpush1.bf16.msra.mxu0 %v10082_v27 }
 0x99a   : > { %10084 = vmatprep.subr.bf16.mxu0 %v11173_v29 }
 0x99c   : > { %9775 = vmatmul.mubr.msk.f32.gmra.mrb[100].mxu0 %vm6023_vm3, %v5989_v16 }
 0x99d   : > { %9777 = vmatprep.mubr.msk.f32.mxu0 %vm11174_vm15, %v11175_v6  ;;  %10086 = vmatpush1.bf16.msra.mxu0 %v10085_v12 }
 0x99e   : > { %10087 = vmatprep.subr.bf16.mxu0 %v11173_v29 }
 0x9a0   : > { %9778 = vmatmul.mubr.msk.f32.gmra.mrb[102].mxu0 %vm6023_vm3, %v5992_v25 }
 0x9a1   : > { %9780 = vmatprep.mubr.msk.f32.mxu0 %vm11174_vm15, %v11175_v6  ;;  %10089 = vmatpush1.bf16.msra.mxu0 %v10088_v17 }
 0x9a2   : > { %10090 = vmatprep.subr.bf16.mxu0 %v11173_v29 }
 0x9a4   : > { %9781 = vmatmul.mubr.msk.f32.gmra.mrb[104].mxu0 %vm6023_vm3, %v5995_v63 }
 0x9a5   : > { %9783 = vmatprep.mubr.msk.f32.mxu0 %vm11174_vm15, %v11175_v6  ;;  %10092 = vmatpush1.bf16.msra.mxu0 %v10091_v37 }
 0x9a6   : > { %10093 = vmatprep.subr.bf16.mxu0 %v11173_v29 }
 0x9a8   : > { %9784 = vmatmul.mubr.msk.f32.gmra.mrb[106].mxu0 %vm6023_vm3, %v5998_v34 }
 0x9a9   : > { %9786 = vmatprep.mubr.msk.f32.mxu0 %vm11174_vm15, %v11175_v6  ;;  %10095 = vmatpush1.bf16.msra.mxu0 %v10094_v1 }
 0x9aa   : > { %10096 = vmatprep.subr.bf16.mxu0 %v11173_v29 }
 0x9ac   : > { %9787 = vmatmul.mubr.msk.f32.gmra.mrb[108].mxu0 %vm6023_vm3, %v6001_v40 }
 0x9ad   : > { %9789 = vmatprep.mubr.msk.f32.mxu0 %vm11174_vm15, %v11175_v6 }
 0x9b0   : > { %9790 = vmatmul.mubr.msk.f32.gmra.mrb[110].mxu0 %vm6023_vm3, %v6004_v9 }
 0x9b1   : > { %9792 = vmatprep.mubr.msk.f32.mxu0 %vm11174_vm15, %v11175_v6 }
 0x9b4   : > { %9793 = vmatmul.mubr.msk.f32.gmra.mrb[112].mxu0 %vm6023_vm3, %v6007_v30 }
 0x9b5   : > { %9795 = vmatprep.mubr.msk.f32.mxu0 %vm11174_vm15, %v11175_v6 }
 0x9b8   : > { %9796 = vmatmul.mubr.msk.f32.gmra.mrb[114].mxu0 %vm6023_vm3, %v6010_v28 }
 0x9b9   : > { %9798 = vmatprep.mubr.msk.f32.mxu0 %vm11174_vm15, %v11175_v6 }
 0x9bc   : > { %9799 = vmatmul.mubr.msk.f32.gmra.mrb[116].mxu0 %vm6023_vm3, %v6013_v44 }
 0x9bd   : > { %9801 = vmatprep.mubr.msk.f32.mxu0 %vm11174_vm15, %v11175_v6 }
 0x9c0   : > { %9802 = vmatmul.mubr.msk.f32.gmra.mrb[118].mxu0 %vm6023_vm3, %v6016_v49 }
 0x9c1   : > { %9804 = vmatprep.mubr.msk.f32.mxu0 %vm11174_vm15, %v11175_v6 }
 0x9c4   : > { %9805 = vmatmul.mubr.msk.f32.gmra.mrb[120].mxu0 %vm6023_vm3, %v6019_v42 }
 0x9c5   : > { %9807 = vmatprep.mubr.msk.f32.mxu0 %vm11174_vm15, %v11175_v6 }
 0x9c8   : > { %9808 = vmatmul.mubr.msk.f32.gmra.mrb[122].mxu0 %vm6023_vm3, %v6022_v24 }
 0xa37   : > { %v9304_v54 = vpop.f32.mrb[72].mxu0 }
 0xa38   : > { %v9305_v43 = vpop.f32.mrb[73].mxu0 }
 0xa39   : > { %v14385_v33 = vadd.f32 %v9305_v43, %v9304_v54  ;;  %v6761_v54 = vld [vmem:[%s15064_s5 + $0x50] sm:$0xff]  ;;  %v6762_v43 = vld [vmem:[%s15064_s5 + $0x58] sm:$0xff] }
 0xa3b   : > { %v9307_v35 = vpop.f32.mrb[74].mxu0 }
 0xa3c   : > { %v9308_v52 = vpop.f32.mrb[75].mxu0 }
 0xa3d   : > { %v14387_v4 = vadd.f32 %v9308_v52, %v9307_v35  ;;  %v10097_v52 = vpack.c.bf16 %v6762_v43, %v6761_v54 }
 0xa3f   : > { %v9310_v14 = vpop.f32.mrb[76].mxu0  ;;  %10098 = vmatpush1.bf16.msra.mxu0 %v10097_v52 }
 0xa40   : > { %v9311_v23 = vpop.f32.mrb[77].mxu0  ;;  %10099 = vmatprep.subr.bf16.mxu0 %v11173_v29 }
 0xa41   : > { %v14389_v59 = vadd.f32 %v9311_v23, %v9310_v14  ;;  %v6763_v14 = vld [vmem:[%s15064_s5 + $0x60] sm:$0xff]  ;;  %v6764_v23 = vld [vmem:[%s15064_s5 + $0x68] sm:$0xff] }
 0xa43   : > { %v9313_v51 = vpop.f32.mrb[78].mxu0 }
 0xa44   : > { %v9314_v53 = vpop.f32.mrb[79].mxu0 }
 0xa45   : > { %v14391_v0 = vadd.f32 %v9314_v53, %v9313_v51 }
 0xa47   : > { %v9316_v5 = vpop.f32.mrb[80].mxu0 }
 0xa48   : > { %v9317_v32 = vpop.f32.mrb[81].mxu0 }
 0xa49   : > { %v14402_v15 = vadd.f32 %v9317_v32, %v9316_v5  ;;  %v6765_v32 = vld [vmem:[%s15064_s5 + $0x70] sm:$0xff] }
 0xa4a   : > { %v10103_v27 = vpack.c.bf16 %v6766_v39, %v6765_v32 }
 0xa4b   : > { %v9319_v7 = vpop.f32.mrb[82].mxu0 }
 0xa4c   : > { %v9320_v21 = vpop.f32.mrb[83].mxu0 }
 0xa4d   : > { %v14414_v22 = vadd.f32 %v9320_v21, %v9319_v7 }
 0xa4f   : > { %v9322_v2 = vpop.f32.mrb[84].mxu0 }
 0xa50   : > { %v9323_v41 = vpop.f32.mrb[85].mxu0 }
 0xa51   : > { %v14423_v3 = vadd.f32 %v9323_v41, %v9322_v2  ;;  %v6767_v2 = vld [vmem:[%s15064_s5 + $0x80] sm:$0xff] }
 0xa53   : > { %v9325_v26 = vpop.f32.mrb[86].mxu0 }
 0xa54   : > { %v9326_v50 = vpop.f32.mrb[87].mxu0 }
 0xa55   : > { %v14432_v48 = vadd.f32 %v9326_v50, %v9325_v26 }
 0xa57   : > { %v9328_v55 = vpop.f32.mrb[88].mxu0 }
 0xa58   : > { %v9329_v47 = vpop.f32.mrb[89].mxu0 }
 0xa59   : > { %v14435_v56 = vadd.f32 %v9329_v47, %v9328_v55 }
 0xa5b   : > { %v9331_v8 = vpop.f32.mrb[90].mxu0 }
 0xa5c   : > { %v9332_v11 = vpop.f32.mrb[91].mxu0 }
 0xa5d   : > { %v14438_v38 = vadd.f32 %v9332_v11, %v9331_v8 }
 0xa5f   : > { %v9334_v19 = vpop.f32.mrb[92].mxu0 }
 0xa60   : > { %v9335_v10 = vpop.f32.mrb[93].mxu0 }
 0xa61   : > { %v14440_v60 = vadd.f32 %v9335_v10, %v9334_v19 }
 0xa63   : > { %v9337_v57 = vpop.f32.mrb[94].mxu0 }
 0xa64   : > { %v9338_v16 = vpop.f32.mrb[95].mxu0 }
 0xa65   : > { %v14442_v25 = vadd.f32 %v9338_v16, %v9337_v57 }
 0xa67   : > { %v9340_v63 = vpop.f32.mrb[96].mxu0 }
 0xa68   : > { %v9341_v34 = vpop.f32.mrb[97].mxu0 }
 0xa69   : > { %v14444_v40 = vadd.f32 %v9341_v34, %v9340_v63 }
 0xa6b   : > { %v6262_v9 = vpop.f32.mrb[98].mxu0 }
 0xa6c   : > { %v6263_v30 = vadd.f32 %v14385_v33, %v6262_v9  ;;  %v9773_v28 = vpop.f32.mrb[99].mxu0 }
 0xa6e   : > { %6326 = vst.msk [vmem:[#allocation5] sm:$0xff] %vm5045_vm6, %v6263_v30 }
 0xa6f   : > { %v6267_v44 = vpop.f32.mrb[100].mxu0 }
 0xa70   : > { %v6268_v49 = vadd.f32 %v14387_v4, %v6267_v44  ;;  %v9776_v42 = vpop.f32.mrb[101].mxu0 }
 0xa72   : > { %6327 = vst.msk [vmem:[#allocation5 + $0x8] sm:$0xff] %vm5045_vm6, %v6268_v49 }
 0xa73   : > { %v6272_v24 = vpop.f32.mrb[102].mxu0 }
 0xa74   : > { %v6273_v33 = vadd.f32 %v14389_v59, %v6272_v24  ;;  %v9779_v35 = vpop.f32.mrb[103].mxu0  ;;  %v10100_v59 = vpack.c.bf16 %v6764_v23, %v6763_v14 }
 0xa76   : > { %6328 = vst.msk [vmem:[#allocation5 + $0x10] sm:$0xff] %vm5045_vm6, %v6273_v33  ;;  %10101 = vmatpush1.bf16.msra.mxu0 %v10100_v59 }
 0xa77   : > { %v6277_v4 = vpop.f32.mrb[104].mxu0  ;;  %10102 = vmatprep.subr.bf16.mxu0 %v11173_v29 }
 0xa78   : > { %v6278_v51 = vadd.f32 %v14391_v0, %v6277_v4  ;;  %v9782_v53 = vpop.f32.mrb[105].mxu0 }
 0xa79   : > { %v6360_v0 = vld [vmem:[#allocation5 + $0x2] sm:$0xff] }
 0xa7a   : > { %6329 = vst.msk [vmem:[#allocation5 + $0x18] sm:$0xff] %vm5045_vm6, %v6278_v51  ;;  %v6350_v7 = vld [vmem:[#allocation5 + $0x1] sm:$0xff]  ;;  %10104 = vmatpush1.bf16.msra.mxu0 %v10103_v27 }
 0xa7b   : > { %v6282_v5 = vpop.f32.mrb[106].mxu0  ;;  %10105 = vmatprep.subr.bf16.mxu0 %v11173_v29 }
 0xa7c   : > { %v6283_v20 = vadd.f32 %v14402_v15, %v6282_v5  ;;  %v9785_v61 = vpop.f32.mrb[107].mxu0  ;;  %v6768_v15 = vld [vmem:[%s15064_s5 + $0x88] sm:$0xff] }
 0xa7d   : > { %v6361_v36 = vld [vmem:[#allocation5 + $0xa] sm:$0xff]  ;;  %v10106_v31 = vpack.c.bf16 %v6768_v15, %v6767_v2 }
 0xa7e   : > { %v6351_v12 = vld [vmem:[#allocation5 + $0x9] sm:$0xff]  ;;  %6330 = vst.msk [vmem:[#allocation5 + $0x20] sm:$0xff] %vm5045_vm6, %v6283_v20  ;;  %v10470_v21 = vpack.i.bf16 %v6361_v36, %v6360_v0 }
 0xa7f   : > { %v10465_v58 = vpack.i.bf16 %v6351_v12, %v6350_v7  ;;  %v6287_v62 = vpop.f32.mrb[108].mxu0  ;;  %v6372_v46 = vld [vmem:[#allocation5 + $0xb] sm:$0xff]  ;;  %10107 = vmatpush1.bf16.msra.mxu0 %v10106_v31 }
 0xa80   : > { %v6288_v17 = vadd.f32 %v14414_v22, %v6287_v62  ;;  %10471 = vrot.lane.b32.xlu1 %v10470_v21, %s11178_s27  ;;  %v9788_v41 = vpop.f32.mrb[109].mxu0  ;;  %10108 = vmatprep.subr.bf16.mxu0 %v11173_v29  ;;  %v6382_v11 = vld [vmem:[#allocation5 + $0xc] sm:$0xff] }
 0xa81   : > { %10466 = vrot.lane.b32.xlu0 %v10465_v58, %s11177_s19  ;;  %v6404_v26 = vld [vmem:[#allocation5 + $0x16] sm:$0xff] }
 0xa82   : > { %v6373_v37 = vld [vmem:[#allocation5 + $0x13] sm:$0xff]  ;;  %6331 = vst.msk [vmem:[#allocation5 + $0x28] sm:$0xff] %vm5045_vm6, %v6288_v17  ;;  %9081 = vmatprep.mubr.msk.f32.mxu0 %vm5045_vm6, %v6404_v26 }
 0xa83   : > { %v6362_v50 = vld [vmem:[#allocation5 + $0x12] sm:$0xff]  ;;  %v10480_v45 = vpack.i.bf16 %v6373_v37, %v6372_v46  ;;  %v6292_v55 = vpop.f32.mrb[110].mxu0 }
 0xa84   : > { %v10475_v18 = vpack.i.bf16 %v6362_v50, %v6361_v36  ;;  %v6383_v1 = vld [vmem:[#allocation5 + $0x14] sm:$0xff]  ;;  %v6293_v22 = vadd.f32 %v14423_v3, %v6292_v55  ;;  %v9791_v47 = vpop.f32.mrb[111].mxu0 }
 0xa85   : > { %10481 = vrot.lane.b32.xlu1 %v10480_v45, %s11182_s26  ;;  %v6384_v8 = vld [vmem:[#allocation5 + $0x1c] sm:$0xff]  ;;  %v10485_v10 = vpack.i.bf16 %v6383_v1, %v6382_v11  ;;  %v6352_v9 = vld [vmem:[#allocation5 + $0x11] sm:$0xff] }
 0xa86   : > { %10476 = vrot.lane.b32.xlu0 %v10475_v18, %s11180_s0  ;;  %6332 = vst.msk [vmem:[#allocation5 + $0x30] sm:$0xff] %vm5045_vm6, %v6293_v22  ;;  %v10490_v19 = vpack.i.bf16 %v6384_v8, %v6383_v1  ;;  %v6353_v16 = vld [vmem:[#allocation5 + $0x19] sm:$0xff] }
 0xa87   : > { %v6297_v57 = vpop.f32.mrb[112].mxu0  ;;  %v6395_v63 = vld [vmem:[#allocation5 + $0x1d] sm:$0xff]  ;;  %v6394_v30 = vld [vmem:[#allocation5 + $0x15] sm:$0xff]  ;;  %v10500_v28 = vpack.i.bf16 %v6353_v16, %v6352_v9 }
 0xa88   : > { %v6298_v34 = vadd.f32 %v14432_v48, %v6297_v57  ;;  %v9794_v3 = vpop.f32.mrb[113].mxu0  ;;  %v10495_v44 = vpack.i.bf16 %v6395_v63, %v6394_v30  ;;  %v6363_v42 = vld [vmem:[#allocation5 + $0x1a] sm:$0xff] }
 0xa89   : > { %10491 = vrot.lane.b32.xlu1 %v10490_v19, %s11183_s3  ;;  %v6364_v24 = vld [vmem:[#allocation5 + $0x22] sm:$0xff]  ;;  %v10505_v33 = vpack.i.bf16 %v6363_v42, %v6362_v50 }
 0xa8a   : > { %10486 = vrot.lane.b32.xlu0 %v10485_v10, %s11184_s28  ;;  %6333 = vst.msk [vmem:[#allocation5 + $0x38] sm:$0xff] %vm5045_vm6, %v6298_v34  ;;  %v10510_v43 = vpack.i.bf16 %v6364_v24, %v6363_v42  ;;  %v6385_v52 = vld [vmem:[#allocation5 + $0x24] sm:$0xff]  ;;  %v6374_v23 = vld [vmem:[#allocation5 + $0x1b] sm:$0xff] }
 0xa8b   : > { %v6302_v49 = vpop.f32.mrb[114].mxu0  ;;  %v6375_v4 = vld [vmem:[#allocation5 + $0x23] sm:$0xff]  ;;  %v10520_v51 = vpack.i.bf16 %v6385_v52, %v6384_v8 }
 0xa8c   : > { %v6303_v54 = vadd.f32 %v14435_v56, %v6302_v49  ;;  %v9797_v48 = vpop.f32.mrb[115].mxu0  ;;  %v10515_v53 = vpack.i.bf16 %v6375_v4, %v6374_v23  ;;  %v6396_v20 = vld [vmem:[#allocation5 + $0x25] sm:$0xff] }
 0xa8d   : > { %10501 = vrot.lane.b32.xlu1 %v10500_v28, %s11177_s19  ;;  %v6397_v5 = vld [vmem:[#allocation5 + $0x2d] sm:$0xff]  ;;  %v6354_v21 = vld [vmem:[#allocation5 + $0x21] sm:$0xff] }
 0xa8e   : > { %10496 = vrot.lane.b32.xlu0 %v10495_v44, %s11185_s23  ;;  %6334 = vst.msk [vmem:[#allocation5 + $0x40] sm:$0xff] %vm5045_vm6, %v6303_v54  ;;  %v6386_v32 = vld [vmem:[#allocation5 + $0x2c] sm:$0xff]  ;;  %v10530_v61 = vpack.i.bf16 %v6397_v5, %v6396_v20 }
 0xa8f   : > { %v6307_v35 = vpop.f32.mrb[116].mxu0  ;;  %v10525_v0 = vpack.i.bf16 %v6386_v32, %v6385_v52  ;;  %v6365_v36 = vld [vmem:[#allocation5 + $0x2a] sm:$0xff] }
 0xa90   : > { %v6308_v14 = vadd.f32 %v14438_v38, %v6307_v35  ;;  %v9800_v56 = vpop.f32.mrb[117].mxu0  ;;  %v6355_v7 = vld [vmem:[#allocation5 + $0x29] sm:$0xff]  ;;  %v10540_v58 = vpack.i.bf16 %v6365_v36, %v6364_v24 }
 0xa91   : > { %10511 = vrot.lane.b32.xlu1 %v10510_v43, %s11180_s0  ;;  %v10535_v62 = vpack.i.bf16 %v6355_v7, %v6354_v21  ;;  %v6377_v15 = vld [vmem:[#allocation5 + $0x33] sm:$0xff]  ;;  %v6376_v46 = vld [vmem:[#allocation5 + $0x2b] sm:$0xff] }
 0xa92   : > { %10506 = vrot.lane.b32.xlu0 %v10505_v33, %s11178_s27  ;;  %6335 = vst.msk [vmem:[#allocation5 + $0x48] sm:$0xff] %vm5045_vm6, %v6308_v14  ;;  %v6366_v17 = vld [vmem:[#allocation5 + $0x32] sm:$0xff]  ;;  %v10550_v31 = vpack.i.bf16 %v6377_v15, %v6376_v46 }
 0xa93   : > { %v6312_v59 = vpop.f32.mrb[118].mxu0  ;;  %v10545_v26 = vpack.i.bf16 %v6366_v17, %v6365_v36  ;;  %v6387_v37 = vld [vmem:[#allocation5 + $0x34] sm:$0xff] }
 0xa94   : > { %v6313_v39 = vadd.f32 %v14440_v60, %v6312_v59  ;;  %v9803_v38 = vpop.f32.mrb[119].mxu0  ;;  %v10555_v18 = vpack.i.bf16 %v6387_v37, %v6386_v32  ;;  %v6356_v1 = vld [vmem:[#allocation5 + $0x31] sm:$0xff] }
 0xa95   : > { %10521 = vrot.lane.b32.xlu1 %v10520_v51, %s11184_s28  ;;  %v6388_v50 = vld [vmem:[#allocation5 + $0x3c] sm:$0xff] }
 0xa96   : > { %10516 = vrot.lane.b32.xlu0 %v10515_v53, %s11182_s26  ;;  %6336 = vst.msk [vmem:[#allocation5 + $0x50] sm:$0xff] %vm5045_vm6, %v6313_v39  ;;  %v10560_v45 = vpack.i.bf16 %v6388_v50, %v6387_v37  ;;  %v6357_v55 = vld [vmem:[#allocation5 + $0x39] sm:$0xff] }
 0xa97   : > { %v6317_v27 = vpop.f32.mrb[120].mxu0  ;;  %v6398_v22 = vld [vmem:[#allocation5 + $0x35] sm:$0xff]  ;;  %v10570_v47 = vpack.i.bf16 %v6357_v55, %v6356_v1 }
 0xa98   : > { %v6318_v12 = vadd.f32 %v14442_v25, %v6317_v27  ;;  %v9806_v60 = vpop.f32.mrb[121].mxu0  ;;  %v6367_v11 = vld [vmem:[#allocation5 + $0x3a] sm:$0xff] }
 0xa99   : > { %10531 = vrot.lane.b32.xlu1 %v10530_v61, %s11185_s23  ;;  %v6368_v19 = vld [vmem:[#allocation5 + $0x42] sm:$0xff]  ;;  %v10575_v57 = vpack.i.bf16 %v6367_v11, %v6366_v17  ;;  %v6369_v30 = vld [vmem:[#allocation5 + $0x4a] sm:$0x3f] }
 0xa9a   : > { %10526 = vrot.lane.b32.xlu0 %v10525_v0, %s11183_s3  ;;  %6337 = vst.msk [vmem:[#allocation5 + $0x58] sm:$0xff] %vm5045_vm6, %v6318_v12  ;;  %v10580_v10 = vpack.i.bf16 %v6368_v19, %v6367_v11  ;;  %v6389_v16 = vld [vmem:[#allocation5 + $0x44] sm:$0xff]  ;;  %v6378_v34 = vld [vmem:[#allocation5 + $0x3b] sm:$0xff]  ;;  %v10600_v49 = vpack.i.bf16 %v6369_v30, %v6368_v19 }
 0xa9b   : > { %v6322_v2 = vpop.f32.mrb[122].mxu0  ;;  %v6379_v63 = vld [vmem:[#allocation5 + $0x43] sm:$0xff]  ;;  %v10590_v3 = vpack.i.bf16 %v6389_v16, %v6388_v50 }
 0xa9c   : > { %v6323_v41 = vadd.f32 %v14444_v40, %v6322_v2  ;;  %v9809_v25 = vpop.f32.mrb[123].mxu0  ;;  %v6399_v40 = vld [vmem:[#allocation5 + $0x3d] sm:$0xff]  ;;  %v10585_v9 = vpack.i.bf16 %v6379_v63, %v6378_v34  ;;  %v6359_v44 = vld [vmem:[#allocation5 + $0x49] sm:$0x3f] }
 0xa9d   : > { %10541 = vrot.lane.b32.xlu1 %v10540_v58, %s11178_s27  ;;  %v10565_v8 = vpack.i.bf16 %v6399_v40, %v6398_v22  ;;  %v6358_v28 = vld [vmem:[#allocation5 + $0x41] sm:$0xff]  ;;  %v6401_v24 = vld [vmem:[#allocation5 + $0x4d] sm:$0xff] }
 0xa9e   : > { %10536 = vrot.lane.b32.xlu0 %v10535_v62, %s11177_s19  ;;  %6339 = vst.msk [vmem:[#allocation5 + $0x60] sm:$0xf] %vm6338_vm4, %v6323_v41  ;;  %v10595_v42 = vpack.i.bf16 %v6359_v44, %v6358_v28  ;;  %v6390_v54 = vld [vmem:[#allocation5 + $0x4c] sm:$0xff]  ;;  %v6340_v0 = vld [vmem:[#allocation5] sm:$0xff] }
 0xa9f   : > { %v6400_v48 = vld [vmem:[#allocation5 + $0x45] sm:$0xff]  ;;  %v10605_v33 = vpack.i.bf16 %v6390_v54, %v6389_v16  ;;  %v6371_v4 = vld [vmem:[#allocation5 + $0x52] sm:$0x3f] }
 0xaa0   : > { %v10610_v43 = vpack.i.bf16 %v6401_v24, %v6400_v48  ;;  %v6370_v52 = vld [vmem:[#allocation5 + $0x4a] sm:$0xff]  ;;  %v6405_v30 = vld [vmem:[#allocation5 + $0x1e] sm:$0xff] }
 0xaa1   : > { %10551 = vrot.lane.b32.xlu1 %v10550_v31, %s11182_s26  ;;  %v6381_v35 = vld [vmem:[#allocation5 + $0x53] sm:$0x3f]  ;;  %v6380_v14 = vld [vmem:[#allocation5 + $0x4b] sm:$0xff]  ;;  %v10615_v23 = vpack.i.bf16 %v6371_v4, %v6370_v52 }
 0xaa2   : > { %10546 = vrot.lane.b32.xlu0 %v10545_v26, %s11180_s0  ;;  %v10620_v56 = vpack.i.bf16 %v6381_v35, %v6380_v14  ;;  %v6392_v51 = vld [vmem:[#allocation5 + $0x54] sm:$0xff]  ;;  %v6341_v58 = vld [vmem:[#allocation5 + $0x8] sm:$0xff] }
 0xaa3   : > { %v6391_v53 = vld [vmem:[#allocation5 + $0x54] sm:$0x3f] }
 0xaa4   : > { %v6402_v59 = vld [vmem:[#allocation5 + $0x55] sm:$0xff] }
 0xaa5   : > { %10561 = vrot.lane.b32.xlu1 %v10560_v45, %s11183_s3  ;;  %v6403_v5 = vld [vmem:[#allocation5 + $0x5d] sm:$0x3f]  ;;  %v6342_v28 = vld [vmem:[#allocation5 + $0x10] sm:$0xff] }
 0xaa6   : > { %10556 = vrot.lane.b32.xlu0 %v10555_v18, %s11184_s28  ;;  %v6393_v32 = vld [vmem:[#allocation5 + $0x5c] sm:$0x3f] }
 0xaa7   : > { %v6343_v48 = vld [vmem:[#allocation5 + $0x18] sm:$0xff] }
 0xaa9   : > { %10571 = vrot.lane.b32.xlu1 %v10570_v47, %s11177_s19 }
 0xaaa   : > { %10566 = vrot.lane.b32.xlu0 %v10565_v8, %s11185_s23 }
 0xaad   : > { %10581 = vrot.lane.b32.xlu1 %v10580_v10, %s11180_s0 }
 0xaae   : > { %10576 = vrot.lane.b32.xlu0 %v10575_v57, %s11178_s27 }
 0xab1   : > { %10591 = vrot.lane.b32.xlu1 %v10590_v3, %s11184_s28 }
 0xab2   : > { %10586 = vrot.lane.b32.xlu0 %v10585_v9, %s11182_s26 }
 0xab5   : > { %10601 = vrot.lane.b32.xlu1 %v10600_v49, %s11178_s27 }
 0xab6   : > { %10596 = vrot.lane.b32.xlu0 %v10595_v42, %s11177_s19 }
 0xab9   : > { %10611 = vrot.lane.b32.xlu1 %v10610_v43, %s11185_s23 }
 0xaba   : > { %10606 = vrot.lane.b32.xlu0 %v10605_v33, %s11183_s3 }
 0xabd   : > { %10621 = vrot.lane.b32.xlu1 %v10620_v56, %s11182_s26  ;;  %v6406_v56 = vld [vmem:[#allocation5 + $0x26] sm:$0xff] }
 0xabe   : > { %10616 = vrot.lane.b32.xlu0 %v10615_v23, %s11180_s0 }
 0xac1   : > { %6624 = vrot.lane.b32.xlu1 %v6392_v51, %s11183_s3 }
 0xac2   : > { %6592 = vrot.lane.b32.xlu0 %v6390_v54, %s11184_s28 }
 0xac5   : > { %6594 = vrot.lane.b32.xlu1 %v6391_v53, %s11184_s28 }
 0xac6   : > { %6664 = vrot.lane.b32.xlu0 %v6402_v59, %s11185_s23 }
 0xac9   : > { %6666 = vrot.lane.b32.xlu1 %v6403_v5, %s11185_s23 }
 0xaca   : > { %6626 = vrot.lane.b32.xlu0 %v6393_v32, %s11183_s3 }
 0xaf2   : > { %v10472_v39 = vpop.permute.xlu1 %10471 }
 0xaf3   : > { %v10467_v38 = vpop.permute.xlu0 %10466  ;;  %v10473_v61 = vunpack.i.l.bf16 %v10472_v39  ;;  %v10474_v21 = vunpack.i.h.bf16 %v10472_v39 }
 0xaf4   : > { %v10468_v20 = vunpack.i.l.bf16 %v10467_v38  ;;  %v10469_v27 = vunpack.i.h.bf16 %v10467_v38 }
 0xaf6   : > { %v6678_v36 = vsel %vm5045_vm6, %v6340_v0, %v10468_v20  ;;  %v6679_v15 = vsel %vm5045_vm6, %v6341_v58, %v10469_v27 }
 0xaf7   : > { %v10482_v7 = vpop.permute.xlu1 %10481  ;;  %v6688_v2 = vsel %vm5118_vm8, %v6678_v36, %v10473_v61  ;;  %v6689_v37 = vsel %vm5118_vm8, %v6679_v15, %v10474_v21 }
 0xaf8   : > { %v10477_v12 = vpop.permute.xlu0 %10476  ;;  %v10483_v62 = vunpack.i.l.bf16 %v10482_v7  ;;  %v10484_v26 = vunpack.i.h.bf16 %v10482_v7 }
 0xaf9   : > { %v10478_v60 = vunpack.i.l.bf16 %v10477_v12  ;;  %v10479_v17 = vunpack.i.h.bf16 %v10477_v12 }
 0xafb   : > { %v6698_v41 = vsel %vm5192_vm11, %v6688_v2, %v10478_v60  ;;  %v10492_v25 = vpop.permute.xlu1 %10491  ;;  %v6699_v18 = vsel %vm5192_vm11, %v6689_v37, %v10479_v17 }
 0xafc   : > { %v10487_v46 = vpop.permute.xlu0 %10486  ;;  %v10493_v50 = vunpack.i.l.bf16 %v10492_v25  ;;  %v6708_v45 = vsel %vm5266_vm0, %v6698_v41, %v10483_v62  ;;  %v10494_v8 = vunpack.i.h.bf16 %v10492_v25  ;;  %v6709_v10 = vsel %vm5266_vm0, %v6699_v18, %v10484_v26  ;;  %v6407_v41 = vld [vmem:[#allocation5 + $0x2e] sm:$0xff] }
 0xafd   : > { %v10488_v31 = vunpack.i.l.bf16 %v10487_v46  ;;  %v10489_v55 = vunpack.i.h.bf16 %v10487_v46 }
 0xaff   : > { %v6719_v40 = vsel %vm6718_vm9, %v6708_v45, %v10488_v31  ;;  %v10502_v1 = vpop.permute.xlu1 %10501  ;;  %v6720_v63 = vsel %vm6718_vm9, %v6709_v10, %v10489_v55  ;;  %v6344_v31 = vld [vmem:[#allocation5 + $0x20] sm:$0xff] }
 0xb00   : > { %v10497_v22 = vpop.permute.xlu0 %10496  ;;  %v10503_v11 = vunpack.i.l.bf16 %v10502_v1  ;;  %v6730_v19 = vsel %vm6729_vm12, %v6719_v40, %v10493_v50  ;;  %v10504_v34 = vunpack.i.h.bf16 %v10502_v1  ;;  %v6731_v54 = vsel %vm6729_vm12, %v6720_v63, %v10494_v8  ;;  %v6408_v40 = vld [vmem:[#allocation5 + $0x36] sm:$0xff] }
 0xb01   : > { %v10498_v47 = vunpack.i.l.bf16 %v10497_v22  ;;  %v10499_v57 = vunpack.i.h.bf16 %v10497_v22  ;;  %v6345_v22 = vld [vmem:[#allocation5 + $0x28] sm:$0xff] }
 0xb02   : > { %v6680_v42 = vsel %vm5045_vm6, %v6342_v28, %v10503_v11  ;;  %v6681_v35 = vsel %vm5045_vm6, %v6343_v48, %v10504_v34 }
 0xb03   : > { %v6741_v16 = vsel %vm6740_vm5, %v6730_v19, %v10498_v47  ;;  %v10512_v3 = vpop.permute.xlu1 %10511  ;;  %v6742_v33 = vsel %vm6740_vm5, %v6731_v54, %v10499_v57 }
 0xb04   : > { %v10507_v9 = vpop.permute.xlu0 %10506  ;;  %6871 = vmatmul.mubr.f32.vlgmr.msra.gmra.mrb[124].mxu0 %v6741_v16  ;;  %v10513_v24 = vunpack.i.l.bf16 %v10512_v3  ;;  %v10514_v52 = vunpack.i.h.bf16 %v10512_v3 }
 0xb05   : > { %v10509_v44 = vunpack.i.h.bf16 %v10507_v9  ;;  %v10508_v49 = vunpack.i.l.bf16 %v10507_v9  ;;  %9082 = vmatprep.mubr.msk.f32.mxu0 %vm5045_vm6, %v6405_v30 }
 0xb07   : > { %v6690_v43 = vsel %vm5118_vm8, %v6680_v42, %v10508_v49  ;;  %v10522_v4 = vpop.permute.xlu1 %10521  ;;  %v6691_v23 = vsel %vm5118_vm8, %v6681_v35, %v10509_v44 }
 0xb08   : > { %v10517_v14 = vpop.permute.xlu0 %10516  ;;  %6876 = vmatmul.mubr.f32.gmra.mrb[126].mxu0 %v6742_v33  ;;  %v10523_v59 = vunpack.i.l.bf16 %v10522_v4  ;;  %v6700_v5 = vsel %vm5192_vm11, %v6690_v43, %v10513_v24  ;;  %v10524_v39 = vunpack.i.h.bf16 %v10522_v4  ;;  %v6701_v38 = vsel %vm5192_vm11, %v6691_v23, %v10514_v52  ;;  %v6409_v23 = vld [vmem:[#allocation5 + $0x3e] sm:$0xff] }
 0xb09   : > { %v10519_v51 = vunpack.i.h.bf16 %v10517_v14  ;;  %v10518_v53 = vunpack.i.l.bf16 %v10517_v14  ;;  %9083 = vmatprep.mubr.msk.f32.mxu0 %vm5045_vm6, %v6406_v56 }
 0xb0b   : > { %v6710_v32 = vsel %vm5266_vm0, %v6700_v5, %v10518_v53  ;;  %v10532_v20 = vpop.permute.xlu1 %10531  ;;  %v6711_v0 = vsel %vm5266_vm0, %v6701_v38, %v10519_v51 }
 0xb0c   : > { %v10527_v61 = vpop.permute.xlu0 %10526  ;;  %v10533_v27 = vunpack.i.l.bf16 %v10532_v20  ;;  %v6721_v12 = vsel %vm6718_vm9, %v6710_v32, %v10523_v59  ;;  %v10534_v21 = vunpack.i.h.bf16 %v10532_v20  ;;  %v6722_v15 = vsel %vm6718_vm9, %v6711_v0, %v10524_v39  ;;  %v6410_v20 = vld [vmem:[#allocation5 + $0x46] sm:$0xff] }
 0xb0d   : > { %v10529_v36 = vunpack.i.h.bf16 %v10527_v61  ;;  %v10528_v7 = vunpack.i.l.bf16 %v10527_v61  ;;  %v6346_v61 = vld [vmem:[#allocation5 + $0x30] sm:$0xff] }
 0xb0f   : > { %v6732_v60 = vsel %vm6729_vm12, %v6721_v12, %v10528_v7  ;;  %v10542_v58 = vpop.permute.xlu1 %10541  ;;  %v6733_v25 = vsel %vm6729_vm12, %v6722_v15, %v10529_v36  ;;  %v6347_v7 = vld [vmem:[#allocation5 + $0x38] sm:$0xff] }
 0xb10   : > { %v10537_v62 = vpop.permute.xlu0 %10536  ;;  %v6743_v2 = vsel %vm6740_vm5, %v6732_v60, %v10533_v27  ;;  %v10543_v46 = vunpack.i.l.bf16 %v10542_v58  ;;  %v6744_v18 = vsel %vm6740_vm5, %v6733_v25, %v10534_v21  ;;  %v10544_v1 = vunpack.i.h.bf16 %v10542_v58 }
 0xb11   : > { %v10538_v17 = vunpack.i.l.bf16 %v10537_v62  ;;  %6881 = vmatmul.mubr.f32.gmra.mrb[128].mxu0 %v6743_v2  ;;  %v10539_v26 = vunpack.i.h.bf16 %v10537_v62 }
 0xb12   : > { %9084 = vmatprep.mubr.msk.f32.mxu0 %vm5045_vm6, %v6407_v41 }
 0xb13   : > { %v6682_v37 = vsel %vm5045_vm6, %v6344_v31, %v10538_v17  ;;  %v10552_v50 = vpop.permute.xlu1 %10551  ;;  %v6683_v11 = vsel %vm5045_vm6, %v6345_v22, %v10539_v26 }
 0xb14   : > { %v10547_v45 = vpop.permute.xlu0 %10546  ;;  %v10553_v47 = vunpack.i.l.bf16 %v10552_v50  ;;  %v6692_v8 = vsel %vm5118_vm8, %v6682_v37, %v10543_v46  ;;  %v10554_v34 = vunpack.i.h.bf16 %v10552_v50  ;;  %v6693_v3 = vsel %vm5118_vm8, %v6683_v11, %v10544_v1 }
 0xb15   : > { %v10548_v55 = vunpack.i.l.bf16 %v10547_v45  ;;  %6886 = vmatmul.mubr.f32.gmra.mrb[130].mxu0 %v6744_v18  ;;  %v10549_v19 = vunpack.i.h.bf16 %v10547_v45 }
 0xb16   : > { %9085 = vmatprep.mubr.msk.f32.mxu0 %vm5045_vm6, %v6408_v40 }
 0xb17   : > { %v6702_v10 = vsel %vm5192_vm11, %v6692_v8, %v10548_v55  ;;  %v10562_v57 = vpop.permute.xlu1 %10561  ;;  %v6703_v28 = vsel %vm5192_vm11, %v6693_v3, %v10549_v19 }
 0xb18   : > { %v10557_v16 = vpop.permute.xlu0 %10556  ;;  %v10563_v9 = vunpack.i.l.bf16 %v10562_v57  ;;  %v6712_v30 = vsel %vm5266_vm0, %v6702_v10, %v10553_v47  ;;  %v10564_v48 = vunpack.i.h.bf16 %v10562_v57  ;;  %v6713_v33 = vsel %vm5266_vm0, %v6703_v28, %v10554_v34  ;;  %v6348_v47 = vld [vmem:[#allocation5 + $0x40] sm:$0xff]  ;;  %v6411_v28 = vld [vmem:[#allocation5 + $0x4e] sm:$0xff] }
 0xb19   : > { %v10558_v63 = vunpack.i.l.bf16 %v10557_v16  ;;  %v10559_v44 = vunpack.i.h.bf16 %v10557_v16 }
 0xb1b   : > { %v6723_v49 = vsel %vm6718_vm9, %v6712_v30, %v10558_v63  ;;  %v10572_v42 = vpop.permute.xlu1 %10571  ;;  %v6724_v4 = vsel %vm6718_vm9, %v6713_v33, %v10559_v44 }
 0xb1c   : > { %v10567_v24 = vpop.permute.xlu0 %10566  ;;  %v6734_v43 = vsel %vm6729_vm12, %v6723_v49, %v10563_v9  ;;  %v10573_v51 = vunpack.i.l.bf16 %v10572_v42  ;;  %v6735_v53 = vsel %vm6729_vm12, %v6724_v4, %v10564_v48  ;;  %v10574_v32 = vunpack.i.h.bf16 %v10572_v42 }
 0xb1d   : > { %v10568_v54 = vunpack.i.l.bf16 %v10567_v24  ;;  %v10569_v35 = vunpack.i.h.bf16 %v10567_v24  ;;  %v6349_v24 = vld [vmem:[#allocation5 + $0x48] sm:$0x3f] }
 0xb1e   : > { %v6684_v27 = vsel %vm5045_vm6, %v6346_v61, %v10573_v51  ;;  %v6685_v21 = vsel %vm5045_vm6, %v6347_v7, %v10574_v32 }
 0xb1f   : > { %v6745_v52 = vsel %vm6740_vm5, %v6734_v43, %v10568_v54  ;;  %v10582_v14 = vpop.permute.xlu1 %10581  ;;  %v6746_v5 = vsel %vm6740_vm5, %v6735_v53, %v10569_v35 }
 0xb20   : > { %v10577_v56 = vpop.permute.xlu0 %10576  ;;  %6891 = vmatmul.mubr.f32.gmra.mrb[132].mxu0 %v6745_v52  ;;  %v10583_v36 = vunpack.i.l.bf16 %v10582_v14  ;;  %v10584_v58 = vunpack.i.h.bf16 %v10582_v14 }
 0xb21   : > { %9086 = vmatprep.mubr.msk.f32.mxu0 %vm5045_vm6, %v6409_v23  ;;  %v10578_v59 = vunpack.i.l.bf16 %v10577_v56  ;;  %v10579_v0 = vunpack.i.h.bf16 %v10577_v56  ;;  %v6412_v56 = vld [vmem:[#allocation5 + $0x56] sm:$0xff] }
 0xb23   : > { %v10592_v39 = vpop.permute.xlu1 %10591  ;;  %v6694_v12 = vsel %vm5118_vm8, %v6684_v27, %v10578_v59  ;;  %v6695_v15 = vsel %vm5118_vm8, %v6685_v21, %v10579_v0 }
 0xb24   : > { %v10587_v38 = vpop.permute.xlu0 %10586  ;;  %6896 = vmatmul.mubr.f32.gmra.mrb[134].mxu0 %v6746_v5  ;;  %v10593_v41 = vunpack.i.l.bf16 %v10592_v39  ;;  %v6704_v25 = vsel %vm5192_vm11, %v6694_v12, %v10583_v36  ;;  %v10594_v26 = vunpack.i.h.bf16 %v10592_v39  ;;  %v6705_v37 = vsel %vm5192_vm11, %v6695_v15, %v10584_v58  ;;  %v9080_v12 = vld [vmem:[%s15065_s6] ss:$0 sm:$0xff] }
 0xb25   : > { %9087 = vmatprep.mubr.msk.f32.mxu0 %vm5045_vm6, %v6410_v20  ;;  %v10588_v60 = vunpack.i.l.bf16 %v10587_v38  ;;  %v10589_v17 = vunpack.i.h.bf16 %v10587_v38  ;;  %v6413_v38 = vld [vmem:[#allocation5 + $0x5e] sm:$0x3f] }
 0xb27   : > { %v10602_v62 = vpop.permute.xlu1 %10601  ;;  %v6714_v46 = vsel %vm5266_vm0, %v6704_v25, %v10588_v60  ;;  %v6715_v18 = vsel %vm5266_vm0, %v6705_v37, %v10589_v17 }
 0xb28   : > { %v10597_v2 = vpop.permute.xlu0 %10596  ;;  %v10603_v22 = vunpack.i.l.bf16 %v10602_v62  ;;  %v6725_v8 = vsel %vm6718_vm9, %v6714_v46, %v10593_v41  ;;  %v6726_v3 = vsel %vm6718_vm9, %v6715_v18, %v10594_v26  ;;  %v10604_v42 = vunpack.i.h.bf16 %v10602_v62 }
 0xb29   : > { %v10598_v31 = vunpack.i.l.bf16 %v10597_v2  ;;  %v10599_v10 = vunpack.i.h.bf16 %v10597_v2 }
 0xb2b   : > { %v10612_v50 = vpop.permute.xlu1 %10611  ;;  %v6686_v11 = vsel %vm5045_vm6, %v6348_v47, %v10598_v31  ;;  %v6687_v48 = vsel %vm5045_vm6, %v6349_v24, %v10599_v10 }
 0xb2c   : > { %v10607_v45 = vpop.permute.xlu0 %10606  ;;  %v10613_v55 = vunpack.i.l.bf16 %v10612_v50  ;;  %v10614_v57 = vunpack.i.h.bf16 %v10612_v50  ;;  %v6696_v49 = vsel %vm5118_vm8, %v6686_v11, %v10603_v22  ;;  %v6697_v51 = vsel %vm5118_vm8, %v6687_v48, %v10604_v42 }
 0xb2d   : > { %v10609_v40 = vunpack.i.h.bf16 %v10607_v45  ;;  %v10608_v1 = vunpack.i.l.bf16 %v10607_v45 }
 0xb2f   : > { %v6736_v19 = vsel %vm6729_vm12, %v6725_v8, %v10608_v1  ;;  %v10622_v16 = vpop.permute.xlu1 %10621  ;;  %v6737_v44 = vsel %vm6729_vm12, %v6726_v3, %v10609_v40 }
 0xb30   : > { %v10617_v63 = vpop.permute.xlu0 %10616  ;;  %v6747_v34 = vsel %vm6740_vm5, %v6736_v19, %v10613_v55  ;;  %v10623_v9 = vunpack.i.l.bf16 %v10622_v16  ;;  %v6748_v4 = vsel %vm6740_vm5, %v6737_v44, %v10614_v57  ;;  %v10624_v23 = vunpack.i.h.bf16 %v10622_v16 }
 0xb31   : > { %v10618_v30 = vunpack.i.l.bf16 %v10617_v63  ;;  %6901 = vmatmul.mubr.f32.gmra.mrb[136].mxu0 %v6747_v34  ;;  %v10619_v43 = vunpack.i.h.bf16 %v10617_v63 }
 0xb32   : > { %9088 = vmatprep.mubr.msk.f32.mxu0 %vm5045_vm6, %v6411_v28 }
 0xb33   : > { %v6706_v54 = vsel %vm5192_vm11, %v6696_v49, %v10618_v30  ;;  %v6625_v33 = vpop.permute.xlu1 %6624  ;;  %v6707_v59 = vsel %vm5192_vm11, %v6697_v51, %v10619_v43  ;;  %v6934_v51 = vld [vmem:[%s15074_s15 + $0x18] sm:$0xff] }
 0xb34   : > { %v6593_v35 = vpop.permute.xlu0 %6592  ;;  %v6716_v52 = vsel %vm5266_vm0, %v6706_v54, %v10623_v9  ;;  %v6717_v20 = vsel %vm5266_vm0, %v6707_v59, %v10624_v23  ;;  %v6932_v23 = vld [vmem:[%s15074_s15 + $0x8] sm:$0xff] }
 0xb35   : > { %v6727_v14 = vsel %vm6718_vm9, %v6716_v52, %v6593_v35  ;;  %6906 = vmatmul.mubr.f32.gmra.mrb[138].mxu0 %v6748_v4  ;;  %v6936_v59 = vld [vmem:[%s15074_s15 + $0x28] sm:$0xff] }
 0xb36   : > { %9089 = vmatprep.mubr.msk.f32.mxu0 %vm5045_vm6, %v6412_v56  ;;  %v6738_v32 = vsel %vm6729_vm12, %v6727_v14, %v6625_v33  ;;  %v6931_v56 = vld [vmem:[%s15074_s15] sm:$0xff] }
 0xb37   : > { %v6595_v53 = vpop.permute.xlu1 %6594 }
 0xb38   : > { %v6665_v5 = vpop.permute.xlu0 %6664  ;;  %v6728_v61 = vsel %vm6718_vm9, %v6717_v20, %v6595_v53  ;;  %v6935_v53 = vld [vmem:[%s15074_s15 + $0x20] sm:$0xff]  ;;  %v6941_v20 = vld [vmem:[%s15074_s15 + $0x50] sm:$0xff] }
 0xb39   : > { %v6749_v39 = vsel %vm6740_vm5, %v6738_v32, %v6665_v5  ;;  %v6937_v5 = vld [vmem:[%s15074_s15 + $0x30] sm:$0xff]  ;;  %v6938_v32 = vld [vmem:[%s15074_s15 + $0x38] sm:$0xff] }
 0xb3a   : > { %6911 = vmatmul.mubr.f32.gmra.mrb[140].mxu0 %v6749_v39  ;;  %v6939_v39 = vld [vmem:[%s15074_s15 + $0x40] sm:$0xff] }
 0xb3b   : > { %9090 = vmatprep.mubr.msk.f32.mxu0 %vm5045_vm6, %v6413_v38  ;;  %v6667_v0 = vpop.permute.xlu1 %6666  ;;  %v6940_v38 = vld [vmem:[%s15074_s15 + $0x48] sm:$0xff] }
 0xb3c   : > { %v6627_v27 = vpop.permute.xlu0 %6626 }
 0xb3d   : > { %v6739_v36 = vsel %vm6729_vm12, %v6728_v61, %v6627_v27  ;;  %v6942_v61 = vld [vmem:[%s15074_s15 + $0x58] sm:$0xff]  ;;  %v7538_v27 = vld [vmem:[#allocation14] sm:$0xff] }
 0xb3e   : > { %v6750_v7 = vsel %vm6740_vm5, %v6739_v36, %v6667_v0  ;;  %v6943_v0 = vld [vmem:[%s15074_s15 + $0x60] sm:$0xf]  ;;  %v7539_v36 = vld [vmem:[#allocation14 + $0x8] sm:$0xff] }
 0xb3f   : > { %6916 = vmatmul.mubr.f32.gmra.mrb[142].mxu0 %v6750_v7  ;;  %v7540_v7 = vld [vmem:[#allocation14 + $0x10] sm:$0xff] }
 0xb40   : > { %9830 = vmatprep.mubr.msk.f32.mxu0 %vm11174_vm15, %v11175_v6 }
 0xbd7   : > { %v6872_v60 = vpop.f32.mrb[124].mxu0 }
 0xbd8   : > { %v6874_v21 = vpop.f32.mrb[125].mxu0  ;;  %v6873_v58 = vadd.f32 %v9080_v12, %v6872_v60  ;;  %v7541_v60 = vld [vmem:[#allocation14 + $0x18] sm:$0xff] }
 0xbd9   : > { %v10128_v21 = vpack.c.bf16 %v7541_v60, %v7540_v7 }
 0xbda   : > { %v6921_v17 = vmax.f32 %v6873_v58, 0.0  ;;  %v7542_v58 = vld [vmem:[#allocation14 + $0x20] sm:$0xff] }
 0xbdb   : > { %v6877_v62 = vpop.f32.mrb[126].mxu0 }
 0xbdc   : > { %v6878_v2 = vadd.f32 %v9080_v12, %v6877_v62  ;;  %v6879_v15 = vpop.f32.mrb[127].mxu0  ;;  %v7543_v62 = vld [vmem:[#allocation14 + $0x28] sm:$0xff] }
 0xbdd   : > { %v7544_v15 = vld [vmem:[#allocation14 + $0x30] sm:$0xff] }
 0xbde   : > { %v6922_v41 = vmax.f32 %v6878_v2, 0.0  ;;  %v10131_v2 = vpack.c.bf16 %v7543_v62, %v7542_v58 }
 0xbe0   : > { %v10109_v25 = vpack.c.bf16 %v6922_v41, %v6921_v17  ;;  %v7545_v17 = vld [vmem:[#allocation14 + $0x38] sm:$0xff] }
 0xbe1   : > { %v10134_v41 = vpack.c.bf16 %v7545_v17, %v7544_v15 }
 0xbe2   : > { %10110 = vmatpush3.bf16.msra.mxu0 %v10109_v25  ;;  %v7546_v25 = vld [vmem:[#allocation14 + $0x40] sm:$0xff] }
 0xbe3   : > { %10111 = vmatprep.subr.bf16.mxu0 %v11173_v29 }
 0xbe4   : > { %v6882_v46 = vpop.f32.mrb[128].mxu0 }
 0xbe5   : > { %v6884_v31 = vpop.f32.mrb[129].mxu0  ;;  %v6883_v26 = vadd.f32 %v9080_v12, %v6882_v46  ;;  %v7547_v46 = vld [vmem:[#allocation14 + $0x48] sm:$0xff] }
 0xbe6   : > { %v10137_v31 = vpack.c.bf16 %v7547_v46, %v7546_v25 }
 0xbe7   : > { %v6923_v18 = vmax.f32 %v6883_v26, 0.0 }
 0xbe8   : > { %v6887_v37 = vpop.f32.mrb[130].mxu0 }
 0xbe9   : > { %v6888_v50 = vadd.f32 %v9080_v12, %v6887_v37  ;;  %v6889_v45 = vpop.f32.mrb[131].mxu0 }
 0xbeb   : > { %v6924_v55 = vmax.f32 %v6888_v50, 0.0 }
 0xbed   : > { %v10112_v40 = vpack.c.bf16 %v6924_v55, %v6923_v18  ;;  %v7548_v18 = vld [vmem:[#allocation14 + $0x50] sm:$0xff]  ;;  %v7549_v55 = vld [vmem:[#allocation14 + $0x58] sm:$0xff] }
 0xbef   : > { %10113 = vmatpush3.bf16.msra.mxu0 %v10112_v40  ;;  %v10140_v40 = vpack.c.bf16 %v7549_v55, %v7548_v18 }
 0xbf0   : > { %10114 = vmatprep.subr.bf16.mxu0 %v11173_v29 }
 0xbf3   : > { %v6892_v1 = vpop.f32.mrb[132].mxu0 }
 0xbf4   : > { %v6894_v22 = vpop.f32.mrb[133].mxu0  ;;  %v6893_v47 = vadd.f32 %v9080_v12, %v6892_v1 }
 0xbf6   : > { %v6925_v10 = vmax.f32 %v6893_v47, 0.0  ;;  %v7550_v47 = vld [vmem:[#allocation14 + $0x60] sm:$0xff] }
 0xbf7   : > { %v6897_v8 = vpop.f32.mrb[134].mxu0 }
 0xbf8   : > { %v6898_v11 = vadd.f32 %v9080_v12, %v6897_v8  ;;  %v6899_v19 = vpop.f32.mrb[135].mxu0  ;;  %v7551_v8 = vld [vmem:[#allocation14 + $0x68] sm:$0xff] }
 0xbfa   : > { %v6926_v57 = vmax.f32 %v6898_v11, 0.0  ;;  %v10143_v11 = vpack.c.bf16 %v7551_v8, %v7550_v47 }
 0xbfc   : > { %v10115_v16 = vpack.c.bf16 %v6926_v57, %v6925_v10  ;;  %v7552_v57 = vld [vmem:[#allocation14 + $0x70] sm:$0xff] }
 0xbfe   : > { %10116 = vmatpush3.bf16.msra.mxu0 %v10115_v16  ;;  %v7553_v16 = vld [vmem:[#allocation14 + $0x78] sm:$0xff] }
 0xbff   : > { %10117 = vmatprep.subr.bf16.mxu0 %v11173_v29 }
 0xc04   : > { %v6902_v63 = vpop.f32.mrb[136].mxu0 }
 0xc05   : > { %v6904_v34 = vpop.f32.mrb[137].mxu0  ;;  %v6903_v3 = vadd.f32 %v9080_v12, %v6902_v63 }
 0xc06   : > { %v10146_v34 = vpack.c.bf16 %v7553_v16, %v7552_v57 }
 0xc07   : > { %v6927_v44 = vmax.f32 %v6903_v3, 0.0 }
 0xc08   : > { %v6907_v9 = vpop.f32.mrb[138].mxu0 }
 0xc09   : > { %v6908_v30 = vadd.f32 %v9080_v12, %v6907_v9  ;;  %v6909_v28 = vpop.f32.mrb[139].mxu0 }
 0xc0b   : > { %v6928_v49 = vmax.f32 %v6908_v30, 0.0 }
 0xc0d   : > { %v10118_v42 = vpack.c.bf16 %v6928_v49, %v6927_v44  ;;  %v6912_v24 = vpop.f32.mrb[140].mxu0 }
 0xc0e   : > { %v6914_v54 = vpop.f32.mrb[141].mxu0  ;;  %v6913_v48 = vadd.f32 %v9080_v12, %v6912_v24  ;;  %v7554_v24 = vld [vmem:[#allocation14 + $0x80] sm:$0xff] }
 0xc0f   : > { %10119 = vmatpush3.bf16.msra.mxu0 %v10118_v42  ;;  %v7555_v54 = vld [vmem:[#allocation14 + $0x88] sm:$0xff] }
 0xc10   : > { %10120 = vmatprep.subr.bf16.mxu0 %v11173_v29  ;;  %v6929_v52 = vmax.f32 %v6913_v48, 0.0  ;;  %v10149_v48 = vpack.c.bf16 %v7555_v54, %v7554_v24 }
 0xc12   : > { %v6917_v43 = vpop.f32.mrb[142].mxu0 }
 0xc13   : > { %v6918_v33 = vadd.f32 %v9080_v12, %v6917_v43  ;;  %v6919_v35 = vpop.f32.mrb[143].mxu0  ;;  %v10125_v12 = vpack.c.bf16 %v7539_v36, %v7538_v27 }
 0xc15   : > { %v6930_v4 = vmax.f32 %v6918_v33, 0.0 }
 0xc17   : > { %v10121_v14 = vpack.c.bf16 %v6930_v4, %v6929_v52 }
 0xc19   : > { %10123 = vmatpush3.bf16.msk.msra.mxu0 %vm12787_vm14, %v10121_v14  ;;  %vm7727_vm14 = vcmask 259072  }
 0xc1a   : > { %10124 = vmatprep.subr.bf16.mxu0 %v11173_v29 }
 0xc1c   : > { %9831 = vmatmul.mubr.msk.f32.vlgmr.msra.gmra.mrb[144].mxu0 %vm6944_vm10, %v6931_v56 }
 0xc1d   : > { %9833 = vmatprep.mubr.msk.f32.mxu0 %vm11174_vm15, %v11175_v6  ;;  %10126 = vmatpush1.bf16.msra.mxu0 %v10125_v12 }
 0xc1e   : > { %10127 = vmatprep.subr.bf16.mxu0 %v11173_v29 }
 0xc20   : > { %9834 = vmatmul.mubr.msk.f32.gmra.mrb[146].mxu0 %vm6944_vm10, %v6932_v23 }
 0xc21   : > { %9836 = vmatprep.mubr.msk.f32.mxu0 %vm11174_vm15, %v11175_v6  ;;  %10129 = vmatpush1.bf16.msra.mxu0 %v10128_v21 }
 0xc22   : > { %10130 = vmatprep.subr.bf16.mxu0 %v11173_v29 }
 0xc24   : > { %9837 = vmatmul.mubr.msk.f32.gmra.mrb[148].mxu0 %vm6944_vm10, %v6933_v13 }
 0xc25   : > { %9839 = vmatprep.mubr.msk.f32.mxu0 %vm11174_vm15, %v11175_v6  ;;  %10132 = vmatpush1.bf16.msra.mxu0 %v10131_v2 }
 0xc26   : > { %10133 = vmatprep.subr.bf16.mxu0 %v11173_v29 }
 0xc28   : > { %9840 = vmatmul.mubr.msk.f32.gmra.mrb[150].mxu0 %vm6944_vm10, %v6934_v51 }
 0xc29   : > { %9842 = vmatprep.mubr.msk.f32.mxu0 %vm11174_vm15, %v11175_v6  ;;  %10135 = vmatpush1.bf16.msra.mxu0 %v10134_v41 }
 0xc2a   : > { %10136 = vmatprep.subr.bf16.mxu0 %v11173_v29 }
 0xc2c   : > { %9843 = vmatmul.mubr.msk.f32.gmra.mrb[152].mxu0 %vm6944_vm10, %v6935_v53 }
 0xc2d   : > { %9845 = vmatprep.mubr.msk.f32.mxu0 %vm11174_vm15, %v11175_v6  ;;  %10138 = vmatpush1.bf16.msra.mxu0 %v10137_v31 }
 0xc2e   : > { %10139 = vmatprep.subr.bf16.mxu0 %v11173_v29 }
 0xc30   : > { %9846 = vmatmul.mubr.msk.f32.gmra.mrb[154].mxu0 %vm6944_vm10, %v6936_v59 }
 0xc31   : > { %9848 = vmatprep.mubr.msk.f32.mxu0 %vm11174_vm15, %v11175_v6  ;;  %10141 = vmatpush1.bf16.msra.mxu0 %v10140_v40 }
 0xc32   : > { %10142 = vmatprep.subr.bf16.mxu0 %v11173_v29 }
 0xc34   : > { %9849 = vmatmul.mubr.msk.f32.gmra.mrb[156].mxu0 %vm6944_vm10, %v6937_v5 }
 0xc35   : > { %9851 = vmatprep.mubr.msk.f32.mxu0 %vm11174_vm15, %v11175_v6  ;;  %10144 = vmatpush1.bf16.msra.mxu0 %v10143_v11 }
 0xc36   : > { %10145 = vmatprep.subr.bf16.mxu0 %v11173_v29 }
 0xc38   : > { %9852 = vmatmul.mubr.msk.f32.gmra.mrb[158].mxu0 %vm6944_vm10, %v6938_v32 }
 0xc39   : > { %9854 = vmatprep.mubr.msk.f32.mxu0 %vm11174_vm15, %v11175_v6  ;;  %10147 = vmatpush1.bf16.msra.mxu0 %v10146_v34 }
 0xc3a   : > { %10148 = vmatprep.subr.bf16.mxu0 %v11173_v29 }
 0xc3c   : > { %9855 = vmatmul.mubr.msk.f32.gmra.mrb[160].mxu0 %vm6944_vm10, %v6939_v39 }
 0xc3d   : > { %9857 = vmatprep.mubr.msk.f32.mxu0 %vm11174_vm15, %v11175_v6  ;;  %10150 = vmatpush1.bf16.msra.mxu0 %v10149_v48 }
 0xc3e   : > { %10151 = vmatprep.subr.bf16.mxu0 %v11173_v29 }
 0xc40   : > { %9858 = vmatmul.mubr.msk.f32.gmra.mrb[162].mxu0 %vm6944_vm10, %v6940_v38 }
 0xc41   : > { %9860 = vmatprep.mubr.msk.f32.mxu0 %vm11174_vm15, %v11175_v6 }
 0xc44   : > { %9861 = vmatmul.mubr.msk.f32.gmra.mrb[164].mxu0 %vm6944_vm10, %v6941_v20 }
 0xc45   : > { %9863 = vmatprep.mubr.msk.f32.mxu0 %vm11174_vm15, %v11175_v6 }
 0xc48   : > { %9864 = vmatmul.mubr.msk.f32.gmra.mrb[166].mxu0 %vm6944_vm10, %v6942_v61 }
 0xc49   : > { %9866 = vmatprep.mubr.msk.f32.mxu0 %vm11174_vm15, %v11175_v6 }
 0xc4c   : > { %9867 = vmatmul.mubr.msk.f32.gmra.mrb[168].mxu0 %vm6944_vm10, %v6943_v0 }
 0xcef   : > { %v7053_v26 = vpop.f32.mrb[144].mxu0 }
 0xcf0   : > { %7117 = vst.msk [vmem:[#allocation6] sm:$0xff] %vm5045_vm6, %v7053_v26  ;;  %v9832_v37 = vpop.f32.mrb[145].mxu0 }
 0xcf3   : > { %v7058_v50 = vpop.f32.mrb[146].mxu0 }
 0xcf4   : > { %7118 = vst.msk [vmem:[#allocation6 + $0x8] sm:$0xff] %vm5045_vm6, %v7058_v50  ;;  %v9835_v45 = vpop.f32.mrb[147].mxu0 }
 0xcf7   : > { %v7063_v1 = vpop.f32.mrb[148].mxu0 }
 0xcf8   : > { %7119 = vst.msk [vmem:[#allocation6 + $0x10] sm:$0xff] %vm5045_vm6, %v7063_v1  ;;  %v9838_v22 = vpop.f32.mrb[149].mxu0 }
 0xcfb   : > { %v7068_v19 = vpop.f32.mrb[150].mxu0  ;;  %v7150_v63 = vld [vmem:[#allocation6 + $0x2] sm:$0xff] }
 0xcfc   : > { %7120 = vst.msk [vmem:[#allocation6 + $0x18] sm:$0xff] %vm5045_vm6, %v7068_v19  ;;  %v9841_v10 = vpop.f32.mrb[151].mxu0  ;;  %v7140_v30 = vld [vmem:[#allocation6 + $0x1] sm:$0xff] }
 0xcff   : > { %v7073_v3 = vpop.f32.mrb[152].mxu0  ;;  %v7151_v9 = vld [vmem:[#allocation6 + $0xa] sm:$0xff] }
 0xd00   : > { %v7141_v28 = vld [vmem:[#allocation6 + $0x9] sm:$0xff]  ;;  %7121 = vst.msk [vmem:[#allocation6 + $0x20] sm:$0xff] %vm5045_vm6, %v7073_v3  ;;  %v10630_v44 = vpack.i.bf16 %v7151_v9, %v7150_v63  ;;  %v9844_v42 = vpop.f32.mrb[153].mxu0 }
 0xd01   : > { %v10625_v49 = vpack.i.bf16 %v7141_v28, %v7140_v30  ;;  %v7162_v43 = vld [vmem:[#allocation6 + $0xb] sm:$0xff] }
 0xd02   : > { %10631 = vrot.lane.b32.xlu1 %v10630_v44, %s11178_s27  ;;  %v7172_v51 = vld [vmem:[#allocation6 + $0xc] sm:$0xff] }
 0xd03   : > { %10626 = vrot.lane.b32.xlu0 %v10625_v49, %s11177_s19  ;;  %v7163_v33 = vld [vmem:[#allocation6 + $0x13] sm:$0xff]  ;;  %v7078_v52 = vpop.f32.mrb[154].mxu0 }
 0xd04   : > { %v7152_v35 = vld [vmem:[#allocation6 + $0x12] sm:$0xff]  ;;  %v10640_v4 = vpack.i.bf16 %v7163_v33, %v7162_v43  ;;  %7122 = vst.msk [vmem:[#allocation6 + $0x28] sm:$0xff] %vm5045_vm6, %v7078_v52  ;;  %v9847_v56 = vpop.f32.mrb[155].mxu0 }
 0xd05   : > { %v10635_v14 = vpack.i.bf16 %v7152_v35, %v7151_v9  ;;  %v7194_v23 = vld [vmem:[#allocation6 + $0x16] sm:$0xff] }
 0xd06   : > { %v7173_v13 = vld [vmem:[#allocation6 + $0x14] sm:$0xff]  ;;  %9106 = vmatprep.mubr.msk.f32.mxu0 %vm5045_vm6, %v7194_v23  ;;  %10641 = vrot.lane.b32.xlu1 %v10640_v4, %s11182_s26 }
 0xd07   : > { %10636 = vrot.lane.b32.xlu0 %v10635_v14, %s11180_s0  ;;  %v7174_v53 = vld [vmem:[#allocation6 + $0x1c] sm:$0xff]  ;;  %v7083_v59 = vpop.f32.mrb[156].mxu0  ;;  %v10645_v5 = vpack.i.bf16 %v7173_v13, %v7172_v51  ;;  %v7142_v0 = vld [vmem:[#allocation6 + $0x11] sm:$0xff] }
 0xd08   : > { %v10650_v32 = vpack.i.bf16 %v7174_v53, %v7173_v13  ;;  %7123 = vst.msk [vmem:[#allocation6 + $0x30] sm:$0xff] %vm5045_vm6, %v7083_v59  ;;  %v9850_v39 = vpop.f32.mrb[157].mxu0  ;;  %v7185_v38 = vld [vmem:[#allocation6 + $0x1d] sm:$0xff]  ;;  %v7184_v61 = vld [vmem:[#allocation6 + $0x15] sm:$0xff] }
 0xd09   : > { %v7143_v20 = vld [vmem:[#allocation6 + $0x19] sm:$0xff]  ;;  %v10655_v36 = vpack.i.bf16 %v7185_v38, %v7184_v61 }
 0xd0a   : > { %10651 = vrot.lane.b32.xlu1 %v10650_v32, %s11183_s3  ;;  %v10660_v7 = vpack.i.bf16 %v7143_v20, %v7142_v0  ;;  %v7153_v60 = vld [vmem:[#allocation6 + $0x1a] sm:$0xff] }
 0xd0b   : > { %10646 = vrot.lane.b32.xlu0 %v10645_v5, %s11184_s28  ;;  %v7088_v27 = vpop.f32.mrb[158].mxu0  ;;  %v7154_v21 = vld [vmem:[#allocation6 + $0x22] sm:$0xff]  ;;  %v10665_v62 = vpack.i.bf16 %v7153_v60, %v7152_v35 }
 0xd0c   : > { %7124 = vst.msk [vmem:[#allocation6 + $0x38] sm:$0xff] %vm5045_vm6, %v7088_v27  ;;  %v9853_v12 = vpop.f32.mrb[159].mxu0  ;;  %v10670_v2 = vpack.i.bf16 %v7154_v21, %v7153_v60  ;;  %v7165_v17 = vld [vmem:[#allocation6 + $0x23] sm:$0xff]  ;;  %v7164_v25 = vld [vmem:[#allocation6 + $0x1b] sm:$0xff] }
 0xd0d   : > { %v7175_v41 = vld [vmem:[#allocation6 + $0x24] sm:$0xff]  ;;  %v10675_v31 = vpack.i.bf16 %v7165_v17, %v7164_v25 }
 0xd0e   : > { %10661 = vrot.lane.b32.xlu1 %v10660_v7, %s11177_s19  ;;  %v10680_v26 = vpack.i.bf16 %v7175_v41, %v7174_v53  ;;  %v7186_v18 = vld [vmem:[#allocation6 + $0x25] sm:$0xff] }
 0xd0f   : > { %10656 = vrot.lane.b32.xlu0 %v10655_v36, %s11185_s23  ;;  %v7093_v58 = vpop.f32.mrb[160].mxu0  ;;  %v7187_v50 = vld [vmem:[#allocation6 + $0x2d] sm:$0xff]  ;;  %v7144_v11 = vld [vmem:[#allocation6 + $0x21] sm:$0xff] }
 0xd10   : > { %7125 = vst.msk [vmem:[#allocation6 + $0x40] sm:$0xff] %vm5045_vm6, %v7093_v58  ;;  %v9856_v15 = vpop.f32.mrb[161].mxu0  ;;  %v7176_v45 = vld [vmem:[#allocation6 + $0x2c] sm:$0xff]  ;;  %v10690_v40 = vpack.i.bf16 %v7187_v50, %v7186_v18 }
 0xd11   : > { %v10685_v1 = vpack.i.bf16 %v7176_v45, %v7175_v41  ;;  %v7155_v47 = vld [vmem:[#allocation6 + $0x2a] sm:$0xff] }
 0xd12   : > { %10671 = vrot.lane.b32.xlu1 %v10670_v2, %s11180_s0  ;;  %v7145_v8 = vld [vmem:[#allocation6 + $0x29] sm:$0xff]  ;;  %v10700_v10 = vpack.i.bf16 %v7155_v47, %v7154_v21 }
 0xd13   : > { %10666 = vrot.lane.b32.xlu0 %v10665_v62, %s11178_s27  ;;  %v7098_v46 = vpop.f32.mrb[162].mxu0  ;;  %v10695_v57 = vpack.i.bf16 %v7145_v8, %v7144_v11  ;;  %v7167_v63 = vld [vmem:[#allocation6 + $0x33] sm:$0xff]  ;;  %v7166_v3 = vld [vmem:[#allocation6 + $0x2b] sm:$0xff] }
 0xd14   : > { %7126 = vst.msk [vmem:[#allocation6 + $0x48] sm:$0xff] %vm5045_vm6, %v7098_v46  ;;  %v9859_v37 = vpop.f32.mrb[163].mxu0  ;;  %v7156_v34 = vld [vmem:[#allocation6 + $0x32] sm:$0xff]  ;;  %v10710_v30 = vpack.i.bf16 %v7167_v63, %v7166_v3 }
 0xd15   : > { %v10705_v28 = vpack.i.bf16 %v7156_v34, %v7155_v47  ;;  %v7177_v49 = vld [vmem:[#allocation6 + $0x34] sm:$0xff] }
 0xd16   : > { %10681 = vrot.lane.b32.xlu1 %v10680_v26, %s11184_s28  ;;  %v10715_v24 = vpack.i.bf16 %v7177_v49, %v7176_v45  ;;  %v7188_v48 = vld [vmem:[#allocation6 + $0x35] sm:$0xff] }
 0xd17   : > { %10676 = vrot.lane.b32.xlu0 %v10675_v31, %s11182_s26  ;;  %v7103_v55 = vpop.f32.mrb[164].mxu0  ;;  %v7178_v42 = vld [vmem:[#allocation6 + $0x3c] sm:$0xff]  ;;  %v7146_v33 = vld [vmem:[#allocation6 + $0x31] sm:$0xff] }
 0xd18   : > { %7127 = vst.msk [vmem:[#allocation6 + $0x50] sm:$0xff] %vm5045_vm6, %v7103_v55  ;;  %v9862_v22 = vpop.f32.mrb[165].mxu0  ;;  %v10720_v54 = vpack.i.bf16 %v7178_v42, %v7177_v49  ;;  %v7189_v43 = vld [vmem:[#allocation6 + $0x3d] sm:$0xff] }
 0xd19   : > { %v7147_v35 = vld [vmem:[#allocation6 + $0x39] sm:$0xff]  ;;  %v10725_v52 = vpack.i.bf16 %v7189_v43, %v7188_v48 }
 0xd1a   : > { %10691 = vrot.lane.b32.xlu1 %v10690_v40, %s11185_s23  ;;  %v10730_v4 = vpack.i.bf16 %v7147_v35, %v7146_v33  ;;  %v7157_v14 = vld [vmem:[#allocation6 + $0x3a] sm:$0xff] }
 0xd1b   : > { %10686 = vrot.lane.b32.xlu0 %v10685_v1, %s11183_s3  ;;  %v7108_v19 = vpop.f32.mrb[166].mxu0  ;;  %v7158_v56 = vld [vmem:[#allocation6 + $0x42] sm:$0xff]  ;;  %v10735_v23 = vpack.i.bf16 %v7157_v14, %v7156_v34  ;;  %v7159_v39 = vld [vmem:[#allocation6 + $0x4a] sm:$0x3f] }
 0xd1c   : > { %7128 = vst.msk [vmem:[#allocation6 + $0x58] sm:$0xff] %vm5045_vm6, %v7108_v19  ;;  %v9865_v16 = vpop.f32.mrb[167].mxu0  ;;  %v10740_v13 = vpack.i.bf16 %v7158_v56, %v7157_v14  ;;  %v7168_v51 = vld [vmem:[#allocation6 + $0x3b] sm:$0xff]  ;;  %v7169_v53 = vld [vmem:[#allocation6 + $0x43] sm:$0xff]  ;;  %v10760_v61 = vpack.i.bf16 %v7159_v39, %v7158_v56  ;;  %v7132_v39 = vld [vmem:[#allocation6 + $0x10] sm:$0xff] }
 0xd1d   : > { %v7179_v59 = vld [vmem:[#allocation6 + $0x44] sm:$0xff]  ;;  %v10745_v5 = vpack.i.bf16 %v7169_v53, %v7168_v51 }
 0xd1e   : > { %10701 = vrot.lane.b32.xlu1 %v10700_v10, %s11178_s27  ;;  %v10750_v32 = vpack.i.bf16 %v7179_v59, %v7178_v42  ;;  %v7148_v38 = vld [vmem:[#allocation6 + $0x41] sm:$0xff]  ;;  %v7149_v20 = vld [vmem:[#allocation6 + $0x49] sm:$0x3f] }
 0xd1f   : > { %10696 = vrot.lane.b32.xlu0 %v10695_v57, %s11177_s19  ;;  %v7113_v9 = vpop.f32.mrb[168].mxu0  ;;  %v10755_v0 = vpack.i.bf16 %v7149_v20, %v7148_v38  ;;  %v7190_v27 = vld [vmem:[#allocation6 + $0x45] sm:$0xff]  ;;  %v7191_v36 = vld [vmem:[#allocation6 + $0x4d] sm:$0xff] }
 0xd20   : > { %7129 = vst.msk [vmem:[#allocation6 + $0x60] sm:$0xf] %vm6338_vm4, %v7113_v9  ;;  %v9868_v44 = vpop.f32.mrb[169].mxu0  ;;  %v7180_v7 = vld [vmem:[#allocation6 + $0x4c] sm:$0xff]  ;;  %v10770_v12 = vpack.i.bf16 %v7191_v36, %v7190_v27  ;;  %v7130_v55 = vld [vmem:[#allocation6] sm:$0xff]  ;;  %v7133_v36 = vld [vmem:[#allocation6 + $0x18] sm:$0xff] }
 0xd21   : > { %v10765_v60 = vpack.i.bf16 %v7180_v7, %v7179_v59  ;;  %v7160_v21 = vld [vmem:[#allocation6 + $0x4a] sm:$0xff]  ;;  %v7161_v58 = vld [vmem:[#allocation6 + $0x52] sm:$0x3f] }
 0xd22   : > { %10711 = vrot.lane.b32.xlu1 %v10710_v30, %s11182_s26  ;;  %v7170_v62 = vld [vmem:[#allocation6 + $0x4b] sm:$0xff]  ;;  %v10775_v15 = vpack.i.bf16 %v7161_v58, %v7160_v21 }
 0xd23   : > { %10706 = vrot.lane.b32.xlu0 %v10705_v28, %s11180_s0  ;;  %v7171_v2 = vld [vmem:[#allocation6 + $0x53] sm:$0x3f]  ;;  %v7131_v19 = vld [vmem:[#allocation6 + $0x8] sm:$0xff] }
 0xd24   : > { %v10780_v17 = vpack.i.bf16 %v7171_v2, %v7170_v62  ;;  %v7182_v41 = vld [vmem:[#allocation6 + $0x54] sm:$0xff]  ;;  %v7196_v2 = vld [vmem:[#allocation6 + $0x26] sm:$0xff] }
 0xd25   : > { %v7192_v25 = vld [vmem:[#allocation6 + $0x55] sm:$0xff] }
 0xd26   : > { %10721 = vrot.lane.b32.xlu1 %v10720_v54, %s11183_s3  ;;  %v7181_v46 = vld [vmem:[#allocation6 + $0x54] sm:$0x3f] }
 0xd27   : > { %10716 = vrot.lane.b32.xlu0 %v10715_v24, %s11184_s28  ;;  %v7183_v31 = vld [vmem:[#allocation6 + $0x5c] sm:$0x3f] }
 0xd28   : > { %v7193_v26 = vld [vmem:[#allocation6 + $0x5d] sm:$0x3f] }
 0xd2a   : > { %10731 = vrot.lane.b32.xlu1 %v10730_v4, %s11177_s19 }
 0xd2b   : > { %10726 = vrot.lane.b32.xlu0 %v10725_v52, %s11185_s23 }
 0xd2e   : > { %10741 = vrot.lane.b32.xlu1 %v10740_v13, %s11180_s0 }
 0xd2f   : > { %10736 = vrot.lane.b32.xlu0 %v10735_v23, %s11178_s27 }
 0xd32   : > { %10751 = vrot.lane.b32.xlu1 %v10750_v32, %s11184_s28  ;;  %v7195_v32 = vld [vmem:[#allocation6 + $0x1e] sm:$0xff] }
 0xd33   : > { %10746 = vrot.lane.b32.xlu0 %v10745_v5, %s11182_s26 }
 0xd36   : > { %10761 = vrot.lane.b32.xlu1 %v10760_v61, %s11178_s27 }
 0xd37   : > { %10756 = vrot.lane.b32.xlu0 %v10755_v0, %s11177_s19  ;;  %s8801_s19 = sshll.u32 %s697_s21, 4  ;;  %s15019_s19 = int_to_ptr.vmem [resolvable:$true] %s8801_s19 }
 0xd38   : > { %p11080_p5 = scmp.lt.s32.totalorder %s15019_s19, %s11078_s2 }
 0xd3a   : > { %10771 = vrot.lane.b32.xlu1 %v10770_v12, %s11185_s23 }
 0xd3b   : > { %10766 = vrot.lane.b32.xlu0 %v10765_v60, %s11183_s3 }
 0xd3e   : > { %10781 = vrot.lane.b32.xlu1 %v10780_v17, %s11182_s26 }
 0xd3f   : > { %10776 = vrot.lane.b32.xlu0 %v10775_v15, %s11180_s0 }
 0xd42   : > { %7414 = vrot.lane.b32.xlu1 %v7182_v41, %s11183_s3 }
 0xd43   : > { %7382 = vrot.lane.b32.xlu0 %v7180_v7, %s11184_s28 }
 0xd46   : > { %7384 = vrot.lane.b32.xlu1 %v7181_v46, %s11184_s28 }
 0xd47   : > { %7454 = vrot.lane.b32.xlu0 %v7192_v25, %s11185_s23 }
 0xd4a   : > { %7456 = vrot.lane.b32.xlu1 %v7193_v26, %s11185_s23  ;;  %s15142_s23 = sld [smem:[#allocation45_spill]] }
 0xd4b   : > { %7416 = vrot.lane.b32.xlu0 %v7183_v31, %s11183_s3 }
 0xd74   : > { %v10632_v37 = vpop.permute.xlu1 %10631 }
 0xd75   : > { %v10627_v50 = vpop.permute.xlu0 %10626  ;;  %v10633_v18 = vunpack.i.l.bf16 %v10632_v37  ;;  %v10634_v11 = vunpack.i.h.bf16 %v10632_v37 }
 0xd76   : > { %v10628_v45 = vunpack.i.l.bf16 %v10627_v50  ;;  %v10629_v40 = vunpack.i.h.bf16 %v10627_v50 }
 0xd78   : > { %v7468_v1 = vsel %vm5045_vm6, %v7130_v55, %v10628_v45  ;;  %v10642_v22 = vpop.permute.xlu1 %10641  ;;  %v7469_v16 = vsel %vm5045_vm6, %v7131_v19, %v10629_v40 }
 0xd79   : > { %v10637_v47 = vpop.permute.xlu0 %10636  ;;  %v10643_v10 = vunpack.i.l.bf16 %v10642_v22  ;;  %v7478_v57 = vsel %vm5118_vm8, %v7468_v1, %v10633_v18  ;;  %v10644_v28 = vunpack.i.h.bf16 %v10642_v22  ;;  %v7479_v44 = vsel %vm5118_vm8, %v7469_v16, %v10634_v11 }
 0xd7a   : > { %v10638_v8 = vunpack.i.l.bf16 %v10637_v47  ;;  %v10639_v63 = vunpack.i.h.bf16 %v10637_v47 }
 0xd7c   : > { %v7488_v34 = vsel %vm5192_vm11, %v7478_v57, %v10638_v8  ;;  %v10652_v9 = vpop.permute.xlu1 %10651  ;;  %v7489_v24 = vsel %vm5192_vm11, %v7479_v44, %v10639_v63  ;;  %v7197_v63 = vld [vmem:[#allocation6 + $0x2e] sm:$0xff] }
 0xd7d   : > { %v10647_v3 = vpop.permute.xlu0 %10646  ;;  %v7498_v49 = vsel %vm5266_vm0, %v7488_v34, %v10643_v10  ;;  %v10653_v42 = vunpack.i.l.bf16 %v10652_v9  ;;  %v10654_v52 = vunpack.i.h.bf16 %v10652_v9  ;;  %v7499_v56 = vsel %vm5266_vm0, %v7489_v24, %v10644_v28  ;;  %v7134_v9 = vld [vmem:[#allocation6 + $0x20] sm:$0xff] }
 0xd7e   : > { %v10648_v30 = vunpack.i.l.bf16 %v10647_v3  ;;  %v10649_v54 = vunpack.i.h.bf16 %v10647_v3 }
 0xd80   : > { %v7508_v48 = vsel %vm6718_vm9, %v7498_v49, %v10648_v30  ;;  %v10662_v33 = vpop.permute.xlu1 %10661  ;;  %v7509_v51 = vsel %vm6718_vm9, %v7499_v56, %v10649_v54  ;;  %v7198_v54 = vld [vmem:[#allocation6 + $0x36] sm:$0xff] }
 0xd81   : > { %v10657_v43 = vpop.permute.xlu0 %10656  ;;  %v7518_v4 = vsel %vm6729_vm12, %v7508_v48, %v10653_v42  ;;  %v10663_v14 = vunpack.i.l.bf16 %v10662_v33  ;;  %v10664_v53 = vunpack.i.h.bf16 %v10662_v33  ;;  %v7519_v27 = vsel %vm6729_vm12, %v7509_v51, %v10654_v52 }
 0xd82   : > { %v10658_v35 = vunpack.i.l.bf16 %v10657_v43  ;;  %v10659_v23 = vunpack.i.h.bf16 %v10657_v43  ;;  %v7135_v43 = vld [vmem:[#allocation6 + $0x28] sm:$0xff] }
 0xd83   : > { %v7470_v61 = vsel %vm5045_vm6, %v7132_v39, %v10663_v14  ;;  %v7471_v60 = vsel %vm5045_vm6, %v7133_v36, %v10664_v53 }
 0xd84   : > { %v7528_v13 = vsel %vm6740_vm5, %v7518_v4, %v10658_v35  ;;  %v10672_v5 = vpop.permute.xlu1 %10671  ;;  %v7529_v12 = vsel %vm6740_vm5, %v7519_v27, %v10659_v23 }
 0xd85   : > { %7658 = vmatmul.mubr.f32.vlgmr.msra.gmra.mrb[170].mxu0 %v7528_v13  ;;  %v10667_v59 = vpop.permute.xlu0 %10666  ;;  %v10673_v0 = vunpack.i.l.bf16 %v10672_v5  ;;  %v10674_v21 = vunpack.i.h.bf16 %v10672_v5 }
 0xd86   : > { %v10669_v38 = vunpack.i.h.bf16 %v10667_v59  ;;  %v10668_v20 = vunpack.i.l.bf16 %v10667_v59  ;;  %9107 = vmatprep.mubr.msk.f32.mxu0 %vm5045_vm6, %v7195_v32 }
 0xd88   : > { %v7480_v7 = vsel %vm5118_vm8, %v7470_v61, %v10668_v20  ;;  %v10682_v62 = vpop.permute.xlu1 %10681  ;;  %v7481_v15 = vsel %vm5118_vm8, %v7471_v60, %v10669_v38 }
 0xd89   : > { %7663 = vmatmul.mubr.f32.gmra.mrb[172].mxu0 %v7529_v12  ;;  %v10677_v58 = vpop.permute.xlu0 %10676  ;;  %v7490_v25 = vsel %vm5192_vm11, %v7480_v7, %v10673_v0  ;;  %v10683_v46 = vunpack.i.l.bf16 %v10682_v62  ;;  %v7491_v26 = vsel %vm5192_vm11, %v7481_v15, %v10674_v21  ;;  %v10684_v37 = vunpack.i.h.bf16 %v10682_v62 }
 0xd8a   : > { %v10679_v17 = vunpack.i.h.bf16 %v10677_v58  ;;  %v10678_v41 = vunpack.i.l.bf16 %v10677_v58  ;;  %9108 = vmatprep.mubr.msk.f32.mxu0 %vm5045_vm6, %v7196_v2  ;;  %v7199_v2 = vld [vmem:[#allocation6 + $0x3e] sm:$0xff] }
 0xd8c   : > { %v7500_v31 = vsel %vm5266_vm0, %v7490_v25, %v10678_v41  ;;  %v10692_v50 = vpop.permute.xlu1 %10691  ;;  %v7501_v18 = vsel %vm5266_vm0, %v7491_v26, %v10679_v17 }
 0xd8d   : > { %v10687_v45 = vpop.permute.xlu0 %10686  ;;  %v10693_v55 = vunpack.i.l.bf16 %v10692_v50  ;;  %v7510_v22 = vsel %vm6718_vm9, %v7500_v31, %v10683_v46  ;;  %v10694_v8 = vunpack.i.h.bf16 %v10692_v50  ;;  %v7511_v57 = vsel %vm6718_vm9, %v7501_v18, %v10684_v37  ;;  %v7200_v37 = vld [vmem:[#allocation6 + $0x46] sm:$0xff]  ;;  %v7136_v50 = vld [vmem:[#allocation6 + $0x30] sm:$0xff] }
 0xd8e   : > { %v10689_v40 = vunpack.i.h.bf16 %v10687_v45  ;;  %v10688_v1 = vunpack.i.l.bf16 %v10687_v45 }
 0xd90   : > { %v7520_v47 = vsel %vm6729_vm12, %v7510_v22, %v10688_v1  ;;  %v10702_v11 = vpop.permute.xlu1 %10701  ;;  %v7521_v34 = vsel %vm6729_vm12, %v7511_v57, %v10689_v40  ;;  %v7137_v40 = vld [vmem:[#allocation6 + $0x38] sm:$0xff] }
 0xd91   : > { %v10697_v19 = vpop.permute.xlu0 %10696  ;;  %v7530_v10 = vsel %vm6740_vm5, %v7520_v47, %v10693_v55  ;;  %v10703_v3 = vunpack.i.l.bf16 %v10702_v11  ;;  %v7531_v42 = vsel %vm6740_vm5, %v7521_v34, %v10694_v8  ;;  %v10704_v48 = vunpack.i.h.bf16 %v10702_v11 }
 0xd92   : > { %v10698_v16 = vunpack.i.l.bf16 %v10697_v19  ;;  %7668 = vmatmul.mubr.f32.gmra.mrb[174].mxu0 %v7530_v10  ;;  %v10699_v30 = vunpack.i.h.bf16 %v10697_v19 }
 0xd93   : > { %9109 = vmatprep.mubr.msk.f32.mxu0 %vm5045_vm6, %v7197_v63 }
 0xd94   : > { %v7472_v28 = vsel %vm5045_vm6, %v7134_v9, %v10698_v16  ;;  %v10712_v44 = vpop.permute.xlu1 %10711  ;;  %v7473_v52 = vsel %vm5045_vm6, %v7135_v43, %v10699_v30  ;;  %v7138_v43 = vld [vmem:[#allocation6 + $0x40] sm:$0xff] }
 0xd95   : > { %v10707_v49 = vpop.permute.xlu0 %10706  ;;  %v10713_v33 = vunpack.i.l.bf16 %v10712_v44  ;;  %v7482_v35 = vsel %vm5118_vm8, %v7472_v28, %v10703_v3  ;;  %v10714_v51 = vunpack.i.h.bf16 %v10712_v44  ;;  %v7483_v53 = vsel %vm5118_vm8, %v7473_v52, %v10704_v48 }
 0xd96   : > { %v10708_v24 = vunpack.i.l.bf16 %v10707_v49  ;;  %7673 = vmatmul.mubr.f32.gmra.mrb[176].mxu0 %v7531_v42  ;;  %v10709_v4 = vunpack.i.h.bf16 %v10707_v49 }
 0xd97   : > { %9110 = vmatprep.mubr.msk.f32.mxu0 %vm5045_vm6, %v7198_v54 }
 0xd98   : > { %v7492_v14 = vsel %vm5192_vm11, %v7482_v35, %v10708_v24  ;;  %v10722_v23 = vpop.permute.xlu1 %10721  ;;  %v7493_v32 = vsel %vm5192_vm11, %v7483_v53, %v10709_v4 }
 0xd99   : > { %v10717_v56 = vpop.permute.xlu0 %10716  ;;  %v10723_v59 = vunpack.i.l.bf16 %v10722_v23  ;;  %v7502_v5 = vsel %vm5266_vm0, %v7492_v14, %v10713_v33  ;;  %v10724_v27 = vunpack.i.h.bf16 %v10722_v23  ;;  %v7503_v7 = vsel %vm5266_vm0, %v7493_v32, %v10714_v51 }
 0xd9a   : > { %v10718_v13 = vunpack.i.l.bf16 %v10717_v56  ;;  %v10719_v39 = vunpack.i.h.bf16 %v10717_v56 }
 0xd9c   : > { %v7512_v38 = vsel %vm6718_vm9, %v7502_v5, %v10718_v13  ;;  %v10732_v61 = vpop.permute.xlu1 %10731  ;;  %v7513_v21 = vsel %vm6718_vm9, %v7503_v7, %v10719_v39  ;;  %v7201_v5 = vld [vmem:[#allocation6 + $0x4e] sm:$0xff] }
 0xd9d   : > { %v10727_v20 = vpop.permute.xlu0 %10726  ;;  %v7522_v36 = vsel %vm6729_vm12, %v7512_v38, %v10723_v59  ;;  %v10733_v15 = vunpack.i.l.bf16 %v10732_v61  ;;  %v7523_v17 = vsel %vm6729_vm12, %v7513_v21, %v10724_v27  ;;  %v10734_v46 = vunpack.i.h.bf16 %v10732_v61 }
 0xd9e   : > { %v10728_v0 = vunpack.i.l.bf16 %v10727_v20  ;;  %v10729_v12 = vunpack.i.h.bf16 %v10727_v20  ;;  %v7139_v20 = vld [vmem:[#allocation6 + $0x48] sm:$0x3f] }
 0xd9f   : > { %v7474_v18 = vsel %vm5045_vm6, %v7136_v50, %v10733_v15  ;;  %v7475_v47 = vsel %vm5045_vm6, %v7137_v40, %v10734_v46  ;;  %v14851_v40 = vld [vmem:[%s15067_s8] ss:$0 sm:$0xff] }
 0xda0   : > { %v7532_v60 = vsel %vm6740_vm5, %v7522_v36, %v10728_v0  ;;  %v10742_v62 = vpop.permute.xlu1 %10741  ;;  %v7533_v25 = vsel %vm6740_vm5, %v7523_v17, %v10729_v12 }
 0xda1   : > { %7678 = vmatmul.mubr.f32.gmra.mrb[178].mxu0 %v7532_v60  ;;  %v10737_v58 = vpop.permute.xlu0 %10736  ;;  %v10743_v55 = vunpack.i.l.bf16 %v10742_v62  ;;  %v10744_v8 = vunpack.i.h.bf16 %v10742_v62 }
 0xda2   : > { %9111 = vmatprep.mubr.msk.f32.mxu0 %vm5045_vm6, %v7199_v2  ;;  %v10738_v41 = vunpack.i.l.bf16 %v10737_v58  ;;  %v10739_v45 = vunpack.i.h.bf16 %v10737_v58  ;;  %v7202_v58 = vld [vmem:[#allocation6 + $0x56] sm:$0xff] }
 0xda4   : > { %v10752_v26 = vpop.permute.xlu1 %10751  ;;  %v7484_v1 = vsel %vm5118_vm8, %v7474_v18, %v10738_v41  ;;  %v7485_v10 = vsel %vm5118_vm8, %v7475_v47, %v10739_v45 }
 0xda5   : > { %7683 = vmatmul.mubr.f32.gmra.mrb[180].mxu0 %v7533_v25  ;;  %v10747_v31 = vpop.permute.xlu0 %10746  ;;  %v7494_v16 = vsel %vm5192_vm11, %v7484_v1, %v10743_v55  ;;  %v10753_v63 = vunpack.i.l.bf16 %v10752_v26  ;;  %v7495_v9 = vsel %vm5192_vm11, %v7485_v10, %v10744_v8  ;;  %v10754_v30 = vunpack.i.h.bf16 %v10752_v26 }
 0xda6   : > { %9112 = vmatprep.mubr.msk.f32.mxu0 %vm5045_vm6, %v7200_v37  ;;  %v10748_v22 = vunpack.i.l.bf16 %v10747_v31  ;;  %v10749_v57 = vunpack.i.h.bf16 %v10747_v31  ;;  %v7203_v31 = vld [vmem:[#allocation6 + $0x5e] sm:$0x3f] }
 0xda8   : > { %v10762_v11 = vpop.permute.xlu1 %10761  ;;  %v7504_v34 = vsel %vm5266_vm0, %v7494_v16, %v10748_v22  ;;  %v7505_v49 = vsel %vm5266_vm0, %v7495_v9, %v10749_v57 }
 0xda9   : > { %v10757_v19 = vpop.permute.xlu0 %10756  ;;  %v10763_v48 = vunpack.i.l.bf16 %v10762_v11  ;;  %v7514_v33 = vsel %vm6718_vm9, %v7504_v34, %v10753_v63  ;;  %v7515_v51 = vsel %vm6718_vm9, %v7505_v49, %v10754_v30  ;;  %v10764_v38 = vunpack.i.h.bf16 %v10762_v11 }
 0xdaa   : > { %v10758_v3 = vunpack.i.l.bf16 %v10757_v19  ;;  %v10759_v4 = vunpack.i.h.bf16 %v10757_v19 }
 0xdac   : > { %v10772_v28 = vpop.permute.xlu1 %10771  ;;  %v7476_v35 = vsel %vm5045_vm6, %v7138_v43, %v10758_v3  ;;  %v7477_v0 = vsel %vm5045_vm6, %v7139_v20, %v10759_v4 }
 0xdad   : > { %v10767_v44 = vpop.permute.xlu0 %10766  ;;  %v10773_v42 = vunpack.i.l.bf16 %v10772_v28  ;;  %v10774_v14 = vunpack.i.h.bf16 %v10772_v28  ;;  %v7486_v39 = vsel %vm5118_vm8, %v7476_v35, %v10763_v48  ;;  %v7487_v2 = vsel %vm5118_vm8, %v7477_v0, %v10764_v38 }
 0xdae   : > { %v10769_v24 = vunpack.i.h.bf16 %v10767_v44  ;;  %v10768_v54 = vunpack.i.l.bf16 %v10767_v44 }
 0xdb0   : > { %v7524_v52 = vsel %vm6729_vm12, %v7514_v33, %v10768_v54  ;;  %v10782_v23 = vpop.permute.xlu1 %10781  ;;  %v7525_v32 = vsel %vm6729_vm12, %v7515_v51, %v10769_v24 }
 0xdb1   : > { %v10777_v56 = vpop.permute.xlu0 %10776  ;;  %v7534_v13 = vsel %vm6740_vm5, %v7524_v52, %v10773_v42  ;;  %v10783_v59 = vunpack.i.l.bf16 %v10782_v23  ;;  %v7535_v60 = vsel %vm6740_vm5, %v7525_v32, %v10774_v14  ;;  %v10784_v62 = vunpack.i.h.bf16 %v10782_v23 }
 0xdb2   : > { %v10778_v53 = vunpack.i.l.bf16 %v10777_v56  ;;  %7688 = vmatmul.mubr.f32.gmra.mrb[182].mxu0 %v7534_v13  ;;  %v10779_v27 = vunpack.i.h.bf16 %v10777_v56 }
 0xdb3   : > { %9113 = vmatprep.mubr.msk.f32.mxu0 %vm5045_vm6, %v7201_v5 }
 0xdb4   : > { %v7496_v61 = vsel %vm5192_vm11, %v7486_v39, %v10778_v53  ;;  %v7415_v12 = vpop.permute.xlu1 %7414  ;;  %v7497_v41 = vsel %vm5192_vm11, %v7487_v2, %v10779_v27  ;;  %vm8246_vm11 = vcmask 179200  }
 0xdb5   : > { %v7383_v36 = vpop.permute.xlu0 %7382  ;;  %v7506_v7 = vsel %vm5266_vm0, %v7496_v61, %v10783_v59  ;;  %v7507_v26 = vsel %vm5266_vm0, %v7497_v41, %v10784_v62 }
 0xdb6   : > { %v7516_v21 = vsel %vm6718_vm9, %v7506_v7, %v7383_v36  ;;  %7693 = vmatmul.mubr.f32.gmra.mrb[184].mxu0 %v7535_v60 }
 0xdb7   : > { %9114 = vmatprep.mubr.msk.f32.mxu0 %vm5045_vm6, %v7202_v58  ;;  %v7526_v15 = vsel %vm6729_vm12, %v7516_v21, %v7415_v12 }
 0xdb8   : > { %v7385_v25 = vpop.permute.xlu1 %7384 }
 0xdb9   : > { %v7455_v17 = vpop.permute.xlu0 %7454  ;;  %v7517_v37 = vsel %vm6718_vm9, %v7507_v26, %v7385_v25 }
 0xdba   : > { %v7536_v46 = vsel %vm6740_vm5, %v7526_v15, %v7455_v17 }
 0xdbb   : > { %7698 = vmatmul.mubr.f32.gmra.mrb[186].mxu0 %v7536_v46 }
 0xdbc   : > { %9115 = vmatprep.mubr.msk.f32.mxu0 %vm5045_vm6, %v7203_v31  ;;  %v7457_v45 = vpop.permute.xlu1 %7456  ;;  %vm7797_vm6 = vcmask 547840  }
 0xdbd   : > { %v7417_v50 = vpop.permute.xlu0 %7416 }
 0xdbe   : > { %v7527_v18 = vsel %vm6729_vm12, %v7517_v37, %v7417_v50 }
 0xdbf   : > { %v7537_v55 = vsel %vm6740_vm5, %v7527_v18, %v7457_v45 }
 0xdc0   : > { %7703 = vmatmul.mubr.f32.gmra.mrb[188].mxu0 %v7537_v55 }
 0xdc1   : > { %9887 = vmatprep.mubr.msk.f32.mxu0 %vm11174_vm15, %v11175_v6 }
 0xe58   : > { %v7659_v1 = vpop.f32.mrb[170].mxu0 }
 0xe59   : > { %v7660_v22 = vadd.f32 %v14851_v40, %v7659_v1  ;;  %v7661_v47 = vpop.f32.mrb[171].mxu0 }
 0xe5b   : > { %v7708_v8 = vmax.f32 %v7660_v22, 0.0 }
 0xe5c   : > { %v7664_v11 = vpop.f32.mrb[172].mxu0 }
 0xe5d   : > { %7718 = vst.msk [vmem:[#allocation7] sm:$0xff] %vm5118_vm8, %v7708_v8  ;;  %v7665_v19 = vadd.f32 %v14851_v40, %v7664_v11  ;;  %v7666_v10 = vpop.f32.mrb[173].mxu0 }
 0xe5f   : > { %v7709_v57 = vmax.f32 %v7665_v19, 0.0 }
 0xe61   : > { %7719 = vst.msk [vmem:[#allocation7 + $0x8] sm:$0xff] %vm5118_vm8, %v7709_v57 }
 0xe64   : > { %v7729_v43 = vld [vmem:[#allocation7] sm:$0xff] }
 0xe65   : > { %v7669_v16 = vpop.f32.mrb[174].mxu0 }
 0xe66   : > { %v7670_v63 = vadd.f32 %v14851_v40, %v7669_v16  ;;  %v7671_v34 = vpop.f32.mrb[175].mxu0 }
 0xe68   : > { %v7710_v3 = vmax.f32 %v7670_v63, 0.0  ;;  %v7738_v24 = vld [vmem:[#allocation7 + $0x1] sm:$0xff] }
 0xe69   : > { %v7674_v9 = vpop.f32.mrb[176].mxu0  ;;  %v7730_v4 = vld [vmem:[#allocation7 + $0x8] sm:$0xff]  ;;  %v7747_v23 = vmax.f32 %v7729_v43, %v7738_v24 }
 0xe6a   : > { %7720 = vst.msk [vmem:[#allocation7 + $0x10] sm:$0xff] %vm5118_vm8, %v7710_v3  ;;  %v7675_v30 = vadd.f32 %v14851_v40, %v7674_v9  ;;  %v7676_v28 = vpop.f32.mrb[177].mxu0 }
 0xe6c   : > { %v7711_v44 = vmax.f32 %v7675_v30, 0.0 }
 0xe6e   : > { %7721 = vst.msk [vmem:[#allocation7 + $0x18] sm:$0xff] %vm5118_vm8, %v7711_v44 }
 0xe71   : > { %v7756_v49 = vld [vmem:[#allocation7 + $0xa] sm:$0xff] }
 0xe72   : > { %v7765_v42 = vld [vmem:[#allocation7 + $0xb] sm:$0xff] }
 0xe73   : > { %v7739_v54 = vld [vmem:[#allocation7 + $0x9] sm:$0xff]  ;;  %v7774_v33 = vmax.f32 %v7756_v49, %v7765_v42 }
 0xe74   : > { %v7679_v48 = vpop.f32.mrb[178].mxu0  ;;  %v7748_v13 = vmax.f32 %v7730_v4, %v7739_v54  ;;  %v7731_v12 = vld [vmem:[#allocation7 + $0x10] sm:$0xff] }
 0xe75   : > { %v7680_v35 = vadd.f32 %v14851_v40, %v7679_v48  ;;  %v7681_v52 = vpop.f32.mrb[179].mxu0  ;;  %v7757_v14 = vld [vmem:[#allocation7 + $0x12] sm:$0xff]  ;;  %v7783_v5 = vmax.f32 %v7747_v23, %v7774_v33 }
 0xe76   : > { %v7766_v56 = vld [vmem:[#allocation7 + $0x13] sm:$0xff] }
 0xe77   : > { %v7775_v51 = vmax.f32 %v7757_v14, %v7766_v56  ;;  %v7712_v53 = vmax.f32 %v7680_v35, 0.0  ;;  %v7740_v36 = vld [vmem:[#allocation7 + $0x11] sm:$0xff] }
 0xe78   : > { %v7684_v59 = vpop.f32.mrb[180].mxu0  ;;  %v7732_v21 = vld [vmem:[#allocation7 + $0x18] sm:$0xff]  ;;  %v7749_v15 = vmax.f32 %v7731_v12, %v7740_v36 }
 0xe79   : > { %v7784_v32 = vmax.f32 %v7748_v13, %v7775_v51  ;;  %7722 = vst.msk [vmem:[#allocation7 + $0x20] sm:$0xff] %vm5118_vm8, %v7712_v53  ;;  %v7685_v39 = vadd.f32 %v14851_v40, %v7684_v59  ;;  %v7686_v38 = vpop.f32.mrb[181].mxu0 }
 0xe7b   : > { %v10152_v20 = vpack.c.bf16 %v7784_v32, %v7783_v5  ;;  %v7713_v61 = vmax.f32 %v7685_v39, 0.0 }
 0xe7d   : > { %10153 = vmatpush3.bf16.msra.mxu0 %v10152_v20  ;;  %7723 = vst.msk [vmem:[#allocation7 + $0x28] sm:$0xff] %vm5118_vm8, %v7713_v61 }
 0xe7e   : > { %10154 = vmatprep.subr.bf16.mxu0 %v11173_v29 }
 0xe80   : > { %v7758_v0 = vld [vmem:[#allocation7 + $0x1a] sm:$0xff] }
 0xe81   : > { %v7767_v27 = vld [vmem:[#allocation7 + $0x1b] sm:$0xff] }
 0xe82   : > { %v7741_v7 = vld [vmem:[#allocation7 + $0x19] sm:$0xff]  ;;  %v7776_v60 = vmax.f32 %v7758_v0, %v7767_v27 }
 0xe83   : > { %v7750_v17 = vmax.f32 %v7732_v21, %v7741_v7  ;;  %v7733_v9 = vld [vmem:[#allocation7 + $0x20] sm:$0xff]  ;;  %v7792_v21 = vld [vmem:[#allocation20] sm:$0xff] }
 0xe84   : > { %v7759_v58 = vld [vmem:[#allocation7 + $0x22] sm:$0xff]  ;;  %v7785_v31 = vmax.f32 %v7749_v15, %v7776_v60 }
 0xe85   : > { %v7768_v62 = vld [vmem:[#allocation7 + $0x23] sm:$0xff]  ;;  %v7689_v2 = vpop.f32.mrb[182].mxu0 }
 0xe86   : > { %v7777_v41 = vmax.f32 %v7759_v58, %v7768_v62  ;;  %v7690_v25 = vadd.f32 %v14851_v40, %v7689_v2  ;;  %v7691_v46 = vpop.f32.mrb[183].mxu0  ;;  %v7742_v16 = vld [vmem:[#allocation7 + $0x21] sm:$0xff]  ;;  %v7793_v58 = vld [vmem:[#allocation20 + $0x8] sm:$0xff]  ;;  %v7794_v62 = vld [vmem:[#allocation20 + $0x10] sm:$0xff] }
 0xe87   : > { %v7734_v28 = vld [vmem:[#allocation7 + $0x28] sm:$0xff]  ;;  %v7751_v24 = vmax.f32 %v7733_v9, %v7742_v16  ;;  %v7795_v2 = vld [vmem:[#allocation20 + $0x18] sm:$0xff]  ;;  %v8051_v9 = vld [vmem:[#allocation16 + $0xc0] sm:$0xff] }
 0xe88   : > { %v7786_v26 = vmax.f32 %v7750_v17, %v7777_v41  ;;  %v7714_v37 = vmax.f32 %v7690_v25, 0.0  ;;  %v7796_v15 = vld [vmem:[#allocation20 + $0x20] sm:$0xf]  ;;  %v8043_v17 = vld [vmem:[#allocation16 + $0x80] sm:$0xff]  ;;  %v8044_v41 = vld [vmem:[#allocation16 + $0x88] sm:$0xff] }
 0xe89   : > { %v7694_v50 = vpop.f32.mrb[184].mxu0  ;;  %v8027_v25 = vld [vmem:[#allocation16] sm:$0xff]  ;;  %v10163_v46 = vpack.c.bf16 %v8044_v41, %v8043_v17 }
 0xe8a   : > { %v10155_v45 = vpack.c.bf16 %v7786_v26, %v7785_v31  ;;  %7724 = vst.msk [vmem:[#allocation7 + $0x30] sm:$0xff] %vm5118_vm8, %v7714_v37  ;;  %v7695_v18 = vadd.f32 %v14851_v40, %v7694_v50  ;;  %v7696_v55 = vpop.f32.mrb[185].mxu0  ;;  %v8028_v31 = vld [vmem:[#allocation16 + $0x8] sm:$0xff]  ;;  %v8045_v37 = vld [vmem:[#allocation16 + $0x90] sm:$0xff]  ;;  %v8046_v50 = vld [vmem:[#allocation16 + $0x98] sm:$0xff] }
 0xe8b   : > { %v10165_v26 = vpack.c.bf16 %v8028_v31, %v8027_v25  ;;  %10164 = vmatprep.subr.bf16.mxu1 %v10163_v46  ;;  %v8030_v55 = vld [vmem:[#allocation16 + $0x18] sm:$0xff] }
 0xe8c   : > { %10156 = vmatpush3.bf16.msra.mxu0 %v10155_v45  ;;  %v7715_v1 = vmax.f32 %v7695_v18, 0.0  ;;  %v8029_v45 = vld [vmem:[#allocation16 + $0x10] sm:$0xff]  ;;  %v10167_v18 = vpack.c.bf16 %v8046_v50, %v8045_v37 }
 0xe8d   : > { %10157 = vmatprep.subr.bf16.mxu0 %v11173_v29  ;;  %10166 = vmatpush3.bf16.msra.mxu1 %v10165_v26 }
 0xe8e   : > { %7725 = vst.msk [vmem:[#allocation7 + $0x38] sm:$0xff] %vm5118_vm8, %v7715_v1  ;;  %v7699_v22 = vpop.f32.mrb[186].mxu0  ;;  %v8047_v1 = vld [vmem:[#allocation16 + $0xa0] sm:$0xff]  ;;  %10168 = vmatprep.subr.bf16.mxu1 %v10167_v18 }
 0xe8f   : > { %v7700_v47 = vadd.f32 %v14851_v40, %v7699_v22  ;;  %v7701_v8 = vpop.f32.mrb[187].mxu0  ;;  %v8048_v22 = vld [vmem:[#allocation16 + $0xa8] sm:$0xff] }
 0xe90   : > { %v10171_v8 = vpack.c.bf16 %v8048_v22, %v8047_v1 }
 0xe91   : > { %v7716_v11 = vmax.f32 %v7700_v47, 0.0  ;;  %v7760_v19 = vld [vmem:[#allocation7 + $0x2a] sm:$0xff]  ;;  %v10169_v47 = vpack.c.bf16 %v8030_v55, %v8029_v45 }
 0xe92   : > { %v7769_v10 = vld [vmem:[#allocation7 + $0x2b] sm:$0xff] }
 0xe93   : > { %7726 = vst.msk [vmem:[#allocation7 + $0x40] sm:$0xff] %vm5118_vm8, %v7716_v11  ;;  %v7704_v57 = vpop.f32.mrb[188].mxu0  ;;  %v7743_v63 = vld [vmem:[#allocation7 + $0x29] sm:$0xff]  ;;  %v7778_v30 = vmax.f32 %v7760_v19, %v7769_v10  ;;  %v8032_v19 = vld [vmem:[#allocation16 + $0x28] sm:$0xff]  ;;  %v8049_v10 = vld [vmem:[#allocation16 + $0xb0] sm:$0xff]  ;;  %10170 = vmatpush3.bf16.msra.mxu1 %v10169_v47 }
 0xe94   : > { %v7705_v34 = vadd.f32 %v14851_v40, %v7704_v57  ;;  %v7706_v3 = vpop.f32.mrb[189].mxu0  ;;  %v7752_v54 = vmax.f32 %v7734_v28, %v7743_v63  ;;  %v7735_v56 = vld [vmem:[#allocation7 + $0x30] sm:$0xff]  ;;  %v8050_v57 = vld [vmem:[#allocation16 + $0xb8] sm:$0xff]  ;;  %10172 = vmatprep.subr.bf16.mxu1 %v10171_v8 }
 0xe95   : > { %v7761_v44 = vld [vmem:[#allocation7 + $0x32] sm:$0xff]  ;;  %v7787_v43 = vmax.f32 %v7751_v24, %v7778_v30  ;;  %v10175_v63 = vpack.c.bf16 %v8050_v57, %v8049_v10  ;;  %v8034_v3 = vld [vmem:[#allocation16 + $0x38] sm:$0xff]  ;;  %v8053_v24 = vld [vmem:[#allocation16 + $0xd0] sm:$0xff] }
 0xe96   : > { %v7770_v49 = vld [vmem:[#allocation7 + $0x33] sm:$0xff]  ;;  %v7717_v42 = vmax.f32 %v7705_v34, 0.0  ;;  %v8033_v34 = vld [vmem:[#allocation16 + $0x30] sm:$0xff] }
 0xe97   : > { %v7779_v48 = vmax.f32 %v7761_v44, %v7770_v49  ;;  %v7744_v40 = vld [vmem:[#allocation7 + $0x31] sm:$0xff]  ;;  %v10177_v28 = vpack.c.bf16 %v8034_v3, %v8033_v34 }
 0xe98   : > { %7728 = vst.msk [vmem:[#allocation7 + $0x48] sm:$0x3f] %vm7727_vm14, %v7717_v42  ;;  %v7736_v13 = vld [vmem:[#allocation7 + $0x38] sm:$0xff]  ;;  %v7753_v59 = vmax.f32 %v7735_v56, %v7744_v40  ;;  %v8031_v11 = vld [vmem:[#allocation16 + $0x20] sm:$0xff] }
 0xe99   : > { %v7788_v33 = vmax.f32 %v7752_v54, %v7779_v48  ;;  %v10173_v16 = vpack.c.bf16 %v8032_v19, %v8031_v11  ;;  %v8052_v30 = vld [vmem:[#allocation16 + $0xc8] sm:$0xff]  ;;  %v8035_v49 = vld [vmem:[#allocation16 + $0x40] sm:$0xff]  ;;  %v8054_v54 = vld [vmem:[#allocation16 + $0xd8] sm:$0xff] }
 0xe9a   : > { %v7762_v52 = vld [vmem:[#allocation7 + $0x3a] sm:$0xff]  ;;  %v10179_v44 = vpack.c.bf16 %v8052_v30, %v8051_v9 }
 0xe9b   : > { %v10158_v35 = vpack.c.bf16 %v7788_v33, %v7787_v43  ;;  %v7771_v4 = vld [vmem:[#allocation7 + $0x3b] sm:$0xff]  ;;  %10174 = vmatpush3.bf16.msra.mxu1 %v10173_v16  ;;  %v10183_v43 = vpack.c.bf16 %v8054_v54, %v8053_v24 }
 0xe9c   : > { %v7745_v14 = vld [vmem:[#allocation7 + $0x39] sm:$0xff]  ;;  %v7780_v23 = vmax.f32 %v7762_v52, %v7771_v4  ;;  %v7746_v27 = vld [vmem:[#allocation7 + $0x41] sm:$0x7]  ;;  %10176 = vmatprep.subr.bf16.mxu1 %v10175_v63 }
 0xe9d   : > { %10159 = vmatpush3.bf16.msra.mxu0 %v10158_v35  ;;  %v7754_v5 = vmax.f32 %v7736_v13, %v7745_v14  ;;  %v7737_v0 = vld [vmem:[#allocation7 + $0x40] sm:$0x7]  ;;  %v8036_v42 = vld [vmem:[#allocation16 + $0x48] sm:$0xff]  ;;  %v8038_v35 = vld [vmem:[#allocation16 + $0x58] sm:$0xff] }
 0xe9e   : > { %10160 = vmatprep.subr.bf16.mxu0 %v11173_v29  ;;  %v7789_v20 = vmax.f32 %v7753_v59, %v7780_v23  ;;  %v7755_v12 = vmax.f32 %v7737_v0, %v7746_v27  ;;  %v10181_v48 = vpack.c.bf16 %v8036_v42, %v8035_v49  ;;  %v8037_v33 = vld [vmem:[#allocation16 + $0x50] sm:$0xff]  ;;  %v8055_v14 = vld [vmem:[#allocation16 + $0xe0] sm:$0xff]  ;;  %v8056_v56 = vld [vmem:[#allocation16 + $0xe8] sm:$0xff] }
 0xe9f   : > { %v7763_v51 = vld [vmem:[#allocation7 + $0x42] sm:$0xff]  ;;  %v7764_v39 = vld [vmem:[#allocation7 + $0x4a] sm:$0x7]  ;;  %10178 = vmatpush3.bf16.msra.mxu1 %v10177_v28  ;;  %v10185_v52 = vpack.c.bf16 %v8038_v35, %v8037_v33  ;;  %v10187_v13 = vpack.c.bf16 %v8056_v56, %v8055_v14  ;;  %v8059_v42 = vld [vmem:[#allocation16 + $0x100] sm:$0xff] }
 0xea0   : > { %v7772_v53 = vld [vmem:[#allocation7 + $0x43] sm:$0xff]  ;;  %v7773_v38 = vld [vmem:[#allocation7 + $0x4b] sm:$0x7]  ;;  %10180 = vmatprep.subr.bf16.mxu1 %v10179_v44  ;;  %v8060_v24 = vld [vmem:[#allocation16 + $0x108] sm:$0xff] }
 0xea1   : > { %v7781_v32 = vmax.f32 %v7763_v51, %v7772_v53  ;;  %v7782_v7 = vmax.f32 %v7764_v39, %v7773_v38  ;;  %v8039_v51 = vld [vmem:[#allocation16 + $0x60] sm:$0xff]  ;;  %v8040_v53 = vld [vmem:[#allocation16 + $0x68] sm:$0xff]  ;;  %v8058_v39 = vld [vmem:[#allocation16 + $0xf8] sm:$0xff] }
 0xea2   : > { %v8042_v0 = vld [vmem:[#allocation16 + $0x78] sm:$0xff] }
 0xea3   : > { %v7790_v61 = vmax.f32 %v7754_v5, %v7781_v32  ;;  %v7791_v60 = vmax.f32 %v7755_v12, %v7782_v7  ;;  %10182 = vmatpush3.bf16.msra.mxu1 %v10181_v48  ;;  %v10189_v5 = vpack.c.bf16 %v8040_v53, %v8039_v51  ;;  %v8057_v32 = vld [vmem:[#allocation16 + $0xf0] sm:$0xff] }
 0xea4   : > { %10184 = vmatprep.subr.bf16.mxu1 %v10183_v43 }
 0xea5   : > { %v10161_v36 = vpack.c.bf16 %v7790_v61, %v7789_v20  ;;  %v10191_v20 = vpack.c.bf16 %v8058_v39, %v8057_v32  ;;  %v8041_v61 = vld [vmem:[#allocation16 + $0x70] sm:$0xff]  ;;  %v8062_v32 = vld [vmem:[#allocation16 + $0x118] sm:$0xff] }
 0xea7   : > { %10162 = vmatpush3.bf16.msra.mxu0 %v10161_v36  ;;  %10186 = vmatpush3.bf16.msra.mxu1 %v10185_v52  ;;  %v10193_v36 = vpack.c.bf16 %v8042_v0, %v8041_v61 }
 0xea8   : > { %9885 = vmatprep.subr.mxu0 %v11175_v6  ;;  %10188 = vmatprep.subr.bf16.mxu1 %v10187_v13 }
 0xeab   : > { %9886 = vmatpush3.msk.msra.mxu0 %vm2546_vm1, %v7791_v60  ;;  %10190 = vmatpush3.bf16.msra.mxu1 %v10189_v5  ;;  %vm7910_vm1 = vcmask 257024   ;;  %v8061_v5 = vld [vmem:[#allocation16 + $0x110] sm:$0xff] }
 0xeac   : > { %9888 = vmatmul.mubr.msk.f32.vlgmr.msra.gmra.mrb[190].mxu0 %vm7797_vm6, %v7792_v21  ;;  %10201 = vmatprep.subr.bf16.mxu0 %v11173_v29 }
 0xead   : > { %9890 = vmatprep.mubr.msk.f32.mxu0 %vm11174_vm15, %v11175_v6  ;;  %10192 = vmatprep.subr.bf16.mxu1 %v10191_v20 }
 0xeaf   : > { %10194 = vmatpush3.bf16.msra.mxu1 %v10193_v36 }
 0xeb0   : > { %9891 = vmatmul.mubr.msk.f32.gmra.mrb[192].mxu0 %vm7797_vm6, %v7793_v58  ;;  %10195 = vmatprep.subr.bf16.mxu1 %v11173_v29 }
 0xeb1   : > { %9893 = vmatprep.mubr.msk.f32.mxu0 %vm11174_vm15, %v11175_v6 }
 0xeb4   : > { %9894 = vmatmul.mubr.msk.f32.gmra.mrb[194].mxu0 %vm7797_vm6, %v7794_v62 }
 0xeb5   : > { %9896 = vmatprep.mubr.msk.f32.mxu0 %vm11174_vm15, %v11175_v6 }
 0xeb8   : > { %9897 = vmatmul.mubr.msk.f32.gmra.mrb[196].mxu0 %vm7797_vm6, %v7795_v2 }
 0xeb9   : > { %9899 = vmatprep.mubr.msk.f32.mxu0 %vm11174_vm15, %v11175_v6 }
 0xebc   : > { %9900 = vmatmul.mubr.msk.f32.gmra.mrb[198].mxu0 %vm7797_vm6, %v7796_v15 }
 0xebd   : > { %9925 = vmatprep.mubr.msk.f32.mxu0 %vm11174_vm15, %v11175_v6 }
 0xf7f   : > { %v7882_v4 = vpop.f32.mrb[190].mxu0 }
 0xf80   : > { %7906 = vst.msk [vmem:[#allocation8] sm:$0xff] %vm5118_vm8, %v7882_v4  ;;  %v9889_v40 = vpop.f32.mrb[191].mxu0 }
 0xf83   : > { %v7887_v23 = vpop.f32.mrb[192].mxu0 }
 0xf84   : > { %7907 = vst.msk [vmem:[#allocation8 + $0x8] sm:$0xff] %vm5118_vm8, %v7887_v23  ;;  %v9892_v59 = vpop.f32.mrb[193].mxu0  ;;  %v10196_v23 = vpack.c.bf16 %v8060_v24, %v8059_v42 }
 0xf87   : > { %v7892_v38 = vpop.f32.mrb[194].mxu0  ;;  %v7912_v54 = vld [vmem:[#allocation8] sm:$0xff] }
 0xf88   : > { %7908 = vst.msk [vmem:[#allocation8 + $0x10] sm:$0xff] %vm5118_vm8, %v7892_v38  ;;  %v9895_v27 = vpop.f32.mrb[195].mxu0 }
 0xf8b   : > { %v7897_v7 = vpop.f32.mrb[196].mxu0  ;;  %v14891_v12 = vld [vmem:[#allocation8 + $0x8] sm:$0xff] }
 0xf8c   : > { %v7915_v60 = vld [vmem:[#allocation8 + $0x1] sm:$0xff]  ;;  %7909 = vst.msk [vmem:[#allocation8 + $0x18] sm:$0xff] %vm5118_vm8, %v7897_v7  ;;  %v9898_v58 = vpop.f32.mrb[197].mxu0  ;;  %v10199_v7 = vpack.c.bf16 %v8062_v32, %v8061_v5 }
 0xf8d   : > { %v10785_v21 = vpack.i.bf16 %v7915_v60, %v14891_v12  ;;  %v7921_v62 = vld [vmem:[#allocation8 + $0x6] sm:$0xff] }
 0xf8e   : > { %v7918_v15 = vld [vmem:[#allocation8 + $0x2] sm:$0xff] }
 0xf8f   : > { %10786 = vrot.lane.b32.xlu0 %v10785_v21, %s11178_s27  ;;  %v7932_v2 = vld [vmem:[#allocation8 + $0xd] sm:$0xff]  ;;  %v7902_v41 = vpop.f32.mrb[198].mxu0  ;;  %v8241_v5 = vld [vmem:[#allocation22] sm:$0xff] }
 0xf90   : > { %v7929_v17 = vld [vmem:[#allocation8 + $0xc] sm:$0xff]  ;;  %v10795_v25 = vpack.i.bf16 %v7921_v62, %v7932_v2  ;;  %7911 = vst.msk [vmem:[#allocation8 + $0x20] sm:$0xf] %vm7910_vm1, %v7902_v41  ;;  %v9901_v31 = vpop.f32.mrb[199].mxu0 }
 0xf91   : > { %v10790_v46 = vpack.i.bf16 %v7918_v15, %v7929_v17  ;;  %v7916_v26 = vld [vmem:[#allocation8 + $0x9] sm:$0xff]  ;;  %v7917_v8 = vld [vmem:[#allocation8 + $0x11] sm:$0x3f] }
 0xf92   : > { %v7927_v37 = vld [vmem:[#allocation8 + $0x10] sm:$0xff]  ;;  %v7924_v52 = vld [vmem:[#allocation8 + $0x7] sm:$0xff] }
 0xf93   : > { %10796 = vrot.lane.b32.xlu0 %v10795_v25, %s11183_s3  ;;  %10791 = vrot.lane.b32.xlu1 %v10790_v46, %s11182_s26  ;;  %v7919_v50 = vld [vmem:[#allocation8 + $0xa] sm:$0xff]  ;;  %v7930_v45 = vld [vmem:[#allocation8 + $0x14] sm:$0xff]  ;;  %v10800_v18 = vpack.i.bf16 %v7916_v26, %v7927_v37 }
 0xf94   : > { %v10805_v55 = vpack.i.bf16 %v7919_v50, %v7930_v45  ;;  %v7933_v1 = vld [vmem:[#allocation8 + $0x15] sm:$0xff]  ;;  %v8242_v32 = vld [vmem:[#allocation22 + $0x8] sm:$0xff] }
 0xf95   : > { %v7928_v22 = vld [vmem:[#allocation8 + $0x18] sm:$0x3f]  ;;  %v14902_v47 = vld [vmem:[#allocation8 + $0xe] sm:$0xff] }
 0xf96   : > { %v10810_v11 = vpack.i.bf16 %v14902_v47, %v7933_v1  ;;  %v10815_v19 = vpack.i.bf16 %v7917_v8, %v7928_v22  ;;  %v7920_v16 = vld [vmem:[#allocation8 + $0x12] sm:$0x3f] }
 0xf97   : > { %10801 = vrot.lane.b32.xlu1 %v10800_v18, %s11178_s27  ;;  %10806 = vrot.lane.b32.xlu0 %v10805_v55, %s11182_s26  ;;  %v7931_v10 = vld [vmem:[#allocation8 + $0x1c] sm:$0x3f]  ;;  %v7923_v63 = vld [vmem:[#allocation8 + $0x16] sm:$0x3f]  ;;  %v7914_v55 = vld [vmem:[#allocation8 + $0x10] sm:$0x3f] }
 0xf98   : > { %v7934_v57 = vld [vmem:[#allocation8 + $0x1d] sm:$0x3f]  ;;  %v10820_v34 = vpack.i.bf16 %v7920_v16, %v7931_v10  ;;  %v7925_v0 = vld [vmem:[#allocation8 + $0xf] sm:$0xff]  ;;  %v7926_v18 = vld [vmem:[#allocation8 + $0x17] sm:$0x3f] }
 0xf99   : > { %v10825_v3 = vpack.i.bf16 %v7923_v63, %v7934_v57  ;;  %v7935_v57 = vld [vmem:[#allocation8 + $0x16] sm:$0xff]  ;;  %v7936_v16 = vld [vmem:[#allocation8 + $0x1e] sm:$0x3f] }
 0xf9b   : > { %10811 = vrot.lane.b32.xlu1 %v10810_v11, %s11183_s3  ;;  %10816 = vrot.lane.b32.xlu0 %v10815_v19, %s11178_s27 }
 0xf9f   : > { %10821 = vrot.lane.b32.xlu1 %v10820_v34, %s11182_s26  ;;  %10826 = vrot.lane.b32.xlu0 %v10825_v3, %s11183_s3 }
0x1001   : > { %v10787_v9 = vpop.permute.xlu0 %10786 }
0x1002   : > { %v10789_v30 = vunpack.i.h.bf16 %v10787_v9  ;;  %v10788_v28 = vunpack.i.l.bf16 %v10787_v9 }
0x1004   : > { %v8009_v4 = vsel %vm5118_vm8, %v7912_v54, %v10789_v30  ;;  %v8018_v40 = vsel %vm5118_vm8, %v7924_v52, %v10788_v28 }
0x1005   : > { %v10797_v44 = vpop.permute.xlu0 %10796  ;;  %v10792_v49 = vpop.permute.xlu1 %10791 }
0x1006   : > { %v10799_v48 = vunpack.i.h.bf16 %v10797_v44  ;;  %v10798_v43 = vunpack.i.l.bf16 %v10797_v44  ;;  %v10794_v33 = vunpack.i.h.bf16 %v10792_v49  ;;  %v10793_v35 = vunpack.i.l.bf16 %v10792_v49 }
0x1008   : > { %v8012_v14 = vsel %vm5266_vm0, %v8009_v4, %v10794_v33  ;;  %v8021_v56 = vsel %vm5266_vm0, %v8018_v40, %v10793_v35 }
0x1009   : > { %v10802_v13 = vpop.permute.xlu1 %10801  ;;  %v10807_v51 = vpop.permute.xlu0 %10806  ;;  %v8024_v53 = vsel %vm6729_vm12, %v8021_v56, %v10798_v43  ;;  %v8015_v59 = vsel %vm6729_vm12, %v8012_v14, %v10799_v48 }
0x100a   : > { %v10804_v39 = vunpack.i.h.bf16 %v10802_v13  ;;  %v10803_v38 = vunpack.i.l.bf16 %v10802_v13  ;;  %8142 = vmatprep.mubr.f32.mxu1 %v8024_v53  ;;  %v10809_v20 = vunpack.i.h.bf16 %v10807_v51  ;;  %v10808_v61 = vunpack.i.l.bf16 %v10807_v51 }
0x100b   : > { %8143 = vmatmul.mubr.f32.vlgmr.msra.gmra.mrb[82].mxu1 %v8015_v59 }
0x100c   : > { %v8019_v27 = vsel %vm5118_vm8, %v7925_v0, %v10803_v38  ;;  %v8010_v36 = vsel %vm5118_vm8, %v14891_v12, %v10804_v39  ;;  %10197 = vmatpush3.bf16.msra.mxu1 %v10196_v23  ;;  %v8243_v39 = vld [vmem:[#allocation22 + $0x10] sm:$0xff]  ;;  %v8244_v38 = vld [vmem:[#allocation22 + $0x18] sm:$0xff]  ;;  %v8508_v0 = vld [vmem:[#allocation17 + $0x108] sm:$0xff] }
0x100d   : > { %v10812_v60 = vpop.permute.xlu1 %10811  ;;  %v10817_v21 = vpop.permute.xlu0 %10816  ;;  %10198 = vmatprep.subr.bf16.mxu1 %v11173_v29  ;;  %v8022_v17 = vsel %vm5266_vm0, %v8019_v27, %v10808_v61  ;;  %v8013_v41 = vsel %vm5266_vm0, %v8010_v36, %v10809_v20  ;;  %v8245_v20 = vld [vmem:[#allocation22 + $0x20] sm:$0xf]  ;;  %v8509_v36 = vld [vmem:[#allocation17 + $0x110] sm:$0xff] }
0x100e   : > { %v10814_v58 = vunpack.i.h.bf16 %v10812_v60  ;;  %v10813_v62 = vunpack.i.l.bf16 %v10812_v60  ;;  %v10819_v2 = vunpack.i.h.bf16 %v10817_v21  ;;  %v10818_v15 = vunpack.i.l.bf16 %v10817_v21  ;;  %v8507_v61 = vld [vmem:[#allocation17 + $0x100] sm:$0xff] }
0x100f   : > { %v10237_v27 = vpack.c.bf16 %v8508_v0, %v8507_v61  ;;  %v8491_v21 = vld [vmem:[#allocation17 + $0x80] sm:$0xff] }
0x1010   : > { %v8025_v25 = vsel %vm6729_vm12, %v8022_v17, %v10813_v62  ;;  %v8016_v46 = vsel %vm6729_vm12, %v8013_v41, %v10814_v58  ;;  %10200 = vmatpush3.bf16.msra.mxu1 %v10199_v7  ;;  %v8020_v1 = vsel %vm5118_vm8, %v7926_v18, %v10818_v15  ;;  %v8011_v22 = vsel %vm5118_vm8, %v7914_v55, %v10819_v2  ;;  %v8510_v7 = vld [vmem:[#allocation17 + $0x118] sm:$0xff]  ;;  %v8492_v58 = vld [vmem:[#allocation17 + $0x88] sm:$0xff]  ;;  %v8475_v62 = vld [vmem:[#allocation17] sm:$0xff] }
0x1011   : > { %8147 = vmatprep.mubr.f32.mxu1 %v8025_v25  ;;  %v10822_v12 = vpop.permute.xlu1 %10821  ;;  %v10827_v31 = vpop.permute.xlu0 %10826  ;;  %v10240_v60 = vpack.c.bf16 %v8510_v7, %v8509_v36  ;;  %v10204_v2 = vpack.c.bf16 %v8492_v58, %v8491_v21  ;;  %v8476_v15 = vld [vmem:[#allocation17 + $0x8] sm:$0xff]  ;;  %v8493_v17 = vld [vmem:[#allocation17 + $0x90] sm:$0xff]  ;;  %v8494_v41 = vld [vmem:[#allocation17 + $0x98] sm:$0xff] }
0x1012   : > { %v10824_v26 = vunpack.i.h.bf16 %v10822_v12  ;;  %v10823_v37 = vunpack.i.l.bf16 %v10822_v12  ;;  %8148 = vmatmul.mubr.f32.gmra.mrb[84].mxu1 %v8016_v46  ;;  %v10829_v50 = vunpack.i.h.bf16 %v10827_v31  ;;  %v10828_v45 = vunpack.i.l.bf16 %v10827_v31  ;;  %v8477_v12 = vld [vmem:[#allocation17 + $0x10] sm:$0xff]  ;;  %v8478_v31 = vld [vmem:[#allocation17 + $0x18] sm:$0xff]  ;;  %v8479_v18 = vld [vmem:[#allocation17 + $0x20] sm:$0xff] }
0x1013   : > { %v10206_v25 = vpack.c.bf16 %v8476_v15, %v8475_v62  ;;  %v10208_v46 = vpack.c.bf16 %v8494_v41, %v8493_v17  ;;  %10205 = vmatprep.subr.bf16.mxu1 %v10204_v2  ;;  %v8497_v55 = vld [vmem:[#allocation17 + $0xb0] sm:$0xff] }
0x1014   : > { %v8023_v8 = vsel %vm5266_vm0, %v8020_v1, %v10823_v37  ;;  %v8014_v11 = vsel %vm5266_vm0, %v8011_v22, %v10824_v26  ;;  %v8495_v26 = vld [vmem:[#allocation17 + $0xa0] sm:$0xff]  ;;  %v8496_v37 = vld [vmem:[#allocation17 + $0xa8] sm:$0xff]  ;;  %v8498_v1 = vld [vmem:[#allocation17 + $0xb8] sm:$0xff] }
0x1015   : > { %v8026_v19 = vsel %vm6729_vm12, %v8023_v8, %v10828_v45  ;;  %v8017_v10 = vsel %vm6729_vm12, %v8014_v11, %v10829_v50  ;;  %v10210_v50 = vpack.c.bf16 %v8478_v31, %v8477_v12  ;;  %v10212_v45 = vpack.c.bf16 %v8496_v37, %v8495_v26  ;;  %v8481_v11 = vld [vmem:[#allocation17 + $0x30] sm:$0xff] }
0x1016   : > { %8152 = vmatprep.mubr.f32.mxu1 %v8026_v19  ;;  %v10216_v8 = vpack.c.bf16 %v8498_v1, %v8497_v55  ;;  %v8482_v19 = vld [vmem:[#allocation17 + $0x38] sm:$0xff] }
0x1017   : > { %8153 = vmatmul.mubr.f32.gmra.mrb[86].mxu1 %v8017_v10  ;;  %v8499_v10 = vld [vmem:[#allocation17 + $0xc0] sm:$0xff] }
0x1018   : > { %9910 = vmatprep.mubr.msk.f32.mxu1 %vm11174_vm15, %v11175_v6 }
0x101b   : > { %9911 = vmatmul.mubr.msk.f32.vlgmr.msra.gmra.mrb[88].mxu1 %vm5118_vm8, %v14902_v47  ;;  %v9122_v47 = vld [vmem:[%s15069_s10] ss:$0 sm:$0xff] }
0x101c   : > { %9913 = vmatprep.mubr.msk.f32.mxu1 %vm11174_vm15, %v11175_v6  ;;  %10207 = vmatpush3.bf16.msra.mxu1 %v10206_v25 }
0x101d   : > { %10209 = vmatprep.subr.bf16.mxu1 %v10208_v46 }
0x101f   : > { %9914 = vmatmul.mubr.msk.f32.gmra.mrb[90].mxu1 %vm5118_vm8, %v7935_v57  ;;  %v8500_v57 = vld [vmem:[#allocation17 + $0xc8] sm:$0xff] }
0x1020   : > { %9916 = vmatprep.mubr.msk.f32.mxu1 %vm11174_vm15, %v11175_v6  ;;  %10211 = vmatpush3.bf16.msra.mxu1 %v10210_v50 }
0x1021   : > { %10213 = vmatprep.subr.bf16.mxu1 %v10212_v45 }
0x1023   : > { %9917 = vmatmul.mubr.msk.f32.gmra.mrb[92].mxu1 %vm5118_vm8, %v7936_v16  ;;  %v10218_v16 = vpack.c.bf16 %v8482_v19, %v8481_v11 }
0x10de   : > { %v9427_v63 = vpop.f32.mrb[82].mxu1 }
0x10df   : > { %v9428_v34 = vpop.f32.mrb[83].mxu1 }
0x10e0   : > { %v9429_v3 = vadd.f32 %v9428_v34, %v9427_v63  ;;  %v10220_v63 = vpack.c.bf16 %v8500_v57, %v8499_v10  ;;  %v8483_v34 = vld [vmem:[#allocation17 + $0x40] sm:$0xff] }
0x10e2   : > { %v8145_v24 = vadd.f32 %v9429_v3, %v9122_v47  ;;  %v8484_v3 = vld [vmem:[#allocation17 + $0x48] sm:$0xff] }
0x10e5   : > { %v9430_v9 = vpop.f32.mrb[84].mxu1 }
0x10e6   : > { %v9431_v30 = vpop.f32.mrb[85].mxu1 }
0x10e7   : > { %v9432_v28 = vadd.f32 %v9431_v30, %v9430_v9  ;;  %v8501_v9 = vld [vmem:[#allocation17 + $0xd0] sm:$0xff]  ;;  %v8502_v30 = vld [vmem:[#allocation17 + $0xd8] sm:$0xff] }
0x10e9   : > { %v8150_v33 = vadd.f32 %v9432_v28, %v9122_v47  ;;  %v10222_v28 = vpack.c.bf16 %v8484_v3, %v8483_v34 }
0x10ea   : > { %v9433_v44 = vpop.f32.mrb[86].mxu1 }
0x10eb   : > { %v9434_v49 = vpop.f32.mrb[87].mxu1 }
0x10ec   : > { %v9435_v42 = vadd.f32 %v9434_v49, %v9433_v44  ;;  %v10224_v44 = vpack.c.bf16 %v8502_v30, %v8501_v9  ;;  %v8486_v49 = vld [vmem:[#allocation17 + $0x58] sm:$0xff] }
0x10ee   : > { %v8224_v54 = vpop.f32.mrb[88].mxu1  ;;  %v8155_v56 = vadd.f32 %v9435_v42, %v9122_v47  ;;  %v8485_v47 = vld [vmem:[#allocation17 + $0x50] sm:$0xff] }
0x10ef   : > { %v8225_v48 = vadd.f32 %v8224_v54, %v8145_v24  ;;  %v9912_v43 = vpop.f32.mrb[89].mxu1  ;;  %v10226_v42 = vpack.c.bf16 %v8486_v49, %v8485_v47 }
0x10f0   : > { %v8504_v43 = vld [vmem:[#allocation17 + $0xe8] sm:$0xff] }
0x10f1   : > { %v8238_v40 = vmax.f32 %v8225_v48, 0.0  ;;  %v8503_v48 = vld [vmem:[#allocation17 + $0xe0] sm:$0xff] }
0x10f2   : > { %v8229_v35 = vpop.f32.mrb[90].mxu1 }
0x10f3   : > { %v8230_v52 = vadd.f32 %v8229_v35, %v8150_v33  ;;  %v9915_v4 = vpop.f32.mrb[91].mxu1  ;;  %v10228_v35 = vpack.c.bf16 %v8504_v43, %v8503_v48 }
0x10f4   : > { %v8488_v4 = vld [vmem:[#allocation17 + $0x68] sm:$0xff] }
0x10f5   : > { %v8239_v14 = vmax.f32 %v8230_v52, 0.0  ;;  %v8487_v52 = vld [vmem:[#allocation17 + $0x60] sm:$0xff] }
0x10f6   : > { %v8234_v23 = vpop.f32.mrb[92].mxu1 }
0x10f7   : > { %v10202_v13 = vpack.c.bf16 %v8239_v14, %v8238_v40  ;;  %v8235_v51 = vadd.f32 %v8234_v23, %v8155_v56  ;;  %v9918_v53 = vpop.f32.mrb[93].mxu1  ;;  %v10230_v14 = vpack.c.bf16 %v8488_v4, %v8487_v52  ;;  %v8505_v56 = vld [vmem:[#allocation17 + $0xf0] sm:$0xff]  ;;  %v8506_v23 = vld [vmem:[#allocation17 + $0xf8] sm:$0xff] }
0x10f8   : > { %v8489_v53 = vld [vmem:[#allocation17 + $0x70] sm:$0xff] }
0x10f9   : > { %10203 = vmatpush3.bf16.msra.mxu0 %v10202_v13  ;;  %v8240_v59 = vmax.f32 %v8235_v51, 0.0  ;;  %v10232_v51 = vpack.c.bf16 %v8506_v23, %v8505_v56 }
0x10fa   : > { %9923 = vmatprep.subr.mxu0 %v11175_v6 }
0x10fd   : > { %9924 = vmatpush3.msk.msra.mxu0 %vm3078_vm13, %v8240_v59  ;;  %v8490_v59 = vld [vmem:[#allocation17 + $0x78] sm:$0xff]  ;;  %vm8691_vm13 = vcmask 521216  }
0x10fe   : > { %9926 = vmatmul.mubr.msk.f32.vlgmr.msra.gmra.mrb[200].mxu0 %vm8246_vm11, %v8241_v5  ;;  %10236 = vmatprep.subr.bf16.mxu0 %v11173_v29 }
0x10ff   : > { %9928 = vmatprep.mubr.msk.f32.mxu0 %vm11174_vm15, %v11175_v6  ;;  %10238 = vmatpush3.bf16.msra.mxu0 %v10237_v27 }
0x1100   : > { %10239 = vmatprep.subr.bf16.mxu0 %v11173_v29 }
0x1102   : > { %9929 = vmatmul.mubr.msk.f32.gmra.mrb[202].mxu0 %vm8246_vm11, %v8242_v32  ;;  %v10234_v32 = vpack.c.bf16 %v8490_v59, %v8489_v53 }
0x1103   : > { %9931 = vmatprep.mubr.msk.f32.mxu0 %vm11174_vm15, %v11175_v6  ;;  %10241 = vmatpush3.bf16.msra.mxu0 %v10240_v60 }
0x1104   : > { %10242 = vmatprep.subr.bf16.mxu0 %v11173_v29  ;;  %v8480_v29 = vld [vmem:[#allocation17 + $0x28] sm:$0xff] }
0x1105   : > { %v10214_v22 = vpack.c.bf16 %v8480_v29, %v8479_v18 }
0x1106   : > { %9932 = vmatmul.mubr.msk.f32.gmra.mrb[204].mxu0 %vm8246_vm11, %v8243_v39 }
0x1107   : > { %9934 = vmatprep.mubr.msk.f32.mxu0 %vm11174_vm15, %v11175_v6  ;;  %10215 = vmatpush3.bf16.msra.mxu1 %v10214_v22 }
0x1108   : > { %10217 = vmatprep.subr.bf16.mxu1 %v10216_v8 }
0x110a   : > { %9935 = vmatmul.mubr.msk.f32.gmra.mrb[206].mxu0 %vm8246_vm11, %v8244_v38 }
0x110b   : > { %9937 = vmatprep.mubr.msk.f32.mxu0 %vm11174_vm15, %v11175_v6  ;;  %10219 = vmatpush3.bf16.msra.mxu1 %v10218_v16 }
0x110c   : > { %10221 = vmatprep.subr.bf16.mxu1 %v10220_v63 }
0x110e   : > { %9938 = vmatmul.mubr.msk.f32.gmra.mrb[208].mxu0 %vm8246_vm11, %v8245_v20 }
0x110f   : > { %9948 = vmatprep.mubr.msk.f32.mxu0 %vm11174_vm15, %v11175_v6  ;;  %10223 = vmatpush3.bf16.msra.mxu1 %v10222_v28 }
0x1110   : > { %10225 = vmatprep.subr.bf16.mxu1 %v10224_v44 }
0x1113   : > { %10227 = vmatpush3.bf16.msra.mxu1 %v10226_v42 }
0x1114   : > { %10229 = vmatprep.subr.bf16.mxu1 %v10228_v35 }
0x1117   : > { %10231 = vmatpush3.bf16.msra.mxu1 %v10230_v14 }
0x1118   : > { %10233 = vmatprep.subr.bf16.mxu1 %v10232_v51 }
0x111b   : > { %10235 = vmatpush3.bf16.msra.mxu1 %v10234_v32 }
0x11d1   : > { %v8331_v24 = vpop.f32.mrb[200].mxu0 }
0x11d2   : > { %8355 = vst.msk [vmem:[#allocation9] sm:$0xff] %vm5118_vm8, %v8331_v24  ;;  %v9927_v54 = vpop.f32.mrb[201].mxu0 }
0x11d5   : > { %v8336_v33 = vpop.f32.mrb[202].mxu0 }
0x11d6   : > { %8356 = vst.msk [vmem:[#allocation9 + $0x8] sm:$0xff] %vm5118_vm8, %v8336_v33  ;;  %v9930_v40 = vpop.f32.mrb[203].mxu0 }
0x11d9   : > { %v8341_v13 = vpop.f32.mrb[204].mxu0  ;;  %v8360_v9 = vld [vmem:[#allocation9] sm:$0xff] }
0x11da   : > { %8357 = vst.msk [vmem:[#allocation9 + $0x10] sm:$0xff] %vm5118_vm8, %v8341_v13  ;;  %v9933_v5 = vpop.f32.mrb[205].mxu0 }
0x11dd   : > { %v8346_v39 = vpop.f32.mrb[206].mxu0  ;;  %v14960_v38 = vld [vmem:[#allocation9 + $0x8] sm:$0xff] }
0x11de   : > { %v8363_v20 = vld [vmem:[#allocation9 + $0x1] sm:$0xff]  ;;  %8358 = vst.msk [vmem:[#allocation9 + $0x18] sm:$0xff] %vm5118_vm8, %v8346_v39  ;;  %v9936_v0 = vpop.f32.mrb[207].mxu0 }
0x11df   : > { %v10830_v61 = vpack.i.bf16 %v8363_v20, %v14960_v38  ;;  %v8369_v27 = vld [vmem:[#allocation9 + $0x6] sm:$0xff] }
0x11e0   : > { %v8366_v7 = vld [vmem:[#allocation9 + $0x2] sm:$0xff] }
0x11e1   : > { %10831 = vrot.lane.b32.xlu1 %v10830_v61, %s11178_s27  ;;  %v8380_v36 = vld [vmem:[#allocation9 + $0xd] sm:$0xff]  ;;  %v8351_v21 = vpop.f32.mrb[208].mxu0 }
0x11e2   : > { %v8377_v60 = vld [vmem:[#allocation9 + $0xc] sm:$0xff]  ;;  %v10840_v58 = vpack.i.bf16 %v8369_v27, %v8380_v36  ;;  %8359 = vst.msk [vmem:[#allocation9 + $0x20] sm:$0xf] %vm7910_vm1, %v8351_v21  ;;  %v9939_v15 = vpop.f32.mrb[209].mxu0 }
0x11e3   : > { %v10835_v62 = vpack.i.bf16 %v8366_v7, %v8377_v60  ;;  %v8370_v2 = vld [vmem:[#allocation9 + $0xe] sm:$0xff] }
0x11e4   : > { %v8364_v17 = vld [vmem:[#allocation9 + $0x9] sm:$0xff]  ;;  %9949 = vmatmul.mubr.msk.f32.vlgmr.msra.gmra.mrb[210].mxu0 %vm5118_vm8, %v8370_v2  ;;  %v8365_v45 = vld [vmem:[#allocation9 + $0x11] sm:$0x3f] }
0x11e5   : > { %v8375_v41 = vld [vmem:[#allocation9 + $0x10] sm:$0xff]  ;;  %10841 = vrot.lane.b32.xlu1 %v10840_v58, %s11183_s3  ;;  %10836 = vrot.lane.b32.xlu0 %v10835_v62, %s11182_s26  ;;  %v8376_v50 = vld [vmem:[#allocation9 + $0x18] sm:$0x3f]  ;;  %v8372_v49 = vld [vmem:[#allocation9 + $0x7] sm:$0xff] }
0x11e6   : > { %v8367_v25 = vld [vmem:[#allocation9 + $0xa] sm:$0xff]  ;;  %v8378_v46 = vld [vmem:[#allocation9 + $0x14] sm:$0xff]  ;;  %9951 = vmatprep.mubr.msk.f32.mxu0 %vm11174_vm15, %v11175_v6  ;;  %v10845_v12 = vpack.i.bf16 %v8364_v17, %v8375_v41  ;;  %v10860_v55 = vpack.i.bf16 %v8365_v45, %v8376_v50 }
0x11e7   : > { %v10850_v31 = vpack.i.bf16 %v8367_v25, %v8378_v46  ;;  %v8383_v26 = vld [vmem:[#allocation9 + $0x16] sm:$0xff] }
0x11e8   : > { %v8381_v37 = vld [vmem:[#allocation9 + $0x15] sm:$0xff]  ;;  %9952 = vmatmul.mubr.msk.f32.gmra.mrb[212].mxu0 %vm5118_vm8, %v8383_v26 }
0x11e9   : > { %10846 = vrot.lane.b32.xlu0 %v10845_v12, %s11178_s27  ;;  %10851 = vrot.lane.b32.xlu1 %v10850_v31, %s11182_s26  ;;  %v8384_v18 = vld [vmem:[#allocation9 + $0x1e] sm:$0x3f]  ;;  %v10855_v29 = vpack.i.bf16 %v8370_v2, %v8381_v37  ;;  %v8368_v8 = vld [vmem:[#allocation9 + $0x12] sm:$0x3f] }
0x11ea   : > { %9954 = vmatprep.mubr.msk.f32.mxu0 %vm11174_vm15, %v11175_v6  ;;  %v8379_v1 = vld [vmem:[#allocation9 + $0x1c] sm:$0x3f]  ;;  %v8371_v11 = vld [vmem:[#allocation9 + $0x16] sm:$0x3f]  ;;  %v8362_v2 = vld [vmem:[#allocation9 + $0x10] sm:$0x3f] }
0x11eb   : > { %v8382_v22 = vld [vmem:[#allocation9 + $0x1d] sm:$0x3f]  ;;  %v10865_v19 = vpack.i.bf16 %v8368_v8, %v8379_v1  ;;  %v8373_v56 = vld [vmem:[#allocation9 + $0xf] sm:$0xff]  ;;  %v8374_v62 = vld [vmem:[#allocation9 + $0x17] sm:$0x3f] }
0x11ec   : > { %9955 = vmatmul.mubr.msk.f32.gmra.mrb[214].mxu0 %vm5118_vm8, %v8384_v18  ;;  %v10870_v10 = vpack.i.bf16 %v8371_v11, %v8382_v22 }
0x11ed   : > { %10856 = vrot.lane.b32.xlu0 %v10855_v29, %s11183_s3  ;;  %10861 = vrot.lane.b32.xlu1 %v10860_v55, %s11178_s27  ;;  %s15017_s27 = scalar_lea.hbm %s15142_s23, %s9139_s18 }
0x11ee   : > { %9961 = vmatprep.mubr.msk.f32.mxu0 %vm11174_vm15, %v11175_v6  ;;  %vm8711_vm15 = vcmask 1046528  }
0x11f1   : > { %10866 = vrot.lane.b32.xlu0 %v10865_v19, %s11182_s26  ;;  %10871 = vrot.lane.b32.xlu1 %v10870_v10, %s11183_s3  ;;  %s15138_s3 = sld [smem:[#allocation43_spill]]  ;;  %s8788_s26 = scalar_lea.sflag [#allocation13], %s695_s12 }
0x11f7   : > { %v9132_v55 = vld [vmem:[%s15138_s3] ss:$0 sm:$0xff]  ;;  %s11073_s3 = scalar_lea.vmem %s15019_s19, 64 }
0x11f8   : > { %p11074_p13 = scmp.ne.s32.totalorder %s15019_s19, %s11073_s3  ;;  %p11081_p0 = scmp.lt.s32.totalorder %s11079_s30, %s11073_s3 }
0x11fa   : > { %p11075_p6 = pnand %p11074_p13, %p15143_p1  ;;  %p11082_p10 = por %p11081_p0, %p11080_p5 }
0x11fc   : > { %p11076_p9 = pneg %p11075_p6 }
0x11fe   : > { %p11083_p2 = pnand %p11082_p10, %p11076_p9 }
0x1253   : > { %v10832_v57 = vpop.permute.xlu1 %10831 }
0x1254   : > { %v10834_v16 = vunpack.i.h.bf16 %v10832_v57  ;;  %v10833_v63 = vunpack.i.l.bf16 %v10832_v57 }
0x1256   : > { %v8457_v42 = vsel %vm5118_vm8, %v8360_v9, %v10834_v16  ;;  %v8466_v6 = vsel %vm5118_vm8, %v8372_v49, %v10833_v63 }
0x1257   : > { %v10842_v34 = vpop.permute.xlu1 %10841  ;;  %v10837_v3 = vpop.permute.xlu0 %10836 }
0x1258   : > { %v10844_v30 = vunpack.i.h.bf16 %v10842_v34  ;;  %v10843_v28 = vunpack.i.l.bf16 %v10842_v34  ;;  %v10839_v44 = vunpack.i.h.bf16 %v10837_v3  ;;  %v10838_v47 = vunpack.i.l.bf16 %v10837_v3 }
0x125a   : > { %v8460_v24 = vsel %vm5266_vm0, %v8457_v42, %v10839_v44  ;;  %v8469_v54 = vsel %vm5266_vm0, %v8466_v6, %v10838_v47 }
0x125b   : > { %v10847_v48 = vpop.permute.xlu0 %10846  ;;  %v10852_v43 = vpop.permute.xlu1 %10851  ;;  %v8472_v33 = vsel %vm6729_vm12, %v8469_v54, %v10843_v28  ;;  %v8463_v35 = vsel %vm6729_vm12, %v8460_v24, %v10844_v30 }
0x125c   : > { %v10849_v52 = vunpack.i.h.bf16 %v10847_v48  ;;  %v10848_v4 = vunpack.i.l.bf16 %v10847_v48  ;;  %8590 = vmatprep.mubr.f32.mxu1 %v8472_v33  ;;  %v10854_v40 = vunpack.i.h.bf16 %v10852_v43  ;;  %v10853_v14 = vunpack.i.l.bf16 %v10852_v43 }
0x125d   : > { %8591 = vmatmul.mubr.f32.vlgmr.msra.gmra.mrb[94].mxu1 %v8463_v35 }
0x125e   : > { %v8467_v23 = vsel %vm5118_vm8, %v8373_v56, %v10848_v4  ;;  %v8458_v13 = vsel %vm5118_vm8, %v14960_v38, %v10849_v52 }
0x125f   : > { %v10857_v51 = vpop.permute.xlu0 %10856  ;;  %v10862_v53 = vpop.permute.xlu1 %10861  ;;  %v8470_v20 = vsel %vm5266_vm0, %v8467_v23, %v10853_v14  ;;  %v8461_v61 = vsel %vm5266_vm0, %v8458_v13, %v10854_v40 }
0x1260   : > { %v10859_v59 = vunpack.i.h.bf16 %v10857_v51  ;;  %v10858_v5 = vunpack.i.l.bf16 %v10857_v51  ;;  %v10864_v32 = vunpack.i.h.bf16 %v10862_v53  ;;  %v10863_v39 = vunpack.i.l.bf16 %v10862_v53  ;;  %v8707_v51 = vld [vmem:[%s15140_s29] sm:$0xf] }
0x1262   : > { %v8473_v0 = vsel %vm6729_vm12, %v8470_v20, %v10858_v5  ;;  %v8464_v27 = vsel %vm6729_vm12, %v8461_v61, %v10859_v59  ;;  %v8468_v15 = vsel %vm5118_vm8, %v8374_v62, %v10863_v39  ;;  %v8459_v17 = vsel %vm5118_vm8, %v8362_v2, %v10864_v32  ;;  %vm10244_vm8 = vmpackc.low %vm8711_vm15, %vm11171_vm2 }
0x1263   : > { %8595 = vmatprep.mubr.f32.mxu1 %v8473_v0  ;;  %v10867_v36 = vpop.permute.xlu0 %10866  ;;  %v10872_v7 = vpop.permute.xlu1 %10871 }
0x1264   : > { %v10869_v60 = vunpack.i.h.bf16 %v10867_v36  ;;  %v10868_v21 = vunpack.i.l.bf16 %v10867_v36  ;;  %8596 = vmatmul.mubr.f32.gmra.mrb[96].mxu1 %v8464_v27  ;;  %v10874_v38 = vunpack.i.h.bf16 %v10872_v7  ;;  %v10873_v58 = vunpack.i.l.bf16 %v10872_v7 }
0x1266   : > { %v8471_v41 = vsel %vm5266_vm0, %v8468_v15, %v10868_v21  ;;  %v8462_v25 = vsel %vm5266_vm0, %v8459_v17, %v10869_v60 }
0x1267   : > { %v8474_v46 = vsel %vm6729_vm12, %v8471_v41, %v10873_v58  ;;  %v8465_v12 = vsel %vm6729_vm12, %v8462_v25, %v10874_v38 }
0x1268   : > { %8600 = vmatprep.mubr.f32.mxu1 %v8474_v46 }
0x1269   : > { %8601 = vmatmul.mubr.f32.gmra.mrb[98].mxu1 %v8465_v12 }
0x12b7   : > { %v8672_v31 = vpop.f32.mrb[210].mxu0 }
0x12b8   : > { %v9950_v26 = vpop.f32.mrb[211].mxu0 }
0x12bb   : > { %v8677_v37 = vpop.f32.mrb[212].mxu0 }
0x12bc   : > { %v9953_v50 = vpop.f32.mrb[213].mxu0 }
0x12bf   : > { %v8682_v45 = vpop.f32.mrb[214].mxu0 }
0x12c0   : > { %v9956_v18 = vpop.f32.mrb[215].mxu0 }
0x1330   : > { %v9483_v29 = vpop.f32.mrb[94].mxu1 }
0x1331   : > { %v9484_v1 = vpop.f32.mrb[95].mxu1 }
0x1332   : > { %v9485_v22 = vadd.f32 %v9484_v1, %v9483_v29 }
0x1334   : > { %v8593_v8 = vadd.f32 %v9485_v22, %v9132_v55 }
0x1336   : > { %v8673_v11 = vadd.f32 %v8672_v31, %v8593_v8 }
0x1337   : > { %v9486_v19 = vpop.f32.mrb[96].mxu1 }
0x1338   : > { %v8686_v10 = vmax.f32 %v8673_v11, 0.0  ;;  %v9487_v57 = vpop.f32.mrb[97].mxu1 }
0x1339   : > { %v9488_v16 = vadd.f32 %v9487_v57, %v9486_v19 }
0x133a   : > { %8689 = vst.msk [vmem:[#allocation10] sm:$0xff] %vm5266_vm0, %v8686_v10 }
0x133b   : > { %v8598_v63 = vadd.f32 %v9488_v16, %v9132_v55 }
0x133c   : > { %v9489_v34 = vpop.f32.mrb[98].mxu1 }
0x133d   : > { %v8678_v3 = vadd.f32 %v8677_v37, %v8598_v63  ;;  %v9490_v9 = vpop.f32.mrb[99].mxu1 }
0x133e   : > { %v9491_v30 = vadd.f32 %v9490_v9, %v9489_v34 }
0x133f   : > { %v8687_v28 = vmax.f32 %v8678_v3, 0.0 }
0x1340   : > { %v8603_v44 = vadd.f32 %v9491_v30, %v9132_v55 }
0x1341   : > { %8690 = vst.msk [vmem:[#allocation10 + $0x8] sm:$0xff] %vm5266_vm0, %v8687_v28  ;;  %v8693_v54 = vld [vmem:[#allocation10] sm:$0xff]  ;;  %vm8785_vm0 = vcmask 519168  }
0x1342   : > { %v8683_v47 = vadd.f32 %v8682_v45, %v8603_v44 }
0x1344   : > { %v8688_v49 = vmax.f32 %v8683_v47, 0.0 }
0x1346   : > { %8692 = vst.msk [vmem:[#allocation10 + $0x10] sm:$0x3f] %vm8691_vm13, %v8688_v49 }
0x1348   : > { %v8695_v42 = vld [vmem:[#allocation10 + $0x1] sm:$0xff]  ;;  %v8696_v43 = vld [vmem:[#allocation10 + $0x9] sm:$0x7f] }
0x1349   : > { %v8699_v6 = vld [vmem:[#allocation10 + $0x6] sm:$0xff]  ;;  %v8697_v33 = vmax.f32 %v8693_v54, %v8695_v42 }
0x134a   : > { %v8701_v24 = vld [vmem:[#allocation10 + $0x7] sm:$0xff] }
0x134b   : > { %v8694_v48 = vld [vmem:[#allocation10 + $0x8] sm:$0x7f]  ;;  %v8703_v35 = vmax.f32 %v8699_v6, %v8701_v24 }
0x134c   : > { %v8698_v40 = vmax.f32 %v8694_v48, %v8696_v43 }
0x134d   : > { %v8700_v52 = vld [vmem:[#allocation10 + $0xe] sm:$0x7f]  ;;  %v8705_v56 = vmax.f32 %v8697_v33, %v8703_v35 }
0x134e   : > { %v8702_v4 = vld [vmem:[#allocation10 + $0xf] sm:$0x7f] }
0x134f   : > { %v8704_v14 = vmax.f32 %v8700_v52, %v8702_v4 }
0x1351   : > { %v8706_v23 = vmax.f32 %v8698_v40, %v8704_v14 }
0x1353   : > { %v10243_v13 = vpack.c.bf16 %v8706_v23, %v8705_v56 }
0x1355   : > { %10245 = vmatpush3.bf16.msk.msra.mxu0 %vm10244_vm8, %v10243_v13 }
0x1358   : > { %9962 = vmatmul.mubr.msk.f32.vlgmr.msra.gmra.mrb[216].mxu0 %vm2278_vm7, %v8707_v51 }
0x142b   : > { %v8781_v53 = vpop.f32.mrb[216].mxu0 }
0x142c   : > { %8786 = vst.msk [vmem:[%s697_s21] sm:$0xf] %vm8785_vm0, %v8781_v53  ;;  %v9963_v59 = vpop.f32.mrb[217].mxu0 }
0x142d   : > { %11086 = shalt.err (!%p11083_p2)
}
0x142e   : > { %s11087_s22 = scalar_lea.hbm %s15017_s27, 64  ;;  %s11091_s20 = scalar_lea.hbm %s15142_s23, 128 }
0x142f   : > { %p11088_p3 = scmp.ne.s32.totalorder %s15017_s27, %s11087_s22  ;;  %p11092_p7 = scmp.lt.u32.totalorder %s15017_s27, %s15142_s23 }
0x1430   : > { %p11093_p8 = scmp.lt.u32.totalorder %s11091_s20, %s11087_s22  ;;  %p11095_p13 = scmp.lt.u32.totalorder %s11087_s22, %s15017_s27 }
0x1431   : > { %p11089_p4 = pnand %p11088_p3, %p15143_p1 }
0x1432   : > { %p11094_p11 = por %p11093_p8, %p11092_p7 }
0x1433   : > { %p11090_p12 = pneg %p11089_p4 }
0x1434   : > { %p11096_p6 = por %p11095_p13, %p11094_p11 }
0x1436   : > { %p11097_p9 = pnand %p11096_p6, %p11090_p12 }
0x1438   : > { %11100 = shalt.err (!%p11097_p9)
}
0x1439   : > { %10357 = dma.vmem_to_hbm [thread:$0]  (%p15143_p1), %s15019_s19, 64, %s15017_s27, %s8788_s26  }
0x143a PF: > { %s15144_s0 = sld [smem:[#allocation32_spill]]  ;;  %s15145_s28 = sld [smem:[#allocation29_spill]] }
0x143b   : > { %s15146_s3 = sld [smem:[#allocation36_spill]] }
0x1440   : > { %p10399_p5 = scmp.ge.s32.totalorder %s15144_s0, 2  ;;  %s8813_s1 = sand.u32 1, %s15145_s28  }
0x1441   : > { %p15147_p0 = scmp.ne.s32.totalorder %s15146_s3, 0  ;;  %s8814_s2 = scalar_lea.sflag [#allocation13], %s8813_s1 }
0x1443   : > { %p10382_p10 = pnand %p10399_p5, %p15147_p0 }
0x1445   : > { %11134 = dma.done.wait (!%p10382_p10), %s8814_s2, 64  }
0x1446   : > { %11136 = vsyncadd (!%p10382_p10), %s8814_s2, 4294967232  ;;  %s15148_s21 = sld [smem:[#allocation33_spill]]  ;;  %s15149_s0 = sld [smem:[#allocation30_spill]] }
0x1447   : > { %s15150_s30 = sld [smem:[#allocation31_spill]]  ;;  %s15151_s20 = sld [smem:[#allocation34_spill]] }
0x144c   : > { %p33_p2 = scmp.ge.s32.totalorder %s15148_s21, 4  }
0x144e   :  { %35 = sbr.rel (!%p33_p2) target bundleno = 17 (0x11), region = 160 }
0x1455   :  { %8819 = vsyncpa [#allocation12], 1 }
0x1456   :  { %8821 = vsyncpa [#allocation12 + $0x1], 1 }
0x1457   :  { %8822 = vsyncpa [#allocation15], 1 }
0x1458   :  { %8823 = vsyncpa [#allocation18], 1 }
0x1459   :  { %8824 = vsyncpa [#allocation21], 1 }
0x145a   :  { %8825 = vsyncpa [#allocation13], 1 }
0x145b   :  { %8827 = vsyncpa [#allocation13 + $0x1], 1 }

</bundles_post_ra>
